<compile_context>
chip_gen: v7x
topology: tpu7x:2x2x1
jax: 0.10.0
libtpu: 0.0.40
codegen_flags: <defaults>
</compile_context>

<pallas_src>
import jax
import jax.numpy as jnp
from jax import lax
from jax.experimental import pallas as pl
from jax.experimental.pallas import tpu as pltpu

EPS = 1e-5

# Fixed geometry of the module (MNIST 28x28).
H0 = 28            # input spatial size
K1, C1 = 11, 64    # conv1 kernel / out-channels
K2, C2 = 10, 256   # conv2 kernel / out-channels
H1 = H0 - K1 + 1   # 18: conv1 output / conv2 input spatial size
H2 = H1 - K2 + 1   # 9 : conv2 output spatial size
CK1 = 1 * K1 * K1  # 121: layer-1 GEMM contraction size (Cin=1)


def _make_fused_kernel(B):
    S1 = H1 * H1                    # 324: conv1 spatial positions per image
    M1 = B * S1                     # layer-1 GEMM rows (b, iy, ix)
    MP = M1 + 16                    # act1 scratch rows; pad >= K2-1 keeps every
                                    # shifted window read in-bounds
    MW = H2 * H1                    # 162: "wide" conv2 rows per image (full ox axis)
    inv_n2 = 1.0 / float(B * H2 * H2)   # BN2 stats count only the valid 9x9 positions

    def kernel(p1_ref, w1_ref, b1_ref, g1_ref, bt1_ref,
               w2_ref, b2_ref, g2_ref, bt2_ref, mask_ref,
               o_ref, act1_ref, acc_ref):
        dy = pl.program_id(0)

        # ---- grid step 0: layer 1 = one GEMM + bias + ReLU + BN, stashed in VMEM
        #      (flat rows b*324 + iy*18 + ix, channels on the lane axis).
        @pl.when(dy == 0)
        def _():
            a1 = jnp.dot(p1_ref[...], w1_ref[...],
                         preferred_element_type=jnp.float32)
            a1 = jnp.maximum(a1 + b1_ref[...], 0.0)
            m = jnp.mean(a1, axis=0, keepdims=True)
            var = jnp.maximum(jnp.mean(a1 * a1, axis=0, keepdims=True) - m * m, 0.0)
            scale = g1_ref[...] * lax.rsqrt(var + EPS)
            act1_ref[0:M1, :] = a1 * scale + (bt1_ref[...] - m * scale)
            act1_ref[M1:MP, :] = jnp.zeros((MP - M1, C1), jnp.float32)
            acc_ref[...] = jnp.zeros_like(acc_ref)

        # ---- every step: accumulate conv2 kernel-row `dy` as K2 shifted GEMMs per
        #      image.  Wide row r = oy*18 + j receives
        #      act1_flat[b, (oy+dy)*18 + j + dx] @ W2[dy, dx]; columns j >= 9 are
        #      junk (masked out of the BN stats, sliced away on the host).
        for b in range(B):
            part = jnp.zeros((MW, C2), jnp.float32)
            for dx in range(K2):
                x = act1_ref[pl.ds(b * S1 + dy * H1 + dx, MW), :]
                part = part + jnp.dot(x.astype(jnp.bfloat16), w2_ref[0, dx],
                                      preferred_element_type=jnp.float32)
            acc_ref[b] += part

        # ---- last step: bias + ReLU + BN (stats over valid rows only), one
        #      lane-dense (256-wide) store of the whole output block.
        @pl.when(dy == pl.num_programs(0) - 1)
        def _():
            a2 = jnp.maximum(acc_ref[...] + b2_ref[...], 0.0)   # (B, MW, C2)
            a2v = a2 * mask_ref[...]                            # zero the junk columns
            s1 = jnp.sum(jnp.sum(a2v, axis=1, keepdims=True), axis=0, keepdims=True)
            s2 = jnp.sum(jnp.sum(a2v * a2v, axis=1, keepdims=True), axis=0,
                         keepdims=True)
            m = s1 * inv_n2
            var = jnp.maximum(s2 * inv_n2 - m * m, 0.0)
            scale = g2_ref[...] * lax.rsqrt(var + EPS)
            o_ref[...] = a2 * scale + (bt2_ref[...] - m * scale)

    return kernel, M1, MP, MW


def _im2col(x, kh, kw):
    """(B, C, H, W) -> (B*OH*OW, C*kh*kw); rows ordered (b, oy, ox), cols (c, kh, kw)."""
    B, C, H, W = x.shape
    oh, ow = H - kh + 1, W - kw + 1
    cols = [x[:, :, i:i + oh, j:j + ow] for i in range(kh) for j in range(kw)]
    p = jnp.stack(cols, axis=0).reshape(kh, kw, B, C, oh, ow)
    return p.transpose(2, 4, 5, 3, 0, 1).reshape(B * oh * ow, C * kh * kw)


def pack_params(params):
    """One-time packing (outside the forward path): GEMM layouts, bf16 conv weights."""
    w1 = params["w1"]   # (64, 1, 11, 11)  OIHW
    w2 = params["w2"]   # (256, 64, 10, 10) OIHW
    return {
        "w1": w1.reshape(w1.shape[0], -1).T.astype(jnp.bfloat16),  # (121, 64)
        "w2": w2.transpose(2, 3, 1, 0).astype(jnp.bfloat16),       # (10, 10, 64, 256)
        "b1": params["b1"].reshape(1, -1).astype(jnp.float32),
        "g1": params["g1"].reshape(1, -1).astype(jnp.float32),
        "beta1": params["beta1"].reshape(1, -1).astype(jnp.float32),
        "b2": params["b2"].reshape(1, -1).astype(jnp.float32),
        "g2": params["g2"].reshape(1, -1).astype(jnp.float32),
        "beta2": params["beta2"].reshape(1, -1).astype(jnp.float32),
    }


@jax.jit
def backbone_forward(x, packed):
    """BackboneHiNoStride.forward: (B,1,28,28) NCHW -> (B,256,9,9) NCHW."""
    B = x.shape[0]
    kernel, M1, MP, MW = _make_fused_kernel(B)

    # Layer-1 im2col stays on the host: it is tiny (B*324 x 121, ~160 KB in bf16).
    p1 = _im2col(x, K1, K1).astype(jnp.bfloat16)
    # Valid-row mask for the wide conv2 accumulator: (row mod 18) < 9.
    mask = ((jnp.arange(MW) % H1) < H2).astype(jnp.float32).reshape(1, MW, 1)

    flops = 2 * B * MW * C1 * C2 * K2 * K2 + 2 * M1 * CK1 * C1
    bytes_accessed = (M1 * CK1 * 2 + CK1 * C1 * 2 + K2 * K2 * C1 * C2 * 2
                      + 3 * (C1 + C2) * 4 + MW * 4 + B * MW * C2 * 4)

    out_wide = pl.pallas_call(
        kernel,
        out_shape=jax.ShapeDtypeStruct((B, MW, C2), jnp.float32),
        grid=(K2,),
        in_specs=[
            pl.BlockSpec((M1, CK1), lambda k: (0, 0)),               # layer-1 patches
            pl.BlockSpec((CK1, C1), lambda k: (0, 0)),               # w1 (K, C1)
            pl.BlockSpec((1, C1), lambda k: (0, 0)),                 # bias1
            pl.BlockSpec((1, C1), lambda k: (0, 0)),                 # gamma1
            pl.BlockSpec((1, C1), lambda k: (0, 0)),                 # beta1
            pl.BlockSpec((1, K2, C1, C2), lambda k: (k, 0, 0, 0)),   # w2 row tile (pipelined)
            pl.BlockSpec((1, C2), lambda k: (0, 0)),                 # bias2
            pl.BlockSpec((1, C2), lambda k: (0, 0)),                 # gamma2
            pl.BlockSpec((1, C2), lambda k: (0, 0)),                 # beta2
            pl.BlockSpec((1, MW, 1), lambda k: (0, 0, 0)),           # BN2 valid-row mask
        ],
        out_specs=pl.BlockSpec((B, MW, C2), lambda k: (0, 0, 0)),
        scratch_shapes=[
            pltpu.VMEM((MP, C1), jnp.float32),      # layer-1 activation, flat + padded
            pltpu.VMEM((B, MW, C2), jnp.float32),   # layer-2 wide f32 accumulator
        ],
        compiler_params=pltpu.CompilerParams(
            dimension_semantics=("arbitrary",),
            vmem_limit_bytes=32 * 1024 * 1024,
        ),
        cost_estimate=pl.CostEstimate(flops=flops, transcendentals=C1 + C2,
                                      bytes_accessed=bytes_accessed),
    )(p1, packed["w1"], packed["b1"], packed["g1"], packed["beta1"],
      packed["w2"], packed["b2"], packed["g2"], packed["beta2"], mask)

    # (B, 162, 256) wide rows -> (B, 9, 9, 256) NHWC -> NCHW at the boundary.
    y = out_wide.reshape(B, H2, H1, C2)[:, :, :H2, :]
    return y.transpose(0, 3, 1, 2)


# ----------------------------------------------------------------------------
# Pure-JAX reference (same math) for a sanity check.
# ----------------------------------------------------------------------------
def _bn_train_ref(y, gamma, beta):
    mean = jnp.mean(y, axis=(0, 2, 3), keepdims=True)
    var = jnp.mean(jnp.square(y - mean), axis=(0, 2, 3), keepdims=True)
    return (y - mean) * lax.rsqrt(var + EPS) * gamma[None, :, None, None] \
        + beta[None, :, None, None]


def ref_forward(x, p):
    dn = ("NCHW", "OIHW", "NCHW")
    y = lax.conv_general_dilated(x, p["w1"], (1, 1), "VALID", dimension_numbers=dn)
    y = jnp.maximum(y + p["b1"][None, :, None, None], 0.0)
    y = _bn_train_ref(y, p["g1"], p["beta1"])
    y = lax.conv_general_dilated(y, p["w2"], (1, 1), "VALID", dimension_numbers=dn)
    y = jnp.maximum(y + p["b2"][None, :, None, None], 0.0)
    y = _bn_train_ref(y, p["g2"], p["beta2"])
    return y


def init_params(key):
    ks = jax.random.split(key, 8)
    f32 = jnp.float32
    return {
        # Conv2d(1, 64, kernel_size=11)
        "w1": 0.08 * jax.random.normal(ks[0], (C1, 1, K1, K1), f32),
        "b1": 0.05 * jax.random.normal(ks[1], (C1,), f32),
        # BatchNorm2d(64)
        "g1": 1.0 + 0.1 * jax.random.normal(ks[2], (C1,), f32),
        "beta1": 0.1 * jax.random.normal(ks[3], (C1,), f32),
        # Conv2d(64, 256, kernel_size=10)
        "w2": 0.02 * jax.random.normal(ks[4], (C2, C1, K2, K2), f32),
        "b2": 0.05 * jax.random.normal(ks[5], (C2,), f32),
        # BatchNorm2d(256)
        "g2": 1.0 + 0.1 * jax.random.normal(ks[6], (C2,), f32),
        "beta2": 0.1 * jax.random.normal(ks[7], (C2,), f32),
    }


if __name__ == "__main__":
    key = jax.random.PRNGKey(0)
    k_x, k_p = jax.random.split(key)
    params = init_params(k_p)
    packed = pack_params(params)          # weight packing happens once, off the hot path

    B = 2
    x = jax.random.normal(k_x, (B, 1, H0, H0), jnp.float32)   # NCHW, like PyTorch

    out = jax.block_until_ready(backbone_forward(x, packed))
    assert out.shape == (B, C2, H2, H2), out.shape
    assert out.dtype == jnp.float32

    # Sanity check against a pure-JAX reference (loose tol: bf16 MXU path).
    ref = jax.block_until_ready(ref_forward(x, params))
    assert jnp.all(jnp.isfinite(out))
    max_err = float(jnp.max(jnp.abs(out - ref)))
    assert jnp.allclose(out, ref, atol=1e-1, rtol=1e-1), max_err

    print("KERNEL_OK")
</pallas_src>

<mosaic_0001>
module attributes {stable_mosaic.version = 11 : i64} {
  func.func @kernel(%arg0: i32, %arg1: memref<648x121xbf16, #tpu.memory_space<vmem>>, %arg2: memref<121x64xbf16, #tpu.memory_space<vmem>>, %arg3: memref<1x64xf32, #tpu.memory_space<vmem>>, %arg4: memref<1x64xf32, #tpu.memory_space<vmem>>, %arg5: memref<1x64xf32, #tpu.memory_space<vmem>>, %arg6: memref<1x10x64x256xbf16, #tpu.memory_space<vmem>>, %arg7: memref<1x256xf32, #tpu.memory_space<vmem>>, %arg8: memref<1x256xf32, #tpu.memory_space<vmem>>, %arg9: memref<1x256xf32, #tpu.memory_space<vmem>>, %arg10: memref<1x162x1xf32, #tpu.memory_space<vmem>>, %arg11: memref<2x162x256xf32, #tpu.memory_space<vmem>>, %arg12: memref<664x64xf32, #tpu.memory_space<vmem>>, %arg13: memref<2x162x256xf32, #tpu.memory_space<vmem>>) attributes {dimension_semantics = [#tpu.dimension_semantics<arbitrary>], iteration_bounds = array<i64: 10>, scalar_prefetch = 0 : i64, scratch_operands = 2 : i64, tpu.core_type = #tpu.core_type<tc>, window_params = [{pipeline_mode = #tpu.pipeline_mode<synchronous>, transform_indices = @transform_0, window_bounds = array<i64: 648, 121>}, {pipeline_mode = #tpu.pipeline_mode<synchronous>, transform_indices = @transform_1, window_bounds = array<i64: 121, 64>}, {pipeline_mode = #tpu.pipeline_mode<synchronous>, transform_indices = @transform_2, window_bounds = array<i64: 1, 64>}, {pipeline_mode = #tpu.pipeline_mode<synchronous>, transform_indices = @transform_3, window_bounds = array<i64: 1, 64>}, {pipeline_mode = #tpu.pipeline_mode<synchronous>, transform_indices = @transform_4, window_bounds = array<i64: 1, 64>}, {transform_indices = @transform_5, window_bounds = array<i64: 1, 10, 64, 256>}, {pipeline_mode = #tpu.pipeline_mode<synchronous>, transform_indices = @transform_6, window_bounds = array<i64: 1, 256>}, {pipeline_mode = #tpu.pipeline_mode<synchronous>, transform_indices = @transform_7, window_bounds = array<i64: 1, 256>}, {pipeline_mode = #tpu.pipeline_mode<synchronous>, transform_indices = @transform_8, window_bounds = array<i64: 1, 256>}, {pipeline_mode = #tpu.pipeline_mode<synchronous>, transform_indices = @transform_9, window_bounds = array<i64: 1, 162, 1>}, {pipeline_mode = #tpu.pipeline_mode<synchronous>, transform_indices = @transform_10, window_bounds = array<i64: 2, 162, 256>}]} {
    %c0_i32 = arith.constant 0 : i32
    %0 = arith.cmpi eq, %arg0, %c0_i32 : i32
    %1 = arith.extui %0 : i1 to i32
    %c0_i32_0 = arith.constant 0 : i32
    %2 = arith.cmpi ne, %1, %c0_i32_0 : i32
    scf.if %2 {
      %c0_175 = arith.constant 0 : index
      %c0_176 = arith.constant 0 : index
      %220 = vector.load %arg1[%c0_175, %c0_176] : memref<648x121xbf16, #tpu.memory_space<vmem>>, vector<648x121xbf16>
      %c0_177 = arith.constant 0 : index
      %c0_178 = arith.constant 0 : index
      %221 = vector.load %arg2[%c0_177, %c0_178] : memref<121x64xbf16, #tpu.memory_space<vmem>>, vector<121x64xbf16>
      %cst_179 = arith.constant dense<0.000000e+00> : vector<648x64xf32>
      %222 = tpu.matmul %220, %221, %cst_179 {dimension_numbers = #tpu.dot_dimension_numbers<[1], [0], [0], [1], [0, 0, 1, 1], [], []>} : vector<648x121xbf16>, vector<121x64xbf16>, vector<648x64xf32> -> vector<648x64xf32>
      %c0_180 = arith.constant 0 : index
      %c0_181 = arith.constant 0 : index
      %223 = vector.load %arg3[%c0_180, %c0_181] : memref<1x64xf32, #tpu.memory_space<vmem>>, vector<1x64xf32>
      %224 = vector.broadcast %223 : vector<1x64xf32> to vector<648x64xf32>
      %225 = arith.addf %222, %224 : vector<648x64xf32>
      %cst_182 = arith.constant 0.000000e+00 : f32
      %226 = vector.broadcast %cst_182 : f32 to vector<648x64xf32>
      %227 = arith.maximumf %225, %226 : vector<648x64xf32>
      %cst_183 = arith.constant dense<0.000000e+00> : vector<64xf32>
      %228 = vector.multi_reduction <add>, %227, %cst_183 [0] : vector<648x64xf32> to vector<64xf32>
      %229 = vector.shape_cast %228 : vector<64xf32> to vector<1x64xf32>
      %cst_184 = arith.constant 6.480000e+02 : f32
      %230 = vector.broadcast %cst_184 : f32 to vector<1x64xf32>
      %231 = arith.divf %229, %230 : vector<1x64xf32>
      %232 = arith.mulf %227, %227 : vector<648x64xf32>
      %cst_185 = arith.constant dense<0.000000e+00> : vector<64xf32>
      %233 = vector.multi_reduction <add>, %232, %cst_185 [0] : vector<648x64xf32> to vector<64xf32>
      %234 = vector.shape_cast %233 : vector<64xf32> to vector<1x64xf32>
      %cst_186 = arith.constant 6.480000e+02 : f32
      %235 = vector.broadcast %cst_186 : f32 to vector<1x64xf32>
      %236 = arith.divf %234, %235 : vector<1x64xf32>
      %237 = arith.mulf %231, %231 : vector<1x64xf32>
      %238 = arith.subf %236, %237 : vector<1x64xf32>
      %cst_187 = arith.constant 0.000000e+00 : f32
      %239 = vector.broadcast %cst_187 : f32 to vector<1x64xf32>
      %240 = arith.maximumf %238, %239 : vector<1x64xf32>
      %c0_188 = arith.constant 0 : index
      %c0_189 = arith.constant 0 : index
      %241 = vector.load %arg4[%c0_188, %c0_189] : memref<1x64xf32, #tpu.memory_space<vmem>>, vector<1x64xf32>
      %cst_190 = arith.constant 9.99999974E-6 : f32
      %242 = vector.broadcast %cst_190 : f32 to vector<1x64xf32>
      %243 = arith.addf %240, %242 : vector<1x64xf32>
      %244 = math.rsqrt %243 : vector<1x64xf32>
      %245 = arith.mulf %241, %244 : vector<1x64xf32>
      %246 = vector.broadcast %245 : vector<1x64xf32> to vector<648x64xf32>
      %247 = arith.mulf %227, %246 : vector<648x64xf32>
      %c0_191 = arith.constant 0 : index
      %c0_192 = arith.constant 0 : index
      %248 = vector.load %arg5[%c0_191, %c0_192] : memref<1x64xf32, #tpu.memory_space<vmem>>, vector<1x64xf32>
      %249 = arith.mulf %231, %245 : vector<1x64xf32>
      %250 = arith.subf %248, %249 : vector<1x64xf32>
      %251 = vector.broadcast %250 : vector<1x64xf32> to vector<648x64xf32>
      %252 = arith.addf %247, %251 : vector<648x64xf32>
      %c0_193 = arith.constant 0 : index
      %c0_194 = arith.constant 0 : index
      %253 = vector.load %arg12[%c0_193, %c0_194] : memref<664x64xf32, #tpu.memory_space<vmem>>, vector<648x64xf32>
      tpu.vector_store %arg12[%c0_193, %c0_194], %252 {strides = array<i32>} : memref<664x64xf32, #tpu.memory_space<vmem>>, vector<648x64xf32>,
      %cst_195 = arith.constant 0.000000e+00 : f32
      %254 = vector.broadcast %cst_195 : f32 to vector<16x64xf32>
      %c648 = arith.constant 648 : index
      %c0_196 = arith.constant 0 : index
      %255 = vector.load %arg12[%c648, %c0_196] : memref<664x64xf32, #tpu.memory_space<vmem>>, vector<16x64xf32>
      tpu.vector_store %arg12[%c648, %c0_196], %254 {strides = array<i32>} : memref<664x64xf32, #tpu.memory_space<vmem>>, vector<16x64xf32>,
      %cst_197 = arith.constant 0.000000e+00 : f32
      %256 = vector.broadcast %cst_197 : f32 to vector<2x162x256xf32>
      %c0_198 = arith.constant 0 : index
      %c0_199 = arith.constant 0 : index
      %c0_200 = arith.constant 0 : index
      %257 = vector.load %arg13[%c0_198, %c0_199, %c0_200] : memref<2x162x256xf32, #tpu.memory_space<vmem>>, vector<2x162x256xf32>
      tpu.vector_store %arg13[%c0_198, %c0_199, %c0_200], %256 {strides = array<i32>} : memref<2x162x256xf32, #tpu.memory_space<vmem>>, vector<2x162x256xf32>,
    } else {
    }
    %cst = arith.constant 0.000000e+00 : f32
    %3 = vector.broadcast %cst : f32 to vector<162x256xf32>
    %c18_i32 = arith.constant 18 : i32
    %4 = arith.muli %arg0, %c18_i32 : i32
    %c0_i32_1 = arith.constant 0 : i32
    %5 = arith.addi %c0_i32_1, %4 : i32
    %c0_i32_2 = arith.constant 0 : i32
    %6 = arith.addi %5, %c0_i32_2 : i32
    %7 = arith.index_cast %6 : i32 to index
    %c0 = arith.constant 0 : index
    %8 = vector.load %arg12[%7, %c0] : memref<664x64xf32, #tpu.memory_space<vmem>>, vector<162x64xf32>
    %9 = arith.truncf %8 : vector<162x64xf32> to vector<162x64xbf16>
    %c0_3 = arith.constant 0 : index
    %c0_4 = arith.constant 0 : index
    %c0_5 = arith.constant 0 : index
    %c0_6 = arith.constant 0 : index
    %10 = vector.load %arg6[%c0_3, %c0_4, %c0_5, %c0_6] : memref<1x10x64x256xbf16, #tpu.memory_space<vmem>>, vector<1x1x64x256xbf16>
    %11 = vector.shape_cast %10 : vector<1x1x64x256xbf16> to vector<64x256xbf16>
    %cst_7 = arith.constant dense<0.000000e+00> : vector<162x256xf32>
    %12 = tpu.matmul %9, %11, %cst_7 {dimension_numbers = #tpu.dot_dimension_numbers<[1], [0], [0], [1], [0, 0, 1, 1], [], []>} : vector<162x64xbf16>, vector<64x256xbf16>, vector<162x256xf32> -> vector<162x256xf32>
    %13 = arith.addf %3, %12 : vector<162x256xf32>
    %c18_i32_8 = arith.constant 18 : i32
    %14 = arith.muli %arg0, %c18_i32_8 : i32
    %c0_i32_9 = arith.constant 0 : i32
    %15 = arith.addi %c0_i32_9, %14 : i32
    %c1_i32 = arith.constant 1 : i32
    %16 = arith.addi %15, %c1_i32 : i32
    %17 = arith.index_cast %16 : i32 to index
    %c0_10 = arith.constant 0 : index
    %18 = vector.load %arg12[%17, %c0_10] : memref<664x64xf32, #tpu.memory_space<vmem>>, vector<162x64xf32>
    %19 = arith.truncf %18 : vector<162x64xf32> to vector<162x64xbf16>
    %c0_11 = arith.constant 0 : index
    %c1 = arith.constant 1 : index
    %c0_12 = arith.constant 0 : index
    %c0_13 = arith.constant 0 : index
    %20 = vector.load %arg6[%c0_11, %c1, %c0_12, %c0_13] : memref<1x10x64x256xbf16, #tpu.memory_space<vmem>>, vector<1x1x64x256xbf16>
    %21 = vector.shape_cast %20 : vector<1x1x64x256xbf16> to vector<64x256xbf16>
    %cst_14 = arith.constant dense<0.000000e+00> : vector<162x256xf32>
    %22 = tpu.matmul %19, %21, %cst_14 {dimension_numbers = #tpu.dot_dimension_numbers<[1], [0], [0], [1], [0, 0, 1, 1], [], []>} : vector<162x64xbf16>, vector<64x256xbf16>, vector<162x256xf32> -> vector<162x256xf32>
    %23 = arith.addf %13, %22 : vector<162x256xf32>
    %c18_i32_15 = arith.constant 18 : i32
    %24 = arith.muli %arg0, %c18_i32_15 : i32
    %c0_i32_16 = arith.constant 0 : i32
    %25 = arith.addi %c0_i32_16, %24 : i32
    %c2_i32 = arith.constant 2 : i32
    %26 = arith.addi %25, %c2_i32 : i32
    %27 = arith.index_cast %26 : i32 to index
    %c0_17 = arith.constant 0 : index
    %28 = vector.load %arg12[%27, %c0_17] : memref<664x64xf32, #tpu.memory_space<vmem>>, vector<162x64xf32>
    %29 = arith.truncf %28 : vector<162x64xf32> to vector<162x64xbf16>
    %c0_18 = arith.constant 0 : index
    %c2 = arith.constant 2 : index
    %c0_19 = arith.constant 0 : index
    %c0_20 = arith.constant 0 : index
    %30 = vector.load %arg6[%c0_18, %c2, %c0_19, %c0_20] : memref<1x10x64x256xbf16, #tpu.memory_space<vmem>>, vector<1x1x64x256xbf16>
    %31 = vector.shape_cast %30 : vector<1x1x64x256xbf16> to vector<64x256xbf16>
    %cst_21 = arith.constant dense<0.000000e+00> : vector<162x256xf32>
    %32 = tpu.matmul %29, %31, %cst_21 {dimension_numbers = #tpu.dot_dimension_numbers<[1], [0], [0], [1], [0, 0, 1, 1], [], []>} : vector<162x64xbf16>, vector<64x256xbf16>, vector<162x256xf32> -> vector<162x256xf32>
    %33 = arith.addf %23, %32 : vector<162x256xf32>
    %c18_i32_22 = arith.constant 18 : i32
    %34 = arith.muli %arg0, %c18_i32_22 : i32
    %c0_i32_23 = arith.constant 0 : i32
    %35 = arith.addi %c0_i32_23, %34 : i32
    %c3_i32 = arith.constant 3 : i32
    %36 = arith.addi %35, %c3_i32 : i32
    %37 = arith.index_cast %36 : i32 to index
    %c0_24 = arith.constant 0 : index
    %38 = vector.load %arg12[%37, %c0_24] : memref<664x64xf32, #tpu.memory_space<vmem>>, vector<162x64xf32>
    %39 = arith.truncf %38 : vector<162x64xf32> to vector<162x64xbf16>
    %c0_25 = arith.constant 0 : index
    %c3 = arith.constant 3 : index
    %c0_26 = arith.constant 0 : index
    %c0_27 = arith.constant 0 : index
    %40 = vector.load %arg6[%c0_25, %c3, %c0_26, %c0_27] : memref<1x10x64x256xbf16, #tpu.memory_space<vmem>>, vector<1x1x64x256xbf16>
    %41 = vector.shape_cast %40 : vector<1x1x64x256xbf16> to vector<64x256xbf16>
    %cst_28 = arith.constant dense<0.000000e+00> : vector<162x256xf32>
    %42 = tpu.matmul %39, %41, %cst_28 {dimension_numbers = #tpu.dot_dimension_numbers<[1], [0], [0], [1], [0, 0, 1, 1], [], []>} : vector<162x64xbf16>, vector<64x256xbf16>, vector<162x256xf32> -> vector<162x256xf32>
    %43 = arith.addf %33, %42 : vector<162x256xf32>
    %c18_i32_29 = arith.constant 18 : i32
    %44 = arith.muli %arg0, %c18_i32_29 : i32
    %c0_i32_30 = arith.constant 0 : i32
    %45 = arith.addi %c0_i32_30, %44 : i32
    %c4_i32 = arith.constant 4 : i32
    %46 = arith.addi %45, %c4_i32 : i32
    %47 = arith.index_cast %46 : i32 to index
    %c0_31 = arith.constant 0 : index
    %48 = vector.load %arg12[%47, %c0_31] : memref<664x64xf32, #tpu.memory_space<vmem>>, vector<162x64xf32>
    %49 = arith.truncf %48 : vector<162x64xf32> to vector<162x64xbf16>
    %c0_32 = arith.constant 0 : index
    %c4 = arith.constant 4 : index
    %c0_33 = arith.constant 0 : index
    %c0_34 = arith.constant 0 : index
    %50 = vector.load %arg6[%c0_32, %c4, %c0_33, %c0_34] : memref<1x10x64x256xbf16, #tpu.memory_space<vmem>>, vector<1x1x64x256xbf16>
    %51 = vector.shape_cast %50 : vector<1x1x64x256xbf16> to vector<64x256xbf16>
    %cst_35 = arith.constant dense<0.000000e+00> : vector<162x256xf32>
    %52 = tpu.matmul %49, %51, %cst_35 {dimension_numbers = #tpu.dot_dimension_numbers<[1], [0], [0], [1], [0, 0, 1, 1], [], []>} : vector<162x64xbf16>, vector<64x256xbf16>, vector<162x256xf32> -> vector<162x256xf32>
    %53 = arith.addf %43, %52 : vector<162x256xf32>
    %c18_i32_36 = arith.constant 18 : i32
    %54 = arith.muli %arg0, %c18_i32_36 : i32
    %c0_i32_37 = arith.constant 0 : i32
    %55 = arith.addi %c0_i32_37, %54 : i32
    %c5_i32 = arith.constant 5 : i32
    %56 = arith.addi %55, %c5_i32 : i32
    %57 = arith.index_cast %56 : i32 to index
    %c0_38 = arith.constant 0 : index
    %58 = vector.load %arg12[%57, %c0_38] : memref<664x64xf32, #tpu.memory_space<vmem>>, vector<162x64xf32>
    %59 = arith.truncf %58 : vector<162x64xf32> to vector<162x64xbf16>
    %c0_39 = arith.constant 0 : index
    %c5 = arith.constant 5 : index
    %c0_40 = arith.constant 0 : index
    %c0_41 = arith.constant 0 : index
    %60 = vector.load %arg6[%c0_39, %c5, %c0_40, %c0_41] : memref<1x10x64x256xbf16, #tpu.memory_space<vmem>>, vector<1x1x64x256xbf16>
    %61 = vector.shape_cast %60 : vector<1x1x64x256xbf16> to vector<64x256xbf16>
    %cst_42 = arith.constant dense<0.000000e+00> : vector<162x256xf32>
    %62 = tpu.matmul %59, %61, %cst_42 {dimension_numbers = #tpu.dot_dimension_numbers<[1], [0], [0], [1], [0, 0, 1, 1], [], []>} : vector<162x64xbf16>, vector<64x256xbf16>, vector<162x256xf32> -> vector<162x256xf32>
    %63 = arith.addf %53, %62 : vector<162x256xf32>
    %c18_i32_43 = arith.constant 18 : i32
    %64 = arith.muli %arg0, %c18_i32_43 : i32
    %c0_i32_44 = arith.constant 0 : i32
    %65 = arith.addi %c0_i32_44, %64 : i32
    %c6_i32 = arith.constant 6 : i32
    %66 = arith.addi %65, %c6_i32 : i32
    %67 = arith.index_cast %66 : i32 to index
    %c0_45 = arith.constant 0 : index
    %68 = vector.load %arg12[%67, %c0_45] : memref<664x64xf32, #tpu.memory_space<vmem>>, vector<162x64xf32>
    %69 = arith.truncf %68 : vector<162x64xf32> to vector<162x64xbf16>
    %c0_46 = arith.constant 0 : index
    %c6 = arith.constant 6 : index
    %c0_47 = arith.constant 0 : index
    %c0_48 = arith.constant 0 : index
    %70 = vector.load %arg6[%c0_46, %c6, %c0_47, %c0_48] : memref<1x10x64x256xbf16, #tpu.memory_space<vmem>>, vector<1x1x64x256xbf16>
    %71 = vector.shape_cast %70 : vector<1x1x64x256xbf16> to vector<64x256xbf16>
    %cst_49 = arith.constant dense<0.000000e+00> : vector<162x256xf32>
    %72 = tpu.matmul %69, %71, %cst_49 {dimension_numbers = #tpu.dot_dimension_numbers<[1], [0], [0], [1], [0, 0, 1, 1], [], []>} : vector<162x64xbf16>, vector<64x256xbf16>, vector<162x256xf32> -> vector<162x256xf32>
    %73 = arith.addf %63, %72 : vector<162x256xf32>
    %c18_i32_50 = arith.constant 18 : i32
    %74 = arith.muli %arg0, %c18_i32_50 : i32
    %c0_i32_51 = arith.constant 0 : i32
    %75 = arith.addi %c0_i32_51, %74 : i32
    %c7_i32 = arith.constant 7 : i32
    %76 = arith.addi %75, %c7_i32 : i32
    %77 = arith.index_cast %76 : i32 to index
    %c0_52 = arith.constant 0 : index
    %78 = vector.load %arg12[%77, %c0_52] : memref<664x64xf32, #tpu.memory_space<vmem>>, vector<162x64xf32>
    %79 = arith.truncf %78 : vector<162x64xf32> to vector<162x64xbf16>
    %c0_53 = arith.constant 0 : index
    %c7 = arith.constant 7 : index
    %c0_54 = arith.constant 0 : index
    %c0_55 = arith.constant 0 : index
    %80 = vector.load %arg6[%c0_53, %c7, %c0_54, %c0_55] : memref<1x10x64x256xbf16, #tpu.memory_space<vmem>>, vector<1x1x64x256xbf16>
    %81 = vector.shape_cast %80 : vector<1x1x64x256xbf16> to vector<64x256xbf16>
    %cst_56 = arith.constant dense<0.000000e+00> : vector<162x256xf32>
    %82 = tpu.matmul %79, %81, %cst_56 {dimension_numbers = #tpu.dot_dimension_numbers<[1], [0], [0], [1], [0, 0, 1, 1], [], []>} : vector<162x64xbf16>, vector<64x256xbf16>, vector<162x256xf32> -> vector<162x256xf32>
    %83 = arith.addf %73, %82 : vector<162x256xf32>
    %c18_i32_57 = arith.constant 18 : i32
    %84 = arith.muli %arg0, %c18_i32_57 : i32
    %c0_i32_58 = arith.constant 0 : i32
    %85 = arith.addi %c0_i32_58, %84 : i32
    %c8_i32 = arith.constant 8 : i32
    %86 = arith.addi %85, %c8_i32 : i32
    %87 = arith.index_cast %86 : i32 to index
    %c0_59 = arith.constant 0 : index
    %88 = vector.load %arg12[%87, %c0_59] : memref<664x64xf32, #tpu.memory_space<vmem>>, vector<162x64xf32>
    %89 = arith.truncf %88 : vector<162x64xf32> to vector<162x64xbf16>
    %c0_60 = arith.constant 0 : index
    %c8 = arith.constant 8 : index
    %c0_61 = arith.constant 0 : index
    %c0_62 = arith.constant 0 : index
    %90 = vector.load %arg6[%c0_60, %c8, %c0_61, %c0_62] : memref<1x10x64x256xbf16, #tpu.memory_space<vmem>>, vector<1x1x64x256xbf16>
    %91 = vector.shape_cast %90 : vector<1x1x64x256xbf16> to vector<64x256xbf16>
    %cst_63 = arith.constant dense<0.000000e+00> : vector<162x256xf32>
    %92 = tpu.matmul %89, %91, %cst_63 {dimension_numbers = #tpu.dot_dimension_numbers<[1], [0], [0], [1], [0, 0, 1, 1], [], []>} : vector<162x64xbf16>, vector<64x256xbf16>, vector<162x256xf32> -> vector<162x256xf32>
    %93 = arith.addf %83, %92 : vector<162x256xf32>
    %c18_i32_64 = arith.constant 18 : i32
    %94 = arith.muli %arg0, %c18_i32_64 : i32
    %c0_i32_65 = arith.constant 0 : i32
    %95 = arith.addi %c0_i32_65, %94 : i32
    %c9_i32 = arith.constant 9 : i32
    %96 = arith.addi %95, %c9_i32 : i32
    %97 = arith.index_cast %96 : i32 to index
    %c0_66 = arith.constant 0 : index
    %98 = vector.load %arg12[%97, %c0_66] : memref<664x64xf32, #tpu.memory_space<vmem>>, vector<162x64xf32>
    %99 = arith.truncf %98 : vector<162x64xf32> to vector<162x64xbf16>
    %c0_67 = arith.constant 0 : index
    %c9 = arith.constant 9 : index
    %c0_68 = arith.constant 0 : index
    %c0_69 = arith.constant 0 : index
    %100 = vector.load %arg6[%c0_67, %c9, %c0_68, %c0_69] : memref<1x10x64x256xbf16, #tpu.memory_space<vmem>>, vector<1x1x64x256xbf16>
    %101 = vector.shape_cast %100 : vector<1x1x64x256xbf16> to vector<64x256xbf16>
    %cst_70 = arith.constant dense<0.000000e+00> : vector<162x256xf32>
    %102 = tpu.matmul %99, %101, %cst_70 {dimension_numbers = #tpu.dot_dimension_numbers<[1], [0], [0], [1], [0, 0, 1, 1], [], []>} : vector<162x64xbf16>, vector<64x256xbf16>, vector<162x256xf32> -> vector<162x256xf32>
    %103 = arith.addf %93, %102 : vector<162x256xf32>
    %c0_71 = arith.constant 0 : index
    %c0_72 = arith.constant 0 : index
    %c0_73 = arith.constant 0 : index
    %104 = vector.load %arg13[%c0_71, %c0_72, %c0_73] : memref<2x162x256xf32, #tpu.memory_space<vmem>>, vector<1x162x256xf32>
    %105 = vector.shape_cast %104 : vector<1x162x256xf32> to vector<162x256xf32>
    %106 = arith.addf %105, %103 : vector<162x256xf32>
    %c0_74 = arith.constant 0 : index
    %c0_75 = arith.constant 0 : index
    %c0_76 = arith.constant 0 : index
    %107 = vector.load %arg13[%c0_74, %c0_75, %c0_76] : memref<2x162x256xf32, #tpu.memory_space<vmem>>, vector<1x162x256xf32>
    %108 = vector.shape_cast %107 : vector<1x162x256xf32> to vector<162x256xf32>
    %109 = vector.shape_cast %106 : vector<162x256xf32> to vector<1x162x256xf32>
    tpu.vector_store %arg13[%c0_74, %c0_75, %c0_76], %109 {strides = array<i32>} : memref<2x162x256xf32, #tpu.memory_space<vmem>>, vector<1x162x256xf32>,
    %cst_77 = arith.constant 0.000000e+00 : f32
    %110 = vector.broadcast %cst_77 : f32 to vector<162x256xf32>
    %c18_i32_78 = arith.constant 18 : i32
    %111 = arith.muli %arg0, %c18_i32_78 : i32
    %c324_i32 = arith.constant 324 : i32
    %112 = arith.addi %c324_i32, %111 : i32
    %c0_i32_79 = arith.constant 0 : i32
    %113 = arith.addi %112, %c0_i32_79 : i32
    %114 = arith.index_cast %113 : i32 to index
    %c0_80 = arith.constant 0 : index
    %115 = vector.load %arg12[%114, %c0_80] : memref<664x64xf32, #tpu.memory_space<vmem>>, vector<162x64xf32>
    %116 = arith.truncf %115 : vector<162x64xf32> to vector<162x64xbf16>
    %c0_81 = arith.constant 0 : index
    %c0_82 = arith.constant 0 : index
    %c0_83 = arith.constant 0 : index
    %c0_84 = arith.constant 0 : index
    %117 = vector.load %arg6[%c0_81, %c0_82, %c0_83, %c0_84] : memref<1x10x64x256xbf16, #tpu.memory_space<vmem>>, vector<1x1x64x256xbf16>
    %118 = vector.shape_cast %117 : vector<1x1x64x256xbf16> to vector<64x256xbf16>
    %cst_85 = arith.constant dense<0.000000e+00> : vector<162x256xf32>
    %119 = tpu.matmul %116, %118, %cst_85 {dimension_numbers = #tpu.dot_dimension_numbers<[1], [0], [0], [1], [0, 0, 1, 1], [], []>} : vector<162x64xbf16>, vector<64x256xbf16>, vector<162x256xf32> -> vector<162x256xf32>
    %120 = arith.addf %110, %119 : vector<162x256xf32>
    %c18_i32_86 = arith.constant 18 : i32
    %121 = arith.muli %arg0, %c18_i32_86 : i32
    %c324_i32_87 = arith.constant 324 : i32
    %122 = arith.addi %c324_i32_87, %121 : i32
    %c1_i32_88 = arith.constant 1 : i32
    %123 = arith.addi %122, %c1_i32_88 : i32
    %124 = arith.index_cast %123 : i32 to index
    %c0_89 = arith.constant 0 : index
    %125 = vector.load %arg12[%124, %c0_89] : memref<664x64xf32, #tpu.memory_space<vmem>>, vector<162x64xf32>
    %126 = arith.truncf %125 : vector<162x64xf32> to vector<162x64xbf16>
    %c0_90 = arith.constant 0 : index
    %c1_91 = arith.constant 1 : index
    %c0_92 = arith.constant 0 : index
    %c0_93 = arith.constant 0 : index
    %127 = vector.load %arg6[%c0_90, %c1_91, %c0_92, %c0_93] : memref<1x10x64x256xbf16, #tpu.memory_space<vmem>>, vector<1x1x64x256xbf16>
    %128 = vector.shape_cast %127 : vector<1x1x64x256xbf16> to vector<64x256xbf16>
    %cst_94 = arith.constant dense<0.000000e+00> : vector<162x256xf32>
    %129 = tpu.matmul %126, %128, %cst_94 {dimension_numbers = #tpu.dot_dimension_numbers<[1], [0], [0], [1], [0, 0, 1, 1], [], []>} : vector<162x64xbf16>, vector<64x256xbf16>, vector<162x256xf32> -> vector<162x256xf32>
    %130 = arith.addf %120, %129 : vector<162x256xf32>
    %c18_i32_95 = arith.constant 18 : i32
    %131 = arith.muli %arg0, %c18_i32_95 : i32
    %c324_i32_96 = arith.constant 324 : i32
    %132 = arith.addi %c324_i32_96, %131 : i32
    %c2_i32_97 = arith.constant 2 : i32
    %133 = arith.addi %132, %c2_i32_97 : i32
    %134 = arith.index_cast %133 : i32 to index
    %c0_98 = arith.constant 0 : index
    %135 = vector.load %arg12[%134, %c0_98] : memref<664x64xf32, #tpu.memory_space<vmem>>, vector<162x64xf32>
    %136 = arith.truncf %135 : vector<162x64xf32> to vector<162x64xbf16>
    %c0_99 = arith.constant 0 : index
    %c2_100 = arith.constant 2 : index
    %c0_101 = arith.constant 0 : index
    %c0_102 = arith.constant 0 : index
    %137 = vector.load %arg6[%c0_99, %c2_100, %c0_101, %c0_102] : memref<1x10x64x256xbf16, #tpu.memory_space<vmem>>, vector<1x1x64x256xbf16>
    %138 = vector.shape_cast %137 : vector<1x1x64x256xbf16> to vector<64x256xbf16>
    %cst_103 = arith.constant dense<0.000000e+00> : vector<162x256xf32>
    %139 = tpu.matmul %136, %138, %cst_103 {dimension_numbers = #tpu.dot_dimension_numbers<[1], [0], [0], [1], [0, 0, 1, 1], [], []>} : vector<162x64xbf16>, vector<64x256xbf16>, vector<162x256xf32> -> vector<162x256xf32>
    %140 = arith.addf %130, %139 : vector<162x256xf32>
    %c18_i32_104 = arith.constant 18 : i32
    %141 = arith.muli %arg0, %c18_i32_104 : i32
    %c324_i32_105 = arith.constant 324 : i32
    %142 = arith.addi %c324_i32_105, %141 : i32
    %c3_i32_106 = arith.constant 3 : i32
    %143 = arith.addi %142, %c3_i32_106 : i32
    %144 = arith.index_cast %143 : i32 to index
    %c0_107 = arith.constant 0 : index
    %145 = vector.load %arg12[%144, %c0_107] : memref<664x64xf32, #tpu.memory_space<vmem>>, vector<162x64xf32>
    %146 = arith.truncf %145 : vector<162x64xf32> to vector<162x64xbf16>
    %c0_108 = arith.constant 0 : index
    %c3_109 = arith.constant 3 : index
    %c0_110 = arith.constant 0 : index
    %c0_111 = arith.constant 0 : index
    %147 = vector.load %arg6[%c0_108, %c3_109, %c0_110, %c0_111] : memref<1x10x64x256xbf16, #tpu.memory_space<vmem>>, vector<1x1x64x256xbf16>
    %148 = vector.shape_cast %147 : vector<1x1x64x256xbf16> to vector<64x256xbf16>
    %cst_112 = arith.constant dense<0.000000e+00> : vector<162x256xf32>
    %149 = tpu.matmul %146, %148, %cst_112 {dimension_numbers = #tpu.dot_dimension_numbers<[1], [0], [0], [1], [0, 0, 1, 1], [], []>} : vector<162x64xbf16>, vector<64x256xbf16>, vector<162x256xf32> -> vector<162x256xf32>
    %150 = arith.addf %140, %149 : vector<162x256xf32>
    %c18_i32_113 = arith.constant 18 : i32
    %151 = arith.muli %arg0, %c18_i32_113 : i32
    %c324_i32_114 = arith.constant 324 : i32
    %152 = arith.addi %c324_i32_114, %151 : i32
    %c4_i32_115 = arith.constant 4 : i32
    %153 = arith.addi %152, %c4_i32_115 : i32
    %154 = arith.index_cast %153 : i32 to index
    %c0_116 = arith.constant 0 : index
    %155 = vector.load %arg12[%154, %c0_116] : memref<664x64xf32, #tpu.memory_space<vmem>>, vector<162x64xf32>
    %156 = arith.truncf %155 : vector<162x64xf32> to vector<162x64xbf16>
    %c0_117 = arith.constant 0 : index
    %c4_118 = arith.constant 4 : index
    %c0_119 = arith.constant 0 : index
    %c0_120 = arith.constant 0 : index
    %157 = vector.load %arg6[%c0_117, %c4_118, %c0_119, %c0_120] : memref<1x10x64x256xbf16, #tpu.memory_space<vmem>>, vector<1x1x64x256xbf16>
    %158 = vector.shape_cast %157 : vector<1x1x64x256xbf16> to vector<64x256xbf16>
    %cst_121 = arith.constant dense<0.000000e+00> : vector<162x256xf32>
    %159 = tpu.matmul %156, %158, %cst_121 {dimension_numbers = #tpu.dot_dimension_numbers<[1], [0], [0], [1], [0, 0, 1, 1], [], []>} : vector<162x64xbf16>, vector<64x256xbf16>, vector<162x256xf32> -> vector<162x256xf32>
    %160 = arith.addf %150, %159 : vector<162x256xf32>
    %c18_i32_122 = arith.constant 18 : i32
    %161 = arith.muli %arg0, %c18_i32_122 : i32
    %c324_i32_123 = arith.constant 324 : i32
    %162 = arith.addi %c324_i32_123, %161 : i32
    %c5_i32_124 = arith.constant 5 : i32
    %163 = arith.addi %162, %c5_i32_124 : i32
    %164 = arith.index_cast %163 : i32 to index
    %c0_125 = arith.constant 0 : index
    %165 = vector.load %arg12[%164, %c0_125] : memref<664x64xf32, #tpu.memory_space<vmem>>, vector<162x64xf32>
    %166 = arith.truncf %165 : vector<162x64xf32> to vector<162x64xbf16>
    %c0_126 = arith.constant 0 : index
    %c5_127 = arith.constant 5 : index
    %c0_128 = arith.constant 0 : index
    %c0_129 = arith.constant 0 : index
    %167 = vector.load %arg6[%c0_126, %c5_127, %c0_128, %c0_129] : memref<1x10x64x256xbf16, #tpu.memory_space<vmem>>, vector<1x1x64x256xbf16>
    %168 = vector.shape_cast %167 : vector<1x1x64x256xbf16> to vector<64x256xbf16>
    %cst_130 = arith.constant dense<0.000000e+00> : vector<162x256xf32>
    %169 = tpu.matmul %166, %168, %cst_130 {dimension_numbers = #tpu.dot_dimension_numbers<[1], [0], [0], [1], [0, 0, 1, 1], [], []>} : vector<162x64xbf16>, vector<64x256xbf16>, vector<162x256xf32> -> vector<162x256xf32>
    %170 = arith.addf %160, %169 : vector<162x256xf32>
    %c18_i32_131 = arith.constant 18 : i32
    %171 = arith.muli %arg0, %c18_i32_131 : i32
    %c324_i32_132 = arith.constant 324 : i32
    %172 = arith.addi %c324_i32_132, %171 : i32
    %c6_i32_133 = arith.constant 6 : i32
    %173 = arith.addi %172, %c6_i32_133 : i32
    %174 = arith.index_cast %173 : i32 to index
    %c0_134 = arith.constant 0 : index
    %175 = vector.load %arg12[%174, %c0_134] : memref<664x64xf32, #tpu.memory_space<vmem>>, vector<162x64xf32>
    %176 = arith.truncf %175 : vector<162x64xf32> to vector<162x64xbf16>
    %c0_135 = arith.constant 0 : index
    %c6_136 = arith.constant 6 : index
    %c0_137 = arith.constant 0 : index
    %c0_138 = arith.constant 0 : index
    %177 = vector.load %arg6[%c0_135, %c6_136, %c0_137, %c0_138] : memref<1x10x64x256xbf16, #tpu.memory_space<vmem>>, vector<1x1x64x256xbf16>
    %178 = vector.shape_cast %177 : vector<1x1x64x256xbf16> to vector<64x256xbf16>
    %cst_139 = arith.constant dense<0.000000e+00> : vector<162x256xf32>
    %179 = tpu.matmul %176, %178, %cst_139 {dimension_numbers = #tpu.dot_dimension_numbers<[1], [0], [0], [1], [0, 0, 1, 1], [], []>} : vector<162x64xbf16>, vector<64x256xbf16>, vector<162x256xf32> -> vector<162x256xf32>
    %180 = arith.addf %170, %179 : vector<162x256xf32>
    %c18_i32_140 = arith.constant 18 : i32
    %181 = arith.muli %arg0, %c18_i32_140 : i32
    %c324_i32_141 = arith.constant 324 : i32
    %182 = arith.addi %c324_i32_141, %181 : i32
    %c7_i32_142 = arith.constant 7 : i32
    %183 = arith.addi %182, %c7_i32_142 : i32
    %184 = arith.index_cast %183 : i32 to index
    %c0_143 = arith.constant 0 : index
    %185 = vector.load %arg12[%184, %c0_143] : memref<664x64xf32, #tpu.memory_space<vmem>>, vector<162x64xf32>
    %186 = arith.truncf %185 : vector<162x64xf32> to vector<162x64xbf16>
    %c0_144 = arith.constant 0 : index
    %c7_145 = arith.constant 7 : index
    %c0_146 = arith.constant 0 : index
    %c0_147 = arith.constant 0 : index
    %187 = vector.load %arg6[%c0_144, %c7_145, %c0_146, %c0_147] : memref<1x10x64x256xbf16, #tpu.memory_space<vmem>>, vector<1x1x64x256xbf16>
    %188 = vector.shape_cast %187 : vector<1x1x64x256xbf16> to vector<64x256xbf16>
    %cst_148 = arith.constant dense<0.000000e+00> : vector<162x256xf32>
    %189 = tpu.matmul %186, %188, %cst_148 {dimension_numbers = #tpu.dot_dimension_numbers<[1], [0], [0], [1], [0, 0, 1, 1], [], []>} : vector<162x64xbf16>, vector<64x256xbf16>, vector<162x256xf32> -> vector<162x256xf32>
    %190 = arith.addf %180, %189 : vector<162x256xf32>
    %c18_i32_149 = arith.constant 18 : i32
    %191 = arith.muli %arg0, %c18_i32_149 : i32
    %c324_i32_150 = arith.constant 324 : i32
    %192 = arith.addi %c324_i32_150, %191 : i32
    %c8_i32_151 = arith.constant 8 : i32
    %193 = arith.addi %192, %c8_i32_151 : i32
    %194 = arith.index_cast %193 : i32 to index
    %c0_152 = arith.constant 0 : index
    %195 = vector.load %arg12[%194, %c0_152] : memref<664x64xf32, #tpu.memory_space<vmem>>, vector<162x64xf32>
    %196 = arith.truncf %195 : vector<162x64xf32> to vector<162x64xbf16>
    %c0_153 = arith.constant 0 : index
    %c8_154 = arith.constant 8 : index
    %c0_155 = arith.constant 0 : index
    %c0_156 = arith.constant 0 : index
    %197 = vector.load %arg6[%c0_153, %c8_154, %c0_155, %c0_156] : memref<1x10x64x256xbf16, #tpu.memory_space<vmem>>, vector<1x1x64x256xbf16>
    %198 = vector.shape_cast %197 : vector<1x1x64x256xbf16> to vector<64x256xbf16>
    %cst_157 = arith.constant dense<0.000000e+00> : vector<162x256xf32>
    %199 = tpu.matmul %196, %198, %cst_157 {dimension_numbers = #tpu.dot_dimension_numbers<[1], [0], [0], [1], [0, 0, 1, 1], [], []>} : vector<162x64xbf16>, vector<64x256xbf16>, vector<162x256xf32> -> vector<162x256xf32>
    %200 = arith.addf %190, %199 : vector<162x256xf32>
    %c18_i32_158 = arith.constant 18 : i32
    %201 = arith.muli %arg0, %c18_i32_158 : i32
    %c324_i32_159 = arith.constant 324 : i32
    %202 = arith.addi %c324_i32_159, %201 : i32
    %c9_i32_160 = arith.constant 9 : i32
    %203 = arith.addi %202, %c9_i32_160 : i32
    %204 = arith.index_cast %203 : i32 to index
    %c0_161 = arith.constant 0 : index
    %205 = vector.load %arg12[%204, %c0_161] : memref<664x64xf32, #tpu.memory_space<vmem>>, vector<162x64xf32>
    %206 = arith.truncf %205 : vector<162x64xf32> to vector<162x64xbf16>
    %c0_162 = arith.constant 0 : index
    %c9_163 = arith.constant 9 : index
    %c0_164 = arith.constant 0 : index
    %c0_165 = arith.constant 0 : index
    %207 = vector.load %arg6[%c0_162, %c9_163, %c0_164, %c0_165] : memref<1x10x64x256xbf16, #tpu.memory_space<vmem>>, vector<1x1x64x256xbf16>
    %208 = vector.shape_cast %207 : vector<1x1x64x256xbf16> to vector<64x256xbf16>
    %cst_166 = arith.constant dense<0.000000e+00> : vector<162x256xf32>
    %209 = tpu.matmul %206, %208, %cst_166 {dimension_numbers = #tpu.dot_dimension_numbers<[1], [0], [0], [1], [0, 0, 1, 1], [], []>} : vector<162x64xbf16>, vector<64x256xbf16>, vector<162x256xf32> -> vector<162x256xf32>
    %210 = arith.addf %200, %209 : vector<162x256xf32>
    %c1_167 = arith.constant 1 : index
    %c0_168 = arith.constant 0 : index
    %c0_169 = arith.constant 0 : index
    %211 = vector.load %arg13[%c1_167, %c0_168, %c0_169] : memref<2x162x256xf32, #tpu.memory_space<vmem>>, vector<1x162x256xf32>
    %212 = vector.shape_cast %211 : vector<1x162x256xf32> to vector<162x256xf32>
    %213 = arith.addf %212, %210 : vector<162x256xf32>
    %c1_170 = arith.constant 1 : index
    %c0_171 = arith.constant 0 : index
    %c0_172 = arith.constant 0 : index
    %214 = vector.load %arg13[%c1_170, %c0_171, %c0_172] : memref<2x162x256xf32, #tpu.memory_space<vmem>>, vector<1x162x256xf32>
    %215 = vector.shape_cast %214 : vector<1x162x256xf32> to vector<162x256xf32>
    %216 = vector.shape_cast %213 : vector<162x256xf32> to vector<1x162x256xf32>
    tpu.vector_store %arg13[%c1_170, %c0_171, %c0_172], %216 {strides = array<i32>} : memref<2x162x256xf32, #tpu.memory_space<vmem>>, vector<1x162x256xf32>,
    %c9_i32_173 = arith.constant 9 : i32
    %217 = arith.cmpi eq, %arg0, %c9_i32_173 : i32
    %218 = arith.extui %217 : i1 to i32
    %c0_i32_174 = arith.constant 0 : i32
    %219 = arith.cmpi ne, %218, %c0_i32_174 : i32
    scf.if %219 {
      %c0_175 = arith.constant 0 : index
      %c0_176 = arith.constant 0 : index
      %c0_177 = arith.constant 0 : index
      %220 = vector.load %arg13[%c0_175, %c0_176, %c0_177] : memref<2x162x256xf32, #tpu.memory_space<vmem>>, vector<2x162x256xf32>
      %c0_178 = arith.constant 0 : index
      %c0_179 = arith.constant 0 : index
      %221 = vector.load %arg7[%c0_178, %c0_179] : memref<1x256xf32, #tpu.memory_space<vmem>>, vector<1x256xf32>
      %222 = vector.shape_cast %221 : vector<1x256xf32> to vector<1x1x256xf32>
      %223 = vector.broadcast %222 : vector<1x1x256xf32> to vector<2x162x256xf32>
      %224 = arith.addf %220, %223 : vector<2x162x256xf32>
      %cst_180 = arith.constant 0.000000e+00 : f32
      %225 = vector.broadcast %cst_180 : f32 to vector<2x162x256xf32>
      %226 = arith.maximumf %224, %225 : vector<2x162x256xf32>
      %c0_181 = arith.constant 0 : index
      %c0_182 = arith.constant 0 : index
      %c0_183 = arith.constant 0 : index
      %227 = vector.load %arg10[%c0_181, %c0_182, %c0_183] : memref<1x162x1xf32, #tpu.memory_space<vmem>>, vector<1x162x1xf32>
      %228 = vector.broadcast %227 : vector<1x162x1xf32> to vector<2x162x256xf32>
      %229 = arith.mulf %226, %228 : vector<2x162x256xf32>
      %cst_184 = arith.constant dense<0.000000e+00> : vector<2x256xf32>
      %230 = vector.multi_reduction <add>, %229, %cst_184 [1] : vector<2x162x256xf32> to vector<2x256xf32>
      %231 = vector.shape_cast %230 : vector<2x256xf32> to vector<2x1x256xf32>
      %cst_185 = arith.constant dense<0.000000e+00> : vector<1x256xf32>
      %232 = vector.multi_reduction <add>, %231, %cst_185 [0] : vector<2x1x256xf32> to vector<1x256xf32>
      %233 = vector.shape_cast %232 : vector<1x256xf32> to vector<1x1x256xf32>
      %234 = arith.mulf %229, %229 : vector<2x162x256xf32>
      %cst_186 = arith.constant dense<0.000000e+00> : vector<2x256xf32>
      %235 = vector.multi_reduction <add>, %234, %cst_186 [1] : vector<2x162x256xf32> to vector<2x256xf32>
      %236 = vector.shape_cast %235 : vector<2x256xf32> to vector<2x1x256xf32>
      %cst_187 = arith.constant dense<0.000000e+00> : vector<1x256xf32>
      %237 = vector.multi_reduction <add>, %236, %cst_187 [0] : vector<2x1x256xf32> to vector<1x256xf32>
      %238 = vector.shape_cast %237 : vector<1x256xf32> to vector<1x1x256xf32>
      %cst_188 = arith.constant 0.00617283955 : f32
      %239 = vector.broadcast %cst_188 : f32 to vector<1x1x256xf32>
      %240 = arith.mulf %233, %239 : vector<1x1x256xf32>
      %cst_189 = arith.constant 0.00617283955 : f32
      %241 = vector.broadcast %cst_189 : f32 to vector<1x1x256xf32>
      %242 = arith.mulf %238, %241 : vector<1x1x256xf32>
      %243 = arith.mulf %240, %240 : vector<1x1x256xf32>
      %244 = arith.subf %242, %243 : vector<1x1x256xf32>
      %cst_190 = arith.constant 0.000000e+00 : f32
      %245 = vector.broadcast %cst_190 : f32 to vector<1x1x256xf32>
      %246 = arith.maximumf %244, %245 : vector<1x1x256xf32>
      %c0_191 = arith.constant 0 : index
      %c0_192 = arith.constant 0 : index
      %247 = vector.load %arg8[%c0_191, %c0_192] : memref<1x256xf32, #tpu.memory_space<vmem>>, vector<1x256xf32>
      %cst_193 = arith.constant 9.99999974E-6 : f32
      %248 = vector.broadcast %cst_193 : f32 to vector<1x1x256xf32>
      %249 = arith.addf %246, %248 : vector<1x1x256xf32>
      %250 = math.rsqrt %249 : vector<1x1x256xf32>
      %251 = vector.shape_cast %247 : vector<1x256xf32> to vector<1x1x256xf32>
      %252 = arith.mulf %251, %250 : vector<1x1x256xf32>
      %253 = vector.broadcast %252 : vector<1x1x256xf32> to vector<2x162x256xf32>
      %254 = arith.mulf %226, %253 : vector<2x162x256xf32>
      %c0_194 = arith.constant 0 : index
      %c0_195 = arith.constant 0 : index
      %255 = vector.load %arg9[%c0_194, %c0_195] : memref<1x256xf32, #tpu.memory_space<vmem>>, vector<1x256xf32>
      %256 = arith.mulf %240, %252 : vector<1x1x256xf32>
      %257 = vector.shape_cast %255 : vector<1x256xf32> to vector<1x1x256xf32>
      %258 = arith.subf %257, %256 : vector<1x1x256xf32>
      %259 = vector.broadcast %258 : vector<1x1x256xf32> to vector<2x162x256xf32>
      %260 = arith.addf %254, %259 : vector<2x162x256xf32>
      %c0_196 = arith.constant 0 : index
      %c0_197 = arith.constant 0 : index
      %c0_198 = arith.constant 0 : index
      %261 = vector.load %arg11[%c0_196, %c0_197, %c0_198] : memref<2x162x256xf32, #tpu.memory_space<vmem>>, vector<2x162x256xf32>
      tpu.vector_store %arg11[%c0_196, %c0_197, %c0_198], %260 {strides = array<i32>} : memref<2x162x256xf32, #tpu.memory_space<vmem>>, vector<2x162x256xf32>,
    } else {
    }
    return
  }
  func.func @transform_0(%arg0: i32) -> (i32, i32) {
    %c0_i32 = arith.constant 0 : i32
    %c0_i32_0 = arith.constant 0 : i32
    %c0_i32_1 = arith.constant 0 : i32
    return %c0_i32, %c0_i32_0 : i32, i32
  }
  func.func @transform_1(%arg0: i32) -> (i32, i32) {
    %c0_i32 = arith.constant 0 : i32
    %c0_i32_0 = arith.constant 0 : i32
    %c0_i32_1 = arith.constant 0 : i32
    return %c0_i32, %c0_i32_0 : i32, i32
  }
  func.func @transform_2(%arg0: i32) -> (i32, i32) {
    %c0_i32 = arith.constant 0 : i32
    %c0_i32_0 = arith.constant 0 : i32
    %c0_i32_1 = arith.constant 0 : i32
    return %c0_i32, %c0_i32_0 : i32, i32
  }
  func.func @transform_3(%arg0: i32) -> (i32, i32) {
    %c0_i32 = arith.constant 0 : i32
    %c0_i32_0 = arith.constant 0 : i32
    %c0_i32_1 = arith.constant 0 : i32
    return %c0_i32, %c0_i32_0 : i32, i32
  }
  func.func @transform_4(%arg0: i32) -> (i32, i32) {
    %c0_i32 = arith.constant 0 : i32
    %c0_i32_0 = arith.constant 0 : i32
    %c0_i32_1 = arith.constant 0 : i32
    return %c0_i32, %c0_i32_0 : i32, i32
  }
  func.func @transform_5(%arg0: i32) -> (i32, i32, i32, i32) {
    %c0_i32 = arith.constant 0 : i32
    %c0_i32_0 = arith.constant 0 : i32
    %c0_i32_1 = arith.constant 0 : i32
    %c0_i32_2 = arith.constant 0 : i32
    return %arg0, %c0_i32, %c0_i32_0, %c0_i32_1 : i32, i32, i32, i32
  }
  func.func @transform_6(%arg0: i32) -> (i32, i32) {
    %c0_i32 = arith.constant 0 : i32
    %c0_i32_0 = arith.constant 0 : i32
    %c0_i32_1 = arith.constant 0 : i32
    return %c0_i32, %c0_i32_0 : i32, i32
  }
  func.func @transform_7(%arg0: i32) -> (i32, i32) {
    %c0_i32 = arith.constant 0 : i32
    %c0_i32_0 = arith.constant 0 : i32
    %c0_i32_1 = arith.constant 0 : i32
    return %c0_i32, %c0_i32_0 : i32, i32
  }
  func.func @transform_8(%arg0: i32) -> (i32, i32) {
    %c0_i32 = arith.constant 0 : i32
    %c0_i32_0 = arith.constant 0 : i32
    %c0_i32_1 = arith.constant 0 : i32
    return %c0_i32, %c0_i32_0 : i32, i32
  }
  func.func @transform_9(%arg0: i32) -> (i32, i32, i32) {
    %c0_i32 = arith.constant 0 : i32
    %c0_i32_0 = arith.constant 0 : i32
    %c0_i32_1 = arith.constant 0 : i32
    %c0_i32_2 = arith.constant 0 : i32
    return %c0_i32, %c0_i32_0, %c0_i32_1 : i32, i32, i32
  }
  func.func @transform_10(%arg0: i32) -> (i32, i32, i32) {
    %c0_i32 = arith.constant 0 : i32
    %c0_i32_0 = arith.constant 0 : i32
    %c0_i32_1 = arith.constant 0 : i32
    %c0_i32_2 = arith.constant 0 : i32
    return %c0_i32, %c0_i32_0, %c0_i32_1 : i32, i32, i32
  }
}

</mosaic_0001>

<bundles_post_ra>
// kernel: backbone_forward.1
= control target key start
LH: loop header
LB: loop body
LE: loop exit
PB: predicated region body
PF: predicated region fallthrough
CT: control target
= control target key end

     0   :  { %s11551_s13 = smov 0   ;;  %s15851_s0 = inlined_call_operand.vmem [shape: bf16[648,121], index: 0, kind: input, shape index: {}]   ;;  %s15852_s1 = inlined_call_operand.vmem [shape: bf16[121,64], index: 1, kind: input, shape index: {}]   ;;  %s15853_s2 = inlined_call_operand.vmem [shape: f32[1,64], index: 2, kind: input, shape index: {}]   ;;  %s15854_s3 = inlined_call_operand.vmem [shape: f32[1,64], index: 3, kind: input, shape index: {}]   ;;  %s15855_s4 = inlined_call_operand.vmem [shape: f32[1,64], index: 4, kind: input, shape index: {}]   ;;  %s15856_s5 = inlined_call_operand.vmem [shape: bf16[10,10,64,256], index: 5, kind: input, shape index: {}]   ;;  %s15857_s6 = inlined_call_operand.vmem [shape: f32[1,256], index: 6, kind: input, shape index: {}]   ;;  %s15858_s7 = inlined_call_operand.vmem [shape: f32[1,256], index: 7, kind: input, shape index: {}]   ;;  %s15859_s8 = inlined_call_operand.vmem [shape: f32[1,256], index: 8, kind: input, shape index: {}]   ;;  %s15860_s9 = inlined_call_operand.vmem [shape: f32[1,162,1], index: 9, kind: input, shape index: {}]   ;;  %s15861_s10 = inlined_call_operand.vmem [shape: f32[2,162,256], index: 10, kind: output, shape index: {}]  }
   0x1 LB: > { %s11557_s14 = sadd.s32 4294967295, %s11488_s13   ;;  %p9304_p0 = scmp.ge.s32.totalorder %s11488_s13, 1  ;;  %s11488_s13 = sphi %s11551_s13, %s20_s13  }
   0x2   : > { %p307_p1 = scmp.lt.s32.totalorder %s11488_s13, 11 }
   0x4   : > { %p308_p2 = pnand %p9304_p0, %p307_p1 }
   0x5   : > { %p340_p3 = scmp.lt.s32.totalorder (!%p308_p2), %s11557_s14, 9  ;;  %p9306_p4 = scmp.ne.s32.totalorder (!%p308_p2), %s11557_s14, 0 }
   0x6   : > { %311 = sbr.rel (%p308_p2) target bundleno = 2105 (0x839), region = 60 }
   0xd   : > { %s341_s15 = scalar_select %p340_p3, %s11557_s14, 9 }
   0xe   : > { %349 = sbr.rel (%p9306_p4) target bundleno = 621 (0x26d), region = 64 }
   0xf   : > { %s11289_s16 = smul.u32 640, %s341_s15 }
  0x11   : > { %s11566_s19 = scalar_lea.vmem %s15856_s5, %s11289_s16 }
  0x15   : > { %v11572_v0 = vld [vmem:[%s15852_s1] sm:$0xff]   ;;  %v11490_v1 = vmov 0.0   ;;  %v11305_v2 = vld [vmem:[%s15852_s1 + $0x8] sm:$0xff]   ;;  %v11306_v3 = vld [vmem:[%s15852_s1 + $0x10] sm:$0xff]   ;;  %vm11491_vm0 = vmmov 0   ;;  %vm828_vm1 = vcmask 1043456  }
  0x16   : > { %10373 = vmatprep.subr.bf16.mxu0 %v11490_v1  ;;  %1962 = vst [vmem:[#allocation3] sm:$0xff] %v11490_v1  ;;  %1963 = vst [vmem:[#allocation3 + $0x8] sm:$0xff] %v11490_v1  ;;  %10553 = vmatprep.subr.bf16.mxu1 %v11490_v1  ;;  %v11307_v4 = vld [vmem:[%s15852_s1 + $0x18] sm:$0xff]   ;;  %v11308_v5 = vld [vmem:[%s15852_s1 + $0x20] sm:$0xff]   ;;  %vm829_vm2 = vcmask 1044480   ;;  %v11492_v7 = vmov 65535  }
  0x17   : > { %1964 = vst [vmem:[#allocation3 + $0x10] sm:$0xff] %v11490_v1  ;;  %1965 = vst [vmem:[#allocation3 + $0x18] sm:$0xff] %v11490_v1  ;;  %10374 = vmatpush3.bf16.msra.mxu0 %v11572_v0  ;;  %10561 = vmatpush3.bf16.msra.mxu1 %v11572_v0  ;;  %v11309_v6 = vld [vmem:[%s15852_s1 + $0x28] sm:$0xff]   ;;  %v830_v8 = vsel %vm828_vm1, 4294967295, %v11492_v7  ;;  %v11310_v9 = vld [vmem:[%s15852_s1 + $0x30] sm:$0xff]   ;;  %vm704_vm3 = vcmask 990208  }
  0x18   : > { %1966 = vst [vmem:[#allocation3 + $0x20] sm:$0xff] %v11490_v1  ;;  %1967 = vst [vmem:[#allocation3 + $0x28] sm:$0xff] %v11490_v1  ;;  %10375 = vmatprep.subr.bf16.mxu0 %v11490_v1  ;;  %10554 = vmatprep.subr.bf16.mxu1 %v11490_v1  ;;  %v11311_v10 = vld [vmem:[%s15852_s1 + $0x38] sm:$0x1f]   ;;  %v831_v11 = vsel %vm829_vm2, %v830_v8, 0  ;;  %v11312_v13 = vld [vmem:[%s15851_s0] sm:$0xff]  }
  0x19   : > { %1968 = vst [vmem:[#allocation3 + $0x30] sm:$0xff] %v11490_v1  ;;  %1969 = vst [vmem:[#allocation3 + $0x38] sm:$0xff] %v11490_v1  ;;  %10389 = vmatprep.mubr.msk.bf16.mxu0 %vm11491_vm0, %v11490_v1  ;;  %10473 = vmatprep.mubr.msk.bf16.mxu1 %vm11491_vm0, %v11490_v1  ;;  %v833_v12 = vand.u32 %v11311_v10, %v831_v11  ;;  %v11323_v14 = vld [vmem:[%s15851_s0 + $0xa8] sm:$0xff]   ;;  %v11325_v16 = vld [vmem:[%s15851_s0 + $0xb0] sm:$0xff]   ;;  %vm1276_vm4 = vcmask 523264  }
  0x1a   : > { %1970 = vst [vmem:[#allocation3 + $0x40] sm:$0xff] %v11490_v1  ;;  %1971 = vst [vmem:[#allocation3 + $0x48] sm:$0xff] %v11490_v1  ;;  %v11313_v15 = vld [vmem:[%s15851_s0 + $0x8] sm:$0xff]   ;;  %v11314_v17 = vld [vmem:[%s15851_s0 + $0x10] sm:$0xff]  }
  0x1b   : > { %1972 = vst [vmem:[#allocation3 + $0x50] sm:$0xff] %v11490_v1  ;;  %1973 = vst [vmem:[#allocation3 + $0x58] sm:$0xff] %v11490_v1  ;;  %10376 = vmatpush3.bf16.msra.mxu0 %v11305_v2  ;;  %10562 = vmatpush3.bf16.msra.mxu1 %v11305_v2  ;;  %v11327_v18 = vld [vmem:[%s15851_s0 + $0xb8] sm:$0xff]   ;;  %v11329_v20 = vld [vmem:[%s15851_s0 + $0xc0] sm:$0xff]  }
  0x1c   : > { %1974 = vst [vmem:[#allocation3 + $0x60] sm:$0xff] %v11490_v1  ;;  %1975 = vst [vmem:[#allocation3 + $0x68] sm:$0xff] %v11490_v1  ;;  %10377 = vmatprep.subr.bf16.mxu0 %v11490_v1  ;;  %10555 = vmatprep.subr.bf16.mxu1 %v11490_v1  ;;  %v11315_v19 = vld [vmem:[%s15851_s0 + $0x18] sm:$0xff]   ;;  %v11316_v21 = vld [vmem:[%s15851_s0 + $0x20] sm:$0xff]  }
  0x1d   : > { %1976 = vst [vmem:[#allocation3 + $0x70] sm:$0xff] %v11490_v1  ;;  %1977 = vst [vmem:[#allocation3 + $0x78] sm:$0xff] %v11490_v1  ;;  %v11331_v22 = vld [vmem:[%s15851_s0 + $0xc8] sm:$0xff]   ;;  %v11333_v24 = vld [vmem:[%s15851_s0 + $0xd0] sm:$0xff]  }
  0x1e   : > { %1978 = vst [vmem:[#allocation3 + $0x80] sm:$0xff] %v11490_v1  ;;  %1979 = vst [vmem:[#allocation3 + $0x88] sm:$0xff] %v11490_v1  ;;  %v11317_v23 = vld [vmem:[%s15851_s0 + $0x28] sm:$0xff]   ;;  %v11318_v25 = vld [vmem:[%s15851_s0 + $0x30] sm:$0xff]  }
  0x1f   : > { %1980 = vst [vmem:[#allocation3 + $0x90] sm:$0xff] %v11490_v1  ;;  %1981 = vst [vmem:[#allocation3 + $0x98] sm:$0xff] %v11490_v1  ;;  %10378 = vmatpush3.bf16.msra.mxu0 %v11306_v3  ;;  %10563 = vmatpush3.bf16.msra.mxu1 %v11306_v3  ;;  %v11335_v26 = vld [vmem:[%s15851_s0 + $0xd8] sm:$0xff]   ;;  %v11337_v28 = vld [vmem:[%s15851_s0 + $0xe0] sm:$0xff]  }
  0x20   : > { %1982 = vst [vmem:[#allocation3 + $0xa0] sm:$0xff] %v11490_v1  ;;  %1983 = vst [vmem:[#allocation3 + $0xa8] sm:$0xff] %v11490_v1  ;;  %10379 = vmatprep.subr.bf16.mxu0 %v11490_v1  ;;  %10556 = vmatprep.subr.bf16.mxu1 %v11490_v1  ;;  %v11319_v27 = vld [vmem:[%s15851_s0 + $0x38] sm:$0xff]   ;;  %v11320_v29 = vld [vmem:[%s15851_s0 + $0x40] sm:$0xff]  }
  0x21   : > { %1984 = vst [vmem:[#allocation3 + $0xb0] sm:$0xff] %v11490_v1  ;;  %1985 = vst [vmem:[#allocation3 + $0xb8] sm:$0xff] %v11490_v1  ;;  %v11339_v30 = vld [vmem:[%s15851_s0 + $0xe8] sm:$0xff]   ;;  %v11341_v32 = vld [vmem:[%s15851_s0 + $0xf0] sm:$0xff]  }
  0x22   : > { %1986 = vst [vmem:[#allocation3 + $0xc0] sm:$0xff] %v11490_v1  ;;  %1987 = vst [vmem:[#allocation3 + $0xc8] sm:$0xff] %v11490_v1  ;;  %v11321_v31 = vld [vmem:[%s15851_s0 + $0x48] sm:$0xff]   ;;  %v11322_v33 = vld [vmem:[%s15851_s0 + $0x50] sm:$0xff]  }
  0x23   : > { %1988 = vst [vmem:[#allocation3 + $0xd0] sm:$0xff] %v11490_v1  ;;  %1989 = vst [vmem:[#allocation3 + $0xd8] sm:$0xff] %v11490_v1  ;;  %10380 = vmatpush3.bf16.msra.mxu0 %v11307_v4  ;;  %10564 = vmatpush3.bf16.msra.mxu1 %v11307_v4  ;;  %v11343_v34 = vld [vmem:[%s15851_s0 + $0xf8] sm:$0xff]   ;;  %v11344_v36 = vld [vmem:[%s15851_s0 + $0x100] sm:$0xff]  }
  0x24   : > { %1990 = vst [vmem:[#allocation3 + $0xe0] sm:$0xff] %v11490_v1  ;;  %1991 = vst [vmem:[#allocation3 + $0xe8] sm:$0xff] %v11490_v1  ;;  %10381 = vmatprep.subr.bf16.mxu0 %v11490_v1  ;;  %10557 = vmatprep.subr.bf16.mxu1 %v11490_v1  ;;  %v11324_v35 = vld [vmem:[%s15851_s0 + $0x58] sm:$0xff]   ;;  %v11326_v37 = vld [vmem:[%s15851_s0 + $0x60] sm:$0xff]  }
  0x25   : > { %1992 = vst [vmem:[#allocation3 + $0xf0] sm:$0xff] %v11490_v1  ;;  %1993 = vst [vmem:[#allocation3 + $0xf8] sm:$0xff] %v11490_v1  ;;  %v11345_v38 = vld [vmem:[%s15851_s0 + $0x108] sm:$0xff]   ;;  %v11346_v40 = vld [vmem:[%s15851_s0 + $0x110] sm:$0xff]  }
  0x26   : > { %1994 = vst [vmem:[#allocation3 + $0x100] sm:$0xff] %v11490_v1  ;;  %1995 = vst [vmem:[#allocation3 + $0x108] sm:$0xff] %v11490_v1  ;;  %v11328_v39 = vld [vmem:[%s15851_s0 + $0x68] sm:$0xff]   ;;  %v11330_v41 = vld [vmem:[%s15851_s0 + $0x70] sm:$0xff]  }
  0x27   : > { %1996 = vst [vmem:[#allocation3 + $0x110] sm:$0xff] %v11490_v1  ;;  %1997 = vst [vmem:[#allocation3 + $0x118] sm:$0xff] %v11490_v1  ;;  %10382 = vmatpush3.bf16.msra.mxu0 %v11308_v5  ;;  %10565 = vmatpush3.bf16.msra.mxu1 %v11308_v5  ;;  %v11347_v42 = vld [vmem:[%s15851_s0 + $0x118] sm:$0xff]   ;;  %v11348_v44 = vld [vmem:[%s15851_s0 + $0x120] sm:$0xff]  }
  0x28   : > { %1998 = vst [vmem:[#allocation3 + $0x120] sm:$0xff] %v11490_v1  ;;  %1999 = vst [vmem:[#allocation3 + $0x128] sm:$0xff] %v11490_v1  ;;  %10383 = vmatprep.subr.bf16.mxu0 %v11490_v1  ;;  %10558 = vmatprep.subr.bf16.mxu1 %v11490_v1  ;;  %v11332_v43 = vld [vmem:[%s15851_s0 + $0x78] sm:$0xff]   ;;  %v11334_v45 = vld [vmem:[%s15851_s0 + $0x80] sm:$0xff]  }
  0x29   : > { %2000 = vst [vmem:[#allocation3 + $0x130] sm:$0xff] %v11490_v1  ;;  %2001 = vst [vmem:[#allocation3 + $0x138] sm:$0xff] %v11490_v1  ;;  %v11349_v46 = vld [vmem:[%s15851_s0 + $0x128] sm:$0xff]   ;;  %v11350_v48 = vld [vmem:[%s15851_s0 + $0x130] sm:$0xff]  }
  0x2a   : > { %2002 = vst [vmem:[#allocation3 + $0x140] sm:$0x3] %v11490_v1  ;;  %2003 = vst [vmem:[#allocation3 + $0x148] sm:$0x3] %v11490_v1  ;;  %v11336_v47 = vld [vmem:[%s15851_s0 + $0x88] sm:$0xff]   ;;  %v11338_v49 = vld [vmem:[%s15851_s0 + $0x90] sm:$0xff]  }
  0x2b   : > { %2004 = vst [vmem:[#allocation3 + $0x150] sm:$0xff] %v11490_v1  ;;  %2005 = vst [vmem:[#allocation3 + $0x158] sm:$0xff] %v11490_v1  ;;  %10384 = vmatpush3.bf16.msra.mxu0 %v11309_v6  ;;  %10566 = vmatpush3.bf16.msra.mxu1 %v11309_v6  ;;  %v11351_v50 = vld [vmem:[%s15851_s0 + $0x138] sm:$0xff]   ;;  %v11352_v52 = vld [vmem:[%s15851_s0 + $0x140] ss:$0 sps:$4 sm:$0xff]  }
  0x2c   : > { %2006 = vst [vmem:[#allocation3 + $0x160] sm:$0xff] %v11490_v1  ;;  %2007 = vst [vmem:[#allocation3 + $0x168] sm:$0xff] %v11490_v1  ;;  %10385 = vmatprep.subr.bf16.mxu0 %v11490_v1  ;;  %10559 = vmatprep.subr.bf16.mxu1 %v11490_v1  ;;  %v11340_v51 = vld [vmem:[%s15851_s0 + $0x98] sm:$0xff]   ;;  %v11342_v53 = vld [vmem:[%s15851_s0 + $0xa0] sm:$0xff]  }
  0x2d   : > { %2008 = vst [vmem:[#allocation3 + $0x170] sm:$0xff] %v11490_v1  ;;  %2009 = vst [vmem:[#allocation3 + $0x178] sm:$0xff] %v11490_v1 }
  0x2e   : > { %2010 = vst [vmem:[#allocation3 + $0x180] sm:$0xff] %v11490_v1  ;;  %2011 = vst [vmem:[#allocation3 + $0x188] sm:$0xff] %v11490_v1 }
  0x2f   : > { %2012 = vst [vmem:[#allocation3 + $0x190] sm:$0xff] %v11490_v1  ;;  %2013 = vst [vmem:[#allocation3 + $0x198] sm:$0xff] %v11490_v1  ;;  %10386 = vmatpush3.bf16.msra.mxu0 %v11310_v9  ;;  %10567 = vmatpush3.bf16.msra.mxu1 %v11310_v9 }
  0x30   : > { %2014 = vst [vmem:[#allocation3 + $0x1a0] sm:$0xff] %v11490_v1  ;;  %2015 = vst [vmem:[#allocation3 + $0x1a8] sm:$0xff] %v11490_v1  ;;  %10387 = vmatprep.subr.bf16.mxu0 %v11490_v1  ;;  %10560 = vmatprep.subr.bf16.mxu1 %v11490_v1 }
  0x31   : > { %2016 = vst [vmem:[#allocation3 + $0x1b0] sm:$0xff] %v11490_v1  ;;  %2017 = vst [vmem:[#allocation3 + $0x1b8] sm:$0xff] %v11490_v1 }
  0x32   : > { %2018 = vst [vmem:[#allocation3 + $0x1c0] sm:$0xff] %v11490_v1  ;;  %2019 = vst [vmem:[#allocation3 + $0x1c8] sm:$0xff] %v11490_v1 }
  0x33   : > { %2020 = vst [vmem:[#allocation3 + $0x1d0] sm:$0xff] %v11490_v1  ;;  %2021 = vst [vmem:[#allocation3 + $0x1d8] sm:$0xff] %v11490_v1  ;;  %10388 = vmatpush3.bf16.msra.mxu0 %v833_v12  ;;  %10568 = vmatpush3.bf16.msra.mxu1 %v833_v12 }
  0x34   : > { %2022 = vst [vmem:[#allocation3 + $0x1e0] sm:$0xff] %v11490_v1  ;;  %2023 = vst [vmem:[#allocation3 + $0x1e8] sm:$0xff] %v11490_v1 }
  0x35   : > { %2024 = vst [vmem:[#allocation3 + $0x1f0] sm:$0xff] %v11490_v1  ;;  %2025 = vst [vmem:[#allocation3 + $0x1f8] sm:$0xff] %v11490_v1 }
  0x36   : > { %2026 = vst [vmem:[#allocation3 + $0x200] sm:$0xff] %v11490_v1  ;;  %2027 = vst [vmem:[#allocation3 + $0x208] sm:$0xff] %v11490_v1  ;;  %10390 = vmatmul.mubr.msk.bf16.vlgmr.msra.gmra.mrb[0].mxu0 %vm704_vm3, %v11312_v13  ;;  %10474 = vmatmul.mubr.msk.bf16.vlgmr.msra.gmra.mrb[0].mxu1 %vm704_vm3, %v11323_v14 }
  0x37   : > { %2028 = vst [vmem:[#allocation3 + $0x210] sm:$0xff] %v11490_v1  ;;  %2029 = vst [vmem:[#allocation3 + $0x218] sm:$0xff] %v11490_v1  ;;  %10393 = vmatprep.mubr.msk.bf16.mxu0 %vm11491_vm0, %v11490_v1  ;;  %10477 = vmatprep.mubr.msk.bf16.mxu1 %vm11491_vm0, %v11490_v1 }
  0x38   : > { %2030 = vst [vmem:[#allocation3 + $0x220] sm:$0xff] %v11490_v1  ;;  %2031 = vst [vmem:[#allocation3 + $0x228] sm:$0xff] %v11490_v1 }
  0x39   : > { %2032 = vst [vmem:[#allocation3 + $0x230] sm:$0xff] %v11490_v1  ;;  %2033 = vst [vmem:[#allocation3 + $0x238] sm:$0xff] %v11490_v1 }
  0x3a   : > { %2034 = vst [vmem:[#allocation3 + $0x240] sm:$0xff] %v11490_v1  ;;  %2035 = vst [vmem:[#allocation3 + $0x248] sm:$0xff] %v11490_v1 }
  0x3b   : > { %2036 = vst [vmem:[#allocation3 + $0x250] sm:$0xff] %v11490_v1  ;;  %2037 = vst [vmem:[#allocation3 + $0x258] sm:$0xff] %v11490_v1 }
  0x3c   : > { %2038 = vst [vmem:[#allocation3 + $0x260] sm:$0xff] %v11490_v1  ;;  %2039 = vst [vmem:[#allocation3 + $0x268] sm:$0xff] %v11490_v1 }
  0x3d   : > { %2040 = vst [vmem:[#allocation3 + $0x270] sm:$0xff] %v11490_v1  ;;  %2041 = vst [vmem:[#allocation3 + $0x278] sm:$0xff] %v11490_v1 }
  0x3e   : > { %2042 = vst [vmem:[#allocation3 + $0x280] sm:$0xff] %v11490_v1  ;;  %2043 = vst [vmem:[#allocation3 + $0x288] sm:$0xff] %v11490_v1  ;;  %10394 = vmatmul.mubr.msk.bf16.gmra.mrb[4].mxu0 %vm704_vm3, %v11313_v15  ;;  %10478 = vmatmul.mubr.msk.bf16.gmra.mrb[4].mxu1 %vm704_vm3, %v11325_v16 }
  0x3f   : > { %2044 = vst [vmem:[#allocation3 + $0x290] sm:$0x3] %v11490_v1  ;;  %2045 = vst [vmem:[#allocation3 + $0x298] sm:$0x3] %v11490_v1  ;;  %10397 = vmatprep.mubr.msk.bf16.mxu0 %vm11491_vm0, %v11490_v1  ;;  %10481 = vmatprep.mubr.msk.bf16.mxu1 %vm11491_vm0, %v11490_v1 }
  0x40   : > { %1960 = vst.msk [vmem:[#allocation2 + $0x288] sm:$0xff] %vm1276_vm4, %v11490_v1  ;;  %1961 = vst.msk [vmem:[#allocation2 + $0x290] sm:$0xff] %vm1276_vm4, %v11490_v1 }
  0x46   : > { %10398 = vmatmul.mubr.msk.bf16.gmra.mrb[8].mxu0 %vm704_vm3, %v11314_v17  ;;  %10482 = vmatmul.mubr.msk.bf16.gmra.mrb[8].mxu1 %vm704_vm3, %v11327_v18 }
  0x47   : > { %10401 = vmatprep.mubr.msk.bf16.mxu0 %vm11491_vm0, %v11490_v1  ;;  %10485 = vmatprep.mubr.msk.bf16.mxu1 %vm11491_vm0, %v11490_v1 }
  0x4e   : > { %10402 = vmatmul.mubr.msk.bf16.gmra.mrb[12].mxu0 %vm704_vm3, %v11315_v19  ;;  %10486 = vmatmul.mubr.msk.bf16.gmra.mrb[12].mxu1 %vm704_vm3, %v11329_v20 }
  0x4f   : > { %10405 = vmatprep.mubr.msk.bf16.mxu0 %vm11491_vm0, %v11490_v1  ;;  %10489 = vmatprep.mubr.msk.bf16.mxu1 %vm11491_vm0, %v11490_v1 }
  0x56   : > { %10406 = vmatmul.mubr.msk.bf16.gmra.mrb[16].mxu0 %vm704_vm3, %v11316_v21  ;;  %10490 = vmatmul.mubr.msk.bf16.gmra.mrb[16].mxu1 %vm704_vm3, %v11331_v22 }
  0x57   : > { %10409 = vmatprep.mubr.msk.bf16.mxu0 %vm11491_vm0, %v11490_v1  ;;  %10493 = vmatprep.mubr.msk.bf16.mxu1 %vm11491_vm0, %v11490_v1 }
  0x5e   : > { %10410 = vmatmul.mubr.msk.bf16.gmra.mrb[20].mxu0 %vm704_vm3, %v11317_v23  ;;  %10494 = vmatmul.mubr.msk.bf16.gmra.mrb[20].mxu1 %vm704_vm3, %v11333_v24 }
  0x5f   : > { %10413 = vmatprep.mubr.msk.bf16.mxu0 %vm11491_vm0, %v11490_v1  ;;  %10497 = vmatprep.mubr.msk.bf16.mxu1 %vm11491_vm0, %v11490_v1 }
  0x66   : > { %10414 = vmatmul.mubr.msk.bf16.gmra.mrb[24].mxu0 %vm704_vm3, %v11318_v25  ;;  %10498 = vmatmul.mubr.msk.bf16.gmra.mrb[24].mxu1 %vm704_vm3, %v11335_v26 }
  0x67   : > { %10417 = vmatprep.mubr.msk.bf16.mxu0 %vm11491_vm0, %v11490_v1  ;;  %10501 = vmatprep.mubr.msk.bf16.mxu1 %vm11491_vm0, %v11490_v1 }
  0x6e   : > { %10418 = vmatmul.mubr.msk.bf16.gmra.mrb[28].mxu0 %vm704_vm3, %v11319_v27  ;;  %10502 = vmatmul.mubr.msk.bf16.gmra.mrb[28].mxu1 %vm704_vm3, %v11337_v28 }
  0x6f   : > { %10421 = vmatprep.mubr.msk.bf16.mxu0 %vm11491_vm0, %v11490_v1  ;;  %10505 = vmatprep.mubr.msk.bf16.mxu1 %vm11491_vm0, %v11490_v1 }
  0x76   : > { %10422 = vmatmul.mubr.msk.bf16.gmra.mrb[32].mxu0 %vm704_vm3, %v11320_v29  ;;  %10506 = vmatmul.mubr.msk.bf16.gmra.mrb[32].mxu1 %vm704_vm3, %v11339_v30  ;;  %v11974_v30 = vld [vmem:[%s15853_s2] ss:$0 sm:$0xff] }
  0x77   : > { %10425 = vmatprep.mubr.msk.bf16.mxu0 %vm11491_vm0, %v11490_v1  ;;  %10509 = vmatprep.mubr.msk.bf16.mxu1 %vm11491_vm0, %v11490_v1 }
  0x7e   : > { %10426 = vmatmul.mubr.msk.bf16.gmra.mrb[36].mxu0 %vm704_vm3, %v11321_v31  ;;  %10510 = vmatmul.mubr.msk.bf16.gmra.mrb[36].mxu1 %vm704_vm3, %v11341_v32 }
  0x7f   : > { %10429 = vmatprep.mubr.msk.bf16.mxu0 %vm11491_vm0, %v11490_v1  ;;  %10513 = vmatprep.mubr.msk.bf16.mxu1 %vm11491_vm0, %v11490_v1 }
  0x86   : > { %10430 = vmatmul.mubr.msk.bf16.gmra.mrb[40].mxu0 %vm704_vm3, %v11322_v33  ;;  %10514 = vmatmul.mubr.msk.bf16.gmra.mrb[40].mxu1 %vm704_vm3, %v11343_v34 }
  0x87   : > { %10433 = vmatprep.mubr.msk.bf16.mxu0 %vm11491_vm0, %v11490_v1  ;;  %10517 = vmatprep.mubr.msk.bf16.mxu1 %vm11491_vm0, %v11490_v1 }
  0x8e   : > { %10434 = vmatmul.mubr.msk.bf16.gmra.mrb[44].mxu0 %vm704_vm3, %v11324_v35  ;;  %10518 = vmatmul.mubr.msk.bf16.gmra.mrb[44].mxu1 %vm704_vm3, %v11344_v36 }
  0x8f   : > { %10437 = vmatprep.mubr.msk.bf16.mxu0 %vm11491_vm0, %v11490_v1  ;;  %10521 = vmatprep.mubr.msk.bf16.mxu1 %vm11491_vm0, %v11490_v1 }
  0x96   : > { %10438 = vmatmul.mubr.msk.bf16.gmra.mrb[48].mxu0 %vm704_vm3, %v11326_v37  ;;  %10522 = vmatmul.mubr.msk.bf16.gmra.mrb[48].mxu1 %vm704_vm3, %v11345_v38 }
  0x97   : > { %10441 = vmatprep.mubr.msk.bf16.mxu0 %vm11491_vm0, %v11490_v1  ;;  %10525 = vmatprep.mubr.msk.bf16.mxu1 %vm11491_vm0, %v11490_v1 }
  0x9e   : > { %10442 = vmatmul.mubr.msk.bf16.gmra.mrb[52].mxu0 %vm704_vm3, %v11328_v39  ;;  %10526 = vmatmul.mubr.msk.bf16.gmra.mrb[52].mxu1 %vm704_vm3, %v11346_v40 }
  0x9f   : > { %10445 = vmatprep.mubr.msk.bf16.mxu0 %vm11491_vm0, %v11490_v1  ;;  %10529 = vmatprep.mubr.msk.bf16.mxu1 %vm11491_vm0, %v11490_v1 }
  0xa6   : > { %10446 = vmatmul.mubr.msk.bf16.gmra.mrb[56].mxu0 %vm704_vm3, %v11330_v41  ;;  %10530 = vmatmul.mubr.msk.bf16.gmra.mrb[56].mxu1 %vm704_vm3, %v11347_v42 }
  0xa7   : > { %10449 = vmatprep.mubr.msk.bf16.mxu0 %vm11491_vm0, %v11490_v1  ;;  %10533 = vmatprep.mubr.msk.bf16.mxu1 %vm11491_vm0, %v11490_v1 }
  0xae   : > { %10450 = vmatmul.mubr.msk.bf16.gmra.mrb[60].mxu0 %vm704_vm3, %v11332_v43  ;;  %10534 = vmatmul.mubr.msk.bf16.gmra.mrb[60].mxu1 %vm704_vm3, %v11348_v44 }
  0xaf   : > { %10453 = vmatprep.mubr.msk.bf16.mxu0 %vm11491_vm0, %v11490_v1  ;;  %10537 = vmatprep.mubr.msk.bf16.mxu1 %vm11491_vm0, %v11490_v1 }
  0xb6   : > { %10454 = vmatmul.mubr.msk.bf16.gmra.mrb[64].mxu0 %vm704_vm3, %v11334_v45  ;;  %10538 = vmatmul.mubr.msk.bf16.gmra.mrb[64].mxu1 %vm704_vm3, %v11349_v46 }
  0xb7   : > { %10457 = vmatprep.mubr.msk.bf16.mxu0 %vm11491_vm0, %v11490_v1  ;;  %10541 = vmatprep.mubr.msk.bf16.mxu1 %vm11491_vm0, %v11490_v1 }
  0xbe   : > { %10458 = vmatmul.mubr.msk.bf16.gmra.mrb[68].mxu0 %vm704_vm3, %v11336_v47  ;;  %10542 = vmatmul.mubr.msk.bf16.gmra.mrb[68].mxu1 %vm704_vm3, %v11350_v48 }
  0xbf   : > { %10461 = vmatprep.mubr.msk.bf16.mxu0 %vm11491_vm0, %v11490_v1  ;;  %10545 = vmatprep.mubr.msk.bf16.mxu1 %vm11491_vm0, %v11490_v1 }
  0xc6   : > { %10462 = vmatmul.mubr.msk.bf16.gmra.mrb[72].mxu0 %vm704_vm3, %v11338_v49  ;;  %10546 = vmatmul.mubr.msk.bf16.gmra.mrb[72].mxu1 %vm704_vm3, %v11351_v50 }
  0xc7   : > { %10465 = vmatprep.mubr.msk.bf16.mxu0 %vm11491_vm0, %v11490_v1  ;;  %10549 = vmatprep.mubr.msk.bf16.mxu1 %vm11491_vm0, %v11490_v1 }
  0xce   : > { %10466 = vmatmul.mubr.msk.bf16.gmra.mrb[76].mxu0 %vm704_vm3, %v11340_v51  ;;  %10550 = vmatmul.mubr.msk.bf16.gmra.mrb[76].mxu1 %vm704_vm3, %v11352_v52 }
  0xcf   : > { %10469 = vmatprep.mubr.msk.bf16.mxu0 %vm11491_vm0, %v11490_v1 }
  0xd6   : > { %10470 = vmatmul.mubr.msk.bf16.gmra.mrb[80].mxu0 %vm704_vm3, %v11342_v53 }
 0x109   : > { %v869_v54 = vpop.f32.mrb[0].mxu0  ;;  %v11947_v55 = vpop.f32.mrb[0].mxu1 }
 0x10a   : > { %v10391_v56 = vpop.f32.mrb[1].mxu0  ;;  %v10475_v57 = vpop.f32.mrb[1].mxu1  ;;  %v870_v32 = vadd.f32 %v11974_v30, %v869_v54 }
 0x10b   : > { %v872_v58 = vpop.f32.mrb[2].mxu0  ;;  %v11949_v59 = vpop.f32.mrb[2].mxu1 }
 0x10c   : > { %v10392_v60 = vpop.f32.mrb[3].mxu0  ;;  %v10476_v61 = vpop.f32.mrb[3].mxu1  ;;  %v873_v31 = vadd.f32 %v11974_v30, %v872_v58  ;;  %v11989_v41 = vmax.f32 %v870_v32, 0.0 }
 0x10e   : > { %v11983_v36 = vmax.f32 %v873_v31, 0.0  ;;  %v1446_v48 = vmul.f32 %v11989_v41, %v11989_v41  ;;  %v1277_v52 = vsel %vm1276_vm4, %v11989_v41, 0.0 }
 0x110   : > { %v1447_v46 = vmul.f32 %v11983_v36, %v11983_v36  ;;  %v1278_v49 = vsel %vm1276_vm4, %v11983_v36, 0.0 }
 0x111   : > { %v877_v62 = vpop.f32.mrb[4].mxu0  ;;  %v11951_v63 = vpop.f32.mrb[4].mxu1 }
 0x112   : > { %v10395_v0 = vpop.f32.mrb[5].mxu0  ;;  %v10479_v1 = vpop.f32.mrb[5].mxu1  ;;  %v878_v33 = vadd.f32 %v11974_v30, %v877_v62  ;;  %v1528_v56 = vsel %vm1276_vm4, %v1447_v46, 0.0 }
 0x113   : > { %v880_v2 = vpop.f32.mrb[6].mxu0  ;;  %v11953_v3 = vpop.f32.mrb[6].mxu1  ;;  %v1279_v0 = vadd.f32 %v1278_v49, %v1277_v52 }
 0x114   : > { %v10396_v4 = vpop.f32.mrb[7].mxu0  ;;  %v10480_v5 = vpop.f32.mrb[7].mxu1  ;;  %v11991_v42 = vmax.f32 %v878_v33, 0.0  ;;  %v881_v43 = vadd.f32 %v11974_v30, %v880_v2 }
 0x115   : > { %v1527_v4 = vsel %vm1276_vm4, %v1446_v48, 0.0 }
 0x116   : > { %16036 = vst [vmem:[#allocation4_spill] sm:$0xff] %v11991_v42  ;;  %v1448_v50 = vmul.f32 %v11991_v42, %v11991_v42  ;;  %v12003_v51 = vmax.f32 %v881_v43, 0.0  ;;  %v1280_v57 = vsel %vm1276_vm4, %v11991_v42, 0.0 }
 0x118   : > { %16037 = vst [vmem:[#allocation5_spill] sm:$0xff] %v12003_v51  ;;  %v1530_v5 = vsel %vm1276_vm4, %v1448_v50, 0.0 }
 0x119   : > { %v885_v6 = vpop.f32.mrb[8].mxu0  ;;  %v11955_v7 = vpop.f32.mrb[8].mxu1 }
 0x11a   : > { %v10399_v8 = vpop.f32.mrb[9].mxu0  ;;  %v10483_v9 = vpop.f32.mrb[9].mxu1  ;;  %v886_v47 = vadd.f32 %v11974_v30, %v885_v6  ;;  %v1449_v6 = vmul.f32 %v12003_v51, %v12003_v51 }
 0x11b   : > { %v888_v10 = vpop.f32.mrb[10].mxu0  ;;  %v11957_v11 = vpop.f32.mrb[10].mxu1 }
 0x11c   : > { %v10400_v12 = vpop.f32.mrb[11].mxu0  ;;  %v10484_v13 = vpop.f32.mrb[11].mxu1  ;;  %v12014_v58 = vmax.f32 %v886_v47, 0.0  ;;  %v889_v60 = vadd.f32 %v11974_v30, %v888_v10  ;;  %v1281_v10 = vadd.f32 %v1280_v57, %v1279_v0 }
 0x11d   : > { %v1529_v13 = vadd.f32 %v1528_v56, %v1527_v4 }
 0x11e   : > { %16038 = vst [vmem:[#allocation6_spill] sm:$0xff] %v12014_v58 }
 0x121   : > { %v893_v14 = vpop.f32.mrb[12].mxu0  ;;  %v11959_v15 = vpop.f32.mrb[12].mxu1 }
 0x122   : > { %v10403_v16 = vpop.f32.mrb[13].mxu0  ;;  %v10487_v17 = vpop.f32.mrb[13].mxu1  ;;  %v894_v8 = vadd.f32 %v11974_v30, %v893_v14 }
 0x123   : > { %v896_v18 = vpop.f32.mrb[14].mxu0  ;;  %v11961_v19 = vpop.f32.mrb[14].mxu1  ;;  %v1282_v16 = vsel %vm1276_vm4, %v12003_v51, 0.0  ;;  %v1450_v17 = vmul.f32 %v12014_v58, %v12014_v58 }
 0x124   : > { %v10404_v20 = vpop.f32.mrb[15].mxu0  ;;  %v10488_v21 = vpop.f32.mrb[15].mxu1  ;;  %v897_v14 = vadd.f32 %v11974_v30, %v896_v18 }
 0x125   : > { %v12030_v20 = vmax.f32 %v889_v60, 0.0  ;;  %v1531_v21 = vadd.f32 %v1530_v5, %v1529_v13  ;;  %v1534_v33 = vsel %vm1276_vm4, %v1450_v17, 0.0 }
 0x126   : > { %v12055_v50 = vmax.f32 %v897_v14, 0.0 }
 0x127   : > { %16039 = vst [vmem:[#allocation7_spill] sm:$0xff] %v12030_v20  ;;  %v1286_v48 = vsel %vm1276_vm4, %v12030_v20, 0.0 }
 0x128   : > { %16041 = vst [vmem:[#allocation9_spill] sm:$0xff] %v12055_v50  ;;  %v1453_v5 = vmul.f32 %v12055_v50, %v12055_v50 }
 0x129   : > { %v11963_v22 = vpop.f32.mrb[16].mxu0  ;;  %v11965_v23 = vpop.f32.mrb[16].mxu1 }
 0x12a   : > { %v10407_v24 = vpop.f32.mrb[17].mxu0  ;;  %v10491_v25 = vpop.f32.mrb[17].mxu1 }
 0x12b   : > { %v11967_v26 = vpop.f32.mrb[18].mxu0  ;;  %v11969_v27 = vpop.f32.mrb[18].mxu1  ;;  %v1532_v24 = vsel %vm1276_vm4, %v1449_v6, 0.0  ;;  %v1284_v25 = vsel %vm1276_vm4, %v12014_v58, 0.0 }
 0x12c   : > { %v10408_v28 = vpop.f32.mrb[19].mxu0  ;;  %v10492_v29 = vpop.f32.mrb[19].mxu1 }
 0x12d   : > { %v12035_v28 = vmax.f32 %v894_v8, 0.0  ;;  %v1283_v29 = vadd.f32 %v1282_v16, %v1281_v10  ;;  %v1290_v10 = vsel %vm1276_vm4, %v12055_v50, 0.0 }
 0x12f   : > { %16040 = vst [vmem:[#allocation8_spill] sm:$0xff] %v12035_v28  ;;  %v1285_v46 = vadd.f32 %v1284_v25, %v1283_v29  ;;  %v1452_v49 = vmul.f32 %v12035_v28, %v12035_v28  ;;  %v1288_v60 = vsel %vm1276_vm4, %v12035_v28, 0.0 }
 0x131   : > { %v11979_v34 = vpop.f32.mrb[20].mxu0  ;;  %v11981_v35 = vpop.f32.mrb[20].mxu1  ;;  %v1287_v0 = vadd.f32 %v1286_v48, %v1285_v46  ;;  %v1538_v4 = vsel %vm1276_vm4, %v1452_v49, 0.0 }
 0x132   : > { %v10411_v37 = vpop.f32.mrb[21].mxu0  ;;  %v10495_v38 = vpop.f32.mrb[21].mxu1  ;;  %v910_v6 = vadd.f32 %v11974_v30, %v11979_v34  ;;  %v1540_v34 = vsel %vm1276_vm4, %v1453_v5, 0.0 }
 0x133   : > { %v11985_v39 = vpop.f32.mrb[22].mxu0  ;;  %v11987_v40 = vpop.f32.mrb[22].mxu1  ;;  %v1451_v37 = vmul.f32 %v12030_v20, %v12030_v20  ;;  %v902_v38 = vadd.f32 %v11974_v30, %v11963_v22 }
 0x134   : > { %v10412_v44 = vpop.f32.mrb[23].mxu0  ;;  %v10496_v45 = vpop.f32.mrb[23].mxu1 }
 0x135   : > { %v1533_v45 = vadd.f32 %v1532_v24, %v1531_v21  ;;  %v1536_v22 = vsel %vm1276_vm4, %v1451_v37, 0.0  ;;  %v913_v37 = vadd.f32 %v11974_v30, %v11985_v39 }
 0x137   : > { %v1535_v57 = vadd.f32 %v1534_v33, %v1533_v45  ;;  %v12084_v33 = vmax.f32 %v910_v6, 0.0  ;;  %v12097_v39 = vmax.f32 %v913_v37, 0.0 }
 0x139   : > { %v12007_v53 = vpop.f32.mrb[24].mxu0  ;;  %v12009_v54 = vpop.f32.mrb[24].mxu1  ;;  %v1537_v8 = vadd.f32 %v1536_v22, %v1535_v57  ;;  %16044 = vst [vmem:[#allocation12_spill] sm:$0xff] %v12084_v33  ;;  %v1456_v57 = vmul.f32 %v12084_v33, %v12084_v33  ;;  %16045 = vst [vmem:[#allocation13_spill] sm:$0xff] %v12097_v39 }
 0x13a   : > { %v10415_v61 = vpop.f32.mrb[25].mxu0  ;;  %v10499_v62 = vpop.f32.mrb[25].mxu1  ;;  %v918_v48 = vadd.f32 %v11974_v30, %v12007_v53 }
 0x13b   : > { %v12017_v1 = vpop.f32.mrb[26].mxu0  ;;  %v12019_v2 = vpop.f32.mrb[26].mxu1  ;;  %v12060_v61 = vmax.f32 %v902_v38, 0.0  ;;  %v905_v62 = vadd.f32 %v11974_v30, %v11967_v26  ;;  %v1539_v24 = vadd.f32 %v1538_v4, %v1537_v8  ;;  %v1296_v4 = vsel %vm1276_vm4, %v12084_v33, 0.0 }
 0x13c   : > { %v10416_v9 = vpop.f32.mrb[27].mxu0  ;;  %v10500_v12 = vpop.f32.mrb[27].mxu1  ;;  %v12104_v53 = vmax.f32 %v918_v48, 0.0  ;;  %v921_v5 = vadd.f32 %v11974_v30, %v12017_v1  ;;  %v1298_v1 = vsel %vm1276_vm4, %v12097_v39, 0.0 }
 0x13d   : > { %16042 = vst [vmem:[#allocation10_spill] sm:$0xff] %v12060_v61  ;;  %v1289_v9 = vadd.f32 %v1288_v60, %v1287_v0  ;;  %v1454_v26 = vmul.f32 %v12060_v61, %v12060_v61  ;;  %v12075_v16 = vmax.f32 %v905_v62, 0.0  ;;  %v1292_v29 = vsel %vm1276_vm4, %v12060_v61, 0.0 }
 0x13e   : > { %v1541_v49 = vadd.f32 %v1540_v34, %v1539_v24  ;;  %16046 = vst [vmem:[#allocation14_spill] sm:$0xff] %v12104_v53  ;;  %v1300_v48 = vsel %vm1276_vm4, %v12104_v53, 0.0 }
 0x13f   : > { %16043 = vst [vmem:[#allocation11_spill] sm:$0xff] %v12075_v16  ;;  %v1542_v45 = vsel %vm1276_vm4, %v1454_v26, 0.0  ;;  %v1455_v46 = vmul.f32 %v12075_v16, %v12075_v16 }
 0x140   : > { %v1543_v22 = vadd.f32 %v1542_v45, %v1541_v49 }
 0x141   : > { %v12038_v31 = vpop.f32.mrb[28].mxu0  ;;  %v12040_v32 = vpop.f32.mrb[28].mxu1  ;;  %v1544_v0 = vsel %vm1276_vm4, %v1455_v46, 0.0 }
 0x142   : > { %v10419_v43 = vpop.f32.mrb[29].mxu0  ;;  %v10503_v44 = vpop.f32.mrb[29].mxu1  ;;  %v926_v24 = vadd.f32 %v11974_v30, %v12038_v31  ;;  %v1545_v37 = vadd.f32 %v1544_v0, %v1543_v22 }
 0x143   : > { %v12047_v47 = vpop.f32.mrb[30].mxu0  ;;  %v12049_v18 = vpop.f32.mrb[30].mxu1  ;;  %v1291_v44 = vadd.f32 %v1290_v10, %v1289_v9 }
 0x144   : > { %v10420_v52 = vpop.f32.mrb[31].mxu0  ;;  %v10504_v56 = vpop.f32.mrb[31].mxu1  ;;  %v12124_v49 = vmax.f32 %v926_v24, 0.0  ;;  %v929_v31 = vadd.f32 %v11974_v30, %v12047_v47 }
 0x145   : > { %v1293_v52 = vadd.f32 %v1292_v29, %v1291_v44  ;;  %v1294_v56 = vsel %vm1276_vm4, %v12075_v16, 0.0  ;;  %v12119_v44 = vmax.f32 %v921_v5, 0.0 }
 0x146   : > { %16048 = vst [vmem:[#allocation16_spill] sm:$0xff] %v12124_v49  ;;  %v1460_v24 = vmul.f32 %v12124_v49, %v12124_v49 }
 0x147   : > { %v1295_v9 = vadd.f32 %v1294_v56, %v1293_v52  ;;  %16047 = vst [vmem:[#allocation15_spill] sm:$0xff] %v12119_v44  ;;  %v1459_v0 = vmul.f32 %v12119_v44, %v12119_v44  ;;  %v1302_v47 = vsel %vm1276_vm4, %v12119_v44, 0.0 }
 0x149   : > { %v933_v12 = vpop.f32.mrb[32].mxu0  ;;  %v12069_v13 = vpop.f32.mrb[32].mxu1 }
 0x14a   : > { %v10423_v17 = vpop.f32.mrb[33].mxu0  ;;  %v10507_v21 = vpop.f32.mrb[33].mxu1 }
 0x14b   : > { %v12077_v25 = vpop.f32.mrb[34].mxu0  ;;  %v12079_v14 = vpop.f32.mrb[34].mxu1  ;;  %v1546_v17 = vsel %vm1276_vm4, %v1456_v57, 0.0  ;;  %v1457_v21 = vmul.f32 %v12097_v39, %v12097_v39 }
 0x14c   : > { %v10424_v38 = vpop.f32.mrb[35].mxu0  ;;  %v10508_v43 = vpop.f32.mrb[35].mxu1  ;;  %v1547_v45 = vadd.f32 %v1546_v17, %v1545_v37 }
 0x14d   : > { %v1297_v38 = vadd.f32 %v1296_v4, %v1295_v9  ;;  %v1458_v43 = vmul.f32 %v12104_v53, %v12104_v53  ;;  %v1548_v46 = vsel %vm1276_vm4, %v1457_v21, 0.0  ;;  %v934_v4 = vadd.f32 %v11974_v30, %v933_v12 }
 0x14e   : > { %v1552_v12 = vsel %vm1276_vm4, %v1459_v0, 0.0 }
 0x14f   : > { %v1299_v52 = vadd.f32 %v1298_v1, %v1297_v38  ;;  %v1550_v22 = vsel %vm1276_vm4, %v1458_v43, 0.0  ;;  %v1304_v1 = vsel %vm1276_vm4, %v12124_v49, 0.0  ;;  %v12145_v43 = vmax.f32 %v934_v4, 0.0 }
 0x151   : > { %v941_v60 = vpop.f32.mrb[36].mxu0  ;;  %v12099_v62 = vpop.f32.mrb[36].mxu1  ;;  %v1301_v9 = vadd.f32 %v1300_v48, %v1299_v52  ;;  %16050 = vst [vmem:[#allocation18_spill] sm:$0xff] %v12145_v43  ;;  %v1554_v48 = vsel %vm1276_vm4, %v1460_v24, 0.0 }
 0x152   : > { %v10427_v6 = vpop.f32.mrb[37].mxu0  ;;  %v10511_v8 = vpop.f32.mrb[37].mxu1  ;;  %v942_v52 = vadd.f32 %v11974_v30, %v941_v60 }
 0x153   : > { %v944_v10 = vpop.f32.mrb[38].mxu0  ;;  %v12108_v26 = vpop.f32.mrb[38].mxu1  ;;  %v1549_v8 = vadd.f32 %v1548_v46, %v1547_v45  ;;  %v937_v45 = vadd.f32 %v11974_v30, %v12077_v25  ;;  %v1303_v46 = vadd.f32 %v1302_v47, %v1301_v9 }
 0x154   : > { %v10428_v34 = vpop.f32.mrb[39].mxu0  ;;  %v10512_v29 = vpop.f32.mrb[39].mxu1 }
 0x155   : > { %v12140_v34 = vmax.f32 %v929_v31, 0.0  ;;  %v1551_v38 = vadd.f32 %v1550_v22, %v1549_v8  ;;  %v1305_v22 = vadd.f32 %v1304_v1, %v1303_v46  ;;  %v1462_v8 = vmul.f32 %v12145_v43, %v12145_v43 }
 0x156   : > { %v12159_v25 = vmax.f32 %v937_v45, 0.0  ;;  %v945_v1 = vadd.f32 %v11974_v30, %v944_v10 }
 0x157   : > { %16049 = vst [vmem:[#allocation17_spill] sm:$0xff] %v12140_v34  ;;  %v1461_v31 = vmul.f32 %v12140_v34, %v12140_v34  ;;  %v1306_v4 = vsel %vm1276_vm4, %v12140_v34, 0.0  ;;  %v1558_v45 = vsel %vm1276_vm4, %v1462_v8, 0.0 }
 0x158   : > { %16051 = vst [vmem:[#allocation19_spill] sm:$0xff] %v12159_v25  ;;  %v1307_v49 = vadd.f32 %v1306_v4, %v1305_v22 }
 0x159   : > { %v949_v56 = vpop.f32.mrb[40].mxu0  ;;  %v12128_v57 = vpop.f32.mrb[40].mxu1  ;;  %v1556_v60 = vsel %vm1276_vm4, %v1461_v31, 0.0  ;;  %v1310_v31 = vsel %vm1276_vm4, %v12159_v25, 0.0 }
 0x15a   : > { %v10431_v5 = vpop.f32.mrb[41].mxu0  ;;  %v10515_v6 = vpop.f32.mrb[41].mxu1 }
 0x15b   : > { %v952_v17 = vpop.f32.mrb[42].mxu0  ;;  %v12134_v21 = vpop.f32.mrb[42].mxu1  ;;  %v1553_v5 = vadd.f32 %v1552_v12, %v1551_v38  ;;  %v1308_v38 = vsel %vm1276_vm4, %v12145_v43, 0.0  ;;  %v12166_v12 = vmax.f32 %v942_v52, 0.0  ;;  %v12177_v43 = vmax.f32 %v945_v1, 0.0 }
 0x15c   : > { %v10432_v29 = vpop.f32.mrb[43].mxu0  ;;  %v10516_v37 = vpop.f32.mrb[43].mxu1 }
 0x15d   : > { %v1555_v24 = vadd.f32 %v1554_v48, %v1553_v5  ;;  %16052 = vst [vmem:[#allocation20_spill] sm:$0xff] %v12166_v12  ;;  %v1463_v48 = vmul.f32 %v12159_v25, %v12159_v25  ;;  %v950_v5 = vadd.f32 %v11974_v30, %v949_v56  ;;  %v1464_v52 = vmul.f32 %v12166_v12, %v12166_v12 }
 0x15e   : > { %16053 = vst [vmem:[#allocation21_spill] sm:$0xff] %v12177_v43  ;;  %v1312_v8 = vsel %vm1276_vm4, %v12166_v12, 0.0 }
 0x15f   : > { %v1560_v4 = vsel %vm1276_vm4, %v1463_v48, 0.0  ;;  %v12184_v56 = vmax.f32 %v950_v5, 0.0  ;;  %v1562_v1 = vsel %vm1276_vm4, %v1464_v52, 0.0 }
 0x161   : > { %v957_v6 = vpop.f32.mrb[44].mxu0  ;;  %v12153_v0 = vpop.f32.mrb[44].mxu1  ;;  %16054 = vst [vmem:[#allocation22_spill] sm:$0xff] %v12184_v56 }
 0x162   : > { %v10435_v9 = vpop.f32.mrb[45].mxu0  ;;  %v10519_v47 = vpop.f32.mrb[45].mxu1  ;;  %v958_v48 = vadd.f32 %v11974_v30, %v957_v6 }
 0x163   : > { %v960_v29 = vpop.f32.mrb[46].mxu0  ;;  %v12161_v37 = vpop.f32.mrb[46].mxu1  ;;  %v1557_v9 = vadd.f32 %v1556_v60, %v1555_v24  ;;  %v1309_v47 = vadd.f32 %v1308_v38, %v1307_v49  ;;  %v953_v49 = vadd.f32 %v11974_v30, %v952_v17  ;;  %v1314_v17 = vsel %vm1276_vm4, %v12177_v43, 0.0 }
 0x164   : > { %v10436_v46 = vpop.f32.mrb[47].mxu0  ;;  %v10520_v34 = vpop.f32.mrb[47].mxu1  ;;  %v12202_v53 = vmax.f32 %v958_v48, 0.0 }
 0x165   : > { %v1559_v10 = vadd.f32 %v1558_v45, %v1557_v9  ;;  %v1311_v38 = vadd.f32 %v1310_v31, %v1309_v47  ;;  %v1465_v45 = vmul.f32 %v12177_v43, %v12177_v43  ;;  %v1466_v47 = vmul.f32 %v12184_v56, %v12184_v56 }
 0x166   : > { %v12197_v31 = vmax.f32 %v953_v49, 0.0  ;;  %16056 = vst [vmem:[#allocation24_spill] sm:$0xff] %v12202_v53 }
 0x167   : > { %v1561_v12 = vadd.f32 %v1560_v4, %v1559_v10  ;;  %v1313_v5 = vadd.f32 %v1312_v8, %v1311_v38  ;;  %v1564_v52 = vsel %vm1276_vm4, %v1465_v45, 0.0  ;;  %v1566_v8 = vsel %vm1276_vm4, %v1466_v47, 0.0 }
 0x168   : > { %16055 = vst [vmem:[#allocation23_spill] sm:$0xff] %v12197_v31  ;;  %v1467_v49 = vmul.f32 %v12197_v31, %v12197_v31 }
 0x169   : > { %v965_v34 = vpop.f32.mrb[48].mxu0  ;;  %v12179_v22 = vpop.f32.mrb[48].mxu1  ;;  %v1315_v6 = vadd.f32 %v1314_v17, %v1313_v5  ;;  %v1468_v5 = vmul.f32 %v12202_v53, %v12202_v53 }
 0x16a   : > { %v10439_v24 = vpop.f32.mrb[49].mxu0  ;;  %v10523_v60 = vpop.f32.mrb[49].mxu1 }
 0x16b   : > { %v968_v46 = vpop.f32.mrb[50].mxu0  ;;  %v12187_v25 = vpop.f32.mrb[50].mxu1  ;;  %v1563_v24 = vadd.f32 %v1562_v1, %v1561_v12  ;;  %v1316_v60 = vsel %vm1276_vm4, %v12184_v56, 0.0  ;;  %v966_v12 = vadd.f32 %v11974_v30, %v965_v34  ;;  %v1568_v34 = vsel %vm1276_vm4, %v1467_v49, 0.0 }
 0x16c   : > { %v10440_v9 = vpop.f32.mrb[51].mxu0  ;;  %v10524_v44 = vpop.f32.mrb[51].mxu1 }
 0x16d   : > { %v961_v44 = vadd.f32 %v11974_v30, %v960_v29  ;;  %v1565_v45 = vadd.f32 %v1564_v52, %v1563_v24  ;;  %v1317_v9 = vadd.f32 %v1316_v60, %v1315_v6  ;;  %v1318_v29 = vsel %vm1276_vm4, %v12197_v31, 0.0 }
 0x16e   : > { %v1320_v24 = vsel %vm1276_vm4, %v12202_v53, 0.0  ;;  %v12222_v52 = vmax.f32 %v966_v12, 0.0  ;;  %v969_v60 = vadd.f32 %v11974_v30, %v968_v46 }
 0x16f   : > { %v12217_v17 = vmax.f32 %v961_v44, 0.0  ;;  %v1567_v39 = vadd.f32 %v1566_v8, %v1565_v45  ;;  %v1319_v6 = vadd.f32 %v1318_v29, %v1317_v9 }
 0x170   : > { %16058 = vst [vmem:[#allocation26_spill] sm:$0xff] %v12222_v52  ;;  %v1470_v12 = vmul.f32 %v12222_v52, %v12222_v52  ;;  %v12235_v46 = vmax.f32 %v969_v60, 0.0 }
 0x171   : > { %v973_v10 = vpop.f32.mrb[52].mxu0  ;;  %v12205_v4 = vpop.f32.mrb[52].mxu1  ;;  %16057 = vst [vmem:[#allocation25_spill] sm:$0xff] %v12217_v17  ;;  %v1322_v49 = vsel %vm1276_vm4, %v12217_v17, 0.0 }
 0x172   : > { %v10443_v38 = vpop.f32.mrb[53].mxu0  ;;  %v10527_v1 = vpop.f32.mrb[53].mxu1  ;;  %v974_v44 = vadd.f32 %v11974_v30, %v973_v10  ;;  %16059 = vst [vmem:[#allocation27_spill] sm:$0xff] %v12235_v46  ;;  %v1324_v10 = vsel %vm1276_vm4, %v12222_v52, 0.0  ;;  %v1574_v60 = vsel %vm1276_vm4, %v1470_v12, 0.0 }
 0x173   : > { %v976_v56 = vpop.f32.mrb[54].mxu0  ;;  %v12211_v48 = vpop.f32.mrb[54].mxu1  ;;  %v1570_v38 = vsel %vm1276_vm4, %v1468_v5, 0.0  ;;  %v1469_v1 = vmul.f32 %v12217_v17, %v12217_v17 }
 0x174   : > { %v10444_v47 = vpop.f32.mrb[55].mxu0  ;;  %v10528_v43 = vpop.f32.mrb[55].mxu1 }
 0x175   : > { %v1569_v47 = vadd.f32 %v1568_v34, %v1567_v39  ;;  %v1321_v43 = vadd.f32 %v1320_v24, %v1319_v6  ;;  %v1572_v39 = vsel %vm1276_vm4, %v1469_v1, 0.0  ;;  %v12242_v34 = vmax.f32 %v974_v44, 0.0 }
 0x176   : > { %v977_v24 = vadd.f32 %v11974_v30, %v976_v56  ;;  %v1326_v1 = vsel %vm1276_vm4, %v12235_v46, 0.0 }
 0x177   : > { %v1571_v5 = vadd.f32 %v1570_v38, %v1569_v47  ;;  %16060 = vst [vmem:[#allocation28_spill] sm:$0xff] %v12242_v34  ;;  %v1323_v33 = vadd.f32 %v1322_v49, %v1321_v43  ;;  %v1471_v38 = vmul.f32 %v12235_v46, %v12235_v46  ;;  %v1472_v44 = vmul.f32 %v12242_v34, %v12242_v34 }
 0x178   : > { %v12253_v52 = vmax.f32 %v977_v24, 0.0  ;;  %v1328_v12 = vsel %vm1276_vm4, %v12242_v34, 0.0 }
 0x179   : > { %v981_v8 = vpop.f32.mrb[56].mxu0  ;;  %v12229_v45 = vpop.f32.mrb[56].mxu1  ;;  %v1576_v49 = vsel %vm1276_vm4, %v1471_v38, 0.0  ;;  %v1578_v24 = vsel %vm1276_vm4, %v1472_v44, 0.0 }
 0x17a   : > { %v10447_v9 = vpop.f32.mrb[57].mxu0  ;;  %v10531_v29 = vpop.f32.mrb[57].mxu1  ;;  %v982_v47 = vadd.f32 %v11974_v30, %v981_v8  ;;  %16061 = vst [vmem:[#allocation29_spill] sm:$0xff] %v12253_v52 }
 0x17b   : > { %v984_v53 = vpop.f32.mrb[58].mxu0  ;;  %v12237_v31 = vpop.f32.mrb[58].mxu1  ;;  %v1573_v9 = vadd.f32 %v1572_v39, %v1571_v5  ;;  %v1325_v29 = vadd.f32 %v1324_v10, %v1323_v33 }
 0x17c   : > { %v10448_v6 = vpop.f32.mrb[59].mxu0  ;;  %v10532_v17 = vpop.f32.mrb[59].mxu1  ;;  %v12260_v8 = vmax.f32 %v982_v47, 0.0  ;;  %v985_v33 = vadd.f32 %v11974_v30, %v984_v53  ;;  %v1330_v53 = vsel %vm1276_vm4, %v12253_v52, 0.0 }
 0x17d   : > { %v1575_v56 = vadd.f32 %v1574_v60, %v1573_v9  ;;  %v1327_v10 = vadd.f32 %v1326_v1, %v1325_v29  ;;  %v1473_v60 = vmul.f32 %v12253_v52, %v12253_v52 }
 0x17e   : > { %16062 = vst [vmem:[#allocation30_spill] sm:$0xff] %v12260_v8  ;;  %v1474_v29 = vmul.f32 %v12260_v8, %v12260_v8  ;;  %v12273_v1 = vmax.f32 %v985_v33, 0.0 }
 0x17f   : > { %v1577_v34 = vadd.f32 %v1576_v49, %v1575_v56  ;;  %v1329_v47 = vadd.f32 %v1328_v12, %v1327_v10  ;;  %v1580_v44 = vsel %vm1276_vm4, %v1473_v60, 0.0 }
 0x180   : > { %16063 = vst [vmem:[#allocation31_spill] sm:$0xff] %v12273_v1  ;;  %v1582_v12 = vsel %vm1276_vm4, %v1474_v29, 0.0  ;;  %v1475_v33 = vmul.f32 %v12273_v1, %v12273_v1 }
 0x181   : > { %v989_v17 = vpop.f32.mrb[60].mxu0  ;;  %v12255_v43 = vpop.f32.mrb[60].mxu1  ;;  %v1331_v56 = vadd.f32 %v1330_v53, %v1329_v47 }
 0x182   : > { %v10451_v5 = vpop.f32.mrb[61].mxu0  ;;  %v10535_v39 = vpop.f32.mrb[61].mxu1  ;;  %v990_v38 = vadd.f32 %v11974_v30, %v989_v17 }
 0x183   : > { %v992_v6 = vpop.f32.mrb[62].mxu0  ;;  %v12263_v46 = vpop.f32.mrb[62].mxu1  ;;  %v1579_v5 = vadd.f32 %v1578_v24, %v1577_v34  ;;  %v1332_v39 = vsel %vm1276_vm4, %v12260_v8, 0.0 }
 0x184   : > { %v10452_v9 = vpop.f32.mrb[63].mxu0  ;;  %v10536_v16 = vpop.f32.mrb[63].mxu1  ;;  %v12278_v61 = vmax.f32 %v990_v38, 0.0 }
 0x185   : > { %v993_v16 = vadd.f32 %v11974_v30, %v992_v6  ;;  %v1581_v60 = vadd.f32 %v1580_v44, %v1579_v5  ;;  %v1333_v9 = vadd.f32 %v1332_v39, %v1331_v56  ;;  %v1334_v6 = vsel %vm1276_vm4, %v12273_v1, 0.0 }
 0x186   : > { %16064 = vst [vmem:[#allocation32_spill] sm:$0xff] %v12278_v61  ;;  %v1476_v47 = vmul.f32 %v12278_v61, %v12278_v61  ;;  %v1336_v5 = vsel %vm1276_vm4, %v12278_v61, 0.0 }
 0x187   : > { %v12293_v53 = vmax.f32 %v993_v16, 0.0  ;;  %v1583_v50 = vadd.f32 %v1582_v12, %v1581_v60  ;;  %v1335_v56 = vadd.f32 %v1334_v6, %v1333_v9 }
 0x189   : > { %v997_v17 = vpop.f32.mrb[64].mxu0  ;;  %v12281_v49 = vpop.f32.mrb[64].mxu1  ;;  %16065 = vst [vmem:[#allocation33_spill] sm:$0xff] %v12293_v53  ;;  %v1337_v1 = vadd.f32 %v1336_v5, %v1335_v56  ;;  %v1338_v12 = vsel %vm1276_vm4, %v12293_v53, 0.0 }
 0x18a   : > { %v998_v34 = vadd.f32 %v11974_v30, %v997_v17  ;;  %v10455_v10 = vpop.f32.mrb[65].mxu0  ;;  %v10539_v24 = vpop.f32.mrb[65].mxu1  ;;  %v1584_v17 = vsel %vm1276_vm4, %v1475_v33, 0.0 }
 0x18b   : > { %v1000_v8 = vpop.f32.mrb[66].mxu0  ;;  %v12287_v38 = vpop.f32.mrb[66].mxu1  ;;  %v1586_v10 = vsel %vm1276_vm4, %v1476_v47, 0.0  ;;  %v1477_v24 = vmul.f32 %v12293_v53, %v12293_v53  ;;  %v1585_v16 = vadd.f32 %v1584_v17, %v1583_v50  ;;  %v1339_v28 = vadd.f32 %v1338_v12, %v1337_v1 }
 0x18c   : > { %v10456_v29 = vpop.f32.mrb[67].mxu0  ;;  %v10540_v52 = vpop.f32.mrb[67].mxu1  ;;  %v12298_v44 = vmax.f32 %v998_v34, 0.0  ;;  %v1001_v39 = vadd.f32 %v11974_v30, %v1000_v8 }
 0x18d   : > { %v1587_v6 = vadd.f32 %v1586_v10, %v1585_v16  ;;  %v1588_v50 = vsel %vm1276_vm4, %v1477_v24, 0.0 }
 0x18e   : > { %16066 = vst [vmem:[#allocation34_spill] sm:$0xff] %v12298_v44  ;;  %v1478_v33 = vmul.f32 %v12298_v44, %v12298_v44  ;;  %v12310_v34 = vmax.f32 %v1001_v39, 0.0  ;;  %v1340_v17 = vsel %vm1276_vm4, %v12298_v44, 0.0 }
 0x18f   : > { %v1589_v16 = vadd.f32 %v1588_v50, %v1587_v6 }
 0x190   : > { %16067 = vst [vmem:[#allocation35_spill] sm:$0xff] %v12310_v34  ;;  %v1479_v10 = vmul.f32 %v12310_v34, %v12310_v34  ;;  %v1342_v24 = vsel %vm1276_vm4, %v12310_v34, 0.0 }
 0x191   : > { %v1005_v29 = vpop.f32.mrb[68].mxu0  ;;  %v12304_v52 = vpop.f32.mrb[68].mxu1 }
 0x192   : > { %v1006_v8 = vadd.f32 %v11974_v30, %v1005_v29  ;;  %v10459_v60 = vpop.f32.mrb[69].mxu0  ;;  %v10543_v9 = vpop.f32.mrb[69].mxu1  ;;  %v1590_v29 = vsel %vm1276_vm4, %v1478_v33, 0.0  ;;  %v1592_v1 = vsel %vm1276_vm4, %v1479_v10, 0.0 }
 0x193   : > { %v1008_v47 = vpop.f32.mrb[70].mxu0  ;;  %v12313_v61 = vpop.f32.mrb[70].mxu1  ;;  %v1341_v60 = vadd.f32 %v1340_v17, %v1339_v28  ;;  %v1591_v44 = vadd.f32 %v1590_v29, %v1589_v16 }
 0x194   : > { %v12318_v5 = vmax.f32 %v1006_v8, 0.0  ;;  %v1009_v56 = vadd.f32 %v11974_v30, %v1008_v47  ;;  %v10460_v53 = vpop.f32.mrb[71].mxu0  ;;  %v10544_v39 = vpop.f32.mrb[71].mxu1 }
 0x195   : > { %v1343_v50 = vadd.f32 %v1342_v24, %v1341_v60 }
 0x196   : > { %16068 = vst [vmem:[#allocation36_spill] sm:$0xff] %v12318_v5  ;;  %v1480_v9 = vmul.f32 %v12318_v5, %v12318_v5  ;;  %v12328_v8 = vmax.f32 %v1009_v56, 0.0  ;;  %v1344_v12 = vsel %vm1276_vm4, %v12318_v5, 0.0  ;;  %v1593_v5 = vadd.f32 %v1592_v1, %v1591_v44 }
 0x197   : > { %v1345_v58 = vadd.f32 %v1344_v12, %v1343_v50 }
 0x198   : > { %16069 = vst [vmem:[#allocation37_spill] sm:$0xff] %v12328_v8  ;;  %v1594_v56 = vsel %vm1276_vm4, %v1480_v9, 0.0  ;;  %v1481_v29 = vmul.f32 %v12328_v8, %v12328_v8 }
 0x199   : > { %v1013_v47 = vpop.f32.mrb[72].mxu0  ;;  %v12330_v53 = vpop.f32.mrb[72].mxu1  ;;  %v1595_v9 = vadd.f32 %v1594_v56, %v1593_v5 }
 0x19a   : > { %v1014_v33 = vadd.f32 %v11974_v30, %v1013_v47  ;;  %v10463_v28 = vpop.f32.mrb[73].mxu0  ;;  %v10547_v6 = vpop.f32.mrb[73].mxu1  ;;  %v1346_v47 = vsel %vm1276_vm4, %v12328_v8, 0.0 }
 0x19b   : > { %v1016_v17 = vpop.f32.mrb[74].mxu0  ;;  %v12336_v39 = vpop.f32.mrb[74].mxu1  ;;  %v1596_v28 = vsel %vm1276_vm4, %v1481_v29, 0.0  ;;  %v1347_v6 = vadd.f32 %v1346_v47, %v1345_v58 }
 0x19c   : > { %v12341_v16 = vmax.f32 %v1014_v33, 0.0  ;;  %v1017_v10 = vadd.f32 %v11974_v30, %v1016_v17  ;;  %v10464_v34 = vpop.f32.mrb[75].mxu0  ;;  %v10548_v20 = vpop.f32.mrb[75].mxu1 }
 0x19e   : > { %16070 = vst [vmem:[#allocation38_spill] sm:$0xff] %v12341_v16  ;;  %v1482_v60 = vmul.f32 %v12341_v16, %v12341_v16  ;;  %v12348_v24 = vmax.f32 %v1017_v10, 0.0  ;;  %v1348_v33 = vsel %vm1276_vm4, %v12341_v16, 0.0  ;;  %v1597_v10 = vadd.f32 %v1596_v28, %v1595_v9 }
 0x19f   : > { %v1349_v5 = vadd.f32 %v1348_v33, %v1347_v6  ;;  %v1038_v33 = vadd.f32 %v11974_v30, %v11947_v55  ;;  %v1046_v55 = vadd.f32 %v11974_v30, %v11951_v63 }
 0x1a0   : > { %v1598_v20 = vsel %vm1276_vm4, %v1482_v60, 0.0  ;;  %v1483_v44 = vmul.f32 %v12348_v24, %v12348_v24  ;;  %v1350_v16 = vsel %vm1276_vm4, %v12348_v24, 0.0 }
 0x1a1   : > { %v1021_v17 = vpop.f32.mrb[76].mxu0  ;;  %v12353_v34 = vpop.f32.mrb[76].mxu1  ;;  %v1599_v51 = vadd.f32 %v1598_v20, %v1597_v10  ;;  %v1351_v6 = vadd.f32 %v1350_v16, %v1349_v5  ;;  %v1041_v20 = vadd.f32 %v11974_v30, %v11949_v59 }
 0x1a2   : > { %v1022_v1 = vadd.f32 %v11974_v30, %v1021_v17  ;;  %v10467_v12 = vpop.f32.mrb[77].mxu0  ;;  %v10551_v50 = vpop.f32.mrb[77].mxu1  ;;  %v1600_v42 = vsel %vm1276_vm4, %v1483_v44, 0.0 }
 0x1a3   : > { %v1024_v56 = vpop.f32.mrb[78].mxu0  ;;  %v1192_v29 = vpop.f32.mrb[78].mxu1  ;;  %v1601_v44 = vadd.f32 %v1600_v42, %v1599_v51  ;;  %v12389_v51 = vmax.f32 %v1041_v20, 0.0 }
 0x1a4   : > { %v12361_v58 = vmax.f32 %v1022_v1, 0.0  ;;  %v1025_v47 = vadd.f32 %v11974_v30, %v1024_v56  ;;  %v10468_v8 = vpop.f32.mrb[79].mxu0  ;;  %v10552_v60 = vpop.f32.mrb[79].mxu1 }
 0x1a6   : > { %v1352_v17 = vsel %vm1276_vm4, %v12361_v58, 0.0  ;;  %v1484_v9 = vmul.f32 %v12361_v58, %v12361_v58  ;;  %v12369_v28 = vmax.f32 %v1025_v47, 0.0  ;;  %v12381_v47 = vmax.f32 %v1038_v33, 0.0 }
 0x1a7   : > { %v1353_v12 = vadd.f32 %v1352_v17, %v1351_v6  ;;  %v1049_v6 = vadd.f32 %v11974_v30, %v11953_v3 }
 0x1a8   : > { %v1602_v1 = vsel %vm1276_vm4, %v1484_v9, 0.0  ;;  %v1485_v8 = vmul.f32 %v12369_v28, %v12369_v28  ;;  %v1354_v10 = vsel %vm1276_vm4, %v12369_v28, 0.0 }
 0x1a9   : > { %v1029_v50 = vpop.f32.mrb[80].mxu0  ;;  %v1603_v16 = vadd.f32 %v1602_v1, %v1601_v44  ;;  %v1355_v17 = vadd.f32 %v1354_v10, %v1353_v12  ;;  %v12401_v44 = vmax.f32 %v1046_v55, 0.0  ;;  %v1054_v12 = vadd.f32 %v11974_v30, %v11955_v7 }
 0x1aa   : > { %v1030_v56 = vadd.f32 %v11974_v30, %v1029_v50  ;;  %v10471_v29 = vpop.f32.mrb[81].mxu0  ;;  %v1604_v60 = vsel %vm1276_vm4, %v1485_v8, 0.0  ;;  %v1488_v8 = vmul.f32 %v12381_v47, %v12381_v47  ;;  %v1489_v55 = vmul.f32 %v12389_v51, %v12389_v51 }
 0x1ab   : > { %v1032_v5 = vpop.f32.mrb[82].mxu0  ;;  %v1605_v50 = vadd.f32 %v1604_v60, %v1603_v16  ;;  %v1360_v29 = vsel %vm1276_vm4, %v12381_v47, 0.0  ;;  %v12414_v16 = vmax.f32 %v1049_v6, 0.0  ;;  %v1057_v7 = vadd.f32 %v11974_v30, %v11957_v11 }
 0x1ac   : > { %v12386_v9 = vmax.f32 %v1030_v56, 0.0  ;;  %v1033_v59 = vadd.f32 %v11974_v30, %v1032_v5  ;;  %v10472_v42 = vpop.f32.mrb[83].mxu0  ;;  %v12426_v6 = vmax.f32 %v1054_v12, 0.0  ;;  %v1065_v11 = vadd.f32 %v11974_v30, %v11961_v19 }
 0x1ad   : > { %v1062_v42 = vadd.f32 %v11974_v30, %v11959_v15  ;;  %v1364_v15 = vsel %vm1276_vm4, %v12401_v44, 0.0  ;;  %v1366_v19 = vsel %vm1276_vm4, %v12414_v16, 0.0 }
 0x1ae   : > { %v1356_v33 = vsel %vm1276_vm4, %v12386_v9, 0.0  ;;  %v1486_v63 = vmul.f32 %v12386_v9, %v12386_v9  ;;  %v12397_v1 = vmax.f32 %v1033_v59, 0.0 }
 0x1af   : > { %v1357_v20 = vadd.f32 %v1356_v33, %v1355_v17 }
 0x1b0   : > { %v1606_v3 = vsel %vm1276_vm4, %v1486_v63, 0.0  ;;  %v1358_v10 = vsel %vm1276_vm4, %v12397_v1, 0.0  ;;  %v1487_v56 = vmul.f32 %v12397_v1, %v12397_v1  ;;  %v1610_v63 = vsel %vm1276_vm4, %v1488_v8, 0.0 }
 0x1b1   : > { %v1607_v5 = vadd.f32 %v1606_v3, %v1605_v50  ;;  %v1359_v59 = vadd.f32 %v1358_v10, %v1357_v20  ;;  %v1362_v50 = vsel %vm1276_vm4, %v12389_v51, 0.0  ;;  %v1490_v20 = vmul.f32 %v12401_v44, %v12401_v44 }
 0x1b2   : > { %v1608_v60 = vsel %vm1276_vm4, %v1487_v56, 0.0  ;;  %v1612_v56 = vsel %vm1276_vm4, %v1489_v55, 0.0  ;;  %v1491_v8 = vmul.f32 %v12414_v16, %v12414_v16  ;;  %v1492_v55 = vmul.f32 %v12426_v6, %v12426_v6 }
 0x1b3   : > { %v1361_v17 = vadd.f32 %v1360_v29, %v1359_v59  ;;  %v1609_v33 = vadd.f32 %v1608_v60, %v1607_v5  ;;  %v12435_v29 = vmax.f32 %v1057_v7, 0.0  ;;  %v12437_v5 = vmax.f32 %v1062_v42, 0.0 }
 0x1b4   : > { %v1614_v60 = vsel %vm1276_vm4, %v1490_v20, 0.0  ;;  %v1616_v42 = vsel %vm1276_vm4, %v1491_v8, 0.0 }
 0x1b5   : > { %v1363_v3 = vadd.f32 %v1362_v50, %v1361_v17  ;;  %v1611_v10 = vadd.f32 %v1610_v63, %v1609_v33  ;;  %v1070_v17 = vadd.f32 %v11974_v30, %v11965_v23  ;;  %v12446_v33 = vmax.f32 %v1065_v11, 0.0 }
 0x1b6   : > { %v1368_v50 = vsel %vm1276_vm4, %v12426_v6, 0.0  ;;  %v1493_v20 = vmul.f32 %v12435_v29, %v12435_v29  ;;  %v1618_v11 = vsel %vm1276_vm4, %v1492_v55, 0.0  ;;  %v1081_v55 = vadd.f32 %v11974_v30, %v11987_v40 }
 0x1b7   : > { %v1365_v59 = vadd.f32 %v1364_v15, %v1363_v3  ;;  %v1613_v12 = vadd.f32 %v1612_v56, %v1611_v10  ;;  %v1073_v3 = vadd.f32 %v11974_v30, %v11969_v27  ;;  %v1494_v10 = vmul.f32 %v12437_v5, %v12437_v5 }
 0x1b8   : > { %v1370_v15 = vsel %vm1276_vm4, %v12435_v29, 0.0  ;;  %v12460_v8 = vmax.f32 %v1070_v17, 0.0 }
 0x1b9   : > { %v1367_v63 = vadd.f32 %v1366_v19, %v1365_v59  ;;  %v1615_v7 = vadd.f32 %v1614_v60, %v1613_v12  ;;  %v1078_v59 = vadd.f32 %v11974_v30, %v11981_v35  ;;  %v1495_v12 = vmul.f32 %v12446_v33, %v12446_v33 }
 0x1ba   : > { %v1620_v19 = vsel %vm1276_vm4, %v1493_v20, 0.0  ;;  %v1622_v17 = vsel %vm1276_vm4, %v1494_v10, 0.0  ;;  %v1374_v35 = vsel %vm1276_vm4, %v12446_v33, 0.0  ;;  %v1086_v20 = vadd.f32 %v11974_v30, %v12009_v54 }
 0x1bb   : > { %v1369_v56 = vadd.f32 %v1368_v50, %v1367_v63  ;;  %v1617_v23 = vadd.f32 %v1616_v42, %v1615_v7  ;;  %v1372_v63 = vsel %vm1276_vm4, %v12437_v5, 0.0  ;;  %v12469_v7 = vmax.f32 %v1073_v3, 0.0 }
 0x1bc   : > { %v1624_v3 = vsel %vm1276_vm4, %v1495_v12, 0.0  ;;  %v1376_v40 = vsel %vm1276_vm4, %v12460_v8, 0.0 }
 0x1bd   : > { %v1371_v60 = vadd.f32 %v1370_v15, %v1369_v56  ;;  %v1619_v27 = vadd.f32 %v1618_v11, %v1617_v23  ;;  %v1496_v56 = vmul.f32 %v12460_v8, %v12460_v8  ;;  %v12478_v23 = vmax.f32 %v1078_v59, 0.0 }
 0x1be   : > { %v1497_v10 = vmul.f32 %v12469_v7, %v12469_v7  ;;  %v1094_v59 = vadd.f32 %v11974_v30, %v12040_v32 }
 0x1bf   : > { %v1373_v42 = vadd.f32 %v1372_v63, %v1371_v60  ;;  %v1621_v50 = vadd.f32 %v1620_v19, %v1619_v27  ;;  %v12487_v60 = vmax.f32 %v1081_v55, 0.0  ;;  %v1089_v27 = vadd.f32 %v11974_v30, %v12019_v2 }
 0x1c0   : > { %v1626_v12 = vsel %vm1276_vm4, %v1496_v56, 0.0  ;;  %v1378_v63 = vsel %vm1276_vm4, %v12469_v7, 0.0  ;;  %v1097_v55 = vadd.f32 %v11974_v30, %v12049_v18  ;;  %v1380_v32 = vsel %vm1276_vm4, %v12478_v23, 0.0 }
 0x1c1   : > { %v1375_v11 = vadd.f32 %v1374_v35, %v1373_v42  ;;  %v1623_v15 = vadd.f32 %v1622_v17, %v1621_v50  ;;  %v1498_v17 = vmul.f32 %v12478_v23, %v12478_v23  ;;  %v12498_v42 = vmax.f32 %v1086_v20, 0.0 }
 0x1c2   : > { %v1628_v35 = vsel %vm1276_vm4, %v1497_v10, 0.0  ;;  %v1499_v56 = vmul.f32 %v12487_v60, %v12487_v60  ;;  %v1382_v18 = vsel %vm1276_vm4, %v12487_v60, 0.0 }
 0x1c3   : > { %v1377_v19 = vadd.f32 %v1376_v40, %v1375_v11  ;;  %v1625_v54 = vadd.f32 %v1624_v3, %v1623_v15  ;;  %v12507_v3 = vmax.f32 %v1089_v27, 0.0  ;;  %v12509_v11 = vmax.f32 %v1094_v59, 0.0 }
 0x1c4   : > { %v1630_v40 = vsel %vm1276_vm4, %v1498_v17, 0.0  ;;  %v1500_v10 = vmul.f32 %v12498_v42, %v12498_v42  ;;  %v1632_v59 = vsel %vm1276_vm4, %v1499_v56, 0.0 }
 0x1c5   : > { %v1379_v50 = vadd.f32 %v1378_v63, %v1377_v19  ;;  %v1627_v2 = vadd.f32 %v1626_v12, %v1625_v54  ;;  %v1102_v19 = vadd.f32 %v11974_v30, %v12069_v13  ;;  %v12518_v54 = vmax.f32 %v1097_v55, 0.0 }
 0x1c6   : > { %v1384_v63 = vsel %vm1276_vm4, %v12498_v42, 0.0  ;;  %v1501_v17 = vmul.f32 %v12507_v3, %v12507_v3  ;;  %v1502_v13 = vmul.f32 %v12509_v11, %v12509_v11 }
 0x1c7   : > { %v1629_v15 = vadd.f32 %v1628_v35, %v1627_v2  ;;  %v1381_v20 = vadd.f32 %v1380_v32, %v1379_v50  ;;  %v12528_v50 = vld [vmem:[%s15853_s2] ss:$0 sm:$0xff]  ;;  %v1634_v35 = vsel %vm1276_vm4, %v1500_v10, 0.0  ;;  %v1386_v32 = vsel %vm1276_vm4, %v12507_v3, 0.0 }
 0x1c8   : > { %v1105_v30 = vadd.f32 %v12528_v50, %v12079_v14  ;;  %v12537_v56 = vmax.f32 %v1102_v19, 0.0  ;;  %v1113_v10 = vadd.f32 %v12528_v50, %v12108_v26  ;;  %v1638_v19 = vsel %vm1276_vm4, %v1502_v13, 0.0 }
 0x1c9   : > { %v1383_v12 = vadd.f32 %v1382_v18, %v1381_v20  ;;  %v1631_v27 = vadd.f32 %v1630_v40, %v1629_v15  ;;  %v1110_v15 = vadd.f32 %v12528_v50, %v12099_v62  ;;  %v1503_v20 = vmul.f32 %v12518_v54, %v12518_v54 }
 0x1ca   : > { %v1636_v18 = vsel %vm1276_vm4, %v1501_v17, 0.0  ;;  %v1390_v62 = vsel %vm1276_vm4, %v12518_v54, 0.0  ;;  %v1118_v17 = vadd.f32 %v12528_v50, %v12128_v57  ;;  %v1392_v26 = vsel %vm1276_vm4, %v12537_v56, 0.0 }
 0x1cb   : > { %v1385_v55 = vadd.f32 %v1384_v63, %v1383_v12  ;;  %v1633_v2 = vadd.f32 %v1632_v59, %v1631_v27  ;;  %v1388_v12 = vsel %vm1276_vm4, %v12509_v11, 0.0  ;;  %v12546_v27 = vmax.f32 %v1105_v30, 0.0 }
 0x1cc   : > { %v1640_v30 = vsel %vm1276_vm4, %v1503_v20, 0.0  ;;  %v1126_v57 = vadd.f32 %v12528_v50, %v12153_v0 }
 0x1cd   : > { %v1387_v40 = vadd.f32 %v1386_v32, %v1385_v55  ;;  %v1635_v14 = vadd.f32 %v1634_v35, %v1633_v2  ;;  %v1504_v55 = vmul.f32 %v12537_v56, %v12537_v56  ;;  %v12555_v2 = vmax.f32 %v1110_v15, 0.0 }
 0x1ce   : > { %v1505_v13 = vmul.f32 %v12546_v27, %v12546_v27 }
 0x1cf   : > { %v1389_v59 = vadd.f32 %v1388_v12, %v1387_v40  ;;  %v1637_v63 = vadd.f32 %v1636_v18, %v1635_v14  ;;  %v12564_v40 = vmax.f32 %v1113_v10, 0.0  ;;  %v1121_v14 = vadd.f32 %v12528_v50, %v12134_v21 }
 0x1d0   : > { %v1642_v20 = vsel %vm1276_vm4, %v1504_v55, 0.0  ;;  %v1394_v12 = vsel %vm1276_vm4, %v12546_v27, 0.0  ;;  %v1129_v21 = vadd.f32 %v12528_v50, %v12161_v37  ;;  %v1396_v0 = vsel %vm1276_vm4, %v12555_v2, 0.0 }
 0x1d1   : > { %v1391_v35 = vadd.f32 %v1390_v62, %v1389_v59  ;;  %v1639_v32 = vadd.f32 %v1638_v19, %v1637_v63  ;;  %v1506_v19 = vmul.f32 %v12555_v2, %v12555_v2  ;;  %v12575_v59 = vmax.f32 %v1118_v17, 0.0 }
 0x1d2   : > { %v1644_v62 = vsel %vm1276_vm4, %v1505_v13, 0.0  ;;  %v1507_v55 = vmul.f32 %v12564_v40, %v12564_v40  ;;  %v1134_v13 = vadd.f32 %v12528_v50, %v12179_v22 }
 0x1d3   : > { %v1393_v15 = vadd.f32 %v1392_v26, %v1391_v35  ;;  %v1641_v18 = vadd.f32 %v1640_v30, %v1639_v32  ;;  %v12584_v30 = vmax.f32 %v1121_v14, 0.0  ;;  %v12586_v26 = vmax.f32 %v1126_v57, 0.0 }
 0x1d4   : > { %v1646_v17 = vsel %vm1276_vm4, %v1506_v19, 0.0  ;;  %v1508_v37 = vmul.f32 %v12575_v59, %v12575_v59  ;;  %v1648_v14 = vsel %vm1276_vm4, %v1507_v55, 0.0  ;;  %v1400_v57 = vsel %vm1276_vm4, %v12575_v59, 0.0 }
 0x1d5   : > { %v1395_v10 = vadd.f32 %v1394_v12, %v1393_v15  ;;  %v1643_v63 = vadd.f32 %v1642_v20, %v1641_v18  ;;  %v1398_v15 = vsel %vm1276_vm4, %v12564_v40, 0.0  ;;  %v12595_v12 = vmax.f32 %v1129_v21, 0.0 }
 0x1d6   : > { %v1509_v19 = vmul.f32 %v12584_v30, %v12584_v30  ;;  %v1510_v22 = vmul.f32 %v12586_v26, %v12586_v26  ;;  %v1402_v21 = vsel %vm1276_vm4, %v12584_v30, 0.0  ;;  %v12609_v55 = vmax.f32 %v1134_v13, 0.0 }
 0x1d7   : > { %v1397_v35 = vadd.f32 %v1396_v0, %v1395_v10  ;;  %v1645_v32 = vadd.f32 %v1644_v62, %v1643_v63  ;;  %v1137_v10 = vadd.f32 %v12528_v50, %v12187_v25  ;;  %v1650_v0 = vsel %vm1276_vm4, %v1508_v37, 0.0 }
 0x1d8   : > { %v1511_v25 = vmul.f32 %v12595_v12, %v12595_v12  ;;  %v1145_v37 = vadd.f32 %v12528_v50, %v12211_v48  ;;  %v1408_v48 = vsel %vm1276_vm4, %v12609_v55, 0.0 }
 0x1d9   : > { %v1399_v18 = vadd.f32 %v1398_v15, %v1397_v35  ;;  %v1647_v20 = vadd.f32 %v1646_v17, %v1645_v32  ;;  %v1142_v35 = vadd.f32 %v12528_v50, %v12205_v4  ;;  %v1652_v15 = vsel %vm1276_vm4, %v1509_v19, 0.0 }
 0x1da   : > { %v1406_v4 = vsel %vm1276_vm4, %v12595_v12, 0.0  ;;  %v1150_v19 = vadd.f32 %v12528_v50, %v12229_v45  ;;  %v1158_v45 = vadd.f32 %v12528_v50, %v12255_v43 }
 0x1db   : > { %v1401_v63 = vadd.f32 %v1400_v57, %v1399_v18  ;;  %v1649_v62 = vadd.f32 %v1648_v14, %v1647_v20  ;;  %v1404_v18 = vsel %vm1276_vm4, %v12586_v26, 0.0  ;;  %v12618_v20 = vmax.f32 %v1137_v10, 0.0 }
 0x1dc   : > { %v1654_v57 = vsel %vm1276_vm4, %v1510_v22, 0.0 }
 0x1dd   : > { %v1651_v32 = vadd.f32 %v1650_v0, %v1649_v62  ;;  %v1403_v17 = vadd.f32 %v1402_v21, %v1401_v63  ;;  %v1512_v63 = vmul.f32 %v12609_v55, %v12609_v55  ;;  %v12627_v62 = vmax.f32 %v1142_v35, 0.0 }
 0x1de   : > { %v1656_v21 = vsel %vm1276_vm4, %v1511_v25, 0.0  ;;  %v1513_v22 = vmul.f32 %v12618_v20, %v12618_v20  ;;  %v1410_v25 = vsel %vm1276_vm4, %v12618_v20, 0.0 }
 0x1df   : > { %v1653_v13 = vadd.f32 %v1652_v15, %v1651_v32  ;;  %v1405_v14 = vadd.f32 %v1404_v18, %v1403_v17  ;;  %v12636_v32 = vmax.f32 %v1145_v37, 0.0  ;;  %v1153_v17 = vadd.f32 %v12528_v50, %v12237_v31 }
 0x1e0   : > { %v1658_v18 = vsel %vm1276_vm4, %v1512_v63, 0.0  ;;  %v1161_v31 = vadd.f32 %v12528_v50, %v12263_v46  ;;  %v1412_v43 = vsel %vm1276_vm4, %v12627_v62, 0.0 }
 0x1e1   : > { %v1655_v10 = vadd.f32 %v1654_v57, %v1653_v13  ;;  %v1407_v0 = vadd.f32 %v1406_v4, %v1405_v14  ;;  %v1514_v13 = vmul.f32 %v12627_v62, %v12627_v62  ;;  %v12647_v14 = vmax.f32 %v1150_v19, 0.0 }
 0x1e2   : > { %v1660_v4 = vsel %vm1276_vm4, %v1513_v22, 0.0  ;;  %v1515_v63 = vmul.f32 %v12636_v32, %v12636_v32  ;;  %v1166_v22 = vadd.f32 %v12528_v50, %v12281_v49 }
 0x1e3   : > { %v1657_v35 = vadd.f32 %v1656_v21, %v1655_v10  ;;  %v1409_v15 = vadd.f32 %v1408_v48, %v1407_v0  ;;  %v12656_v10 = vmax.f32 %v1153_v17, 0.0  ;;  %v12658_v48 = vmax.f32 %v1158_v45, 0.0 }
 0x1e4   : > { %v1662_v19 = vsel %vm1276_vm4, %v1514_v13, 0.0  ;;  %v1516_v46 = vmul.f32 %v12647_v14, %v12647_v14  ;;  %v1169_v17 = vadd.f32 %v12528_v50, %v12287_v38  ;;  %v1664_v45 = vsel %vm1276_vm4, %v1515_v63, 0.0 }
 0x1e5   : > { %v1659_v37 = vadd.f32 %v1658_v18, %v1657_v35  ;;  %v1411_v57 = vadd.f32 %v1410_v25, %v1409_v15  ;;  %16071 = vst [vmem:[#allocation39_spill] sm:$0xff] %v12658_v48  ;;  %v1414_v35 = vsel %vm1276_vm4, %v12636_v32, 0.0  ;;  %v12667_v25 = vmax.f32 %v1161_v31, 0.0 }
 0x1e6   : > { %v1416_v13 = vsel %vm1276_vm4, %v12647_v14, 0.0  ;;  %v1518_v49 = vmul.f32 %v12658_v48, %v12658_v48  ;;  %v1418_v31 = vsel %vm1276_vm4, %v12656_v10, 0.0  ;;  %v1174_v38 = vadd.f32 %v12528_v50, %v12304_v52 }
 0x1e7   : > { %v1661_v0 = vadd.f32 %v1660_v4, %v1659_v37  ;;  %v1413_v21 = vadd.f32 %v1412_v43, %v1411_v57  ;;  %16072 = vst [vmem:[#allocation40_spill] sm:$0xff] %v12667_v25  ;;  %v1517_v37 = vmul.f32 %v12656_v10, %v12656_v10  ;;  %v1666_v43 = vsel %vm1276_vm4, %v1516_v46, 0.0 }
 0x1e8   : > { %v1420_v46 = vsel %vm1276_vm4, %v12658_v48, 0.0  ;;  %v1422_v52 = vsel %vm1276_vm4, %v12667_v25, 0.0 }
 0x1e9   : > { %v1663_v15 = vadd.f32 %v1662_v19, %v1661_v0  ;;  %v1415_v18 = vadd.f32 %v1414_v35, %v1413_v21  ;;  %v12681_v0 = vmax.f32 %v1166_v22, 0.0  ;;  %v1519_v19 = vmul.f32 %v12667_v25, %v12667_v25 }
 0x1ea   : > { %v12687_v35 = vmax.f32 %v1169_v17, 0.0  ;;  %v12699_v17 = vmax.f32 %v1174_v38, 0.0  ;;  %v1190_v38 = vadd.f32 %v12528_v50, %v12353_v34 }
 0x1eb   : > { %v1665_v57 = vadd.f32 %v1664_v45, %v1663_v15  ;;  %v1417_v4 = vadd.f32 %v1416_v13, %v1415_v18  ;;  %16073 = vst [vmem:[#allocation41_spill] sm:$0xff] %v12681_v0  ;;  %v1668_v15 = vsel %vm1276_vm4, %v1517_v37, 0.0  ;;  %v1177_v18 = vadd.f32 %v12528_v50, %v12313_v61 }
 0x1ec   : > { %16074 = vst [vmem:[#allocation42_spill] sm:$0xff] %v12687_v35  ;;  %v1670_v13 = vsel %vm1276_vm4, %v1518_v49, 0.0  ;;  %16075 = vst [vmem:[#allocation43_spill] sm:$0xff] %v12699_v17  ;;  %v1182_v37 = vadd.f32 %v12528_v50, %v12330_v53  ;;  %v1521_v61 = vmul.f32 %v12687_v35, %v12687_v35  ;;  %v1424_v49 = vsel %vm1276_vm4, %v12681_v0, 0.0 }
 0x1ed   : > { %v1667_v63 = vadd.f32 %v1666_v43, %v1665_v57  ;;  %v1419_v21 = vadd.f32 %v1418_v31, %v1417_v4  ;;  %v1520_v57 = vmul.f32 %v12681_v0, %v12681_v0  ;;  %v1672_v31 = vsel %vm1276_vm4, %v1519_v19, 0.0 }
 0x1ee   : > { %v1426_v19 = vsel %vm1276_vm4, %v12687_v35, 0.0 }
 0x1ef   : > { %v1669_v22 = vadd.f32 %v1668_v15, %v1667_v63  ;;  %v1421_v45 = vadd.f32 %v1420_v46, %v1419_v21  ;;  %v12708_v63 = vmax.f32 %v1177_v18, 0.0  ;;  %v1185_v21 = vadd.f32 %v12528_v50, %v12336_v39 }
 0x1f0   : > { %v1674_v46 = vsel %vm1276_vm4, %v1520_v57, 0.0  ;;  %v1428_v39 = vsel %vm1276_vm4, %v12699_v17, 0.0  ;;  %v12728_v57 = vmax.f32 %v1190_v38, 0.0 }
 0x1f1   : > { %v1671_v4 = vadd.f32 %v1670_v13, %v1669_v22  ;;  %v1423_v43 = vadd.f32 %v1422_v52, %v1421_v45  ;;  %16076 = vst [vmem:[#allocation44_spill] sm:$0xff] %v12708_v63  ;;  %v1522_v22 = vmul.f32 %v12699_v17, %v12699_v17  ;;  %v12719_v45 = vmax.f32 %v1182_v37, 0.0 }
 0x1f2   : > { %v1676_v52 = vsel %vm1276_vm4, %v1521_v61, 0.0  ;;  %v1523_v34 = vmul.f32 %v12708_v63, %v12708_v63  ;;  %v12726_v50 = vmax.f32 %v1185_v21, 0.0  ;;  %v1430_v37 = vsel %vm1276_vm4, %v12708_v63, 0.0 }
 0x1f3   : > { %v1673_v15 = vadd.f32 %v1672_v31, %v1671_v4  ;;  %v1425_v53 = vadd.f32 %v1424_v49, %v1423_v43  ;;  %16077 = vst [vmem:[#allocation45_spill] sm:$0xff] %v12719_v45  ;;  %v1678_v31 = vsel %vm1276_vm4, %v1522_v22, 0.0  ;;  %v1524_v61 = vmul.f32 %v12719_v45, %v12719_v45 }
 0x1f4   : > { %v1432_v21 = vsel %vm1276_vm4, %v12719_v45, 0.0  ;;  %v1525_v38 = vmul.f32 %v12726_v50, %v12726_v50 }
 0x1f5   : > { %v1675_v18 = vadd.f32 %v1674_v46, %v1673_v15  ;;  %v1427_v13 = vadd.f32 %v1426_v19, %v1425_v53  ;;  %v1680_v53 = vsel %vm1276_vm4, %v1523_v34, 0.0  ;;  %v1526_v46 = vmul.f32 %v12728_v57, %v12728_v57 }
 0x1f7   : > { %v1677_v4 = vadd.f32 %v1676_v52, %v1675_v18  ;;  %v1429_v43 = vadd.f32 %v1428_v39, %v1427_v13  ;;  %v1682_v18 = vsel %vm1276_vm4, %v1524_v61, 0.0  ;;  %v1434_v13 = vsel %vm1276_vm4, %v12726_v50, 0.0 }
 0x1f8   : > { %v1436_v52 = vsel %vm1276_vm4, %v12728_v57, 0.0 }
 0x1f9   : > { %v1679_v49 = vadd.f32 %v1678_v31, %v1677_v4  ;;  %v1431_v15 = vadd.f32 %v1430_v37, %v1429_v43  ;;  %v1684_v4 = vsel %vm1276_vm4, %v1525_v38, 0.0  ;;  %v1686_v43 = vsel %vm1276_vm4, %v1526_v46, 0.0 }
 0x1fb   : > { %v1681_v19 = vadd.f32 %v1680_v53, %v1679_v49  ;;  %v1433_v22 = vadd.f32 %v1432_v21, %v1431_v15 }
 0x1fd   : > { %v1683_v39 = vadd.f32 %v1682_v18, %v1681_v19  ;;  %v1435_v34 = vadd.f32 %v1434_v13, %v1433_v22 }
 0x1ff   : > { %v1685_v31 = vadd.f32 %v1684_v4, %v1683_v39  ;;  %v1437_v37 = vadd.f32 %v1436_v52, %v1435_v34  ;;  %v1703_v52 = vlaneseq }
 0x201   : > { %v1438_v45 = vrot.slane %v1437_v37, 4  ;;  %v1687_v63 = vadd.f32 %v1686_v43, %v1685_v31  ;;  %v12749_v34 = vshrl.u32 %v1703_v52, 7  ;;  %v16078_v43 = vld [vmem:[#allocation4_spill] sm:$0xff] }
 0x203   : > { %v1439_v49 = vadd.f32 %v1438_v45, %v1437_v37  ;;  %v1688_v15 = vrot.slane %v1687_v63, 4  ;;  %v16079_v37 = vld [vmem:[#allocation5_spill] sm:$0xff] }
 0x205   : > { %v1440_v53 = vrot.slane %v1439_v49, 2  ;;  %v1689_v61 = vadd.f32 %v1688_v15, %v1687_v63  ;;  %v1698_v63 = vld [vmem:[%s15854_s3] sm:$0x1]  ;;  %v16080_v15 = vld [vmem:[#allocation6_spill] sm:$0xff] }
 0x207   : > { %v1441_v21 = vadd.f32 %v1440_v53, %v1439_v49  ;;  %v1690_v17 = vrot.slane %v1689_v61, 2 }
 0x209   : > { %v1442_v35 = vrot.slane %v1441_v21, 1  ;;  %v1691_v0 = vadd.f32 %v1690_v17, %v1689_v61  ;;  %v15904_v17 = vsub.s32 0, %v12749_v34  ;;  %v16081_v61 = vld [vmem:[#allocation7_spill] sm:$0xff] }
 0x20b   : > { %v1443_v25 = vadd.f32 %v1442_v35, %v1441_v21  ;;  %v1692_v48 = vrot.slane %v1691_v0, 1  ;;  %v16082_v21 = vld [vmem:[#allocation8_spill] sm:$0xff] }
 0x20d   : > { %v1445_v19 = vmul.f32 0.0015432099, %v1443_v25  ;;  %v1693_v22 = vadd.f32 %v1692_v48, %v1691_v0 }
 0x20f   : > { %v1694_v18 = vmul.f32 0.0015432099, %v1693_v22  ;;  %v1695_v38 = vmul.f32 %v1445_v19, %v1445_v19 }
 0x211   : > { %v1696_v13 = vsub.f32 %v1694_v18, %v1695_v38  ;;  %v16084_v18 = vld [vmem:[#allocation10_spill] sm:$0xff] }
 0x213   : > { %v1697_v46 = vmax.f32 %v1696_v13, 0.0  ;;  %v16085_v13 = vld [vmem:[#allocation11_spill] sm:$0xff] }
 0x215   : > { %v1699_v39 = vadd.f32 1e-05, %v1697_v46 }
 0x217   : > { %11353 = vrsqrt.f32 %v1699_v39  ;;  %v16086_v39 = vld [vmem:[#allocation12_spill] sm:$0xff] }
 0x221   : > { %v11354_v45 = vpop.eup %11353 }
 0x222   : > { %v1701_v35 = vmul.f32 %v11354_v45, %v1698_v63  ;;  %v16087_v63 = vld [vmem:[#allocation13_spill] sm:$0xff] }
 0x224   : > { %v12755_v4 = vmul.f32 %v1701_v35, %v1445_v19  ;;  %v12759_v48 = vrot.slane %v1701_v35, %v15904_v17  ;;  %v16083_v19 = vld [vmem:[#allocation9_spill] sm:$0xff]  ;;  %v16088_v35 = vld [vmem:[#allocation14_spill] sm:$0xff]  ;;  %v16099_v17 = vld [vmem:[#allocation20_spill] sm:$0xff] }
 0x226   : > { %v12763_v25 = vmul.f32 %v12759_v48, %v11989_v41  ;;  %v12767_v0 = vmul.f32 %v12759_v48, %v11983_v36  ;;  %v12771_v31 = vmul.f32 %v12759_v48, %v16078_v43  ;;  %v12775_v49 = vmul.f32 %v12759_v48, %v16079_v37  ;;  %v16089_v37 = vld [vmem:[#allocation15_spill] sm:$0xff] }
 0x227   : > { %v12779_v53 = vmul.f32 %v12759_v48, %v16080_v15  ;;  %v12783_v41 = vmul.f32 %v12759_v48, %v16081_v61  ;;  %v12787_v36 = vmul.f32 %v12759_v48, %v16082_v21  ;;  %v12791_v22 = vmul.f32 %v12759_v48, %v16083_v19  ;;  %v16091_v61 = vld [vmem:[#allocation16_spill] sm:$0xff]  ;;  %v16093_v19 = vld [vmem:[#allocation17_spill] sm:$0xff] }
 0x228   : > { %v12795_v38 = vmul.f32 %v12759_v48, %v16084_v18  ;;  %v12799_v46 = vmul.f32 %v12759_v48, %v16085_v13  ;;  %v12803_v52 = vmul.f32 %v12759_v48, %v16086_v39  ;;  %v12807_v45 = vmul.f32 %v12759_v48, %v16087_v63  ;;  %v16095_v13 = vld [vmem:[#allocation18_spill] sm:$0xff]  ;;  %v16097_v63 = vld [vmem:[#allocation19_spill] sm:$0xff] }
 0x229   : > { %v12811_v43 = vmul.f32 %v12759_v48, %v16088_v35  ;;  %v12815_v15 = vmul.f32 %v12759_v48, %v16089_v37  ;;  %v12819_v21 = vmul.f32 %v12759_v48, %v16091_v61  ;;  %v12823_v18 = vmul.f32 %v12759_v48, %v16093_v19 }
 0x22a   : > { %v12827_v39 = vmul.f32 %v12759_v48, %v16095_v13  ;;  %v12831_v35 = vmul.f32 %v12759_v48, %v16097_v63  ;;  %v12835_v37 = vmul.f32 %v12759_v48, %v16099_v17 }
 0x22b   : > { %16090 = vst [vmem:[#allocation4_spill] sm:$0xff] %v12815_v15  ;;  %16092 = vst [vmem:[#allocation5_spill] sm:$0xff] %v12819_v21  ;;  %v16101_v15 = vld [vmem:[#allocation21_spill] sm:$0xff]  ;;  %v16103_v21 = vld [vmem:[#allocation22_spill] sm:$0xff] }
 0x22c   : > { %16094 = vst [vmem:[#allocation6_spill] sm:$0xff] %v12823_v18  ;;  %16096 = vst [vmem:[#allocation7_spill] sm:$0xff] %v12827_v39  ;;  %v12839_v61 = vmul.f32 %v12759_v48, %v16101_v15  ;;  %v12843_v19 = vmul.f32 %v12759_v48, %v16103_v21  ;;  %v16105_v18 = vld [vmem:[#allocation23_spill] sm:$0xff]  ;;  %v16107_v39 = vld [vmem:[#allocation24_spill] sm:$0xff] }
 0x22d   : > { %16098 = vst [vmem:[#allocation8_spill] sm:$0xff] %v12831_v35  ;;  %16100 = vst [vmem:[#allocation9_spill] sm:$0xff] %v12835_v37  ;;  %v12847_v13 = vmul.f32 %v12759_v48, %v16105_v18  ;;  %v12851_v63 = vmul.f32 %v12759_v48, %v16107_v39  ;;  %v16109_v35 = vld [vmem:[#allocation25_spill] sm:$0xff]  ;;  %v16111_v37 = vld [vmem:[#allocation26_spill] sm:$0xff] }
 0x22e   : > { %16102 = vst [vmem:[#allocation10_spill] sm:$0xff] %v12839_v61  ;;  %16104 = vst [vmem:[#allocation11_spill] sm:$0xff] %v12843_v19  ;;  %v12855_v17 = vmul.f32 %v12759_v48, %v16109_v35  ;;  %v12859_v15 = vmul.f32 %v12759_v48, %v16111_v37  ;;  %v16113_v61 = vld [vmem:[#allocation27_spill] sm:$0xff]  ;;  %v16115_v19 = vld [vmem:[#allocation28_spill] sm:$0xff] }
 0x22f   : > { %16106 = vst [vmem:[#allocation12_spill] sm:$0xff] %v12847_v13  ;;  %16108 = vst [vmem:[#allocation13_spill] sm:$0xff] %v12851_v63  ;;  %v12863_v21 = vmul.f32 %v12759_v48, %v16113_v61  ;;  %v12867_v18 = vmul.f32 %v12759_v48, %v16115_v19  ;;  %v16117_v13 = vld [vmem:[#allocation29_spill] sm:$0xff]  ;;  %v16119_v63 = vld [vmem:[#allocation30_spill] sm:$0xff] }
 0x230   : > { %16110 = vst [vmem:[#allocation14_spill] sm:$0xff] %v12855_v17  ;;  %16112 = vst [vmem:[#allocation15_spill] sm:$0xff] %v12859_v15  ;;  %v12871_v39 = vmul.f32 %v12759_v48, %v16117_v13  ;;  %v12875_v35 = vmul.f32 %v12759_v48, %v16119_v63  ;;  %v16121_v17 = vld [vmem:[#allocation31_spill] sm:$0xff]  ;;  %v16123_v15 = vld [vmem:[#allocation32_spill] sm:$0xff] }
 0x231   : > { %16114 = vst [vmem:[#allocation16_spill] sm:$0xff] %v12863_v21  ;;  %16116 = vst [vmem:[#allocation17_spill] sm:$0xff] %v12867_v18  ;;  %v12879_v37 = vmul.f32 %v12759_v48, %v16121_v17  ;;  %v12883_v61 = vmul.f32 %v12759_v48, %v16123_v15  ;;  %v16125_v21 = vld [vmem:[#allocation33_spill] sm:$0xff]  ;;  %v16126_v18 = vld [vmem:[#allocation34_spill] sm:$0xff] }
 0x232   : > { %16118 = vst [vmem:[#allocation18_spill] sm:$0xff] %v12871_v39  ;;  %16120 = vst [vmem:[#allocation19_spill] sm:$0xff] %v12875_v35  ;;  %v12887_v19 = vmul.f32 %v12759_v48, %v16125_v21  ;;  %v12891_v13 = vmul.f32 %v12759_v48, %v16126_v18  ;;  %v16127_v39 = vld [vmem:[#allocation35_spill] sm:$0xff]  ;;  %v16128_v35 = vld [vmem:[#allocation36_spill] sm:$0xff]  ;;  %v12911_v18 = vmul.f32 %v12759_v48, %v12348_v24 }
 0x233   : > { %16122 = vst [vmem:[#allocation20_spill] sm:$0xff] %v12879_v37  ;;  %16124 = vst [vmem:[#allocation21_spill] sm:$0xff] %v12883_v61  ;;  %v12895_v63 = vmul.f32 %v12759_v48, %v16127_v39  ;;  %v12899_v17 = vmul.f32 %v12759_v48, %v16128_v35  ;;  %v16129_v37 = vld [vmem:[#allocation37_spill] sm:$0xff]  ;;  %v16130_v61 = vld [vmem:[#allocation38_spill] sm:$0xff]  ;;  %v12915_v39 = vmul.f32 %v12759_v48, %v12361_v58 }
 0x234   : > { %v12903_v15 = vmul.f32 %v12759_v48, %v16129_v37  ;;  %v12907_v21 = vmul.f32 %v12759_v48, %v16130_v61  ;;  %v12919_v35 = vmul.f32 %v12759_v48, %v12369_v28  ;;  %v12923_v37 = vmul.f32 %v12759_v48, %v12386_v9 }
 0x235   : > { %v12927_v61 = vmul.f32 %v12759_v48, %v12397_v1  ;;  %v12931_v24 = vmul.f32 %v12759_v48, %v12381_v47  ;;  %v12935_v58 = vmul.f32 %v12759_v48, %v12389_v51  ;;  %v12939_v28 = vmul.f32 %v12759_v48, %v12401_v44 }
 0x236   : > { %v12943_v9 = vmul.f32 %v12759_v48, %v12414_v16  ;;  %v12947_v1 = vmul.f32 %v12759_v48, %v12426_v6  ;;  %v12951_v47 = vmul.f32 %v12759_v48, %v12435_v29  ;;  %v12955_v51 = vmul.f32 %v12759_v48, %v12437_v5 }
 0x237   : > { %v12959_v44 = vmul.f32 %v12759_v48, %v12446_v33  ;;  %v12963_v16 = vmul.f32 %v12759_v48, %v12460_v8  ;;  %v12967_v6 = vmul.f32 %v12759_v48, %v12469_v7  ;;  %v12971_v29 = vmul.f32 %v12759_v48, %v12478_v23 }
 0x238   : > { %v12975_v5 = vmul.f32 %v12759_v48, %v12487_v60  ;;  %v12979_v33 = vmul.f32 %v12759_v48, %v12498_v42  ;;  %v12983_v8 = vmul.f32 %v12759_v48, %v12507_v3  ;;  %v12987_v7 = vmul.f32 %v12759_v48, %v12509_v11  ;;  %v1789_v42 = vld [vmem:[%s15855_s4] sm:$0x1] }
 0x239   : > { %v12991_v23 = vmul.f32 %v12759_v48, %v12518_v54  ;;  %v12995_v60 = vmul.f32 %v12759_v48, %v12537_v56  ;;  %v13002_v3 = vmul.f32 %v12759_v48, %v12546_v27  ;;  %v13006_v11 = vmul.f32 %v12759_v48, %v12555_v2 }
 0x23a   : > { %v13010_v54 = vmul.f32 %v12759_v48, %v12564_v40  ;;  %v13014_v56 = vmul.f32 %v12759_v48, %v12575_v59  ;;  %v13022_v27 = vmul.f32 %v12759_v48, %v12586_v26  ;;  %v13026_v2 = vmul.f32 %v12759_v48, %v12595_v12 }
 0x23b   : > { %16131 = vst [vmem:[#allocation22_spill] sm:$0xff] %v12995_v60  ;;  %v13018_v60 = vmul.f32 %v12759_v48, %v12584_v30  ;;  %v13030_v40 = vmul.f32 %v12759_v48, %v12726_v50  ;;  %v13034_v59 = vmul.f32 %v12759_v48, %v12609_v55  ;;  %v13038_v30 = vmul.f32 %v12759_v48, %v12618_v20 }
 0x23c   : > { %16132 = vst [vmem:[#allocation23_spill] sm:$0xff] %v13022_v27  ;;  %v13042_v26 = vmul.f32 %v12759_v48, %v12728_v57  ;;  %v1791_v27 = vsub.f32 %v1789_v42, %v12755_v4  ;;  %v13047_v12 = vmul.f32 %v12759_v48, %v12627_v62  ;;  %v13051_v50 = vmul.f32 %v12759_v48, %v12636_v32  ;;  %v16137_v57 = vld [vmem:[#allocation39_spill] sm:$0xff]  ;;  %v16139_v4 = vld [vmem:[#allocation40_spill] sm:$0xff]  ;;  %v16141_v42 = vld [vmem:[#allocation41_spill] sm:$0xff] }
 0x23d   : > { %16133 = vst [vmem:[#allocation24_spill] sm:$0xff] %v13030_v40  ;;  %v13055_v55 = vmul.f32 %v12759_v48, %v12647_v14  ;;  %v13059_v20 = vmul.f32 %v12759_v48, %v12656_v10  ;;  %v13067_v62 = vmul.f32 %v12759_v48, %v16139_v4  ;;  %v13071_v32 = vmul.f32 %v12759_v48, %v16141_v42 }
 0x23e   : > { %16134 = vst [vmem:[#allocation25_spill] sm:$0xff] %v13042_v26  ;;  %v13063_v26 = vmul.f32 %v12759_v48, %v16137_v57  ;;  %v16142_v40 = vsub.s32 0, %v12749_v34 }
 0x23f   : > { %16135 = vst [vmem:[#allocation26_spill] sm:$0xff] %v13055_v55  ;;  %16136 = vst [vmem:[#allocation27_spill] sm:$0xff] %v13059_v20  ;;  %v16143_v55 = vld [vmem:[#allocation42_spill] sm:$0xff]  ;;  %v16144_v20 = vld [vmem:[#allocation43_spill] sm:$0xff] }
 0x240   : > { %16138 = vst [vmem:[#allocation28_spill] sm:$0xff] %v13063_v26  ;;  %16140 = vst [vmem:[#allocation29_spill] sm:$0xff] %v13067_v62  ;;  %v13075_v14 = vrot.slane %v1791_v27, %v16142_v40  ;;  %v13079_v10 = vmul.f32 %v12759_v48, %v16143_v55  ;;  %v13083_v57 = vmul.f32 %v12759_v48, %v16144_v20  ;;  %v16145_v26 = vld [vmem:[#allocation44_spill] sm:$0xff]  ;;  %v16146_v62 = vld [vmem:[#allocation45_spill] sm:$0xff] }
 0x241   : > { %v13087_v4 = vmul.f32 %v12759_v48, %v16145_v26  ;;  %v13091_v42 = vmul.f32 %v12759_v48, %v16146_v62  ;;  %v16150_v62 = vld [vmem:[#allocation7_spill] sm:$0xff] }
 0x242   : > { %v1798_v34 = vadd.f32 %v13075_v14, %v12763_v25  ;;  %v1799_v27 = vadd.f32 %v13075_v14, %v12767_v0  ;;  %v1800_v40 = vadd.f32 %v13075_v14, %v12771_v31  ;;  %v1801_v55 = vadd.f32 %v13075_v14, %v12775_v49 }
 0x243   : > { %v1802_v26 = vadd.f32 %v13075_v14, %v12779_v53  ;;  %v1803_v20 = vadd.f32 %v13075_v14, %v12783_v41  ;;  %v1804_v48 = vadd.f32 %v13075_v14, %v12787_v36  ;;  %v1805_v25 = vadd.f32 %v13075_v14, %v12791_v22  ;;  %v16147_v36 = vld [vmem:[#allocation4_spill] sm:$0xff] }
 0x244   : > { %v1806_v0 = vadd.f32 %v13075_v14, %v12795_v38  ;;  %v1807_v31 = vadd.f32 %v13075_v14, %v12799_v46  ;;  %v1808_v49 = vadd.f32 %v13075_v14, %v12803_v52  ;;  %v1809_v53 = vadd.f32 %v13075_v14, %v12807_v45  ;;  %1879 = vst.msk [vmem:[#allocation2] sm:$0xff] %vm1276_vm4, %v1798_v34  ;;  %v16148_v38 = vld [vmem:[#allocation5_spill] sm:$0xff]  ;;  %v16149_v52 = vld [vmem:[#allocation6_spill] sm:$0xff]  ;;  %v16151_v34 = vld [vmem:[#allocation8_spill] sm:$0xff] }
 0x245   : > { %1880 = vst.msk [vmem:[#allocation2 + $0x8] sm:$0xff] %vm1276_vm4, %v1799_v27  ;;  %1881 = vst.msk [vmem:[#allocation2 + $0x10] sm:$0xff] %vm1276_vm4, %v1800_v40  ;;  %v1810_v41 = vadd.f32 %v13075_v14, %v12811_v43  ;;  %v1811_v22 = vadd.f32 %v13075_v14, %v16147_v36  ;;  %v1812_v46 = vadd.f32 %v13075_v14, %v16148_v38  ;;  %v16152_v40 = vld [vmem:[#allocation9_spill] sm:$0xff]  ;;  %v16153_v36 = vld [vmem:[#allocation10_spill] sm:$0xff] }
 0x246   : > { %1882 = vst.msk [vmem:[#allocation2 + $0x18] sm:$0xff] %vm1276_vm4, %v1801_v55  ;;  %v1813_v45 = vadd.f32 %v13075_v14, %v16149_v52  ;;  %1883 = vst.msk [vmem:[#allocation2 + $0x20] sm:$0xff] %vm1276_vm4, %v1802_v26  ;;  %v1814_v43 = vadd.f32 %v13075_v14, %v16150_v62  ;;  %v1815_v27 = vadd.f32 %v13075_v14, %v16151_v34  ;;  %v16154_v26 = vld [vmem:[#allocation11_spill] sm:$0xff]  ;;  %v16156_v52 = vld [vmem:[#allocation13_spill] sm:$0xff] }
 0x247   : > { %1884 = vst.msk [vmem:[#allocation2 + $0x28] sm:$0xff] %vm1276_vm4, %v1803_v20  ;;  %1885 = vst.msk [vmem:[#allocation2 + $0x30] sm:$0xff] %vm1276_vm4, %v1804_v48  ;;  %v1816_v55 = vadd.f32 %v13075_v14, %v16152_v40  ;;  %v1817_v38 = vadd.f32 %v13075_v14, %v16153_v36  ;;  %v1818_v20 = vadd.f32 %v13075_v14, %v16154_v26  ;;  %v16155_v48 = vld [vmem:[#allocation12_spill] sm:$0xff]  ;;  %v16157_v34 = vld [vmem:[#allocation14_spill] sm:$0xff] }
 0x248   : > { %1886 = vst.msk [vmem:[#allocation2 + $0x38] sm:$0xff] %vm1276_vm4, %v1805_v25  ;;  %1887 = vst.msk [vmem:[#allocation2 + $0x40] sm:$0xff] %vm1276_vm4, %v1806_v0  ;;  %v1819_v25 = vadd.f32 %v13075_v14, %v16155_v48  ;;  %v1820_v62 = vadd.f32 %v13075_v14, %v16156_v52  ;;  %v1821_v40 = vadd.f32 %v13075_v14, %v16157_v34  ;;  %v16158_v0 = vld [vmem:[#allocation15_spill] sm:$0xff]  ;;  %v16160_v36 = vld [vmem:[#allocation17_spill] sm:$0xff] }
 0x249   : > { %1888 = vst.msk [vmem:[#allocation2 + $0x48] sm:$0xff] %vm1276_vm4, %v1807_v31  ;;  %1889 = vst.msk [vmem:[#allocation2 + $0x50] sm:$0xff] %vm1276_vm4, %v1808_v49  ;;  %v1822_v31 = vadd.f32 %v13075_v14, %v16158_v0  ;;  %v16159_v49 = vld [vmem:[#allocation16_spill] sm:$0xff]  ;;  %v1824_v26 = vadd.f32 %v13075_v14, %v16160_v36  ;;  %v16161_v48 = vld [vmem:[#allocation18_spill] sm:$0xff] }
 0x24a   : > { %1890 = vst.msk [vmem:[#allocation2 + $0x58] sm:$0xff] %vm1276_vm4, %v1809_v53  ;;  %1891 = vst.msk [vmem:[#allocation2 + $0x60] sm:$0xff] %vm1276_vm4, %v1810_v41  ;;  %v1823_v53 = vadd.f32 %v13075_v14, %v16159_v49  ;;  %v1825_v52 = vadd.f32 %v13075_v14, %v16161_v48  ;;  %v16162_v41 = vld [vmem:[#allocation19_spill] sm:$0xff]  ;;  %v16164_v34 = vld [vmem:[#allocation21_spill] sm:$0xff]  ;;  %v1829_v49 = vadd.f32 %v13075_v14, %v12887_v19 }
 0x24b   : > { %1892 = vst.msk [vmem:[#allocation2 + $0x68] sm:$0xff] %vm1276_vm4, %v1811_v22  ;;  %1893 = vst.msk [vmem:[#allocation2 + $0x70] sm:$0xff] %vm1276_vm4, %v1812_v46  ;;  %v1826_v22 = vadd.f32 %v13075_v14, %v16162_v41  ;;  %v16163_v46 = vld [vmem:[#allocation20_spill] sm:$0xff]  ;;  %v1828_v0 = vadd.f32 %v13075_v14, %v16164_v34  ;;  %v1833_v19 = vadd.f32 %v13075_v14, %v12903_v15  ;;  %v16170_v36 = vld [vmem:[#allocation29_spill] sm:$0xff] }
 0x24c   : > { %1894 = vst.msk [vmem:[#allocation2 + $0x78] sm:$0xff] %vm1276_vm4, %v1813_v45  ;;  %1895 = vst.msk [vmem:[#allocation2 + $0x80] sm:$0xff] %vm1276_vm4, %v1814_v43  ;;  %v1827_v45 = vadd.f32 %v13075_v14, %v16163_v46  ;;  %v1830_v43 = vadd.f32 %v13075_v14, %v12891_v13  ;;  %v1834_v13 = vadd.f32 %v13075_v14, %v12907_v21  ;;  %v16172_v46 = vld [vmem:[#allocation25_spill] sm:$0xff] }
 0x24d   : > { %1896 = vst.msk [vmem:[#allocation2 + $0x88] sm:$0xff] %vm1276_vm4, %v1815_v27  ;;  %1897 = vst.msk [vmem:[#allocation2 + $0x90] sm:$0xff] %vm1276_vm4, %v1816_v55  ;;  %v1831_v27 = vadd.f32 %v13075_v14, %v12895_v63  ;;  %v1832_v55 = vadd.f32 %v13075_v14, %v12899_v17  ;;  %v1835_v63 = vadd.f32 %v13075_v14, %v12911_v18 }
 0x24e   : > { %1898 = vst.msk [vmem:[#allocation2 + $0x98] sm:$0xff] %vm1276_vm4, %v1817_v38  ;;  %1899 = vst.msk [vmem:[#allocation2 + $0xa0] sm:$0xff] %vm1276_vm4, %v1818_v20  ;;  %v1836_v17 = vadd.f32 %v13075_v14, %v12915_v39  ;;  %v1837_v15 = vadd.f32 %v13075_v14, %v12919_v35  ;;  %v1838_v21 = vadd.f32 %v13075_v14, %v12923_v37  ;;  %v16165_v38 = vld [vmem:[#allocation22_spill] sm:$0xff] }
 0x24f   : > { %1900 = vst.msk [vmem:[#allocation2 + $0xa8] sm:$0xff] %vm1276_vm4, %v1819_v25  ;;  %1901 = vst.msk [vmem:[#allocation2 + $0xb0] sm:$0xff] %vm1276_vm4, %v1820_v62  ;;  %v1839_v18 = vadd.f32 %v13075_v14, %v12927_v61  ;;  %v1840_v39 = vadd.f32 %v13075_v14, %v12931_v24  ;;  %v1841_v35 = vadd.f32 %v13075_v14, %v12935_v58  ;;  %v16166_v25 = vld [vmem:[#allocation23_spill] sm:$0xff] }
 0x250   : > { %1902 = vst.msk [vmem:[#allocation2 + $0xb8] sm:$0xff] %vm1276_vm4, %v1821_v40  ;;  %1903 = vst.msk [vmem:[#allocation2 + $0xc0] sm:$0xff] %vm1276_vm4, %v1822_v31  ;;  %v1842_v37 = vadd.f32 %v13075_v14, %v12939_v28  ;;  %v1843_v61 = vadd.f32 %v13075_v14, %v12943_v9  ;;  %v1844_v24 = vadd.f32 %v13075_v14, %v12947_v1  ;;  %v16167_v40 = vld [vmem:[#allocation26_spill] sm:$0xff]  ;;  %v16168_v31 = vld [vmem:[#allocation27_spill] sm:$0xff] }
 0x251   : > { %1904 = vst.msk [vmem:[#allocation2 + $0xc8] sm:$0xff] %vm1276_vm4, %v1823_v53  ;;  %1905 = vst.msk [vmem:[#allocation2 + $0xd0] sm:$0xff] %vm1276_vm4, %v1824_v26  ;;  %v1845_v58 = vadd.f32 %v13075_v14, %v12951_v47  ;;  %v1846_v28 = vadd.f32 %v13075_v14, %v12955_v51  ;;  %v1847_v9 = vadd.f32 %v13075_v14, %v12959_v44  ;;  %v16169_v53 = vld [vmem:[#allocation28_spill] sm:$0xff] }
 0x252   : > { %1906 = vst.msk [vmem:[#allocation2 + $0xd8] sm:$0xff] %vm1276_vm4, %v1825_v52  ;;  %1907 = vst.msk [vmem:[#allocation2 + $0xe0] sm:$0xff] %vm1276_vm4, %v1826_v22  ;;  %v1848_v1 = vadd.f32 %v13075_v14, %v12963_v16  ;;  %v1849_v47 = vadd.f32 %v13075_v14, %v12967_v6  ;;  %v1850_v51 = vadd.f32 %v13075_v14, %v12971_v29  ;;  %v16171_v22 = vld [vmem:[#allocation24_spill] sm:$0xff] }
 0x253   : > { %1908 = vst.msk [vmem:[#allocation2 + $0xe8] sm:$0xff] %vm1276_vm4, %v1827_v45  ;;  %1909 = vst.msk [vmem:[#allocation2 + $0xf0] sm:$0xff] %vm1276_vm4, %v1828_v0  ;;  %v1851_v44 = vadd.f32 %v13075_v14, %v12975_v5  ;;  %v1852_v16 = vadd.f32 %v13075_v14, %v12979_v33  ;;  %v1853_v6 = vadd.f32 %v13075_v14, %v12983_v8 }
 0x254   : > { %1910 = vst.msk [vmem:[#allocation2 + $0xf8] sm:$0xff] %vm1276_vm4, %v1829_v49  ;;  %1911 = vst.msk [vmem:[#allocation2 + $0x100] sm:$0xff] %vm1276_vm4, %v1830_v43  ;;  %v1854_v29 = vadd.f32 %v13075_v14, %v12987_v7  ;;  %v1855_v5 = vadd.f32 %v13075_v14, %v12991_v23  ;;  %v1856_v33 = vadd.f32 %v13075_v14, %v16165_v38 }
 0x255   : > { %1912 = vst.msk [vmem:[#allocation2 + $0x108] sm:$0xff] %vm1276_vm4, %v1831_v27  ;;  %1913 = vst.msk [vmem:[#allocation2 + $0x110] sm:$0xff] %vm1276_vm4, %v1832_v55  ;;  %v1857_v8 = vadd.f32 %v13075_v14, %v13002_v3  ;;  %v1858_v7 = vadd.f32 %v13075_v14, %v13006_v11  ;;  %v1859_v23 = vadd.f32 %v13075_v14, %v13010_v54 }
 0x256   : > { %1914 = vst.msk [vmem:[#allocation2 + $0x118] sm:$0xff] %vm1276_vm4, %v1833_v19  ;;  %1915 = vst.msk [vmem:[#allocation2 + $0x120] sm:$0xff] %vm1276_vm4, %v1834_v13  ;;  %v1860_v20 = vadd.f32 %v13075_v14, %v13014_v56  ;;  %v1861_v3 = vadd.f32 %v13075_v14, %v13018_v60  ;;  %v1862_v11 = vadd.f32 %v13075_v14, %v16166_v25 }
 0x257   : > { %1916 = vst.msk [vmem:[#allocation2 + $0x128] sm:$0xff] %vm1276_vm4, %v1835_v63  ;;  %1917 = vst.msk [vmem:[#allocation2 + $0x130] sm:$0xff] %vm1276_vm4, %v1836_v17  ;;  %v1863_v54 = vadd.f32 %v13075_v14, %v13026_v2  ;;  %v1864_v56 = vadd.f32 %v13075_v14, %v13034_v59  ;;  %v1865_v60 = vadd.f32 %v13075_v14, %v13038_v30 }
 0x258   : > { %1918 = vst.msk [vmem:[#allocation2 + $0x138] sm:$0xff] %vm1276_vm4, %v1837_v15  ;;  %1919 = vst.msk [vmem:[#allocation2 + $0x140] sm:$0xff] %vm1276_vm4, %v1838_v21  ;;  %v1866_v62 = vadd.f32 %v13075_v14, %v13047_v12  ;;  %v1867_v2 = vadd.f32 %v13075_v14, %v13051_v50  ;;  %v1868_v59 = vadd.f32 %v13075_v14, %v16167_v40 }
 0x259   : > { %1920 = vst.msk [vmem:[#allocation2 + $0x148] sm:$0xff] %vm1276_vm4, %v1839_v18  ;;  %1921 = vst.msk [vmem:[#allocation2 + $0x150] sm:$0xff] %vm1276_vm4, %v1840_v39  ;;  %v1869_v30 = vadd.f32 %v13075_v14, %v16168_v31  ;;  %v1870_v12 = vadd.f32 %v13075_v14, %v16169_v53  ;;  %v1871_v50 = vadd.f32 %v13075_v14, %v16170_v36 }
 0x25a   : > { %1922 = vst.msk [vmem:[#allocation2 + $0x158] sm:$0xff] %vm1276_vm4, %v1841_v35  ;;  %1923 = vst.msk [vmem:[#allocation2 + $0x160] sm:$0xff] %vm1276_vm4, %v1842_v37  ;;  %v1872_v26 = vadd.f32 %v13075_v14, %v13071_v32  ;;  %v1873_v48 = vadd.f32 %v13075_v14, %v13079_v10  ;;  %v1874_v52 = vadd.f32 %v13075_v14, %v13083_v57 }
 0x25b   : > { %1924 = vst.msk [vmem:[#allocation2 + $0x168] sm:$0xff] %vm1276_vm4, %v1843_v61  ;;  %1925 = vst.msk [vmem:[#allocation2 + $0x170] sm:$0xff] %vm1276_vm4, %v1844_v24  ;;  %v1875_v41 = vadd.f32 %v13075_v14, %v13087_v4  ;;  %v1876_v32 = vadd.f32 %v13075_v14, %v13091_v42  ;;  %v1877_v10 = vadd.f32 %v13075_v14, %v16171_v22 }
 0x25c   : > { %1926 = vst.msk [vmem:[#allocation2 + $0x178] sm:$0xff] %vm1276_vm4, %v1845_v58  ;;  %1927 = vst.msk [vmem:[#allocation2 + $0x180] sm:$0xff] %vm1276_vm4, %v1846_v28  ;;  %v1878_v57 = vadd.f32 %v13075_v14, %v16172_v46 }
 0x25d   : > { %1928 = vst.msk [vmem:[#allocation2 + $0x188] sm:$0xff] %vm1276_vm4, %v1847_v9  ;;  %1929 = vst.msk [vmem:[#allocation2 + $0x190] sm:$0xff] %vm1276_vm4, %v1848_v1 }
 0x25e   : > { %1930 = vst.msk [vmem:[#allocation2 + $0x198] sm:$0xff] %vm1276_vm4, %v1849_v47  ;;  %1931 = vst.msk [vmem:[#allocation2 + $0x1a0] sm:$0xff] %vm1276_vm4, %v1850_v51 }
 0x25f   : > { %1932 = vst.msk [vmem:[#allocation2 + $0x1a8] sm:$0xff] %vm1276_vm4, %v1851_v44  ;;  %1933 = vst.msk [vmem:[#allocation2 + $0x1b0] sm:$0xff] %vm1276_vm4, %v1852_v16 }
 0x260   : > { %1934 = vst.msk [vmem:[#allocation2 + $0x1b8] sm:$0xff] %vm1276_vm4, %v1853_v6  ;;  %1935 = vst.msk [vmem:[#allocation2 + $0x1c0] sm:$0xff] %vm1276_vm4, %v1854_v29 }
 0x261   : > { %1936 = vst.msk [vmem:[#allocation2 + $0x1c8] sm:$0xff] %vm1276_vm4, %v1855_v5  ;;  %1937 = vst.msk [vmem:[#allocation2 + $0x1d0] sm:$0xff] %vm1276_vm4, %v1856_v33 }
 0x262   : > { %1938 = vst.msk [vmem:[#allocation2 + $0x1d8] sm:$0xff] %vm1276_vm4, %v1857_v8  ;;  %1939 = vst.msk [vmem:[#allocation2 + $0x1e0] sm:$0xff] %vm1276_vm4, %v1858_v7 }
 0x263   : > { %1940 = vst.msk [vmem:[#allocation2 + $0x1e8] sm:$0xff] %vm1276_vm4, %v1859_v23  ;;  %1941 = vst.msk [vmem:[#allocation2 + $0x1f0] sm:$0xff] %vm1276_vm4, %v1860_v20 }
 0x264   : > { %1942 = vst.msk [vmem:[#allocation2 + $0x1f8] sm:$0xff] %vm1276_vm4, %v1861_v3  ;;  %1943 = vst.msk [vmem:[#allocation2 + $0x200] sm:$0xff] %vm1276_vm4, %v1862_v11 }
 0x265   : > { %1944 = vst.msk [vmem:[#allocation2 + $0x208] sm:$0xff] %vm1276_vm4, %v1863_v54  ;;  %1945 = vst.msk [vmem:[#allocation2 + $0x210] sm:$0xff] %vm1276_vm4, %v1864_v56 }
 0x266   : > { %1946 = vst.msk [vmem:[#allocation2 + $0x218] sm:$0xff] %vm1276_vm4, %v1865_v60  ;;  %1947 = vst.msk [vmem:[#allocation2 + $0x220] sm:$0xff] %vm1276_vm4, %v1866_v62 }
 0x267   : > { %1948 = vst.msk [vmem:[#allocation2 + $0x228] sm:$0xff] %vm1276_vm4, %v1867_v2  ;;  %1949 = vst.msk [vmem:[#allocation2 + $0x230] sm:$0xff] %vm1276_vm4, %v1868_v59 }
 0x268   : > { %1950 = vst.msk [vmem:[#allocation2 + $0x238] sm:$0xff] %vm1276_vm4, %v1869_v30  ;;  %1951 = vst.msk [vmem:[#allocation2 + $0x240] sm:$0xff] %vm1276_vm4, %v1870_v12 }
 0x269   : > { %1952 = vst.msk [vmem:[#allocation2 + $0x248] sm:$0xff] %vm1276_vm4, %v1871_v50  ;;  %1953 = vst.msk [vmem:[#allocation2 + $0x250] sm:$0xff] %vm1276_vm4, %v1872_v26 }
 0x26a   : > { %1954 = vst.msk [vmem:[#allocation2 + $0x258] sm:$0xff] %vm1276_vm4, %v1873_v48  ;;  %1955 = vst.msk [vmem:[#allocation2 + $0x260] sm:$0xff] %vm1276_vm4, %v1874_v52 }
 0x26b   : > { %1956 = vst.msk [vmem:[#allocation2 + $0x268] sm:$0xff] %vm1276_vm4, %v1875_v41  ;;  %1957 = vst.msk [vmem:[#allocation2 + $0x270] sm:$0xff] %vm1276_vm4, %v1876_v32 }
 0x26c   : > { %1958 = vst.msk [vmem:[#allocation2 + $0x278] sm:$0xff] %vm1276_vm4, %v1877_v10  ;;  %1959 = vst.msk [vmem:[#allocation2 + $0x280] sm:$0xff] %vm1276_vm4, %v1878_v57 }
 0x26d PF: > { %v11356_v14 = vld [vmem:[%s11566_s19 + $0x44] ss:$8 sps:$4 sm:$0xff]   ;;  %v11358_v4 = vld [vmem:[%s11566_s19 + $0x40] ss:$8 sps:$4 sm:$0xff]   ;;  %v11493_v42 = vmov 0   ;;  %s2046_s24 = smul.u32 18, %s11557_s14 }
 0x26e   : > { %2237 = vmatprep.mubr.bf16.mxu0 %v11493_v42  ;;  %5267 = vmatprep.mubr.bf16.mxu1 %v11493_v42  ;;  %v11359_v45 = vld [vmem:[%s11566_s19 + $0x54] ss:$8 sps:$4 sm:$0xff]   ;;  %v11361_v34 = vld [vmem:[%s11566_s19 + $0x50] ss:$8 sps:$4 sm:$0xff]   ;;  %v11362_v0 = vld [vmem:[%s11566_s19 + $0x64] ss:$8 sps:$4 sm:$0xff]  }
 0x26f   : > { %2205 = vmatprep.subr.bf16.mxu0 %v11356_v14  ;;  %5235 = vmatprep.subr.bf16.mxu1 %v11356_v14  ;;  %v11364_v49 = vld [vmem:[%s11566_s19 + $0x60] ss:$8 sps:$4 sm:$0xff]   ;;  %v11365_v43 = vld [vmem:[%s11566_s19 + $0x74] ss:$8 sps:$4 sm:$0xff]   ;;  %v11367_v27 = vld [vmem:[%s11566_s19 + $0x70] ss:$8 sps:$4 sm:$0xff]  }
 0x270   : > { %2206 = vmatpush1.bf16.msra.mxu0 %v11358_v4  ;;  %5236 = vmatpush1.bf16.msra.mxu1 %v11358_v4  ;;  %s13347_s25 = scalar_lea.vmem [#allocation2], %s2046_s24  ;;  %v11370_v17 = vld [vmem:[%s11566_s19 + $0x4] ss:$8 sps:$4 sm:$0xff]   ;;  %vm2171_vm5 = vcmask 523264   ;;  %v11368_v18 = vld [vmem:[%s11566_s19] ss:$8 sps:$4 sm:$0xff]  }
 0x271   : > { %2207 = vmatprep.subr.bf16.mxu0 %v11359_v45  ;;  %5237 = vmatprep.subr.bf16.mxu1 %v11359_v45  ;;  %v11373_v39 = vld [vmem:[%s11566_s19 + $0x14] ss:$8 sps:$4 sm:$0xff]   ;;  %v11371_v58 = vld [vmem:[%s11566_s19 + $0x10] ss:$8 sps:$4 sm:$0xff]   ;;  %v11376_v28 = vld [vmem:[%s11566_s19 + $0x24] ss:$8 sps:$4 sm:$0xff]  }
 0x272   : > { %v11374_v47 = vld [vmem:[%s11566_s19 + $0x20] ss:$8 sps:$4 sm:$0xff]   ;;  %v11379_v51 = vld [vmem:[%s11566_s19 + $0x34] ss:$8 sps:$4 sm:$0xff]   ;;  %v11377_v5 = vld [vmem:[%s11566_s19 + $0x30] ss:$8 sps:$4 sm:$0xff]  }
 0x273   : > { %v9398_v55 = vld [vmem:[%s13347_s25 + $0x1] sm:$0xff]  ;;  %v9399_v19 = vld [vmem:[%s13347_s25 + $0x9] sm:$0xff]  ;;  %v9400_v35 = vld [vmem:[%s13347_s25 + $0x11] sm:$0xff]  ;;  %p10321_p5 = scmp.ne.s32.totalorder %s11557_s14, 9 }
 0x274   : > { %2208 = vmatpush1.bf16.msra.mxu0 %v11361_v34  ;;  %5238 = vmatpush1.bf16.msra.mxu1 %v11361_v34  ;;  %v9870_v13 = vld [vmem:[%s13347_s25 + $0x145] sm:$0xff]  ;;  %v9871_v63 = vld [vmem:[%s13347_s25 + $0x14d] sm:$0xff]  ;;  %v2111_v15 = vpack.c.bf16 %v9399_v19, %v9398_v55  ;;  %v9401_v37 = vld [vmem:[%s13347_s25 + $0x19] sm:$0xff] }
 0x275   : > { %2209 = vmatprep.subr.bf16.mxu0 %v11362_v0  ;;  %5239 = vmatprep.subr.bf16.mxu1 %v11362_v0  ;;  %v5143_v21 = vpack.c.bf16 %v9871_v63, %v9870_v13  ;;  %v9872_v61 = vld [vmem:[%s13347_s25 + $0x155] sm:$0xff]  ;;  %v9873_v24 = vld [vmem:[%s13347_s25 + $0x15d] sm:$0xff]  ;;  %v2112_v9 = vpack.c.bf16 %v9401_v37, %v9400_v35  ;;  %v9403_v16 = vld [vmem:[%s13347_s25 + $0x29] sm:$0xff] }
 0x276   : > { %v5144_v1 = vpack.c.bf16 %v9873_v24, %v9872_v61  ;;  %v9402_v44 = vld [vmem:[%s13347_s25 + $0x21] sm:$0xff]  ;;  %v9875_v29 = vld [vmem:[%s13347_s25 + $0x16d] sm:$0xff]  ;;  %v9405_v23 = vld [vmem:[%s13347_s25 + $0x39] sm:$0xff] }
 0x277   : > { %v9874_v6 = vld [vmem:[%s13347_s25 + $0x165] sm:$0xff]  ;;  %v2113_v33 = vpack.c.bf16 %v9403_v16, %v9402_v44  ;;  %v9404_v7 = vld [vmem:[%s13347_s25 + $0x31] sm:$0xff]  ;;  %v9877_v3 = vld [vmem:[%s13347_s25 + $0x17d] sm:$0xff] }
 0x278   : > { %2210 = vmatpush1.bf16.msra.mxu0 %v11364_v49  ;;  %5240 = vmatpush1.bf16.msra.mxu1 %v11364_v49  ;;  %v11382_v38 = vld [vmem:[%s11566_s19 + $0x84] ss:$8 sps:$4 sm:$0xff]   ;;  %v5145_v8 = vpack.c.bf16 %v9875_v29, %v9874_v6  ;;  %v9876_v20 = vld [vmem:[%s13347_s25 + $0x175] sm:$0xff]  ;;  %v2114_v25 = vpack.c.bf16 %v9405_v23, %v9404_v7 }
 0x279   : > { %2211 = vmatprep.subr.bf16.mxu0 %v11365_v43  ;;  %5241 = vmatprep.subr.bf16.mxu1 %v11365_v43  ;;  %v5146_v11 = vpack.c.bf16 %v9877_v3, %v9876_v20  ;;  %v9406_v54 = vld [vmem:[%s13347_s25 + $0x41] sm:$0xff]  ;;  %v9407_v56 = vld [vmem:[%s13347_s25 + $0x49] sm:$0xff]  ;;  %v9408_v59 = vld [vmem:[%s13347_s25 + $0x51] sm:$0xff] }
 0x27a   : > { %v9878_v60 = vld [vmem:[%s13347_s25 + $0x185] sm:$0xff]  ;;  %v9879_v62 = vld [vmem:[%s13347_s25 + $0x18d] sm:$0xff]  ;;  %v2115_v2 = vpack.c.bf16 %v9407_v56, %v9406_v54  ;;  %v9409_v31 = vld [vmem:[%s13347_s25 + $0x59] sm:$0xff] }
 0x27b   : > { %v5147_v40 = vpack.c.bf16 %v9879_v62, %v9878_v60  ;;  %v9880_v30 = vld [vmem:[%s13347_s25 + $0x195] sm:$0xff]  ;;  %v9881_v53 = vld [vmem:[%s13347_s25 + $0x19d] sm:$0xff]  ;;  %v2116_v12 = vpack.c.bf16 %v9409_v31, %v9408_v59  ;;  %v9411_v26 = vld [vmem:[%s13347_s25 + $0x69] sm:$0xff] }
 0x27c   : > { %2212 = vmatpush1.bf16.msra.mxu0 %v11367_v27  ;;  %5242 = vmatpush1.bf16.msra.mxu1 %v11367_v27  ;;  %v5148_v36 = vpack.c.bf16 %v9881_v53, %v9880_v30  ;;  %v9410_v50 = vld [vmem:[%s13347_s25 + $0x61] sm:$0xff]  ;;  %v9883_v52 = vld [vmem:[%s13347_s25 + $0x1ad] sm:$0xff]  ;;  %v9413_v10 = vld [vmem:[%s13347_s25 + $0x79] sm:$0xff] }
 0x27d   : > { %2419 = vmatprep.subr.bf16.mxu0 %v11370_v17  ;;  %5449 = vmatprep.subr.bf16.mxu1 %v11370_v17  ;;  %v9882_v48 = vld [vmem:[%s13347_s25 + $0x1a5] sm:$0xff]  ;;  %v2117_v41 = vpack.c.bf16 %v9411_v26, %v9410_v50  ;;  %v9412_v22 = vld [vmem:[%s13347_s25 + $0x71] sm:$0xff]  ;;  %v9885_v57 = vld [vmem:[%s13347_s25 + $0x1bd] sm:$0xff] }
 0x27e   : > { %v5149_v32 = vpack.c.bf16 %v9883_v52, %v9882_v48  ;;  %v9884_v46 = vld [vmem:[%s13347_s25 + $0x1b5] sm:$0xff]  ;;  %v2118_v14 = vpack.c.bf16 %v9413_v10, %v9412_v22  ;;  %v9414_v45 = vld [vmem:[%s13347_s25 + $0x81] sm:$0xff]  ;;  %v9415_v34 = vld [vmem:[%s13347_s25 + $0x89] sm:$0xff] }
 0x27f   : > { %9435 = vmatmul.mubr.msk.bf16.vlgmr.msra.gmra.mrb[0].mxu0 %vm2171_vm5, %v2111_v15  ;;  %9907 = vmatmul.mubr.msk.bf16.vlgmr.msra.gmra.mrb[0].mxu1 %vm2171_vm5, %v5143_v21  ;;  %v5150_v4 = vpack.c.bf16 %v9885_v57, %v9884_v46  ;;  %v9886_v0 = vld [vmem:[%s13347_s25 + $0x1c5] sm:$0xff]  ;;  %v9887_v49 = vld [vmem:[%s13347_s25 + $0x1cd] sm:$0xff]  ;;  %v2119_v43 = vpack.c.bf16 %v9415_v34, %v9414_v45  ;;  %v9417_v19 = vld [vmem:[%s13347_s25 + $0x99] sm:$0xff] }
 0x280   : > { %2420 = vmatpush1.bf16.msra.mxu0 %v11368_v18  ;;  %5450 = vmatpush1.bf16.msra.mxu1 %v11368_v18  ;;  %v5151_v27 = vpack.c.bf16 %v9887_v49, %v9886_v0  ;;  %v9416_v55 = vld [vmem:[%s13347_s25 + $0x91] sm:$0xff]  ;;  %v9889_v63 = vld [vmem:[%s13347_s25 + $0x1dd] sm:$0xff]  ;;  %v9890_v18 = vld [vmem:[%s13347_s25 + $0x1e5] sm:$0x3] }
 0x281   : > { %2247 = vmatprep.mubr.bf16.mxu0 %v11493_v42  ;;  %5277 = vmatprep.mubr.bf16.mxu1 %v11493_v42  ;;  %v9888_v13 = vld [vmem:[%s13347_s25 + $0x1d5] sm:$0xff]  ;;  %v2120_v17 = vpack.c.bf16 %v9417_v19, %v9416_v55  ;;  %v9418_v21 = vld [vmem:[%s13347_s25 + $0xa1] sm:$0x3]  ;;  %v5153_v35 = vpack.c.bf16 %v9890_v18, %v9890_v18  ;;  %v2049_v61 = vld [vmem:[%s13347_s25 + $0x8] sm:$0xff] }
 0x282   : > { %2421 = vmatprep.subr.bf16.mxu0 %v11373_v39  ;;  %5451 = vmatprep.subr.bf16.mxu1 %v11373_v39  ;;  %v5152_v15 = vpack.c.bf16 %v9889_v63, %v9888_v13  ;;  %v2121_v39 = vpack.c.bf16 %v9418_v21, %v9418_v21  ;;  %v2048_v37 = vld [vmem:[%s13347_s25] sm:$0xff]  ;;  %v2051_v44 = vld [vmem:[%s13347_s25 + $0x18] sm:$0xff]  ;;  %v2053_v20 = vld [vmem:[%s13347_s25 + $0x28] sm:$0xff] }
 0x283   : > { %v9849_v24 = vld [vmem:[%s13347_s25 + $0x144] sm:$0xff]  ;;  %v9851_v16 = vld [vmem:[%s13347_s25 + $0x154] sm:$0xff]  ;;  %v9852_v6 = vld [vmem:[%s13347_s25 + $0x15c] sm:$0xff] }
 0x284   : > { %2422 = vmatpush1.bf16.msra.mxu0 %v11371_v58  ;;  %5452 = vmatpush1.bf16.msra.mxu1 %v11371_v58  ;;  %v9850_v58 = vld [vmem:[%s13347_s25 + $0x14c] sm:$0xff]  ;;  %v11391_v7 = vld [vmem:[%s11566_s19 + $0xb4] ss:$8 sps:$4 sm:$0xff]   ;;  %v2052_v23 = vld [vmem:[%s13347_s25 + $0x20] sm:$0xff] }
 0x285   : > { %2423 = vmatprep.subr.bf16.mxu0 %v11376_v28  ;;  %5453 = vmatprep.subr.bf16.mxu1 %v11376_v28  ;;  %v2069_v28 = vpack.c.bf16 %v2049_v61, %v2048_v37  ;;  %v11383_v29 = vld [vmem:[%s11566_s19 + $0x90] ss:$8 sps:$4 sm:$0xff]   ;;  %v9853_v3 = vld [vmem:[%s13347_s25 + $0x164] sm:$0xff]  ;;  %v2071_v56 = vpack.c.bf16 %v2053_v20, %v2052_v23  ;;  %v9856_v59 = vld [vmem:[%s13347_s25 + $0x17c] sm:$0xff] }
 0x286   : > { %v11394_v54 = vld [vmem:[%s11566_s19 + $0xc4] ss:$8 sps:$4 sm:$0xff]   ;;  %v2054_v62 = vld [vmem:[%s13347_s25 + $0x30] sm:$0xff]  ;;  %v9860_v22 = vld [vmem:[%s13347_s25 + $0x19c] sm:$0xff] }
 0x287   : > { %9436 = vmatmul.mubr.msk.bf16.gmra.mrb[4].mxu0 %vm2171_vm5, %v2112_v9  ;;  %9908 = vmatmul.mubr.msk.bf16.gmra.mrb[4].mxu1 %vm2171_vm5, %v5144_v1  ;;  %v5101_v9 = vpack.c.bf16 %v9850_v58, %v9849_v24  ;;  %v11380_v1 = vld [vmem:[%s11566_s19 + $0x80] ss:$8 sps:$4 sm:$0xff]   ;;  %v9858_v50 = vld [vmem:[%s13347_s25 + $0x18c] sm:$0xff]  ;;  %v2067_v37 = vld [vmem:[%s13347_s25 + $0x98] sm:$0xff] }
 0x288   : > { %2257 = vmatprep.mubr.bf16.mxu0 %v11493_v42  ;;  %5287 = vmatprep.mubr.bf16.mxu1 %v11493_v42  ;;  %v2056_v53 = vld [vmem:[%s13347_s25 + $0x40] sm:$0xff]  ;;  %v2058_v52 = vld [vmem:[%s13347_s25 + $0x50] sm:$0xff] }
 0x289   : > { %2424 = vmatpush1.bf16.msra.mxu0 %v11374_v47  ;;  %5454 = vmatpush1.bf16.msra.mxu1 %v11374_v47  ;;  %v11385_v47 = vld [vmem:[%s11566_s19 + $0x94] ss:$8 sps:$4 sm:$0xff]   ;;  %v2060_v57 = vld [vmem:[%s13347_s25 + $0x60] sm:$0xff]  ;;  %v9862_v45 = vld [vmem:[%s13347_s25 + $0x1ac] sm:$0xff] }
 0x28a   : > { %2425 = vmatprep.subr.bf16.mxu0 %v11379_v51  ;;  %5455 = vmatprep.subr.bf16.mxu1 %v11379_v51  ;;  %v2050_v51 = vld [vmem:[%s13347_s25 + $0x10] sm:$0xff]  ;;  %v9864_v55 = vld [vmem:[%s13347_s25 + $0x1bc] sm:$0xff] }
 0x28b   : > { %v2062_v49 = vld [vmem:[%s13347_s25 + $0x70] sm:$0xff]  ;;  %v2064_v63 = vld [vmem:[%s13347_s25 + $0x80] sm:$0xff] }
 0x28c   : > { %v9866_v21 = vld [vmem:[%s13347_s25 + $0x1cc] sm:$0xff]  ;;  %v9867_v61 = vld [vmem:[%s13347_s25 + $0x1d4] sm:$0xff]  ;;  %v9868_v24 = vld [vmem:[%s13347_s25 + $0x1dc] sm:$0xff] }
 0x28d   : > { %2426 = vmatpush1.bf16.msra.mxu0 %v11377_v5  ;;  %5456 = vmatpush1.bf16.msra.mxu1 %v11377_v5  ;;  %v11388_v5 = vld [vmem:[%s11566_s19 + $0xa4] ss:$8 sps:$4 sm:$0xff]   ;;  %v9468_v23 = vld [vmem:[%s13347_s25 + $0x1a] sm:$0xff] }
 0x28e   : > { %2676 = vmatprep.subr.bf16.mxu0 %v11382_v38  ;;  %5705 = vmatprep.subr.bf16.mxu1 %v11382_v38  ;;  %v2070_v38 = vpack.c.bf16 %v2051_v44, %v2050_v51  ;;  %v9465_v44 = vld [vmem:[%s13347_s25 + $0x2] sm:$0xff]  ;;  %v9939_v20 = vld [vmem:[%s13347_s25 + $0x156] sm:$0xff] }
 0x28f   : > { %9437 = vmatmul.mubr.msk.bf16.gmra.mrb[8].mxu0 %vm2171_vm5, %v2113_v33  ;;  %9909 = vmatmul.mubr.msk.bf16.gmra.mrb[8].mxu1 %vm2171_vm5, %v5145_v8  ;;  %v5102_v33 = vpack.c.bf16 %v9852_v6, %v9851_v16  ;;  %v11386_v8 = vld [vmem:[%s11566_s19 + $0xa0] ss:$8 sps:$4 sm:$0xff]  }
 0x290   : > { %2267 = vmatprep.mubr.bf16.mxu0 %v11493_v42  ;;  %5297 = vmatprep.mubr.bf16.mxu1 %v11493_v42  ;;  %v9466_v16 = vld [vmem:[%s13347_s25 + $0xa] sm:$0xff] }
 0x291   : > { %v9937_v6 = vld [vmem:[%s13347_s25 + $0x146] sm:$0xff] }
 0x297   : > { %9438 = vmatmul.mubr.msk.bf16.gmra.mrb[12].mxu0 %vm2171_vm5, %v2114_v25  ;;  %9910 = vmatmul.mubr.msk.bf16.gmra.mrb[12].mxu1 %vm2171_vm5, %v5146_v11  ;;  %v9854_v25 = vld [vmem:[%s13347_s25 + $0x16c] sm:$0xff] }
 0x298   : > { %2277 = vmatprep.mubr.bf16.mxu0 %v11493_v42  ;;  %5307 = vmatprep.mubr.bf16.mxu1 %v11493_v42  ;;  %v11389_v11 = vld [vmem:[%s11566_s19 + $0xb0] ss:$8 sps:$4 sm:$0xff]   ;;  %v5103_v60 = vpack.c.bf16 %v9854_v25, %v9853_v3  ;;  %v9940_v3 = vld [vmem:[%s13347_s25 + $0x15e] sm:$0xff] }
 0x299   : > { %v11395_v25 = vld [vmem:[%s11566_s19 + $0xd0] ss:$8 sps:$4 sm:$0xff]  }
 0x29f   : > { %9439 = vmatmul.mubr.msk.bf16.gmra.mrb[16].mxu0 %vm2171_vm5, %v2115_v2  ;;  %9911 = vmatmul.mubr.msk.bf16.gmra.mrb[16].mxu1 %vm2171_vm5, %v5147_v40  ;;  %v2055_v2 = vld [vmem:[%s13347_s25 + $0x38] sm:$0xff] }
 0x2a0   : > { %2287 = vmatprep.mubr.bf16.mxu0 %v11493_v42  ;;  %5317 = vmatprep.mubr.bf16.mxu1 %v11493_v42  ;;  %v9855_v40 = vld [vmem:[%s13347_s25 + $0x174] sm:$0xff]  ;;  %v2072_v31 = vpack.c.bf16 %v2055_v2, %v2054_v62  ;;  %v9469_v2 = vld [vmem:[%s13347_s25 + $0x22] sm:$0xff] }
 0x2a1   : > { %v5104_v30 = vpack.c.bf16 %v9856_v59, %v9855_v40  ;;  %v11403_v62 = vld [vmem:[%s11566_s19 + $0xf4] ss:$8 sps:$4 sm:$0xff]   ;;  %v9470_v40 = vld [vmem:[%s13347_s25 + $0x2a] sm:$0xff] }
 0x2a2   : > { %v9941_v59 = vld [vmem:[%s13347_s25 + $0x166] sm:$0xff] }
 0x2a7   : > { %9440 = vmatmul.mubr.msk.bf16.gmra.mrb[20].mxu0 %vm2171_vm5, %v2116_v12  ;;  %9912 = vmatmul.mubr.msk.bf16.gmra.mrb[20].mxu1 %vm2171_vm5, %v5148_v36  ;;  %v2057_v12 = vld [vmem:[%s13347_s25 + $0x48] sm:$0xff] }
 0x2a8   : > { %2297 = vmatprep.mubr.bf16.mxu0 %v11493_v42  ;;  %5327 = vmatprep.mubr.bf16.mxu1 %v11493_v42  ;;  %v9857_v36 = vld [vmem:[%s13347_s25 + $0x184] sm:$0xff]  ;;  %v2073_v26 = vpack.c.bf16 %v2057_v12, %v2056_v53  ;;  %v2585_v12 = vpack.c.bf16 %v9470_v40, %v9469_v2  ;;  %v9516_v2 = vld [vmem:[%s13347_s25 + $0x1b] sm:$0xff] }
 0x2a9   : > { %v5105_v48 = vpack.c.bf16 %v9858_v50, %v9857_v36  ;;  %v11406_v53 = vld [vmem:[%s11566_s19 + $0x104] ss:$8 sps:$4 sm:$0xff]   ;;  %v9471_v50 = vld [vmem:[%s13347_s25 + $0x32] sm:$0xff] }
 0x2aa   : > { %v9987_v40 = vld [vmem:[%s13347_s25 + $0x157] sm:$0xff] }
 0x2af   : > { %9441 = vmatmul.mubr.msk.bf16.gmra.mrb[24].mxu0 %vm2171_vm5, %v2117_v41  ;;  %9913 = vmatmul.mubr.msk.bf16.gmra.mrb[24].mxu1 %vm2171_vm5, %v5149_v32  ;;  %v2059_v41 = vld [vmem:[%s13347_s25 + $0x58] sm:$0xff] }
 0x2b0   : > { %2307 = vmatprep.mubr.bf16.mxu0 %v11493_v42  ;;  %5337 = vmatprep.mubr.bf16.mxu1 %v11493_v42  ;;  %v9859_v32 = vld [vmem:[%s13347_s25 + $0x194] sm:$0xff]  ;;  %v2074_v10 = vpack.c.bf16 %v2059_v41, %v2058_v52  ;;  %v9944_v52 = vld [vmem:[%s13347_s25 + $0x17e] sm:$0xff] }
 0x2b1   : > { %v5106_v46 = vpack.c.bf16 %v9860_v22, %v9859_v32  ;;  %v9473_v22 = vld [vmem:[%s13347_s25 + $0x42] sm:$0xff] }
 0x2b7   : > { %9442 = vmatmul.mubr.msk.bf16.gmra.mrb[28].mxu0 %vm2171_vm5, %v2118_v14  ;;  %9914 = vmatmul.mubr.msk.bf16.gmra.mrb[28].mxu1 %vm2171_vm5, %v5150_v4  ;;  %v2061_v14 = vld [vmem:[%s13347_s25 + $0x68] sm:$0xff] }
 0x2b8   : > { %2317 = vmatprep.mubr.bf16.mxu0 %v11493_v42  ;;  %5347 = vmatprep.mubr.bf16.mxu1 %v11493_v42  ;;  %v9861_v4 = vld [vmem:[%s13347_s25 + $0x1a4] sm:$0xff]  ;;  %v2075_v34 = vpack.c.bf16 %v2061_v14, %v2060_v57  ;;  %v9946_v57 = vld [vmem:[%s13347_s25 + $0x18e] sm:$0xff] }
 0x2b9   : > { %v5107_v0 = vpack.c.bf16 %v9862_v45, %v9861_v4  ;;  %v9475_v45 = vld [vmem:[%s13347_s25 + $0x52] sm:$0xff] }
 0x2bf   : > { %9443 = vmatmul.mubr.msk.bf16.gmra.mrb[32].mxu0 %vm2171_vm5, %v2119_v43  ;;  %9915 = vmatmul.mubr.msk.bf16.gmra.mrb[32].mxu1 %vm2171_vm5, %v5151_v27  ;;  %v2063_v43 = vld [vmem:[%s13347_s25 + $0x78] sm:$0xff] }
 0x2c0   : > { %2327 = vmatprep.mubr.bf16.mxu0 %v11493_v42  ;;  %5357 = vmatprep.mubr.bf16.mxu1 %v11493_v42  ;;  %v9863_v27 = vld [vmem:[%s13347_s25 + $0x1b4] sm:$0xff]  ;;  %v2076_v19 = vpack.c.bf16 %v2063_v43, %v2062_v49  ;;  %v9948_v49 = vld [vmem:[%s13347_s25 + $0x19e] sm:$0xff] }
 0x2c1   : > { %v5108_v13 = vpack.c.bf16 %v9864_v55, %v9863_v27  ;;  %v9477_v55 = vld [vmem:[%s13347_s25 + $0x62] sm:$0xff] }
 0x2c7   : > { %9444 = vmatmul.mubr.msk.bf16.gmra.mrb[36].mxu0 %vm2171_vm5, %v2120_v17  ;;  %9916 = vmatmul.mubr.msk.bf16.gmra.mrb[36].mxu1 %vm2171_vm5, %v5152_v15  ;;  %v2065_v17 = vld [vmem:[%s13347_s25 + $0x88] sm:$0xff] }
 0x2c8   : > { %2337 = vmatprep.mubr.bf16.mxu0 %v11493_v42  ;;  %5367 = vmatprep.mubr.bf16.mxu1 %v11493_v42  ;;  %v9865_v15 = vld [vmem:[%s13347_s25 + $0x1c4] sm:$0xff]  ;;  %v2077_v18 = vpack.c.bf16 %v2065_v17, %v2064_v63  ;;  %v9950_v63 = vld [vmem:[%s13347_s25 + $0x1ae] sm:$0xff] }
 0x2cf   : > { %9445 = vmatmul.mubr.msk.bf16.gmra.mrb[40].mxu0 %vm2171_vm5, %v2121_v39  ;;  %9917 = vmatmul.mubr.msk.bf16.gmra.mrb[40].mxu1 %vm2171_vm5, %v5153_v35  ;;  %v5109_v39 = vpack.c.bf16 %v9866_v21, %v9865_v15  ;;  %v2066_v35 = vld [vmem:[%s13347_s25 + $0x90] sm:$0xff] }
 0x2d0   : > { %2451 = vmatprep.mubr.bf16.mxu0 %v11493_v42  ;;  %5481 = vmatprep.mubr.bf16.mxu1 %v11493_v42  ;;  %v2078_v58 = vpack.c.bf16 %v2067_v37, %v2066_v35  ;;  %v9479_v21 = vld [vmem:[%s13347_s25 + $0x72] sm:$0xff]  ;;  %v9952_v35 = vld [vmem:[%s13347_s25 + $0x1be] sm:$0xff] }
 0x2d7   : > { %9454 = vmatmul.mubr.msk.bf16.vlgmr.msra.gmra.mrb[0].mxu0 %vm2171_vm5, %v2069_v28  ;;  %9926 = vmatmul.mubr.msk.bf16.vlgmr.msra.gmra.mrb[0].mxu1 %vm2171_vm5, %v5101_v9  ;;  %v5110_v28 = vpack.c.bf16 %v9868_v24, %v9867_v61  ;;  %v2068_v9 = vld [vmem:[%s13347_s25 + $0xa0] sm:$0x3]  ;;  %v9481_v24 = vld [vmem:[%s13347_s25 + $0x82] sm:$0xff] }
 0x2d8   : > { %2677 = vmatpush1.bf16.msra.mxu0 %v11380_v1  ;;  %5706 = vmatpush1.bf16.msra.mxu1 %v11380_v1  ;;  %v9869_v1 = vld [vmem:[%s13347_s25 + $0x1e4] sm:$0x3] }
 0x2d9   : > { %2461 = vmatprep.mubr.bf16.mxu0 %v11493_v42  ;;  %5491 = vmatprep.mubr.bf16.mxu1 %v11493_v42  ;;  %v5111_v51 = vpack.c.bf16 %v9869_v1, %v9869_v1 }
 0x2da   : > { %2678 = vmatprep.subr.bf16.mxu0 %v11385_v47  ;;  %5707 = vmatprep.subr.bf16.mxu1 %v11385_v47  ;;  %v2079_v47 = vpack.c.bf16 %v2068_v9, %v2068_v9  ;;  %v9954_v9 = vld [vmem:[%s13347_s25 + $0x1ce] sm:$0xff] }
 0x2dc   : > { %2679 = vmatpush1.bf16.msra.mxu0 %v11383_v29  ;;  %5708 = vmatpush1.bf16.msra.mxu1 %v11383_v29  ;;  %v9938_v29 = vld [vmem:[%s13347_s25 + $0x14e] sm:$0xff] }
 0x2dd   : > { %2680 = vmatprep.subr.bf16.mxu0 %v11388_v5  ;;  %5709 = vmatprep.subr.bf16.mxu1 %v11388_v5  ;;  %v2583_v5 = vpack.c.bf16 %v9466_v16, %v9465_v44  ;;  %v9484_v44 = vld [vmem:[%s13347_s25 + $0x9a] sm:$0xff] }
 0x2de   : > { %v9955_v16 = vld [vmem:[%s13347_s25 + $0x1d6] sm:$0xff] }
 0x2df   : > { %9455 = vmatmul.mubr.msk.bf16.gmra.mrb[4].mxu0 %vm2171_vm5, %v2070_v38  ;;  %9927 = vmatmul.mubr.msk.bf16.gmra.mrb[4].mxu1 %vm2171_vm5, %v5102_v33  ;;  %v5613_v38 = vpack.c.bf16 %v9938_v29, %v9937_v6  ;;  %v11392_v33 = vld [vmem:[%s11566_s19 + $0xc0] ss:$8 sps:$4 sm:$0xff]  }
 0x2e0   : > { %2471 = vmatprep.mubr.bf16.mxu0 %v11493_v42  ;;  %5501 = vmatprep.mubr.bf16.mxu1 %v11493_v42  ;;  %v9956_v6 = vld [vmem:[%s13347_s25 + $0x1de] sm:$0xff] }
 0x2e1   : > { %2681 = vmatpush1.bf16.msra.mxu0 %v11386_v8  ;;  %5710 = vmatpush1.bf16.msra.mxu1 %v11386_v8  ;;  %v11397_v8 = vld [vmem:[%s11566_s19 + $0xd4] ss:$8 sps:$4 sm:$0xff]  }
 0x2e2   : > { %2682 = vmatprep.subr.bf16.mxu0 %v11391_v7  ;;  %5711 = vmatprep.subr.bf16.mxu1 %v11391_v7  ;;  %v9467_v7 = vld [vmem:[%s13347_s25 + $0x12] sm:$0xff] }
 0x2e5   : > { %2683 = vmatpush1.bf16.msra.mxu0 %v11389_v11  ;;  %5712 = vmatpush1.bf16.msra.mxu1 %v11389_v11  ;;  %v11400_v11 = vld [vmem:[%s11566_s19 + $0xe4] ss:$8 sps:$4 sm:$0xff]  }
 0x2e6   : > { %2975 = vmatprep.subr.bf16.mxu0 %v11394_v54  ;;  %6003 = vmatprep.subr.bf16.mxu1 %v11394_v54  ;;  %v2584_v54 = vpack.c.bf16 %v9468_v23, %v9467_v7  ;;  %v9513_v23 = vld [vmem:[%s13347_s25 + $0x3] sm:$0xff] }
 0x2e7   : > { %9456 = vmatmul.mubr.msk.bf16.gmra.mrb[8].mxu0 %vm2171_vm5, %v2071_v56  ;;  %9928 = vmatmul.mubr.msk.bf16.gmra.mrb[8].mxu1 %vm2171_vm5, %v5103_v60  ;;  %v5614_v56 = vpack.c.bf16 %v9940_v3, %v9939_v20  ;;  %v11398_v60 = vld [vmem:[%s11566_s19 + $0xe0] ss:$8 sps:$4 sm:$0xff]  }
 0x2e8   : > { %2481 = vmatprep.mubr.bf16.mxu0 %v11493_v42  ;;  %5511 = vmatprep.mubr.bf16.mxu1 %v11493_v42  ;;  %v9514_v20 = vld [vmem:[%s13347_s25 + $0xb] sm:$0xff] }
 0x2e9   : > { %v9985_v3 = vld [vmem:[%s13347_s25 + $0x147] sm:$0xff] }
 0x2ef   : > { %9457 = vmatmul.mubr.msk.bf16.gmra.mrb[12].mxu0 %vm2171_vm5, %v2072_v31  ;;  %9929 = vmatmul.mubr.msk.bf16.gmra.mrb[12].mxu1 %vm2171_vm5, %v5104_v30  ;;  %v9942_v31 = vld [vmem:[%s13347_s25 + $0x16e] sm:$0xff] }
 0x2f0   : > { %2491 = vmatprep.mubr.bf16.mxu0 %v11493_v42  ;;  %5521 = vmatprep.mubr.bf16.mxu1 %v11493_v42  ;;  %v11401_v30 = vld [vmem:[%s11566_s19 + $0xf0] ss:$8 sps:$4 sm:$0xff]   ;;  %v5615_v36 = vpack.c.bf16 %v9942_v31, %v9941_v59  ;;  %v9988_v59 = vld [vmem:[%s13347_s25 + $0x15f] sm:$0xff] }
 0x2f1   : > { %v11407_v31 = vld [vmem:[%s11566_s19 + $0x110] ss:$8 sps:$4 sm:$0xff]  }
 0x2f7   : > { %9458 = vmatmul.mubr.msk.bf16.gmra.mrb[16].mxu0 %vm2171_vm5, %v2073_v26  ;;  %9930 = vmatmul.mubr.msk.bf16.gmra.mrb[16].mxu1 %vm2171_vm5, %v5105_v48  ;;  %v9472_v26 = vld [vmem:[%s13347_s25 + $0x3a] sm:$0xff] }
 0x2f8   : > { %2501 = vmatprep.mubr.bf16.mxu0 %v11493_v42  ;;  %5531 = vmatprep.mubr.bf16.mxu1 %v11493_v42  ;;  %v9943_v48 = vld [vmem:[%s13347_s25 + $0x176] sm:$0xff]  ;;  %v2586_v41 = vpack.c.bf16 %v9472_v26, %v9471_v50  ;;  %v9517_v26 = vld [vmem:[%s13347_s25 + $0x23] sm:$0xff] }
 0x2f9   : > { %v5616_v32 = vpack.c.bf16 %v9944_v52, %v9943_v48  ;;  %v11415_v50 = vld [vmem:[%s11566_s19 + $0x134] ss:$8 sps:$4 sm:$0xff]   ;;  %v9518_v48 = vld [vmem:[%s13347_s25 + $0x2b] sm:$0xff] }
 0x2fa   : > { %v9989_v52 = vld [vmem:[%s13347_s25 + $0x167] sm:$0xff] }
 0x2ff   : > { %9459 = vmatmul.mubr.msk.bf16.gmra.mrb[20].mxu0 %vm2171_vm5, %v2074_v10  ;;  %9931 = vmatmul.mubr.msk.bf16.gmra.mrb[20].mxu1 %vm2171_vm5, %v5106_v46  ;;  %v9474_v10 = vld [vmem:[%s13347_s25 + $0x4a] sm:$0xff] }
 0x300   : > { %2511 = vmatprep.mubr.bf16.mxu0 %v11493_v42  ;;  %5541 = vmatprep.mubr.bf16.mxu1 %v11493_v42  ;;  %v9945_v46 = vld [vmem:[%s13347_s25 + $0x186] sm:$0xff]  ;;  %v2587_v14 = vpack.c.bf16 %v9474_v10, %v9473_v22  ;;  %v2884_v10 = vpack.c.bf16 %v9518_v48, %v9517_v26 }
 0x301   : > { %v5617_v4 = vpack.c.bf16 %v9946_v57, %v9945_v46  ;;  %v11418_v22 = vld [vmem:[%s11566_s19 + $0x144] ss:$8 sps:$4 sm:$0xff]   ;;  %v9519_v57 = vld [vmem:[%s13347_s25 + $0x33] sm:$0xff] }
 0x302   : > { %v9562_v26 = vld [vmem:[%s13347_s25 + $0xc] sm:$0xff] }
 0x303   : > { %v10033_v48 = vld [vmem:[%s13347_s25 + $0x148] sm:$0xff] }
 0x307   : > { %9460 = vmatmul.mubr.msk.bf16.gmra.mrb[24].mxu0 %vm2171_vm5, %v2075_v34  ;;  %9932 = vmatmul.mubr.msk.bf16.gmra.mrb[24].mxu1 %vm2171_vm5, %v5107_v0  ;;  %v9476_v34 = vld [vmem:[%s13347_s25 + $0x5a] sm:$0xff] }
 0x308   : > { %2521 = vmatprep.mubr.bf16.mxu0 %v11493_v42  ;;  %5551 = vmatprep.mubr.bf16.mxu1 %v11493_v42  ;;  %v9947_v0 = vld [vmem:[%s13347_s25 + $0x196] sm:$0xff]  ;;  %v2588_v43 = vpack.c.bf16 %v9476_v34, %v9475_v45  ;;  %v9992_v45 = vld [vmem:[%s13347_s25 + $0x17f] sm:$0xff] }
 0x309   : > { %v5618_v27 = vpack.c.bf16 %v9948_v49, %v9947_v0  ;;  %v9521_v49 = vld [vmem:[%s13347_s25 + $0x43] sm:$0xff] }
 0x30f   : > { %9461 = vmatmul.mubr.msk.bf16.gmra.mrb[28].mxu0 %vm2171_vm5, %v2076_v19  ;;  %9933 = vmatmul.mubr.msk.bf16.gmra.mrb[28].mxu1 %vm2171_vm5, %v5108_v13  ;;  %v9478_v19 = vld [vmem:[%s13347_s25 + $0x6a] sm:$0xff] }
 0x310   : > { %2531 = vmatprep.mubr.bf16.mxu0 %v11493_v42  ;;  %5561 = vmatprep.mubr.bf16.mxu1 %v11493_v42  ;;  %v9949_v13 = vld [vmem:[%s13347_s25 + $0x1a6] sm:$0xff]  ;;  %v2589_v17 = vpack.c.bf16 %v9478_v19, %v9477_v55  ;;  %v9994_v55 = vld [vmem:[%s13347_s25 + $0x18f] sm:$0xff] }
 0x311   : > { %v5619_v15 = vpack.c.bf16 %v9950_v63, %v9949_v13 }
 0x317   : > { %9462 = vmatmul.mubr.msk.bf16.gmra.mrb[32].mxu0 %vm2171_vm5, %v2077_v18  ;;  %9934 = vmatmul.mubr.msk.bf16.gmra.mrb[32].mxu1 %vm2171_vm5, %v5109_v39  ;;  %v9480_v18 = vld [vmem:[%s13347_s25 + $0x7a] sm:$0xff] }
 0x318   : > { %2541 = vmatprep.mubr.bf16.mxu0 %v11493_v42  ;;  %5571 = vmatprep.mubr.bf16.mxu1 %v11493_v42  ;;  %v9951_v39 = vld [vmem:[%s13347_s25 + $0x1b6] sm:$0xff]  ;;  %v2590_v37 = vpack.c.bf16 %v9480_v18, %v9479_v21 }
 0x319   : > { %v5620_v61 = vpack.c.bf16 %v9952_v35, %v9951_v39 }
 0x31f   : > { %9463 = vmatmul.mubr.msk.bf16.gmra.mrb[36].mxu0 %vm2171_vm5, %v2078_v58  ;;  %9935 = vmatmul.mubr.msk.bf16.gmra.mrb[36].mxu1 %vm2171_vm5, %v5110_v28  ;;  %v9482_v58 = vld [vmem:[%s13347_s25 + $0x8a] sm:$0xff] }
 0x320   : > { %2551 = vmatprep.mubr.bf16.mxu0 %v11493_v42  ;;  %5581 = vmatprep.mubr.bf16.mxu1 %v11493_v42  ;;  %v9953_v28 = vld [vmem:[%s13347_s25 + $0x1c6] sm:$0xff]  ;;  %v2591_v1 = vpack.c.bf16 %v9482_v58, %v9481_v24  ;;  %v9524_v24 = vld [vmem:[%s13347_s25 + $0x5b] sm:$0xff] }
 0x321   : > { %v9995_v58 = vld [vmem:[%s13347_s25 + $0x197] sm:$0xff] }
 0x327   : > { %9464 = vmatmul.mubr.msk.bf16.gmra.mrb[44].mxu0 %vm2171_vm5, %v2079_v47  ;;  %9936 = vmatmul.mubr.msk.bf16.gmra.mrb[44].mxu1 %vm2171_vm5, %v5111_v51  ;;  %v5621_v47 = vpack.c.bf16 %v9954_v9, %v9953_v28  ;;  %v9483_v51 = vld [vmem:[%s13347_s25 + $0x92] sm:$0xff]  ;;  %v9996_v28 = vld [vmem:[%s13347_s25 + $0x19f] sm:$0xff] }
 0x328   : > { %2708 = vmatprep.mubr.bf16.mxu0 %v11493_v42  ;;  %5737 = vmatprep.mubr.bf16.mxu1 %v11493_v42  ;;  %v2592_v29 = vpack.c.bf16 %v9484_v44, %v9483_v51  ;;  %v9526_v51 = vld [vmem:[%s13347_s25 + $0x6b] sm:$0xff] }
 0x329   : > { %v9997_v44 = vld [vmem:[%s13347_s25 + $0x1a7] sm:$0xff] }
 0x32f   : > { %9502 = vmatmul.mubr.msk.bf16.vlgmr.msra.gmra.mrb[0].mxu0 %vm2171_vm5, %v2583_v5  ;;  %9974 = vmatmul.mubr.msk.bf16.vlgmr.msra.gmra.mrb[0].mxu1 %vm2171_vm5, %v5613_v38  ;;  %v5622_v5 = vpack.c.bf16 %v9956_v6, %v9955_v16  ;;  %v9485_v38 = vld [vmem:[%s13347_s25 + $0xa2] sm:$0x3]  ;;  %v9998_v16 = vld [vmem:[%s13347_s25 + $0x1af] sm:$0xff] }
 0x330   : > { %2976 = vmatpush1.bf16.msra.mxu0 %v11392_v33  ;;  %6004 = vmatpush1.bf16.msra.mxu1 %v11392_v33  ;;  %v9957_v33 = vld [vmem:[%s13347_s25 + $0x1e6] sm:$0x3] }
 0x331   : > { %2718 = vmatprep.mubr.bf16.mxu0 %v11493_v42  ;;  %5747 = vmatprep.mubr.bf16.mxu1 %v11493_v42  ;;  %v5623_v7 = vpack.c.bf16 %v9957_v33, %v9957_v33  ;;  %v9999_v33 = vld [vmem:[%s13347_s25 + $0x1b7] sm:$0xff] }
 0x332   : > { %2977 = vmatprep.subr.bf16.mxu0 %v11397_v8  ;;  %6005 = vmatprep.subr.bf16.mxu1 %v11397_v8  ;;  %v2593_v8 = vpack.c.bf16 %v9485_v38, %v9485_v38  ;;  %v9528_v38 = vld [vmem:[%s13347_s25 + $0x7b] sm:$0xff] }
 0x334   : > { %2978 = vmatpush1.bf16.msra.mxu0 %v11395_v25  ;;  %6006 = vmatpush1.bf16.msra.mxu1 %v11395_v25  ;;  %v9986_v25 = vld [vmem:[%s13347_s25 + $0x14f] sm:$0xff] }
 0x335   : > { %2979 = vmatprep.subr.bf16.mxu0 %v11400_v11  ;;  %6007 = vmatprep.subr.bf16.mxu1 %v11400_v11  ;;  %v2882_v11 = vpack.c.bf16 %v9514_v20, %v9513_v23  ;;  %v9529_v20 = vld [vmem:[%s13347_s25 + $0x83] sm:$0xff] }
 0x337   : > { %9503 = vmatmul.mubr.msk.bf16.gmra.mrb[4].mxu0 %vm2171_vm5, %v2584_v54  ;;  %9975 = vmatmul.mubr.msk.bf16.gmra.mrb[4].mxu1 %vm2171_vm5, %v5614_v56  ;;  %v5911_v54 = vpack.c.bf16 %v9986_v25, %v9985_v3  ;;  %v11404_v56 = vld [vmem:[%s11566_s19 + $0x100] ss:$8 sps:$4 sm:$0xff]  }
 0x338   : > { %2728 = vmatprep.mubr.bf16.mxu0 %v11493_v42  ;;  %5757 = vmatprep.mubr.bf16.mxu1 %v11493_v42  ;;  %v9530_v3 = vld [vmem:[%s13347_s25 + $0x8b] sm:$0xff] }
 0x339   : > { %2980 = vmatpush1.bf16.msra.mxu0 %v11398_v60  ;;  %6008 = vmatpush1.bf16.msra.mxu1 %v11398_v60  ;;  %v11409_v60 = vld [vmem:[%s11566_s19 + $0x114] ss:$8 sps:$4 sm:$0xff]   ;;  %v10001_v25 = vld [vmem:[%s13347_s25 + $0x1c7] sm:$0xff] }
 0x33a   : > { %2981 = vmatprep.subr.bf16.mxu0 %v11403_v62  ;;  %6009 = vmatprep.subr.bf16.mxu1 %v11403_v62  ;;  %v9515_v62 = vld [vmem:[%s13347_s25 + $0x13] sm:$0xff] }
 0x33d   : > { %2982 = vmatpush1.bf16.msra.mxu0 %v11401_v30  ;;  %6010 = vmatpush1.bf16.msra.mxu1 %v11401_v30  ;;  %v11412_v30 = vld [vmem:[%s11566_s19 + $0x124] ss:$8 sps:$4 sm:$0xff]  }
 0x33e   : > { %3274 = vmatprep.subr.bf16.mxu0 %v11406_v53  ;;  %6301 = vmatprep.subr.bf16.mxu1 %v11406_v53  ;;  %v2883_v53 = vpack.c.bf16 %v9516_v2, %v9515_v62  ;;  %v9532_v62 = vld [vmem:[%s13347_s25 + $0x9b] sm:$0xff] }
 0x33f   : > { %9504 = vmatmul.mubr.msk.bf16.gmra.mrb[8].mxu0 %vm2171_vm5, %v2585_v12  ;;  %9976 = vmatmul.mubr.msk.bf16.gmra.mrb[8].mxu1 %vm2171_vm5, %v5615_v36  ;;  %v5912_v12 = vpack.c.bf16 %v9988_v59, %v9987_v40  ;;  %v11410_v36 = vld [vmem:[%s11566_s19 + $0x120] ss:$8 sps:$4 sm:$0xff]   ;;  %v10003_v2 = vld [vmem:[%s13347_s25 + $0x1d7] sm:$0xff] }
 0x340   : > { %2738 = vmatprep.mubr.bf16.mxu0 %v11493_v42  ;;  %5767 = vmatprep.mubr.bf16.mxu1 %v11493_v42  ;;  %v10004_v40 = vld [vmem:[%s13347_s25 + $0x1df] sm:$0xff] }
 0x347   : > { %9505 = vmatmul.mubr.msk.bf16.gmra.mrb[12].mxu0 %vm2171_vm5, %v2586_v41  ;;  %9977 = vmatmul.mubr.msk.bf16.gmra.mrb[12].mxu1 %vm2171_vm5, %v5616_v32  ;;  %v9990_v41 = vld [vmem:[%s13347_s25 + $0x16f] sm:$0xff] }
 0x348   : > { %2748 = vmatprep.mubr.bf16.mxu0 %v11493_v42  ;;  %5777 = vmatprep.mubr.bf16.mxu1 %v11493_v42  ;;  %v11413_v32 = vld [vmem:[%s11566_s19 + $0x130] ss:$8 sps:$4 sm:$0xff]   ;;  %v5913_v46 = vpack.c.bf16 %v9990_v41, %v9989_v52 }
 0x349   : > { %v10034_v52 = vld [vmem:[%s13347_s25 + $0x150] sm:$0xff] }
 0x34f   : > { %9506 = vmatmul.mubr.msk.bf16.gmra.mrb[16].mxu0 %vm2171_vm5, %v2587_v14  ;;  %9978 = vmatmul.mubr.msk.bf16.gmra.mrb[16].mxu1 %vm2171_vm5, %v5617_v4  ;;  %v9520_v14 = vld [vmem:[%s13347_s25 + $0x3b] sm:$0xff] }
 0x350   : > { %2758 = vmatprep.mubr.bf16.mxu0 %v11493_v42  ;;  %5787 = vmatprep.mubr.bf16.mxu1 %v11493_v42  ;;  %v9991_v4 = vld [vmem:[%s13347_s25 + $0x177] sm:$0xff]  ;;  %v2885_v34 = vpack.c.bf16 %v9520_v14, %v9519_v57 }
 0x351   : > { %v5914_v0 = vpack.c.bf16 %v9992_v45, %v9991_v4  ;;  %v9564_v57 = vld [vmem:[%s13347_s25 + $0x1c] sm:$0xff]  ;;  %v11419_v45 = vld [vmem:[%s11566_s19 + $0x150] ss:$8 sps:$4 sm:$0xff]  }
 0x352   : > { %v10035_v14 = vld [vmem:[%s13347_s25 + $0x158] sm:$0xff]  ;;  %v10036_v4 = vld [vmem:[%s13347_s25 + $0x160] sm:$0xff] }
 0x357   : > { %9507 = vmatmul.mubr.msk.bf16.gmra.mrb[20].mxu0 %vm2171_vm5, %v2588_v43  ;;  %9979 = vmatmul.mubr.msk.bf16.gmra.mrb[20].mxu1 %vm2171_vm5, %v5618_v27  ;;  %v9522_v43 = vld [vmem:[%s13347_s25 + $0x4b] sm:$0xff] }
 0x358   : > { %2768 = vmatprep.mubr.bf16.mxu0 %v11493_v42  ;;  %5797 = vmatprep.mubr.bf16.mxu1 %v11493_v42  ;;  %v9993_v27 = vld [vmem:[%s13347_s25 + $0x187] sm:$0xff] }
 0x359   : > { %v5915_v21 = vpack.c.bf16 %v9994_v55, %v9993_v27  ;;  %v11427_v27 = vld [vmem:[%s11566_s19 + $0x174] ss:$8 sps:$4 sm:$0xff]   ;;  %v9565_v55 = vld [vmem:[%s13347_s25 + $0x24] sm:$0xff] }
 0x35f   : > { %9508 = vmatmul.mubr.msk.bf16.gmra.mrb[24].mxu0 %vm2171_vm5, %v2589_v17  ;;  %9980 = vmatmul.mubr.msk.bf16.gmra.mrb[24].mxu1 %vm2171_vm5, %v5619_v15  ;;  %v2886_v15 = vpack.c.bf16 %v9522_v43, %v9521_v49  ;;  %v6210_v49 = vpack.c.bf16 %v10036_v4, %v10035_v14  ;;  %v11422_v43 = vld [vmem:[%s11566_s19 + $0x160] ss:$8 sps:$4 sm:$0xff]   ;;  %v9579_v4 = vld [vmem:[%s13347_s25 + $0x94] sm:$0xff] }
 0x360   : > { %2778 = vmatprep.mubr.bf16.mxu0 %v11493_v42  ;;  %5807 = vmatprep.mubr.bf16.mxu1 %v11493_v42 }
 0x367   : > { %9509 = vmatmul.mubr.msk.bf16.gmra.mrb[28].mxu0 %vm2171_vm5, %v2590_v37  ;;  %9981 = vmatmul.mubr.msk.bf16.gmra.mrb[28].mxu1 %vm2171_vm5, %v5620_v61  ;;  %v9523_v61 = vld [vmem:[%s13347_s25 + $0x53] sm:$0xff] }
 0x368   : > { %2788 = vmatprep.mubr.bf16.mxu0 %v11493_v42  ;;  %5817 = vmatprep.mubr.bf16.mxu1 %v11493_v42  ;;  %v2887_v9 = vpack.c.bf16 %v9524_v24, %v9523_v61  ;;  %v9567_v24 = vld [vmem:[%s13347_s25 + $0x34] sm:$0xff] }
 0x36f   : > { %9510 = vmatmul.mubr.msk.bf16.gmra.mrb[32].mxu0 %vm2171_vm5, %v2591_v1  ;;  %9982 = vmatmul.mubr.msk.bf16.gmra.mrb[32].mxu1 %vm2171_vm5, %v5621_v47  ;;  %v5916_v1 = vpack.c.bf16 %v9996_v28, %v9995_v58  ;;  %v9525_v47 = vld [vmem:[%s13347_s25 + $0x63] sm:$0xff]  ;;  %v10039_v28 = vld [vmem:[%s13347_s25 + $0x178] sm:$0xff] }
 0x370   : > { %2798 = vmatprep.mubr.bf16.mxu0 %v11493_v42  ;;  %5827 = vmatprep.mubr.bf16.mxu1 %v11493_v42  ;;  %v2888_v6 = vpack.c.bf16 %v9526_v51, %v9525_v47  ;;  %v9568_v58 = vld [vmem:[%s13347_s25 + $0x3c] sm:$0xff]  ;;  %v9569_v51 = vld [vmem:[%s13347_s25 + $0x44] sm:$0xff] }
 0x377   : > { %9511 = vmatmul.mubr.msk.bf16.gmra.mrb[36].mxu0 %vm2171_vm5, %v2592_v29  ;;  %9983 = vmatmul.mubr.msk.bf16.gmra.mrb[36].mxu1 %vm2171_vm5, %v5622_v5  ;;  %v5917_v29 = vpack.c.bf16 %v9998_v16, %v9997_v44  ;;  %v9527_v5 = vld [vmem:[%s13347_s25 + $0x73] sm:$0xff]  ;;  %v10041_v16 = vld [vmem:[%s13347_s25 + $0x188] sm:$0xff] }
 0x378   : > { %2808 = vmatprep.mubr.bf16.mxu0 %v11493_v42  ;;  %5837 = vmatprep.mubr.bf16.mxu1 %v11493_v42  ;;  %v9570_v44 = vld [vmem:[%s13347_s25 + $0x4c] sm:$0xff] }
 0x37f   : > { %9512 = vmatmul.mubr.msk.bf16.gmra.mrb[48].mxu0 %vm2171_vm5, %v2593_v8  ;;  %9984 = vmatmul.mubr.msk.bf16.gmra.mrb[48].mxu1 %vm2171_vm5, %v5623_v7  ;;  %v10000_v8 = vld [vmem:[%s13347_s25 + $0x1bf] sm:$0xff]  ;;  %v2889_v7 = vpack.c.bf16 %v9528_v38, %v9527_v5 }
 0x380   : > { %3007 = vmatprep.mubr.bf16.mxu0 %v11493_v42  ;;  %6035 = vmatprep.mubr.bf16.mxu1 %v11493_v42  ;;  %v5918_v23 = vpack.c.bf16 %v10000_v8, %v9999_v33 }
 0x387   : > { %9550 = vmatmul.mubr.msk.bf16.vlgmr.msra.gmra.mrb[0].mxu0 %vm2171_vm5, %v2882_v11  ;;  %10022 = vmatmul.mubr.msk.bf16.vlgmr.msra.gmra.mrb[0].mxu1 %vm2171_vm5, %v5911_v54  ;;  %v10002_v11 = vld [vmem:[%s13347_s25 + $0x1cf] sm:$0xff]  ;;  %v2890_v54 = vpack.c.bf16 %v9530_v3, %v9529_v20 }
 0x388   : > { %3275 = vmatpush1.bf16.msra.mxu0 %v11404_v56  ;;  %6302 = vmatpush1.bf16.msra.mxu1 %v11404_v56  ;;  %v5919_v56 = vpack.c.bf16 %v10002_v11, %v10001_v25 }
 0x389   : > { %3017 = vmatprep.mubr.bf16.mxu0 %v11493_v42  ;;  %6045 = vmatprep.mubr.bf16.mxu1 %v11493_v42 }
 0x38a   : > { %3276 = vmatprep.subr.bf16.mxu0 %v11409_v60  ;;  %6303 = vmatprep.subr.bf16.mxu1 %v11409_v60  ;;  %v9531_v60 = vld [vmem:[%s13347_s25 + $0x93] sm:$0xff] }
 0x38b   : > { %v2891_v59 = vpack.c.bf16 %v9532_v62, %v9531_v60  ;;  %v10044_v60 = vld [vmem:[%s13347_s25 + $0x1a0] sm:$0xff] }
 0x38c   : > { %3277 = vmatpush1.bf16.msra.mxu0 %v11407_v31  ;;  %6304 = vmatpush1.bf16.msra.mxu1 %v11407_v31  ;;  %v5920_v31 = vpack.c.bf16 %v10004_v40, %v10003_v2  ;;  %v9573_v40 = vld [vmem:[%s13347_s25 + $0x64] sm:$0xff] }
 0x38d   : > { %3278 = vmatprep.subr.bf16.mxu0 %v11412_v30  ;;  %6305 = vmatprep.subr.bf16.mxu1 %v11412_v30  ;;  %v9533_v30 = vld [vmem:[%s13347_s25 + $0xa3] sm:$0x3] }
 0x38f   : > { %9551 = vmatmul.mubr.msk.bf16.gmra.mrb[4].mxu0 %vm2171_vm5, %v2883_v53  ;;  %10023 = vmatmul.mubr.msk.bf16.gmra.mrb[4].mxu1 %vm2171_vm5, %v5912_v12  ;;  %v10005_v53 = vld [vmem:[%s13347_s25 + $0x1e7] sm:$0x3]  ;;  %v2892_v12 = vpack.c.bf16 %v9533_v30, %v9533_v30  ;;  %v10046_v30 = vld [vmem:[%s13347_s25 + $0x1b0] sm:$0xff] }
 0x390   : > { %3027 = vmatprep.mubr.bf16.mxu0 %v11493_v42  ;;  %6055 = vmatprep.mubr.bf16.mxu1 %v11493_v42 }
 0x391   : > { %3279 = vmatpush1.bf16.msra.mxu0 %v11410_v36  ;;  %6306 = vmatpush1.bf16.msra.mxu1 %v11410_v36  ;;  %v5921_v36 = vpack.c.bf16 %v10005_v53, %v10005_v53 }
 0x392   : > { %3280 = vmatprep.subr.bf16.mxu0 %v11415_v50  ;;  %6307 = vmatprep.subr.bf16.mxu1 %v11415_v50  ;;  %v9561_v50 = vld [vmem:[%s13347_s25 + $0x4] sm:$0xff] }
 0x393   : > { %v3181_v41 = vpack.c.bf16 %v9562_v26, %v9561_v50  ;;  %v9576_v50 = vld [vmem:[%s13347_s25 + $0x7c] sm:$0xff] }
 0x394   : > { %v10047_v26 = vld [vmem:[%s13347_s25 + $0x1b8] sm:$0xff] }
 0x395   : > { %3281 = vmatpush1.bf16.msra.mxu0 %v11413_v32  ;;  %6308 = vmatpush1.bf16.msra.mxu1 %v11413_v32  ;;  %v6209_v32 = vpack.c.bf16 %v10034_v52, %v10033_v48  ;;  %v10048_v48 = vld [vmem:[%s13347_s25 + $0x1c0] sm:$0xff] }
 0x396   : > { %3573 = vmatprep.subr.bf16.mxu0 %v11418_v22  ;;  %6599 = vmatprep.subr.bf16.mxu1 %v11418_v22  ;;  %v11416_v22 = vld [vmem:[%s11566_s19 + $0x140] ss:$8 sps:$4 sm:$0xff]  }
 0x397   : > { %9552 = vmatmul.mubr.msk.bf16.gmra.mrb[8].mxu0 %vm2171_vm5, %v2884_v10  ;;  %10024 = vmatmul.mubr.msk.bf16.gmra.mrb[8].mxu1 %vm2171_vm5, %v5913_v46  ;;  %v11421_v10 = vld [vmem:[%s11566_s19 + $0x154] ss:$8 sps:$4 sm:$0xff]  }
 0x398   : > { %3037 = vmatprep.mubr.bf16.mxu0 %v11493_v42  ;;  %6065 = vmatprep.mubr.bf16.mxu1 %v11493_v42  ;;  %v9563_v46 = vld [vmem:[%s13347_s25 + $0x14] sm:$0xff] }
 0x39f   : > { %9553 = vmatmul.mubr.msk.bf16.gmra.mrb[12].mxu0 %vm2171_vm5, %v2885_v34  ;;  %10025 = vmatmul.mubr.msk.bf16.gmra.mrb[12].mxu1 %vm2171_vm5, %v5914_v0  ;;  %v11424_v34 = vld [vmem:[%s11566_s19 + $0x164] ss:$8 sps:$4 sm:$0xff]   ;;  %v3182_v0 = vpack.c.bf16 %v9564_v57, %v9563_v46  ;;  %v10050_v46 = vld [vmem:[%s13347_s25 + $0x1d0] sm:$0xff] }
 0x3a0   : > { %3047 = vmatprep.mubr.bf16.mxu0 %v11493_v42  ;;  %6075 = vmatprep.mubr.bf16.mxu1 %v11493_v42 }
 0x3a2   : > { %v13676_v19 = vpop.f32.mrb[40].mxu0  ;;  %v13678_v13 = vpop.f32.mrb[40].mxu1 }
 0x3a3   : > { %v13680_v63 = vpop.f32.mrb[41].mxu0  ;;  %v13682_v17 = vpop.f32.mrb[41].mxu1 }
 0x3a4   : > { %v2343_v18 = vpop.f32.mrb[42].mxu0  ;;  %v5373_v39 = vpop.f32.mrb[42].mxu1 }
 0x3a5   : > { %v2344_v35 = vpop.f32.mrb[43].mxu0  ;;  %v5374_v37 = vpop.f32.mrb[43].mxu1  ;;  %v10038_v18 = vld [vmem:[%s13347_s25 + $0x170] sm:$0xff] }
 0x3a6   : > { %v11425_v39 = vld [vmem:[%s11566_s19 + $0x170] ss:$8 sps:$4 sm:$0xff]   ;;  %v11430_v35 = vld [vmem:[%s11566_s19 + $0x184] ss:$8 sps:$4 sm:$0xff]  }
 0x3a7   : > { %9554 = vmatmul.mubr.msk.bf16.gmra.mrb[16].mxu0 %vm2171_vm5, %v2886_v15  ;;  %10026 = vmatmul.mubr.msk.bf16.gmra.mrb[16].mxu1 %vm2171_vm5, %v5915_v21  ;;  %v9566_v15 = vld [vmem:[%s13347_s25 + $0x2c] sm:$0xff] }
 0x3a8   : > { %3057 = vmatprep.mubr.bf16.mxu0 %v11493_v42  ;;  %6085 = vmatprep.mubr.bf16.mxu1 %v11493_v42  ;;  %v10037_v21 = vld [vmem:[%s13347_s25 + $0x168] sm:$0xff]  ;;  %v3183_v37 = vpack.c.bf16 %v9566_v15, %v9565_v55 }
 0x3a9   : > { %v6211_v61 = vpack.c.bf16 %v10038_v18, %v10037_v21  ;;  %v10053_v55 = vld [vmem:[%s13347_s25 + $0x1e8] sm:$0x3] }
 0x3aa   : > { %v6219_v21 = vpack.c.bf16 %v10053_v55, %v10053_v55  ;;  %v9609_v18 = vld [vmem:[%s13347_s25 + $0x5] sm:$0xff] }
 0x3af   : > { %9555 = vmatmul.mubr.msk.bf16.gmra.mrb[20].mxu0 %vm2171_vm5, %v2887_v9  ;;  %10027 = vmatmul.mubr.msk.bf16.gmra.mrb[20].mxu1 %vm2171_vm5, %v5916_v1  ;;  %v10040_v9 = vld [vmem:[%s13347_s25 + $0x180] sm:$0xff]  ;;  %v3184_v1 = vpack.c.bf16 %v9568_v58, %v9567_v24 }
 0x3b0   : > { %3067 = vmatprep.mubr.bf16.mxu0 %v11493_v42  ;;  %6095 = vmatprep.mubr.bf16.mxu1 %v11493_v42  ;;  %v6212_v47 = vpack.c.bf16 %v10040_v9, %v10039_v28  ;;  %v11428_v58 = vld [vmem:[%s11566_s19 + $0x180] ss:$8 sps:$4 sm:$0xff]   ;;  %v11433_v28 = vld [vmem:[%s11566_s19 + $0x194] ss:$8 sps:$4 sm:$0xff]  }
 0x3b1   : > { %v9611_v9 = vld [vmem:[%s13347_s25 + $0x15] sm:$0xff] }
 0x3b7   : > { %9556 = vmatmul.mubr.msk.bf16.gmra.mrb[24].mxu0 %vm2171_vm5, %v2888_v6  ;;  %10028 = vmatmul.mubr.msk.bf16.gmra.mrb[24].mxu1 %vm2171_vm5, %v5917_v29  ;;  %v10042_v6 = vld [vmem:[%s13347_s25 + $0x190] sm:$0xff] }
 0x3b8   : > { %3077 = vmatprep.mubr.bf16.mxu0 %v11493_v42  ;;  %6105 = vmatprep.mubr.bf16.mxu1 %v11493_v42  ;;  %v6213_v20 = vpack.c.bf16 %v10042_v6, %v10041_v16  ;;  %v11436_v16 = vld [vmem:[%s11566_s19 + $0x1a4] ss:$8 sps:$4 sm:$0xff]  }
 0x3bf   : > { %9557 = vmatmul.mubr.msk.bf16.gmra.mrb[28].mxu0 %vm2171_vm5, %v2889_v7  ;;  %10029 = vmatmul.mubr.msk.bf16.gmra.mrb[28].mxu1 %vm2171_vm5, %v5918_v23  ;;  %v3185_v23 = vpack.c.bf16 %v9570_v44, %v9569_v51  ;;  %v10084_v51 = vld [vmem:[%s13347_s25 + $0x161] sm:$0xff]  ;;  %v11431_v44 = vld [vmem:[%s11566_s19 + $0x190] ss:$8 sps:$4 sm:$0xff]  }
 0x3c0   : > { %3087 = vmatprep.mubr.bf16.mxu0 %v11493_v42  ;;  %6115 = vmatprep.mubr.bf16.mxu1 %v11493_v42 }
 0x3c7   : > { %9558 = vmatmul.mubr.msk.bf16.gmra.mrb[32].mxu0 %vm2171_vm5, %v2890_v54  ;;  %10030 = vmatmul.mubr.msk.bf16.gmra.mrb[32].mxu1 %vm2171_vm5, %v5919_v56 }
 0x3c8   : > { %3097 = vmatprep.mubr.bf16.mxu0 %v11493_v42  ;;  %6125 = vmatprep.mubr.bf16.mxu1 %v11493_v42 }
 0x3cf   : > { %9559 = vmatmul.mubr.msk.bf16.gmra.mrb[36].mxu0 %vm2171_vm5, %v2891_v59  ;;  %10031 = vmatmul.mubr.msk.bf16.gmra.mrb[36].mxu1 %vm2171_vm5, %v5920_v31  ;;  %v9574_v59 = vld [vmem:[%s13347_s25 + $0x6c] sm:$0xff] }
 0x3d0   : > { %3107 = vmatprep.mubr.bf16.mxu0 %v11493_v42  ;;  %6135 = vmatprep.mubr.bf16.mxu1 %v11493_v42  ;;  %v10045_v31 = vld [vmem:[%s13347_s25 + $0x1a8] sm:$0xff]  ;;  %v3187_v53 = vpack.c.bf16 %v9574_v59, %v9573_v40 }
 0x3d1   : > { %v9617_v59 = vld [vmem:[%s13347_s25 + $0x45] sm:$0xff] }
 0x3d7   : > { %9560 = vmatmul.mubr.msk.bf16.gmra.mrb[52].mxu0 %vm2171_vm5, %v2892_v12  ;;  %10032 = vmatmul.mubr.msk.bf16.gmra.mrb[52].mxu1 %vm2171_vm5, %v5921_v36  ;;  %v6215_v12 = vpack.c.bf16 %v10046_v30, %v10045_v31  ;;  %v9575_v36 = vld [vmem:[%s13347_s25 + $0x74] sm:$0xff]  ;;  %v10089_v30 = vld [vmem:[%s13347_s25 + $0x189] sm:$0xff] }
 0x3d8   : > { %3306 = vmatprep.mubr.bf16.mxu0 %v11493_v42  ;;  %6333 = vmatprep.mubr.bf16.mxu1 %v11493_v42  ;;  %v3188_v52 = vpack.c.bf16 %v9576_v50, %v9575_v36  ;;  %v9618_v31 = vld [vmem:[%s13347_s25 + $0x4d] sm:$0xff] }
 0x3df   : > { %9598 = vmatmul.mubr.msk.bf16.vlgmr.msra.gmra.mrb[0].mxu0 %vm2171_vm5, %v3181_v41  ;;  %10070 = vmatmul.mubr.msk.bf16.vlgmr.msra.gmra.mrb[0].mxu1 %vm2171_vm5, %v6209_v32  ;;  %v6216_v41 = vpack.c.bf16 %v10048_v48, %v10047_v26  ;;  %v9577_v32 = vld [vmem:[%s13347_s25 + $0x84] sm:$0xff] }
 0x3e0   : > { %3574 = vmatpush1.bf16.msra.mxu0 %v11416_v22  ;;  %6600 = vmatpush1.bf16.msra.mxu1 %v11416_v22  ;;  %v9578_v22 = vld [vmem:[%s13347_s25 + $0x8c] sm:$0xff] }
 0x3e1   : > { %3316 = vmatprep.mubr.bf16.mxu0 %v11493_v42  ;;  %6343 = vmatprep.mubr.bf16.mxu1 %v11493_v42  ;;  %v3189_v57 = vpack.c.bf16 %v9578_v22, %v9577_v32 }
 0x3e2   : > { %3575 = vmatprep.subr.bf16.mxu0 %v11421_v10  ;;  %6601 = vmatprep.subr.bf16.mxu1 %v11421_v10  ;;  %v10049_v10 = vld [vmem:[%s13347_s25 + $0x1c8] sm:$0xff] }
 0x3e3   : > { %v6217_v14 = vpack.c.bf16 %v10050_v46, %v10049_v10 }
 0x3e4   : > { %3576 = vmatpush1.bf16.msra.mxu0 %v11419_v45  ;;  %6602 = vmatpush1.bf16.msra.mxu1 %v11419_v45  ;;  %v9580_v45 = vld [vmem:[%s13347_s25 + $0x9c] sm:$0xff] }
 0x3e5   : > { %3577 = vmatprep.subr.bf16.mxu0 %v11424_v34  ;;  %6603 = vmatprep.subr.bf16.mxu1 %v11424_v34  ;;  %v10051_v34 = vld [vmem:[%s13347_s25 + $0x1d8] sm:$0xff] }
 0x3e7   : > { %9599 = vmatmul.mubr.msk.bf16.gmra.mrb[4].mxu0 %vm2171_vm5, %v3182_v0  ;;  %10071 = vmatmul.mubr.msk.bf16.gmra.mrb[4].mxu1 %vm2171_vm5, %v6210_v49  ;;  %v10052_v0 = vld [vmem:[%s13347_s25 + $0x1e0] sm:$0xff]  ;;  %v3190_v49 = vpack.c.bf16 %v9580_v45, %v9579_v4 }
 0x3e8   : > { %3326 = vmatprep.mubr.bf16.mxu0 %v11493_v42  ;;  %6353 = vmatprep.mubr.bf16.mxu1 %v11493_v42  ;;  %v10092_v4 = vld [vmem:[%s13347_s25 + $0x1a1] sm:$0xff] }
 0x3e9   : > { %3578 = vmatpush1.bf16.msra.mxu0 %v11422_v43  ;;  %6604 = vmatpush1.bf16.msra.mxu1 %v11422_v43  ;;  %v6218_v43 = vpack.c.bf16 %v10052_v0, %v10051_v34  ;;  %v9621_v0 = vld [vmem:[%s13347_s25 + $0x65] sm:$0xff] }
 0x3ea   : > { %3579 = vmatprep.subr.bf16.mxu0 %v11427_v27  ;;  %6605 = vmatprep.subr.bf16.mxu1 %v11427_v27  ;;  %v9581_v27 = vld [vmem:[%s13347_s25 + $0xa4] sm:$0x3] }
 0x3eb   : > { %v3191_v15 = vpack.c.bf16 %v9581_v27, %v9581_v27  ;;  %v10094_v27 = vld [vmem:[%s13347_s25 + $0x1b1] sm:$0xff] }
 0x3ed   : > { %3580 = vmatpush1.bf16.msra.mxu0 %v11425_v39  ;;  %6606 = vmatpush1.bf16.msra.mxu1 %v11425_v39  ;;  %v9610_v39 = vld [vmem:[%s13347_s25 + $0xd] sm:$0xff] }
 0x3ee   : > { %3872 = vmatprep.subr.bf16.mxu0 %v11430_v35  ;;  %6897 = vmatprep.subr.bf16.mxu1 %v11430_v35  ;;  %v10081_v35 = vld [vmem:[%s13347_s25 + $0x149] sm:$0xff] }
 0x3ef   : > { %9600 = vmatmul.mubr.msk.bf16.gmra.mrb[8].mxu0 %vm2171_vm5, %v3183_v37  ;;  %10072 = vmatmul.mubr.msk.bf16.gmra.mrb[8].mxu1 %vm2171_vm5, %v6211_v61  ;;  %v10082_v37 = vld [vmem:[%s13347_s25 + $0x151] sm:$0xff]  ;;  %v3480_v61 = vpack.c.bf16 %v9610_v39, %v9609_v18  ;;  %v9624_v18 = vld [vmem:[%s13347_s25 + $0x7d] sm:$0xff] }
 0x3f0   : > { %3336 = vmatprep.mubr.bf16.mxu0 %v11493_v42  ;;  %6363 = vmatprep.mubr.bf16.mxu1 %v11493_v42  ;;  %v6507_v24 = vpack.c.bf16 %v10082_v37, %v10081_v35  ;;  %v10095_v39 = vld [vmem:[%s13347_s25 + $0x1b9] sm:$0xff]  ;;  %v10096_v35 = vld [vmem:[%s13347_s25 + $0x1c1] sm:$0xff] }
 0x3f7   : > { %9601 = vmatmul.mubr.msk.bf16.gmra.mrb[12].mxu0 %vm2171_vm5, %v3184_v1  ;;  %10073 = vmatmul.mubr.msk.bf16.gmra.mrb[12].mxu1 %vm2171_vm5, %v6212_v47  ;;  %v9612_v1 = vld [vmem:[%s13347_s25 + $0x1d] sm:$0xff] }
 0x3f8   : > { %3346 = vmatprep.mubr.bf16.mxu0 %v11493_v42  ;;  %6373 = vmatprep.mubr.bf16.mxu1 %v11493_v42  ;;  %v10083_v47 = vld [vmem:[%s13347_s25 + $0x159] sm:$0xff]  ;;  %v3481_v6 = vpack.c.bf16 %v9612_v1, %v9611_v9  ;;  %v10098_v9 = vld [vmem:[%s13347_s25 + $0x1d1] sm:$0xff] }
 0x3fa   : > { %v2553_v29 = vpop.f32.mrb[44].mxu0  ;;  %v5583_v5 = vpop.f32.mrb[44].mxu1 }
 0x3fb   : > { %v13779_v38 = vadd.f32 %v2553_v29, %v13676_v19  ;;  %v13782_v33 = vadd.f32 %v5583_v5, %v13678_v13  ;;  %v2555_v8 = vpop.f32.mrb[45].mxu0  ;;  %v5585_v7 = vpop.f32.mrb[45].mxu1  ;;  %v9571_v13 = vld [vmem:[%s13347_s25 + $0x54] sm:$0xff]  ;;  %v6508_v29 = vpack.c.bf16 %v10084_v51, %v10083_v47  ;;  %v11434_v5 = vld [vmem:[%s11566_s19 + $0x1a0] ss:$8 sps:$4 sm:$0xff]  }
 0x3fc   : > { %v13785_v3 = vadd.f32 %v2555_v8, %v13680_v63  ;;  %v13788_v25 = vadd.f32 %v5585_v7, %v13682_v17  ;;  %v2557_v11 = vpop.f32.mrb[46].mxu0  ;;  %v5587_v19 = vpop.f32.mrb[46].mxu1  ;;  %v9572_v63 = vld [vmem:[%s13347_s25 + $0x5c] sm:$0xff]  ;;  %v9613_v7 = vld [vmem:[%s13347_s25 + $0x25] sm:$0xff] }
 0x3fd   : > { %v2558_v54 = vpop.f32.mrb[47].mxu0  ;;  %v5588_v56 = vpop.f32.mrb[47].mxu1  ;;  %v10043_v17 = vld [vmem:[%s13347_s25 + $0x198] sm:$0xff]  ;;  %v3186_v62 = vpack.c.bf16 %v9572_v63, %v9571_v13 }
 0x3fe   : > { %v6214_v2 = vpack.c.bf16 %v10044_v60, %v10043_v17  ;;  %v11439_v8 = vld [vmem:[%s11566_s19 + $0x1b4] ss:$8 sps:$4 sm:$0xff]   ;;  %v11437_v19 = vld [vmem:[%s11566_s19 + $0x1b0] ss:$8 sps:$4 sm:$0xff]   ;;  %v11442_v54 = vld [vmem:[%s11566_s19 + $0x1c4] ss:$8 sps:$4 sm:$0xff]  }
 0x3ff   : > { %9602 = vmatmul.mubr.msk.bf16.gmra.mrb[16].mxu0 %vm2171_vm5, %v3185_v23  ;;  %10074 = vmatmul.mubr.msk.bf16.gmra.mrb[16].mxu1 %vm2171_vm5, %v6213_v20  ;;  %v9614_v23 = vld [vmem:[%s13347_s25 + $0x2d] sm:$0xff]  ;;  %v9615_v63 = vld [vmem:[%s13347_s25 + $0x35] sm:$0xff]  ;;  %v9616_v17 = vld [vmem:[%s13347_s25 + $0x3d] sm:$0xff] }
 0x400   : > { %3356 = vmatprep.mubr.bf16.mxu0 %v11493_v42  ;;  %6383 = vmatprep.mubr.bf16.mxu1 %v11493_v42  ;;  %v10085_v20 = vld [vmem:[%s13347_s25 + $0x169] sm:$0xff]  ;;  %v10086_v11 = vld [vmem:[%s13347_s25 + $0x171] sm:$0xff]  ;;  %v3482_v56 = vpack.c.bf16 %v9614_v23, %v9613_v7  ;;  %v10087_v60 = vld [vmem:[%s13347_s25 + $0x179] sm:$0xff] }
 0x401   : > { %v6509_v13 = vpack.c.bf16 %v10086_v11, %v10085_v20  ;;  %v9627_v51 = vld [vmem:[%s13347_s25 + $0x95] sm:$0xff]  ;;  %v10101_v7 = vld [vmem:[%s13347_s25 + $0x1e9] sm:$0x3] }
 0x402   : > { %v6517_v20 = vpack.c.bf16 %v10101_v7, %v10101_v7  ;;  %v9657_v11 = vld [vmem:[%s13347_s25 + $0x6] sm:$0xff] }
 0x407   : > { %9603 = vmatmul.mubr.msk.bf16.gmra.mrb[20].mxu0 %vm2171_vm5, %v3186_v62  ;;  %10075 = vmatmul.mubr.msk.bf16.gmra.mrb[20].mxu1 %vm2171_vm5, %v6214_v2  ;;  %v10088_v62 = vld [vmem:[%s13347_s25 + $0x181] sm:$0xff]  ;;  %v3483_v2 = vpack.c.bf16 %v9616_v17, %v9615_v63 }
 0x408   : > { %3366 = vmatprep.mubr.bf16.mxu0 %v11493_v42  ;;  %6393 = vmatprep.mubr.bf16.mxu1 %v11493_v42  ;;  %v6510_v40 = vpack.c.bf16 %v10088_v62, %v10087_v60  ;;  %v11440_v17 = vld [vmem:[%s11566_s19 + $0x1c0] ss:$8 sps:$4 sm:$0xff]   ;;  %v11445_v60 = vld [vmem:[%s11566_s19 + $0x1d4] ss:$8 sps:$4 sm:$0xff]  }
 0x409   : > { %v9659_v62 = vld [vmem:[%s13347_s25 + $0x16] sm:$0xff] }
 0x40f   : > { %9604 = vmatmul.mubr.msk.bf16.gmra.mrb[24].mxu0 %vm2171_vm5, %v3187_v53  ;;  %10076 = vmatmul.mubr.msk.bf16.gmra.mrb[24].mxu1 %vm2171_vm5, %v6215_v12  ;;  %v10090_v53 = vld [vmem:[%s13347_s25 + $0x191] sm:$0xff] }
 0x410   : > { %3376 = vmatprep.mubr.bf16.mxu0 %v11493_v42  ;;  %6403 = vmatprep.mubr.bf16.mxu1 %v11493_v42  ;;  %v6511_v32 = vpack.c.bf16 %v10090_v53, %v10089_v30  ;;  %v11448_v30 = vld [vmem:[%s11566_s19 + $0x1e4] ss:$8 sps:$4 sm:$0xff]  }
 0x417   : > { %9605 = vmatmul.mubr.msk.bf16.gmra.mrb[28].mxu0 %vm2171_vm5, %v3188_v52  ;;  %10077 = vmatmul.mubr.msk.bf16.gmra.mrb[28].mxu1 %vm2171_vm5, %v6216_v41  ;;  %v3484_v41 = vpack.c.bf16 %v9618_v31, %v9617_v59  ;;  %v10132_v59 = vld [vmem:[%s13347_s25 + $0x162] sm:$0xff]  ;;  %v11443_v31 = vld [vmem:[%s11566_s19 + $0x1d0] ss:$8 sps:$4 sm:$0xff]  }
 0x418   : > { %3386 = vmatprep.mubr.bf16.mxu0 %v11493_v42  ;;  %6413 = vmatprep.mubr.bf16.mxu1 %v11493_v42 }
 0x41f   : > { %9606 = vmatmul.mubr.msk.bf16.gmra.mrb[32].mxu0 %vm2171_vm5, %v3189_v57  ;;  %10078 = vmatmul.mubr.msk.bf16.gmra.mrb[32].mxu1 %vm2171_vm5, %v6217_v14 }
 0x420   : > { %3396 = vmatprep.mubr.bf16.mxu0 %v11493_v42  ;;  %6423 = vmatprep.mubr.bf16.mxu1 %v11493_v42 }
 0x427   : > { %9607 = vmatmul.mubr.msk.bf16.gmra.mrb[36].mxu0 %vm2171_vm5, %v3190_v49  ;;  %10079 = vmatmul.mubr.msk.bf16.gmra.mrb[36].mxu1 %vm2171_vm5, %v6218_v43  ;;  %v9622_v49 = vld [vmem:[%s13347_s25 + $0x6d] sm:$0xff] }
 0x428   : > { %3406 = vmatprep.mubr.bf16.mxu0 %v11493_v42  ;;  %6433 = vmatprep.mubr.bf16.mxu1 %v11493_v42  ;;  %v10093_v43 = vld [vmem:[%s13347_s25 + $0x1a9] sm:$0xff]  ;;  %v3486_v55 = vpack.c.bf16 %v9622_v49, %v9621_v0 }
 0x429   : > { %v9665_v49 = vld [vmem:[%s13347_s25 + $0x46] sm:$0xff] }
 0x42f   : > { %9608 = vmatmul.mubr.msk.bf16.gmra.mrb[56].mxu0 %vm2171_vm5, %v3191_v15  ;;  %10080 = vmatmul.mubr.msk.bf16.gmra.mrb[56].mxu1 %vm2171_vm5, %v6219_v21  ;;  %v6513_v15 = vpack.c.bf16 %v10094_v27, %v10093_v43  ;;  %v9623_v21 = vld [vmem:[%s13347_s25 + $0x75] sm:$0xff]  ;;  %v10137_v27 = vld [vmem:[%s13347_s25 + $0x18a] sm:$0xff] }
 0x430   : > { %3605 = vmatprep.mubr.bf16.mxu0 %v11493_v42  ;;  %6631 = vmatprep.mubr.bf16.mxu1 %v11493_v42  ;;  %v3487_v37 = vpack.c.bf16 %v9624_v18, %v9623_v21  ;;  %v9666_v43 = vld [vmem:[%s13347_s25 + $0x4e] sm:$0xff] }
 0x437   : > { %9646 = vmatmul.mubr.msk.bf16.vlgmr.msra.gmra.mrb[0].mxu0 %vm2171_vm5, %v3480_v61  ;;  %10118 = vmatmul.mubr.msk.bf16.vlgmr.msra.gmra.mrb[0].mxu1 %vm2171_vm5, %v6507_v24  ;;  %v6514_v61 = vpack.c.bf16 %v10096_v35, %v10095_v39  ;;  %v9625_v24 = vld [vmem:[%s13347_s25 + $0x85] sm:$0xff] }
 0x438   : > { %3873 = vmatpush1.bf16.msra.mxu0 %v11428_v58  ;;  %6898 = vmatpush1.bf16.msra.mxu1 %v11428_v58  ;;  %v9626_v58 = vld [vmem:[%s13347_s25 + $0x8d] sm:$0xff] }
 0x439   : > { %3615 = vmatprep.mubr.bf16.mxu0 %v11493_v42  ;;  %6641 = vmatprep.mubr.bf16.mxu1 %v11493_v42  ;;  %v3488_v1 = vpack.c.bf16 %v9626_v58, %v9625_v24 }
 0x43a   : > { %3874 = vmatprep.subr.bf16.mxu0 %v11433_v28  ;;  %6899 = vmatprep.subr.bf16.mxu1 %v11433_v28  ;;  %v10097_v28 = vld [vmem:[%s13347_s25 + $0x1c9] sm:$0xff] }
 0x43b   : > { %v6515_v47 = vpack.c.bf16 %v10098_v9, %v10097_v28 }
 0x43c   : > { %3875 = vmatpush1.bf16.msra.mxu0 %v11431_v44  ;;  %6900 = vmatpush1.bf16.msra.mxu1 %v11431_v44  ;;  %v9628_v44 = vld [vmem:[%s13347_s25 + $0x9d] sm:$0xff] }
 0x43d   : > { %3876 = vmatprep.subr.bf16.mxu0 %v11436_v16  ;;  %6901 = vmatprep.subr.bf16.mxu1 %v11436_v16  ;;  %v10099_v16 = vld [vmem:[%s13347_s25 + $0x1d9] sm:$0xff] }
 0x43f   : > { %9647 = vmatmul.mubr.msk.bf16.gmra.mrb[4].mxu0 %vm2171_vm5, %v3481_v6  ;;  %10119 = vmatmul.mubr.msk.bf16.gmra.mrb[4].mxu1 %vm2171_vm5, %v6508_v29  ;;  %v10100_v6 = vld [vmem:[%s13347_s25 + $0x1e1] sm:$0xff]  ;;  %v3489_v29 = vpack.c.bf16 %v9628_v44, %v9627_v51 }
 0x440   : > { %3625 = vmatprep.mubr.bf16.mxu0 %v11493_v42  ;;  %6651 = vmatprep.mubr.bf16.mxu1 %v11493_v42  ;;  %v10140_v51 = vld [vmem:[%s13347_s25 + $0x1a2] sm:$0xff] }
 0x441   : > { %3877 = vmatpush1.bf16.msra.mxu0 %v11434_v5  ;;  %6902 = vmatpush1.bf16.msra.mxu1 %v11434_v5  ;;  %v6516_v5 = vpack.c.bf16 %v10100_v6, %v10099_v16  ;;  %v9669_v6 = vld [vmem:[%s13347_s25 + $0x66] sm:$0xff] }
 0x442   : > { %3878 = vmatprep.subr.bf16.mxu0 %v11439_v8  ;;  %6903 = vmatprep.subr.bf16.mxu1 %v11439_v8  ;;  %v9629_v8 = vld [vmem:[%s13347_s25 + $0xa5] sm:$0x3] }
 0x443   : > { %v3490_v23 = vpack.c.bf16 %v9629_v8, %v9629_v8  ;;  %v10142_v8 = vld [vmem:[%s13347_s25 + $0x1b2] sm:$0xff] }
 0x445   : > { %3879 = vmatpush1.bf16.msra.mxu0 %v11437_v19  ;;  %6904 = vmatpush1.bf16.msra.mxu1 %v11437_v19  ;;  %v9658_v19 = vld [vmem:[%s13347_s25 + $0xe] sm:$0xff] }
 0x446   : > { %4171 = vmatprep.subr.bf16.mxu0 %v11442_v54  ;;  %7195 = vmatprep.subr.bf16.mxu1 %v11442_v54  ;;  %v10129_v54 = vld [vmem:[%s13347_s25 + $0x14a] sm:$0xff] }
 0x447   : > { %9648 = vmatmul.mubr.msk.bf16.gmra.mrb[8].mxu0 %vm2171_vm5, %v3482_v56  ;;  %10120 = vmatmul.mubr.msk.bf16.gmra.mrb[8].mxu1 %vm2171_vm5, %v6509_v13  ;;  %v10130_v56 = vld [vmem:[%s13347_s25 + $0x152] sm:$0xff]  ;;  %v3779_v13 = vpack.c.bf16 %v9658_v19, %v9657_v11  ;;  %v9672_v11 = vld [vmem:[%s13347_s25 + $0x7e] sm:$0xff] }
 0x448   : > { %3635 = vmatprep.mubr.bf16.mxu0 %v11493_v42  ;;  %6661 = vmatprep.mubr.bf16.mxu1 %v11493_v42  ;;  %v6805_v63 = vpack.c.bf16 %v10130_v56, %v10129_v54  ;;  %v10143_v19 = vld [vmem:[%s13347_s25 + $0x1ba] sm:$0xff]  ;;  %v10144_v54 = vld [vmem:[%s13347_s25 + $0x1c2] sm:$0xff] }
 0x44f   : > { %9649 = vmatmul.mubr.msk.bf16.gmra.mrb[12].mxu0 %vm2171_vm5, %v3483_v2  ;;  %10121 = vmatmul.mubr.msk.bf16.gmra.mrb[12].mxu1 %vm2171_vm5, %v6510_v40  ;;  %v9660_v2 = vld [vmem:[%s13347_s25 + $0x1e] sm:$0xff] }
 0x450   : > { %3645 = vmatprep.mubr.bf16.mxu0 %v11493_v42  ;;  %6671 = vmatprep.mubr.bf16.mxu1 %v11493_v42  ;;  %v10131_v40 = vld [vmem:[%s13347_s25 + $0x15a] sm:$0xff]  ;;  %v3780_v53 = vpack.c.bf16 %v9660_v2, %v9659_v62  ;;  %v10146_v62 = vld [vmem:[%s13347_s25 + $0x1d2] sm:$0xff] }
 0x452   : > { %v2810_v12 = vpop.f32.mrb[48].mxu0  ;;  %v5839_v36 = vpop.f32.mrb[48].mxu1 }
 0x453   : > { %v13885_v50 = vadd.f32 %v2810_v12, %v13779_v38  ;;  %v13888_v26 = vadd.f32 %v5839_v36, %v13782_v33  ;;  %v2812_v48 = vpop.f32.mrb[49].mxu0  ;;  %v5841_v52 = vpop.f32.mrb[49].mxu1  ;;  %v9619_v33 = vld [vmem:[%s13347_s25 + $0x55] sm:$0xff]  ;;  %v6806_v12 = vpack.c.bf16 %v10132_v59, %v10131_v40  ;;  %v11446_v36 = vld [vmem:[%s11566_s19 + $0x1e0] ss:$8 sps:$4 sm:$0xff]  }
 0x454   : > { %v13891_v22 = vadd.f32 %v2812_v48, %v13785_v3  ;;  %v13894_v10 = vadd.f32 %v5841_v52, %v13788_v25  ;;  %v2814_v46 = vpop.f32.mrb[50].mxu0  ;;  %v5843_v38 = vpop.f32.mrb[50].mxu1  ;;  %v9620_v3 = vld [vmem:[%s13347_s25 + $0x5d] sm:$0xff]  ;;  %v9661_v52 = vld [vmem:[%s13347_s25 + $0x26] sm:$0xff] }
 0x455   : > { %v2815_v57 = vpop.f32.mrb[51].mxu0  ;;  %v5844_v14 = vpop.f32.mrb[51].mxu1  ;;  %v10091_v25 = vld [vmem:[%s13347_s25 + $0x199] sm:$0xff]  ;;  %v3485_v45 = vpack.c.bf16 %v9620_v3, %v9619_v33 }
 0x456   : > { %v6512_v34 = vpack.c.bf16 %v10092_v4, %v10091_v25  ;;  %v11451_v48 = vld [vmem:[%s11566_s19 + $0x1f4] ss:$8 sps:$4 sm:$0xff]   ;;  %v11449_v38 = vld [vmem:[%s11566_s19 + $0x1f0] ss:$8 sps:$4 sm:$0xff]   ;;  %v11454_v57 = vld [vmem:[%s11566_s19 + $0x204] ss:$8 sps:$4 sm:$0xff]  }
 0x457   : > { %9650 = vmatmul.mubr.msk.bf16.gmra.mrb[16].mxu0 %vm2171_vm5, %v3484_v41  ;;  %10122 = vmatmul.mubr.msk.bf16.gmra.mrb[16].mxu1 %vm2171_vm5, %v6511_v32  ;;  %v9662_v41 = vld [vmem:[%s13347_s25 + $0x2e] sm:$0xff]  ;;  %v9663_v3 = vld [vmem:[%s13347_s25 + $0x36] sm:$0xff]  ;;  %v9664_v25 = vld [vmem:[%s13347_s25 + $0x3e] sm:$0xff] }
 0x458   : > { %3655 = vmatprep.mubr.bf16.mxu0 %v11493_v42  ;;  %6681 = vmatprep.mubr.bf16.mxu1 %v11493_v42  ;;  %v10133_v32 = vld [vmem:[%s13347_s25 + $0x16a] sm:$0xff]  ;;  %v10134_v46 = vld [vmem:[%s13347_s25 + $0x172] sm:$0xff]  ;;  %v3781_v14 = vpack.c.bf16 %v9662_v41, %v9661_v52  ;;  %v10135_v4 = vld [vmem:[%s13347_s25 + $0x17a] sm:$0xff] }
 0x459   : > { %v6807_v33 = vpack.c.bf16 %v10134_v46, %v10133_v32  ;;  %v9675_v59 = vld [vmem:[%s13347_s25 + $0x96] sm:$0xff]  ;;  %v10149_v52 = vld [vmem:[%s13347_s25 + $0x1ea] sm:$0x3] }
 0x45a   : > { %v6815_v32 = vpack.c.bf16 %v10149_v52, %v10149_v52  ;;  %v9705_v46 = vld [vmem:[%s13347_s25 + $0x7] sm:$0xff] }
 0x45f   : > { %9651 = vmatmul.mubr.msk.bf16.gmra.mrb[20].mxu0 %vm2171_vm5, %v3485_v45  ;;  %10123 = vmatmul.mubr.msk.bf16.gmra.mrb[20].mxu1 %vm2171_vm5, %v6512_v34  ;;  %v10136_v45 = vld [vmem:[%s13347_s25 + $0x182] sm:$0xff]  ;;  %v3782_v34 = vpack.c.bf16 %v9664_v25, %v9663_v3 }
 0x460   : > { %3665 = vmatprep.mubr.bf16.mxu0 %v11493_v42  ;;  %6691 = vmatprep.mubr.bf16.mxu1 %v11493_v42  ;;  %v6808_v0 = vpack.c.bf16 %v10136_v45, %v10135_v4  ;;  %v11452_v25 = vld [vmem:[%s11566_s19 + $0x200] ss:$8 sps:$4 sm:$0xff]   ;;  %v11457_v4 = vld [vmem:[%s11566_s19 + $0x214] ss:$8 sps:$4 sm:$0xff]  }
 0x461   : > { %v9707_v45 = vld [vmem:[%s13347_s25 + $0x17] sm:$0xff] }
 0x467   : > { %9652 = vmatmul.mubr.msk.bf16.gmra.mrb[24].mxu0 %vm2171_vm5, %v3486_v55  ;;  %10124 = vmatmul.mubr.msk.bf16.gmra.mrb[24].mxu1 %vm2171_vm5, %v6513_v15  ;;  %v10138_v55 = vld [vmem:[%s13347_s25 + $0x192] sm:$0xff] }
 0x468   : > { %3675 = vmatprep.mubr.bf16.mxu0 %v11493_v42  ;;  %6701 = vmatprep.mubr.bf16.mxu1 %v11493_v42  ;;  %v6809_v24 = vpack.c.bf16 %v10138_v55, %v10137_v27  ;;  %v11460_v27 = vld [vmem:[%s11566_s19 + $0x224] ss:$8 sps:$4 sm:$0xff]  }
 0x46f   : > { %9653 = vmatmul.mubr.msk.bf16.gmra.mrb[28].mxu0 %vm2171_vm5, %v3487_v37  ;;  %10125 = vmatmul.mubr.msk.bf16.gmra.mrb[28].mxu1 %vm2171_vm5, %v6514_v61  ;;  %v3783_v61 = vpack.c.bf16 %v9666_v43, %v9665_v49  ;;  %v10180_v49 = vld [vmem:[%s13347_s25 + $0x163] sm:$0xff]  ;;  %v11455_v43 = vld [vmem:[%s11566_s19 + $0x210] ss:$8 sps:$4 sm:$0xff]  }
 0x470   : > { %3685 = vmatprep.mubr.bf16.mxu0 %v11493_v42  ;;  %6711 = vmatprep.mubr.bf16.mxu1 %v11493_v42 }
 0x477   : > { %9654 = vmatmul.mubr.msk.bf16.gmra.mrb[32].mxu0 %vm2171_vm5, %v3488_v1  ;;  %10126 = vmatmul.mubr.msk.bf16.gmra.mrb[32].mxu1 %vm2171_vm5, %v6515_v47 }
 0x478   : > { %3695 = vmatprep.mubr.bf16.mxu0 %v11493_v42  ;;  %6721 = vmatprep.mubr.bf16.mxu1 %v11493_v42 }
 0x47f   : > { %9655 = vmatmul.mubr.msk.bf16.gmra.mrb[36].mxu0 %vm2171_vm5, %v3489_v29  ;;  %10127 = vmatmul.mubr.msk.bf16.gmra.mrb[36].mxu1 %vm2171_vm5, %v6516_v5  ;;  %v9670_v29 = vld [vmem:[%s13347_s25 + $0x6e] sm:$0xff] }
 0x480   : > { %3705 = vmatprep.mubr.bf16.mxu0 %v11493_v42  ;;  %6731 = vmatprep.mubr.bf16.mxu1 %v11493_v42  ;;  %v10141_v5 = vld [vmem:[%s13347_s25 + $0x1aa] sm:$0xff]  ;;  %v3785_v7 = vpack.c.bf16 %v9670_v29, %v9669_v6 }
 0x481   : > { %v9713_v29 = vld [vmem:[%s13347_s25 + $0x47] sm:$0xff] }
 0x487   : > { %9656 = vmatmul.mubr.msk.bf16.gmra.mrb[60].mxu0 %vm2171_vm5, %v3490_v23  ;;  %10128 = vmatmul.mubr.msk.bf16.gmra.mrb[60].mxu1 %vm2171_vm5, %v6517_v20  ;;  %v6811_v23 = vpack.c.bf16 %v10142_v8, %v10141_v5  ;;  %v9671_v20 = vld [vmem:[%s13347_s25 + $0x76] sm:$0xff]  ;;  %v10185_v8 = vld [vmem:[%s13347_s25 + $0x18b] sm:$0xff] }
 0x488   : > { %3904 = vmatprep.mubr.bf16.mxu0 %v11493_v42  ;;  %6929 = vmatprep.mubr.bf16.mxu1 %v11493_v42  ;;  %v3786_v56 = vpack.c.bf16 %v9672_v11, %v9671_v20  ;;  %v9714_v5 = vld [vmem:[%s13347_s25 + $0x4f] sm:$0xff] }
 0x48f   : > { %9694 = vmatmul.mubr.msk.bf16.vlgmr.msra.gmra.mrb[0].mxu0 %vm2171_vm5, %v3779_v13  ;;  %10166 = vmatmul.mubr.msk.bf16.vlgmr.msra.gmra.mrb[0].mxu1 %vm2171_vm5, %v6805_v63  ;;  %v6812_v13 = vpack.c.bf16 %v10144_v54, %v10143_v19  ;;  %v9673_v63 = vld [vmem:[%s13347_s25 + $0x86] sm:$0xff] }
 0x490   : > { %4172 = vmatpush1.bf16.msra.mxu0 %v11440_v17  ;;  %7196 = vmatpush1.bf16.msra.mxu1 %v11440_v17  ;;  %v9674_v17 = vld [vmem:[%s13347_s25 + $0x8e] sm:$0xff] }
 0x491   : > { %3914 = vmatprep.mubr.bf16.mxu0 %v11493_v42  ;;  %6939 = vmatprep.mubr.bf16.mxu1 %v11493_v42  ;;  %v3787_v2 = vpack.c.bf16 %v9674_v17, %v9673_v63 }
 0x492   : > { %4173 = vmatprep.subr.bf16.mxu0 %v11445_v60  ;;  %7197 = vmatprep.subr.bf16.mxu1 %v11445_v60  ;;  %v10145_v60 = vld [vmem:[%s13347_s25 + $0x1ca] sm:$0xff] }
 0x493   : > { %v6813_v40 = vpack.c.bf16 %v10146_v62, %v10145_v60 }
 0x494   : > { %4174 = vmatpush1.bf16.msra.mxu0 %v11443_v31  ;;  %7198 = vmatpush1.bf16.msra.mxu1 %v11443_v31  ;;  %v9676_v31 = vld [vmem:[%s13347_s25 + $0x9e] sm:$0xff] }
 0x495   : > { %4175 = vmatprep.subr.bf16.mxu0 %v11448_v30  ;;  %7199 = vmatprep.subr.bf16.mxu1 %v11448_v30  ;;  %v10147_v30 = vld [vmem:[%s13347_s25 + $0x1da] sm:$0xff] }
 0x497   : > { %9695 = vmatmul.mubr.msk.bf16.gmra.mrb[4].mxu0 %vm2171_vm5, %v3780_v53  ;;  %10167 = vmatmul.mubr.msk.bf16.gmra.mrb[4].mxu1 %vm2171_vm5, %v6806_v12  ;;  %v10148_v53 = vld [vmem:[%s13347_s25 + $0x1e2] sm:$0xff]  ;;  %v3788_v12 = vpack.c.bf16 %v9676_v31, %v9675_v59 }
 0x498   : > { %3924 = vmatprep.mubr.bf16.mxu0 %v11493_v42  ;;  %6949 = vmatprep.mubr.bf16.mxu1 %v11493_v42  ;;  %v10188_v59 = vld [vmem:[%s13347_s25 + $0x1a3] sm:$0xff] }
 0x499   : > { %4176 = vmatpush1.bf16.msra.mxu0 %v11446_v36  ;;  %7200 = vmatpush1.bf16.msra.mxu1 %v11446_v36  ;;  %v6814_v36 = vpack.c.bf16 %v10148_v53, %v10147_v30  ;;  %v9717_v53 = vld [vmem:[%s13347_s25 + $0x67] sm:$0xff] }
 0x49a   : > { %4177 = vmatprep.subr.bf16.mxu0 %v11451_v48  ;;  %7201 = vmatprep.subr.bf16.mxu1 %v11451_v48  ;;  %v9677_v48 = vld [vmem:[%s13347_s25 + $0xa6] sm:$0x3] }
 0x49b   : > { %v3789_v41 = vpack.c.bf16 %v9677_v48, %v9677_v48  ;;  %v10190_v48 = vld [vmem:[%s13347_s25 + $0x1b3] sm:$0xff] }
 0x49d   : > { %4178 = vmatpush1.bf16.msra.mxu0 %v11449_v38  ;;  %7202 = vmatpush1.bf16.msra.mxu1 %v11449_v38  ;;  %v9706_v38 = vld [vmem:[%s13347_s25 + $0xf] sm:$0xff] }
 0x49e   : > { %4470 = vmatprep.subr.bf16.mxu0 %v11454_v57  ;;  %7493 = vmatprep.subr.bf16.mxu1 %v11454_v57  ;;  %v10177_v57 = vld [vmem:[%s13347_s25 + $0x14b] sm:$0xff] }
 0x49f   : > { %9696 = vmatmul.mubr.msk.bf16.gmra.mrb[8].mxu0 %vm2171_vm5, %v3781_v14  ;;  %10168 = vmatmul.mubr.msk.bf16.gmra.mrb[8].mxu1 %vm2171_vm5, %v6807_v33  ;;  %v10178_v14 = vld [vmem:[%s13347_s25 + $0x153] sm:$0xff]  ;;  %v4078_v33 = vpack.c.bf16 %v9706_v38, %v9705_v46  ;;  %v9720_v46 = vld [vmem:[%s13347_s25 + $0x7f] sm:$0xff] }
 0x4a0   : > { %3934 = vmatprep.mubr.bf16.mxu0 %v11493_v42  ;;  %6959 = vmatprep.mubr.bf16.mxu1 %v11493_v42  ;;  %v7103_v3 = vpack.c.bf16 %v10178_v14, %v10177_v57  ;;  %v10191_v38 = vld [vmem:[%s13347_s25 + $0x1bb] sm:$0xff]  ;;  %v10192_v57 = vld [vmem:[%s13347_s25 + $0x1c3] sm:$0xff] }
 0x4a7   : > { %9697 = vmatmul.mubr.msk.bf16.gmra.mrb[12].mxu0 %vm2171_vm5, %v3782_v34  ;;  %10169 = vmatmul.mubr.msk.bf16.gmra.mrb[12].mxu1 %vm2171_vm5, %v6808_v0  ;;  %v9708_v34 = vld [vmem:[%s13347_s25 + $0x1f] sm:$0xff] }
 0x4a8   : > { %3944 = vmatprep.mubr.bf16.mxu0 %v11493_v42  ;;  %6969 = vmatprep.mubr.bf16.mxu1 %v11493_v42  ;;  %v10179_v0 = vld [vmem:[%s13347_s25 + $0x15b] sm:$0xff]  ;;  %v4079_v55 = vpack.c.bf16 %v9708_v34, %v9707_v45  ;;  %v10194_v45 = vld [vmem:[%s13347_s25 + $0x1d3] sm:$0xff] }
 0x4aa   : > { %v3109_v15 = vpop.f32.mrb[52].mxu0  ;;  %v6137_v21 = vpop.f32.mrb[52].mxu1 }
 0x4ab   : > { %v13991_v18 = vadd.f32 %v3109_v15, %v13885_v50  ;;  %v13994_v39 = vadd.f32 %v6137_v21, %v13888_v26  ;;  %v3111_v35 = vpop.f32.mrb[53].mxu0  ;;  %v6139_v37 = vpop.f32.mrb[53].mxu1  ;;  %v9667_v26 = vld [vmem:[%s13347_s25 + $0x56] sm:$0xff]  ;;  %v7104_v15 = vpack.c.bf16 %v10180_v49, %v10179_v0  ;;  %v11458_v21 = vld [vmem:[%s11566_s19 + $0x220] ss:$8 sps:$4 sm:$0xff]  }
 0x4ac   : > { %v13997_v58 = vadd.f32 %v3111_v35, %v13891_v22  ;;  %v14000_v28 = vadd.f32 %v6139_v37, %v13894_v10  ;;  %v3113_v9 = vpop.f32.mrb[54].mxu0  ;;  %v6141_v50 = vpop.f32.mrb[54].mxu1  ;;  %v9668_v22 = vld [vmem:[%s13347_s25 + $0x5e] sm:$0xff]  ;;  %v9709_v37 = vld [vmem:[%s13347_s25 + $0x27] sm:$0xff] }
 0x4ad   : > { %v3114_v1 = vpop.f32.mrb[55].mxu0  ;;  %v6142_v47 = vpop.f32.mrb[55].mxu1  ;;  %v10139_v10 = vld [vmem:[%s13347_s25 + $0x19a] sm:$0xff]  ;;  %v3784_v44 = vpack.c.bf16 %v9668_v22, %v9667_v26 }
 0x4ae   : > { %v6810_v16 = vpack.c.bf16 %v10140_v51, %v10139_v10  ;;  %v11463_v35 = vld [vmem:[%s11566_s19 + $0x234] ss:$8 sps:$4 sm:$0xff]   ;;  %v11461_v50 = vld [vmem:[%s11566_s19 + $0x230] ss:$8 sps:$4 sm:$0xff]   ;;  %v11466_v1 = vld [vmem:[%s11566_s19 + $0x244] ss:$8 sps:$4 sm:$0xff]  }
 0x4af   : > { %9698 = vmatmul.mubr.msk.bf16.gmra.mrb[16].mxu0 %vm2171_vm5, %v3783_v61  ;;  %10170 = vmatmul.mubr.msk.bf16.gmra.mrb[16].mxu1 %vm2171_vm5, %v6809_v24  ;;  %v9710_v61 = vld [vmem:[%s13347_s25 + $0x2f] sm:$0xff]  ;;  %v9711_v22 = vld [vmem:[%s13347_s25 + $0x37] sm:$0xff]  ;;  %v9712_v10 = vld [vmem:[%s13347_s25 + $0x3f] sm:$0xff] }
 0x4b0   : > { %3954 = vmatprep.mubr.bf16.mxu0 %v11493_v42  ;;  %6979 = vmatprep.mubr.bf16.mxu1 %v11493_v42  ;;  %v10181_v24 = vld [vmem:[%s13347_s25 + $0x16b] sm:$0xff]  ;;  %v10182_v9 = vld [vmem:[%s13347_s25 + $0x173] sm:$0xff]  ;;  %v4080_v47 = vpack.c.bf16 %v9710_v61, %v9709_v37  ;;  %v10183_v51 = vld [vmem:[%s13347_s25 + $0x17b] sm:$0xff] }
 0x4b1   : > { %v7105_v26 = vpack.c.bf16 %v10182_v9, %v10181_v24  ;;  %v9723_v49 = vld [vmem:[%s13347_s25 + $0x97] sm:$0xff]  ;;  %v10197_v37 = vld [vmem:[%s13347_s25 + $0x1eb] sm:$0x3] }
 0x4b2   : > { %v7113_v24 = vpack.c.bf16 %v10197_v37, %v10197_v37  ;;  %v9753_v9 = vld [vmem:[%s13347_s25 + $0x8] sm:$0xff] }
 0x4b7   : > { %9699 = vmatmul.mubr.msk.bf16.gmra.mrb[20].mxu0 %vm2171_vm5, %v3784_v44  ;;  %10171 = vmatmul.mubr.msk.bf16.gmra.mrb[20].mxu1 %vm2171_vm5, %v6810_v16  ;;  %v10184_v44 = vld [vmem:[%s13347_s25 + $0x183] sm:$0xff]  ;;  %v4081_v16 = vpack.c.bf16 %v9712_v10, %v9711_v22 }
 0x4b8   : > { %3964 = vmatprep.mubr.bf16.mxu0 %v11493_v42  ;;  %6989 = vmatprep.mubr.bf16.mxu1 %v11493_v42  ;;  %v7106_v6 = vpack.c.bf16 %v10184_v44, %v10183_v51  ;;  %v11464_v10 = vld [vmem:[%s11566_s19 + $0x240] ss:$8 sps:$4 sm:$0xff]   ;;  %v11469_v51 = vld [vmem:[%s11566_s19 + $0x254] ss:$8 sps:$4 sm:$0xff]  }
 0x4b9   : > { %v9755_v44 = vld [vmem:[%s13347_s25 + $0x18] sm:$0xff] }
 0x4bf   : > { %9700 = vmatmul.mubr.msk.bf16.gmra.mrb[24].mxu0 %vm2171_vm5, %v3785_v7  ;;  %10172 = vmatmul.mubr.msk.bf16.gmra.mrb[24].mxu1 %vm2171_vm5, %v6811_v23  ;;  %v10186_v7 = vld [vmem:[%s13347_s25 + $0x193] sm:$0xff] }
 0x4c0   : > { %3974 = vmatprep.mubr.bf16.mxu0 %v11493_v42  ;;  %6999 = vmatprep.mubr.bf16.mxu1 %v11493_v42  ;;  %v7107_v63 = vpack.c.bf16 %v10186_v7, %v10185_v8  ;;  %v11472_v8 = vld [vmem:[%s11566_s19 + $0x264] ss:$8 sps:$4 sm:$0xff]  }
 0x4c7   : > { %9701 = vmatmul.mubr.msk.bf16.gmra.mrb[28].mxu0 %vm2171_vm5, %v3786_v56  ;;  %10173 = vmatmul.mubr.msk.bf16.gmra.mrb[28].mxu1 %vm2171_vm5, %v6812_v13  ;;  %v4082_v13 = vpack.c.bf16 %v9714_v5, %v9713_v29  ;;  %v10228_v29 = vld [vmem:[%s13347_s25 + $0x164] sm:$0xff]  ;;  %v11467_v5 = vld [vmem:[%s11566_s19 + $0x250] ss:$8 sps:$4 sm:$0xff]  }
 0x4c8   : > { %3984 = vmatprep.mubr.bf16.mxu0 %v11493_v42  ;;  %7009 = vmatprep.mubr.bf16.mxu1 %v11493_v42 }
 0x4cf   : > { %9702 = vmatmul.mubr.msk.bf16.gmra.mrb[32].mxu0 %vm2171_vm5, %v3787_v2  ;;  %10174 = vmatmul.mubr.msk.bf16.gmra.mrb[32].mxu1 %vm2171_vm5, %v6813_v40 }
 0x4d0   : > { %3994 = vmatprep.mubr.bf16.mxu0 %v11493_v42  ;;  %7019 = vmatprep.mubr.bf16.mxu1 %v11493_v42 }
 0x4d7   : > { %9703 = vmatmul.mubr.msk.bf16.gmra.mrb[36].mxu0 %vm2171_vm5, %v3788_v12  ;;  %10175 = vmatmul.mubr.msk.bf16.gmra.mrb[36].mxu1 %vm2171_vm5, %v6814_v36  ;;  %v9718_v12 = vld [vmem:[%s13347_s25 + $0x6f] sm:$0xff] }
 0x4d8   : > { %4004 = vmatprep.mubr.bf16.mxu0 %v11493_v42  ;;  %7029 = vmatprep.mubr.bf16.mxu1 %v11493_v42  ;;  %v10189_v36 = vld [vmem:[%s13347_s25 + $0x1ab] sm:$0xff]  ;;  %v4084_v52 = vpack.c.bf16 %v9718_v12, %v9717_v53 }
 0x4d9   : > { %v9761_v53 = vld [vmem:[%s13347_s25 + $0x48] sm:$0xff]  ;;  %v9762_v12 = vld [vmem:[%s13347_s25 + $0x50] sm:$0xff] }
 0x4df   : > { %9704 = vmatmul.mubr.msk.bf16.gmra.mrb[64].mxu0 %vm2171_vm5, %v3789_v41  ;;  %10176 = vmatmul.mubr.msk.bf16.gmra.mrb[64].mxu1 %vm2171_vm5, %v6815_v32  ;;  %v7109_v41 = vpack.c.bf16 %v10190_v48, %v10189_v36  ;;  %v9719_v32 = vld [vmem:[%s13347_s25 + $0x77] sm:$0xff]  ;;  %v10233_v36 = vld [vmem:[%s13347_s25 + $0x18c] sm:$0xff] }
 0x4e0   : > { %4203 = vmatprep.mubr.bf16.mxu0 %v11493_v42  ;;  %7227 = vmatprep.mubr.bf16.mxu1 %v11493_v42  ;;  %v4085_v14 = vpack.c.bf16 %v9720_v46, %v9719_v32  ;;  %v10234_v48 = vld [vmem:[%s13347_s25 + $0x194] sm:$0xff] }
 0x4e7   : > { %9742 = vmatmul.mubr.msk.bf16.vlgmr.msra.gmra.mrb[0].mxu0 %vm2171_vm5, %v4078_v33  ;;  %10214 = vmatmul.mubr.msk.bf16.vlgmr.msra.gmra.mrb[0].mxu1 %vm2171_vm5, %v7103_v3  ;;  %v7110_v33 = vpack.c.bf16 %v10192_v57, %v10191_v38  ;;  %v9721_v3 = vld [vmem:[%s13347_s25 + $0x87] sm:$0xff] }
 0x4e8   : > { %4471 = vmatpush1.bf16.msra.mxu0 %v11452_v25  ;;  %7494 = vmatpush1.bf16.msra.mxu1 %v11452_v25  ;;  %v9722_v25 = vld [vmem:[%s13347_s25 + $0x8f] sm:$0xff] }
 0x4e9   : > { %4213 = vmatprep.mubr.bf16.mxu0 %v11493_v42  ;;  %7237 = vmatprep.mubr.bf16.mxu1 %v11493_v42  ;;  %v4086_v34 = vpack.c.bf16 %v9722_v25, %v9721_v3 }
 0x4ea   : > { %4472 = vmatprep.subr.bf16.mxu0 %v11457_v4  ;;  %7495 = vmatprep.subr.bf16.mxu1 %v11457_v4  ;;  %v10193_v4 = vld [vmem:[%s13347_s25 + $0x1cb] sm:$0xff] }
 0x4eb   : > { %v7111_v0 = vpack.c.bf16 %v10194_v45, %v10193_v4 }
 0x4ec   : > { %4473 = vmatpush1.bf16.msra.mxu0 %v11455_v43  ;;  %7496 = vmatpush1.bf16.msra.mxu1 %v11455_v43  ;;  %v9724_v43 = vld [vmem:[%s13347_s25 + $0x9f] sm:$0xff] }
 0x4ed   : > { %4474 = vmatprep.subr.bf16.mxu0 %v11460_v27  ;;  %7497 = vmatprep.subr.bf16.mxu1 %v11460_v27  ;;  %v10195_v27 = vld [vmem:[%s13347_s25 + $0x1db] sm:$0xff] }
 0x4ef   : > { %9743 = vmatmul.mubr.msk.bf16.gmra.mrb[4].mxu0 %vm2171_vm5, %v4079_v55  ;;  %10215 = vmatmul.mubr.msk.bf16.gmra.mrb[4].mxu1 %vm2171_vm5, %v7104_v15  ;;  %v10196_v55 = vld [vmem:[%s13347_s25 + $0x1e3] sm:$0xff]  ;;  %v4087_v15 = vpack.c.bf16 %v9724_v43, %v9723_v49 }
 0x4f0   : > { %4223 = vmatprep.mubr.bf16.mxu0 %v11493_v42  ;;  %7247 = vmatprep.mubr.bf16.mxu1 %v11493_v42 }
 0x4f1   : > { %4475 = vmatpush1.bf16.msra.mxu0 %v11458_v21  ;;  %7498 = vmatpush1.bf16.msra.mxu1 %v11458_v21  ;;  %v7112_v21 = vpack.c.bf16 %v10196_v55, %v10195_v27  ;;  %v9765_v27 = vld [vmem:[%s13347_s25 + $0x68] sm:$0xff]  ;;  %v9766_v55 = vld [vmem:[%s13347_s25 + $0x70] sm:$0xff] }
 0x4f2   : > { %4476 = vmatprep.subr.bf16.mxu0 %v11463_v35  ;;  %7499 = vmatprep.subr.bf16.mxu1 %v11463_v35  ;;  %v9725_v35 = vld [vmem:[%s13347_s25 + $0xa7] sm:$0x3] }
 0x4f3   : > { %v4088_v61 = vpack.c.bf16 %v9725_v35, %v9725_v35  ;;  %v4383_v35 = vpack.c.bf16 %v9766_v55, %v9765_v27 }
 0x4f5   : > { %4477 = vmatpush1.bf16.msra.mxu0 %v11461_v50  ;;  %7500 = vmatpush1.bf16.msra.mxu1 %v11461_v50  ;;  %v9754_v50 = vld [vmem:[%s13347_s25 + $0x10] sm:$0xff] }
 0x4f6   : > { %4769 = vmatprep.subr.bf16.mxu0 %v11466_v1  ;;  %7791 = vmatprep.subr.bf16.mxu1 %v11466_v1  ;;  %v10225_v1 = vld [vmem:[%s13347_s25 + $0x14c] sm:$0xff] }
 0x4f7   : > { %9744 = vmatmul.mubr.msk.bf16.gmra.mrb[8].mxu0 %vm2171_vm5, %v4080_v47  ;;  %10216 = vmatmul.mubr.msk.bf16.gmra.mrb[8].mxu1 %vm2171_vm5, %v7105_v26  ;;  %v10226_v47 = vld [vmem:[%s13347_s25 + $0x154] sm:$0xff]  ;;  %v4377_v26 = vpack.c.bf16 %v9754_v50, %v9753_v9  ;;  %v10239_v9 = vld [vmem:[%s13347_s25 + $0x1bc] sm:$0xff]  ;;  %v10240_v50 = vld [vmem:[%s13347_s25 + $0x1c4] sm:$0xff] }
 0x4f8   : > { %4233 = vmatprep.mubr.bf16.mxu0 %v11493_v42  ;;  %7257 = vmatprep.mubr.bf16.mxu1 %v11493_v42  ;;  %v7401_v22 = vpack.c.bf16 %v10226_v47, %v10225_v1  ;;  %v7408_v47 = vpack.c.bf16 %v10240_v50, %v10239_v9 }
 0x4ff   : > { %9745 = vmatmul.mubr.msk.bf16.gmra.mrb[12].mxu0 %vm2171_vm5, %v4081_v16  ;;  %10217 = vmatmul.mubr.msk.bf16.gmra.mrb[12].mxu1 %vm2171_vm5, %v7106_v6  ;;  %v9756_v16 = vld [vmem:[%s13347_s25 + $0x20] sm:$0xff] }
 0x500   : > { %4243 = vmatprep.mubr.bf16.mxu0 %v11493_v42  ;;  %7267 = vmatprep.mubr.bf16.mxu1 %v11493_v42  ;;  %v10227_v6 = vld [vmem:[%s13347_s25 + $0x15c] sm:$0xff]  ;;  %v4378_v7 = vpack.c.bf16 %v9756_v16, %v9755_v44 }
 0x502   : > { %v3408_v23 = vpop.f32.mrb[56].mxu0  ;;  %v6435_v20 = vpop.f32.mrb[56].mxu1 }
 0x503   : > { %v14097_v11 = vadd.f32 %v3408_v23, %v13991_v18  ;;  %v14100_v19 = vadd.f32 %v6435_v20, %v13994_v39  ;;  %v3410_v54 = vpop.f32.mrb[57].mxu0  ;;  %v6437_v56 = vpop.f32.mrb[57].mxu1  ;;  %v9715_v39 = vld [vmem:[%s13347_s25 + $0x57] sm:$0xff]  ;;  %v7402_v23 = vpack.c.bf16 %v10228_v29, %v10227_v6  ;;  %v11470_v20 = vld [vmem:[%s11566_s19 + $0x260] ss:$8 sps:$4 sm:$0xff]  }
 0x504   : > { %v14103_v17 = vadd.f32 %v3410_v54, %v13997_v58  ;;  %v14106_v60 = vadd.f32 %v6437_v56, %v14000_v28  ;;  %v3412_v62 = vpop.f32.mrb[58].mxu0  ;;  %v6439_v18 = vpop.f32.mrb[58].mxu1  ;;  %v9716_v58 = vld [vmem:[%s13347_s25 + $0x5f] sm:$0xff]  ;;  %v9757_v56 = vld [vmem:[%s13347_s25 + $0x28] sm:$0xff] }
 0x505   : > { %v3413_v2 = vpop.f32.mrb[59].mxu0  ;;  %v6440_v40 = vpop.f32.mrb[59].mxu1  ;;  %v10187_v28 = vld [vmem:[%s13347_s25 + $0x19b] sm:$0xff]  ;;  %v4083_v31 = vpack.c.bf16 %v9716_v58, %v9715_v39 }
 0x506   : > { %v7108_v30 = vpack.c.bf16 %v10188_v59, %v10187_v28  ;;  %v11475_v54 = vld [vmem:[%s11566_s19 + $0x274] ss:$8 sps:$4 sm:$0xff]   ;;  %v11473_v18 = vld [vmem:[%s11566_s19 + $0x270] ss:$8 sps:$4 sm:$0xff]   ;;  %v9760_v58 = vld [vmem:[%s13347_s25 + $0x40] sm:$0xff] }
 0x507   : > { %9746 = vmatmul.mubr.msk.bf16.gmra.mrb[16].mxu0 %vm2171_vm5, %v4082_v13  ;;  %10218 = vmatmul.mubr.msk.bf16.gmra.mrb[16].mxu1 %vm2171_vm5, %v7107_v63  ;;  %v9758_v13 = vld [vmem:[%s13347_s25 + $0x30] sm:$0xff]  ;;  %v9759_v39 = vld [vmem:[%s13347_s25 + $0x38] sm:$0xff]  ;;  %v10232_v59 = vld [vmem:[%s13347_s25 + $0x184] sm:$0xff] }
 0x508   : > { %4253 = vmatprep.mubr.bf16.mxu0 %v11493_v42  ;;  %7277 = vmatprep.mubr.bf16.mxu1 %v11493_v42  ;;  %v10229_v63 = vld [vmem:[%s13347_s25 + $0x16c] sm:$0xff]  ;;  %v10230_v62 = vld [vmem:[%s13347_s25 + $0x174] sm:$0xff]  ;;  %v4379_v2 = vpack.c.bf16 %v9758_v13, %v9757_v56  ;;  %v10231_v28 = vld [vmem:[%s13347_s25 + $0x17c] sm:$0xff] }
 0x509   : > { %v7403_v40 = vpack.c.bf16 %v10230_v62, %v10229_v63  ;;  %v9771_v6 = vld [vmem:[%s13347_s25 + $0x98] sm:$0xff]  ;;  %v9772_v29 = vld [vmem:[%s13347_s25 + $0xa0] sm:$0xff]  ;;  %v9801_v63 = vld [vmem:[%s13347_s25 + $0x9] sm:$0xff] }
 0x50a   : > { %v9802_v62 = vld [vmem:[%s13347_s25 + $0x11] sm:$0xff] }
 0x50f   : > { %9747 = vmatmul.mubr.msk.bf16.gmra.mrb[20].mxu0 %vm2171_vm5, %v4083_v31  ;;  %10219 = vmatmul.mubr.msk.bf16.gmra.mrb[20].mxu1 %vm2171_vm5, %v7108_v30  ;;  %v4380_v31 = vpack.c.bf16 %v9760_v58, %v9759_v39  ;;  %v7404_v30 = vpack.c.bf16 %v10232_v59, %v10231_v28  ;;  %v9803_v58 = vld [vmem:[%s13347_s25 + $0x19] sm:$0xff]  ;;  %v9804_v28 = vld [vmem:[%s13347_s25 + $0x21] sm:$0xff] }
 0x510   : > { %4263 = vmatprep.mubr.bf16.mxu0 %v11493_v42  ;;  %7287 = vmatprep.mubr.bf16.mxu1 %v11493_v42  ;;  %v10275_v59 = vld [vmem:[%s13347_s25 + $0x15d] sm:$0xff] }
 0x517   : > { %9748 = vmatmul.mubr.msk.bf16.gmra.mrb[24].mxu0 %vm2171_vm5, %v4084_v52  ;;  %10220 = vmatmul.mubr.msk.bf16.gmra.mrb[24].mxu1 %vm2171_vm5, %v7109_v41 }
 0x518   : > { %4273 = vmatprep.mubr.bf16.mxu0 %v11493_v42  ;;  %7297 = vmatprep.mubr.bf16.mxu1 %v11493_v42 }
 0x51f   : > { %9749 = vmatmul.mubr.msk.bf16.gmra.mrb[28].mxu0 %vm2171_vm5, %v4085_v14  ;;  %10221 = vmatmul.mubr.msk.bf16.gmra.mrb[28].mxu1 %vm2171_vm5, %v7110_v33  ;;  %v4381_v14 = vpack.c.bf16 %v9762_v12, %v9761_v53  ;;  %v7405_v33 = vpack.c.bf16 %v10234_v48, %v10233_v36  ;;  %v9805_v12 = vld [vmem:[%s13347_s25 + $0x29] sm:$0xff]  ;;  %v9806_v36 = vld [vmem:[%s13347_s25 + $0x31] sm:$0xff] }
 0x520   : > { %4283 = vmatprep.mubr.bf16.mxu0 %v11493_v42  ;;  %7307 = vmatprep.mubr.bf16.mxu1 %v11493_v42  ;;  %v10277_v48 = vld [vmem:[%s13347_s25 + $0x16d] sm:$0xff] }
 0x527   : > { %9750 = vmatmul.mubr.msk.bf16.gmra.mrb[32].mxu0 %vm2171_vm5, %v4086_v34  ;;  %10222 = vmatmul.mubr.msk.bf16.gmra.mrb[32].mxu1 %vm2171_vm5, %v7111_v0  ;;  %v10236_v0 = vld [vmem:[%s13347_s25 + $0x1a4] sm:$0xff] }
 0x528   : > { %4293 = vmatprep.mubr.bf16.mxu0 %v11493_v42  ;;  %7317 = vmatprep.mubr.bf16.mxu1 %v11493_v42 }
 0x52f   : > { %9751 = vmatmul.mubr.msk.bf16.gmra.mrb[36].mxu0 %vm2171_vm5, %v4087_v15  ;;  %10223 = vmatmul.mubr.msk.bf16.gmra.mrb[36].mxu1 %vm2171_vm5, %v7112_v21  ;;  %v10237_v15 = vld [vmem:[%s13347_s25 + $0x1ac] sm:$0xff]  ;;  %v10238_v21 = vld [vmem:[%s13347_s25 + $0x1b4] sm:$0xff] }
 0x530   : > { %4303 = vmatprep.mubr.bf16.mxu0 %v11493_v42  ;;  %7327 = vmatprep.mubr.bf16.mxu1 %v11493_v42  ;;  %v7407_v37 = vpack.c.bf16 %v10238_v21, %v10237_v15 }
 0x537   : > { %9752 = vmatmul.mubr.msk.bf16.gmra.mrb[68].mxu0 %vm2171_vm5, %v4088_v61  ;;  %10224 = vmatmul.mubr.msk.bf16.gmra.mrb[68].mxu1 %vm2171_vm5, %v7113_v24  ;;  %v9767_v61 = vld [vmem:[%s13347_s25 + $0x78] sm:$0xff]  ;;  %v9768_v24 = vld [vmem:[%s13347_s25 + $0x80] sm:$0xff] }
 0x538   : > { %4502 = vmatprep.mubr.bf16.mxu0 %v11493_v42  ;;  %7525 = vmatprep.mubr.bf16.mxu1 %v11493_v42  ;;  %v4384_v1 = vpack.c.bf16 %v9768_v24, %v9767_v61 }
 0x53f   : > { %9790 = vmatmul.mubr.msk.bf16.vlgmr.msra.gmra.mrb[0].mxu0 %vm2171_vm5, %v4377_v26  ;;  %10262 = vmatmul.mubr.msk.bf16.vlgmr.msra.gmra.mrb[0].mxu1 %vm2171_vm5, %v7401_v22  ;;  %v9769_v26 = vld [vmem:[%s13347_s25 + $0x88] sm:$0xff]  ;;  %v9770_v22 = vld [vmem:[%s13347_s25 + $0x90] sm:$0xff] }
 0x540   : > { %4770 = vmatpush1.bf16.msra.mxu0 %v11464_v10  ;;  %7792 = vmatpush1.bf16.msra.mxu1 %v11464_v10  ;;  %v10241_v10 = vld [vmem:[%s13347_s25 + $0x1cc] sm:$0xff]  ;;  %v4385_v44 = vpack.c.bf16 %v9770_v22, %v9769_v26 }
 0x541   : > { %4512 = vmatprep.mubr.bf16.mxu0 %v11493_v42  ;;  %7535 = vmatprep.mubr.bf16.mxu1 %v11493_v42  ;;  %v9813_v22 = vld [vmem:[%s13347_s25 + $0x69] sm:$0xff] }
 0x542   : > { %4771 = vmatprep.subr.bf16.mxu0 %v11469_v51  ;;  %7793 = vmatprep.subr.bf16.mxu1 %v11469_v51  ;;  %v10242_v51 = vld [vmem:[%s13347_s25 + $0x1d4] sm:$0xff] }
 0x543   : > { %v7409_v16 = vpack.c.bf16 %v10242_v51, %v10241_v10  ;;  %v9814_v10 = vld [vmem:[%s13347_s25 + $0x71] sm:$0xff] }
 0x544   : > { %4772 = vmatpush1.bf16.msra.mxu0 %v11467_v5  ;;  %7794 = vmatpush1.bf16.msra.mxu1 %v11467_v5  ;;  %v10243_v5 = vld [vmem:[%s13347_s25 + $0x1dc] sm:$0xff]  ;;  %v10285_v51 = vld [vmem:[%s13347_s25 + $0x1ad] sm:$0xff] }
 0x545   : > { %4773 = vmatprep.subr.bf16.mxu0 %v11472_v8  ;;  %7795 = vmatprep.subr.bf16.mxu1 %v11472_v8  ;;  %v10244_v8 = vld [vmem:[%s13347_s25 + $0x1e4] sm:$0xff] }
 0x547   : > { %9791 = vmatmul.mubr.msk.bf16.gmra.mrb[4].mxu0 %vm2171_vm5, %v4378_v7  ;;  %10263 = vmatmul.mubr.msk.bf16.gmra.mrb[4].mxu1 %vm2171_vm5, %v7402_v23  ;;  %v4386_v7 = vpack.c.bf16 %v9772_v29, %v9771_v6  ;;  %v7410_v23 = vpack.c.bf16 %v10244_v8, %v10243_v5  ;;  %v9815_v29 = vld [vmem:[%s13347_s25 + $0x79] sm:$0xff]  ;;  %v9816_v5 = vld [vmem:[%s13347_s25 + $0x81] sm:$0xff] }
 0x548   : > { %4522 = vmatprep.mubr.bf16.mxu0 %v11493_v42  ;;  %7545 = vmatprep.mubr.bf16.mxu1 %v11493_v42  ;;  %v10287_v8 = vld [vmem:[%s13347_s25 + $0x1bd] sm:$0xff] }
 0x549   : > { %4774 = vmatpush1.bf16.msra.mxu0 %v11470_v20  ;;  %7796 = vmatpush1.bf16.msra.mxu1 %v11470_v20  ;;  %v9773_v20 = vld [vmem:[%s13347_s25 + $0xa8] sm:$0x3] }
 0x54a   : > { %4775 = vmatprep.subr.bf16.mxu0 %v11475_v54  ;;  %7797 = vmatprep.subr.bf16.mxu1 %v11475_v54  ;;  %v10245_v54 = vld [vmem:[%s13347_s25 + $0x1ec] sm:$0x3]  ;;  %v4387_v56 = vpack.c.bf16 %v9773_v20, %v9773_v20 }
 0x54b   : > { %v7411_v13 = vpack.c.bf16 %v10245_v54, %v10245_v54  ;;  %v9817_v54 = vld [vmem:[%s13347_s25 + $0x89] sm:$0xff] }
 0x54d   : > { %4776 = vmatpush1.bf16.msra.mxu0 %v11473_v18  ;;  %7798 = vmatpush1.bf16.msra.mxu1 %v11473_v18  ;;  %v10273_v18 = vld [vmem:[%s13347_s25 + $0x14d] sm:$0xff] }
 0x54f   : > { %9792 = vmatmul.mubr.msk.bf16.gmra.mrb[8].mxu0 %vm2171_vm5, %v4379_v2  ;;  %10264 = vmatmul.mubr.msk.bf16.gmra.mrb[8].mxu1 %vm2171_vm5, %v7403_v40  ;;  %v10274_v2 = vld [vmem:[%s13347_s25 + $0x155] sm:$0xff]  ;;  %v4676_v40 = vpack.c.bf16 %v9802_v62, %v9801_v63 }
 0x550   : > { %4532 = vmatprep.mubr.bf16.mxu0 %v11493_v42  ;;  %7555 = vmatprep.mubr.bf16.mxu1 %v11493_v42  ;;  %v7699_v39 = vpack.c.bf16 %v10274_v2, %v10273_v18  ;;  %v10290_v63 = vld [vmem:[%s13347_s25 + $0x1d5] sm:$0xff] }
 0x551   : > { %v9819_v2 = vld [vmem:[%s13347_s25 + $0x99] sm:$0xff] }
 0x557   : > { %9793 = vmatmul.mubr.msk.bf16.gmra.mrb[12].mxu0 %vm2171_vm5, %v4380_v31  ;;  %10265 = vmatmul.mubr.msk.bf16.gmra.mrb[12].mxu1 %vm2171_vm5, %v7404_v30  ;;  %v10276_v31 = vld [vmem:[%s13347_s25 + $0x165] sm:$0xff]  ;;  %v4677_v30 = vpack.c.bf16 %v9804_v28, %v9803_v58 }
 0x558   : > { %4542 = vmatprep.mubr.bf16.mxu0 %v11493_v42  ;;  %7565 = vmatprep.mubr.bf16.mxu1 %v11493_v42  ;;  %v7700_v53 = vpack.c.bf16 %v10276_v31, %v10275_v59  ;;  %v10292_v58 = vld [vmem:[%s13347_s25 + $0x1e5] sm:$0xff] }
 0x559   : > { %v9821_v31 = vld [vmem:[%s13347_s25 + $0xa9] sm:$0x3] }
 0x55a   : > { %v3707_v52 = vpop.f32.mrb[60].mxu0  ;;  %v6733_v41 = vpop.f32.mrb[60].mxu1 }
 0x55b   : > { %v14202_v32 = vadd.f32 %v3707_v52, %v14097_v11  ;;  %v14205_v46 = vadd.f32 %v6733_v41, %v14100_v19  ;;  %v3709_v38 = vpop.f32.mrb[61].mxu0  ;;  %v6735_v57 = vpop.f32.mrb[61].mxu1  ;;  %v9763_v19 = vld [vmem:[%s13347_s25 + $0x58] sm:$0xff]  ;;  %v4678_v41 = vpack.c.bf16 %v9806_v36, %v9805_v12 }
 0x55c   : > { %v14208_v3 = vadd.f32 %v3709_v38, %v14103_v17  ;;  %v14211_v25 = vadd.f32 %v6735_v57, %v14106_v60  ;;  %v3711_v4 = vpop.f32.mrb[62].mxu0  ;;  %v6737_v11 = vpop.f32.mrb[62].mxu1  ;;  %v9764_v17 = vld [vmem:[%s13347_s25 + $0x60] sm:$0xff]  ;;  %v10278_v52 = vld [vmem:[%s13347_s25 + $0x175] sm:$0xff] }
 0x55d   : > { %v3712_v45 = vpop.f32.mrb[63].mxu0  ;;  %v6738_v34 = vpop.f32.mrb[63].mxu1  ;;  %v10235_v60 = vld [vmem:[%s13347_s25 + $0x19c] sm:$0xff]  ;;  %v4382_v49 = vpack.c.bf16 %v9764_v17, %v9763_v19  ;;  %v7701_v38 = vpack.c.bf16 %v10278_v52, %v10277_v48  ;;  %v10280_v4 = vld [vmem:[%s13347_s25 + $0x185] sm:$0xff]  ;;  %v9810_v19 = vld [vmem:[%s13347_s25 + $0x51] sm:$0xff] }
 0x55e   : > { %v7406_v43 = vpack.c.bf16 %v10236_v0, %v10235_v60  ;;  %v9807_v57 = vld [vmem:[%s13347_s25 + $0x39] sm:$0xff]  ;;  %v9809_v34 = vld [vmem:[%s13347_s25 + $0x49] sm:$0xff] }
 0x55f   : > { %9794 = vmatmul.mubr.msk.bf16.gmra.mrb[16].mxu0 %vm2171_vm5, %v4381_v14  ;;  %10266 = vmatmul.mubr.msk.bf16.gmra.mrb[16].mxu1 %vm2171_vm5, %v7405_v33  ;;  %v9808_v14 = vld [vmem:[%s13347_s25 + $0x41] sm:$0xff]  ;;  %v10281_v17 = vld [vmem:[%s13347_s25 + $0x18d] sm:$0xff]  ;;  %v10282_v60 = vld [vmem:[%s13347_s25 + $0x195] sm:$0xff]  ;;  %v4680_v21 = vpack.c.bf16 %v9810_v19, %v9809_v34 }
 0x560   : > { %4552 = vmatprep.mubr.bf16.mxu0 %v11493_v42  ;;  %7575 = vmatprep.mubr.bf16.mxu1 %v11493_v42  ;;  %v10279_v33 = vld [vmem:[%s13347_s25 + $0x17d] sm:$0xff]  ;;  %v4679_v11 = vpack.c.bf16 %v9808_v14, %v9807_v57 }
 0x561   : > { %v7702_v45 = vpack.c.bf16 %v10280_v4, %v10279_v33 }
 0x567   : > { %9795 = vmatmul.mubr.msk.bf16.gmra.mrb[20].mxu0 %vm2171_vm5, %v4382_v49  ;;  %10267 = vmatmul.mubr.msk.bf16.gmra.mrb[20].mxu1 %vm2171_vm5, %v7406_v43 }
 0x568   : > { %4562 = vmatprep.mubr.bf16.mxu0 %v11493_v42  ;;  %7585 = vmatprep.mubr.bf16.mxu1 %v11493_v42 }
 0x56f   : > { %9796 = vmatmul.mubr.msk.bf16.gmra.mrb[24].mxu0 %vm2171_vm5, %v4383_v35  ;;  %10268 = vmatmul.mubr.msk.bf16.gmra.mrb[24].mxu1 %vm2171_vm5, %v7407_v37  ;;  %v7703_v35 = vpack.c.bf16 %v10282_v60, %v10281_v17 }
 0x570   : > { %4572 = vmatprep.mubr.bf16.mxu0 %v11493_v42  ;;  %7595 = vmatprep.mubr.bf16.mxu1 %v11493_v42 }
 0x577   : > { %9797 = vmatmul.mubr.msk.bf16.gmra.mrb[28].mxu0 %vm2171_vm5, %v4384_v1  ;;  %10269 = vmatmul.mubr.msk.bf16.gmra.mrb[28].mxu1 %vm2171_vm5, %v7408_v47  ;;  %v10284_v1 = vld [vmem:[%s13347_s25 + $0x1a5] sm:$0xff] }
 0x578   : > { %4582 = vmatprep.mubr.bf16.mxu0 %v11493_v42  ;;  %7605 = vmatprep.mubr.bf16.mxu1 %v11493_v42 }
 0x57f   : > { %9798 = vmatmul.mubr.msk.bf16.gmra.mrb[32].mxu0 %vm2171_vm5, %v4385_v44  ;;  %10270 = vmatmul.mubr.msk.bf16.gmra.mrb[32].mxu1 %vm2171_vm5, %v7409_v16  ;;  %v10286_v44 = vld [vmem:[%s13347_s25 + $0x1b5] sm:$0xff]  ;;  %v4682_v16 = vpack.c.bf16 %v9814_v10, %v9813_v22  ;;  %v7978_v10 = vld [vmem:[#allocation3 + $0x168] sm:$0xff] }
 0x580   : > { %4592 = vmatprep.mubr.bf16.mxu0 %v11493_v42  ;;  %7615 = vmatprep.mubr.bf16.mxu1 %v11493_v42  ;;  %v7705_v6 = vpack.c.bf16 %v10286_v44, %v10285_v51  ;;  %v4955_v22 = vld [vmem:[#allocation3 + $0x18] sm:$0xff] }
 0x587   : > { %9799 = vmatmul.mubr.msk.bf16.gmra.mrb[36].mxu0 %vm2171_vm5, %v4386_v7  ;;  %10271 = vmatmul.mubr.msk.bf16.gmra.mrb[36].mxu1 %vm2171_vm5, %v7410_v23  ;;  %v10288_v7 = vld [vmem:[%s13347_s25 + $0x1c5] sm:$0xff]  ;;  %v4683_v23 = vpack.c.bf16 %v9816_v5, %v9815_v29 }
 0x588   : > { %4602 = vmatprep.mubr.bf16.mxu0 %v11493_v42  ;;  %7625 = vmatprep.mubr.bf16.mxu1 %v11493_v42  ;;  %v7706_v20 = vpack.c.bf16 %v10288_v7, %v10287_v8 }
 0x58f   : > { %9800 = vmatmul.mubr.msk.bf16.gmra.mrb[72].mxu0 %vm2171_vm5, %v4387_v56  ;;  %10272 = vmatmul.mubr.msk.bf16.gmra.mrb[72].mxu1 %vm2171_vm5, %v7411_v13  ;;  %v9818_v56 = vld [vmem:[%s13347_s25 + $0x91] sm:$0xff] }
 0x590   : > { %4801 = vmatprep.mubr.bf16.mxu0 %v11493_v42  ;;  %7823 = vmatprep.mubr.bf16.mxu1 %v11493_v42  ;;  %v10289_v13 = vld [vmem:[%s13347_s25 + $0x1cd] sm:$0xff]  ;;  %v4684_v62 = vpack.c.bf16 %v9818_v56, %v9817_v54  ;;  %v4956_v54 = vld [vmem:[#allocation3 + $0x20] sm:$0xff] }
 0x591   : > { %v7707_v18 = vpack.c.bf16 %v10290_v63, %v10289_v13  ;;  %v7979_v56 = vld [vmem:[#allocation3 + $0x170] sm:$0xff]  ;;  %v4957_v13 = vld [vmem:[#allocation3 + $0x28] sm:$0xff]  ;;  %v7980_v63 = vld [vmem:[#allocation3 + $0x178] sm:$0xff] }
 0x597   : > { %9838 = vmatmul.mubr.msk.bf16.vlgmr.msra.gmra.mrb[0].mxu0 %vm2171_vm5, %v4676_v40  ;;  %10310 = vmatmul.mubr.msk.bf16.vlgmr.msra.gmra.mrb[0].mxu1 %vm2171_vm5, %v7699_v39  ;;  %v9820_v40 = vld [vmem:[%s13347_s25 + $0xa1] sm:$0xff] }
 0x598   : > { %4811 = vmatprep.mubr.bf16.mxu0 %v11493_v42  ;;  %7833 = vmatprep.mubr.bf16.mxu1 %v11493_v42  ;;  %v10291_v39 = vld [vmem:[%s13347_s25 + $0x1dd] sm:$0xff]  ;;  %v4685_v28 = vpack.c.bf16 %v9820_v40, %v9819_v2  ;;  %v4958_v2 = vld [vmem:[#allocation3 + $0x30] sm:$0xff] }
 0x599   : > { %v7708_v59 = vpack.c.bf16 %v10292_v58, %v10291_v39  ;;  %v7981_v40 = vld [vmem:[#allocation3 + $0x180] sm:$0xff] }
 0x59f   : > { %9839 = vmatmul.mubr.msk.bf16.gmra.mrb[4].mxu0 %vm2171_vm5, %v4677_v30  ;;  %10311 = vmatmul.mubr.msk.bf16.gmra.mrb[4].mxu1 %vm2171_vm5, %v7700_v53  ;;  %v10293_v30 = vld [vmem:[%s13347_s25 + $0x1ed] sm:$0x3]  ;;  %v4686_v53 = vpack.c.bf16 %v9821_v31, %v9821_v31  ;;  %v4959_v31 = vld [vmem:[#allocation3 + $0x38] sm:$0xff] }
 0x5a0   : > { %4821 = vmatprep.mubr.bf16.mxu0 %v11493_v42  ;;  %7843 = vmatprep.mubr.bf16.mxu1 %v11493_v42  ;;  %v7709_v12 = vpack.c.bf16 %v10293_v30, %v10293_v30  ;;  %v7982_v30 = vld [vmem:[#allocation3 + $0x188] sm:$0xff] }
 0x5a7   : > { %9840 = vmatmul.mubr.msk.bf16.gmra.mrb[8].mxu0 %vm2171_vm5, %v4678_v41  ;;  %10312 = vmatmul.mubr.msk.bf16.gmra.mrb[8].mxu1 %vm2171_vm5, %v7701_v38 }
 0x5a8   : > { %4831 = vmatprep.mubr.bf16.mxu0 %v11493_v42  ;;  %7853 = vmatprep.mubr.bf16.mxu1 %v11493_v42 }
 0x5af   : > { %9841 = vmatmul.mubr.msk.bf16.gmra.mrb[12].mxu0 %vm2171_vm5, %v4679_v11  ;;  %10313 = vmatmul.mubr.msk.bf16.gmra.mrb[12].mxu1 %vm2171_vm5, %v7702_v45 }
 0x5b0   : > { %4841 = vmatprep.mubr.bf16.mxu0 %v11493_v42  ;;  %7863 = vmatprep.mubr.bf16.mxu1 %v11493_v42 }
 0x5b2   : > { %v4006_v0 = vpop.f32.mrb[64].mxu0  ;;  %v7031_v49 = vpop.f32.mrb[64].mxu1 }
 0x5b3   : > { %v14300_v43 = vadd.f32 %v4006_v0, %v14202_v32  ;;  %v14303_v27 = vadd.f32 %v7031_v49, %v14205_v46  ;;  %v4008_v55 = vpop.f32.mrb[65].mxu0  ;;  %v7033_v15 = vpop.f32.mrb[65].mxu1  ;;  %v9811_v46 = vld [vmem:[%s13347_s25 + $0x59] sm:$0xff] }
 0x5b4   : > { %v14306_v37 = vadd.f32 %v4008_v55, %v14208_v3  ;;  %v14309_v61 = vadd.f32 %v7033_v15, %v14211_v25  ;;  %v4010_v24 = vpop.f32.mrb[66].mxu0  ;;  %v7035_v32 = vpop.f32.mrb[66].mxu1  ;;  %v9812_v3 = vld [vmem:[%s13347_s25 + $0x61] sm:$0xff] }
 0x5b5   : > { %v4011_v9 = vpop.f32.mrb[67].mxu0  ;;  %v7036_v50 = vpop.f32.mrb[67].mxu1  ;;  %v10283_v25 = vld [vmem:[%s13347_s25 + $0x19d] sm:$0xff]  ;;  %v4681_v47 = vpack.c.bf16 %v9812_v3, %v9811_v46  ;;  %v7976_v32 = vld [vmem:[#allocation3 + $0x158] sm:$0xff]  ;;  %v4954_v46 = vld [vmem:[#allocation3 + $0x10] sm:$0xff] }
 0x5b6   : > { %v7704_v26 = vpack.c.bf16 %v10284_v1, %v10283_v25  ;;  %v4953_v24 = vld [vmem:[#allocation3 + $0x8] sm:$0xff]  ;;  %v7977_v3 = vld [vmem:[#allocation3 + $0x160] sm:$0xff] }
 0x5b7   : > { %9842 = vmatmul.mubr.msk.bf16.gmra.mrb[16].mxu0 %vm2171_vm5, %v4680_v21  ;;  %10314 = vmatmul.mubr.msk.bf16.gmra.mrb[16].mxu1 %vm2171_vm5, %v7703_v35 }
 0x5b8   : > { %4851 = vmatprep.mubr.bf16.mxu0 %v11493_v42  ;;  %7873 = vmatprep.mubr.bf16.mxu1 %v11493_v42 }
 0x5bf   : > { %9843 = vmatmul.mubr.msk.bf16.gmra.mrb[20].mxu0 %vm2171_vm5, %v4681_v47  ;;  %10315 = vmatmul.mubr.msk.bf16.gmra.mrb[20].mxu1 %vm2171_vm5, %v7704_v26 }
 0x5c0   : > { %4861 = vmatprep.mubr.bf16.mxu0 %v11493_v42  ;;  %7883 = vmatprep.mubr.bf16.mxu1 %v11493_v42 }
 0x5c7   : > { %9844 = vmatmul.mubr.msk.bf16.gmra.mrb[24].mxu0 %vm2171_vm5, %v4682_v16  ;;  %10316 = vmatmul.mubr.msk.bf16.gmra.mrb[24].mxu1 %vm2171_vm5, %v7705_v6 }
 0x5c8   : > { %4871 = vmatprep.mubr.bf16.mxu0 %v11493_v42  ;;  %7893 = vmatprep.mubr.bf16.mxu1 %v11493_v42 }
 0x5cf   : > { %9845 = vmatmul.mubr.msk.bf16.gmra.mrb[28].mxu0 %vm2171_vm5, %v4683_v23  ;;  %10317 = vmatmul.mubr.msk.bf16.gmra.mrb[28].mxu1 %vm2171_vm5, %v7706_v20 }
 0x5d0   : > { %4881 = vmatprep.mubr.bf16.mxu0 %v11493_v42  ;;  %7903 = vmatprep.mubr.bf16.mxu1 %v11493_v42 }
 0x5d7   : > { %9846 = vmatmul.mubr.msk.bf16.gmra.mrb[32].mxu0 %vm2171_vm5, %v4684_v62  ;;  %10318 = vmatmul.mubr.msk.bf16.gmra.mrb[32].mxu1 %vm2171_vm5, %v7707_v18 }
 0x5d8   : > { %4891 = vmatprep.mubr.bf16.mxu0 %v11493_v42  ;;  %7913 = vmatprep.mubr.bf16.mxu1 %v11493_v42 }
 0x5df   : > { %9847 = vmatmul.mubr.msk.bf16.gmra.mrb[36].mxu0 %vm2171_vm5, %v4685_v28  ;;  %10319 = vmatmul.mubr.msk.bf16.gmra.mrb[36].mxu1 %vm2171_vm5, %v7708_v59 }
 0x5e0   : > { %4901 = vmatprep.mubr.bf16.mxu0 %v11493_v42  ;;  %7923 = vmatprep.mubr.bf16.mxu1 %v11493_v42 }
 0x5e7   : > { %9848 = vmatmul.mubr.msk.bf16.gmra.mrb[76].mxu0 %vm2171_vm5, %v4686_v53  ;;  %10320 = vmatmul.mubr.msk.bf16.gmra.mrb[76].mxu1 %vm2171_vm5, %v7709_v12 }
 0x60a   : > { %v4305_v36 = vpop.f32.mrb[68].mxu0  ;;  %v7329_v48 = vpop.f32.mrb[68].mxu1 }
 0x60b   : > { %v4352_v52 = vadd.f32 %v4305_v36, %v14300_v43  ;;  %v7376_v41 = vadd.f32 %v7329_v48, %v14303_v27  ;;  %v4307_v38 = vpop.f32.mrb[69].mxu0  ;;  %v7331_v57 = vpop.f32.mrb[69].mxu1 }
 0x60c   : > { %v4353_v14 = vadd.f32 %v4307_v38, %v14306_v37  ;;  %v7377_v42 = vadd.f32 %v7331_v57, %v14309_v61  ;;  %v4309_v33 = vpop.f32.mrb[70].mxu0  ;;  %v7333_v4 = vpop.f32.mrb[70].mxu1  ;;  %v4952_v37 = vld [vmem:[#allocation3] sm:$0xff]  ;;  %v7975_v61 = vld [vmem:[#allocation3 + $0x150] sm:$0xff] }
 0x60d   : > { %v4310_v11 = vpop.f32.mrb[71].mxu0  ;;  %v7334_v45 = vpop.f32.mrb[71].mxu1  ;;  %v4960_v33 = vld [vmem:[#allocation3 + $0x40] sm:$0xff]  ;;  %v7983_v4 = vld [vmem:[#allocation3 + $0x190] sm:$0xff] }
 0x60e   : > { %v4961_v11 = vld [vmem:[#allocation3 + $0x48] sm:$0xff]  ;;  %v7984_v45 = vld [vmem:[#allocation3 + $0x198] sm:$0xff] }
 0x662   : > { %v4604_v34 = vpop.f32.mrb[72].mxu0  ;;  %v7627_v19 = vpop.f32.mrb[72].mxu1 }
 0x663   : > { %v14363_v17 = vadd.f32 %v4604_v34, %v4352_v52  ;;  %v14365_v60 = vadd.f32 %v7627_v19, %v7376_v41  ;;  %v4606_v0 = vpop.f32.mrb[73].mxu0  ;;  %v7629_v49 = vpop.f32.mrb[73].mxu1 }
 0x664   : > { %v14367_v43 = vadd.f32 %v4606_v0, %v4353_v14  ;;  %v14369_v27 = vadd.f32 %v7629_v49, %v7377_v42  ;;  %v4608_v55 = vpop.f32.mrb[74].mxu0  ;;  %v7631_v15 = vpop.f32.mrb[74].mxu1  ;;  %v4962_v0 = vld [vmem:[#allocation3 + $0x50] sm:$0xff]  ;;  %v7985_v49 = vld [vmem:[#allocation3 + $0x1a0] sm:$0xff] }
 0x665   : > { %v4609_v21 = vpop.f32.mrb[75].mxu0  ;;  %v7632_v35 = vpop.f32.mrb[75].mxu1 }
 0x66a   : > { %v4803_v9 = vpop.f32.mrb[0].mxu0  ;;  %v7825_v50 = vpop.f32.mrb[0].mxu1 }
 0x66b   : > { %v4994_v25 = vadd.f32 %v4952_v37, %v4803_v9  ;;  %v8017_v1 = vadd.f32 %v7975_v61, %v7825_v50  ;;  %v4805_v47 = vpop.f32.mrb[1].mxu0  ;;  %v7827_v26 = vpop.f32.mrb[1].mxu1  ;;  %v4963_v37 = vld [vmem:[#allocation3 + $0x58] sm:$0xff]  ;;  %v7986_v61 = vld [vmem:[#allocation3 + $0x1a8] sm:$0xff] }
 0x66c   : > { %v4995_v51 = vadd.f32 %v4953_v24, %v4805_v47  ;;  %v8018_v44 = vadd.f32 %v7976_v32, %v7827_v26  ;;  %v4807_v16 = vpop.f32.mrb[2].mxu0  ;;  %v7829_v6 = vpop.f32.mrb[2].mxu1 }
 0x66d   : > { %5036 = vst [vmem:[#allocation3] sm:$0xff] %v4994_v25  ;;  %8059 = vst [vmem:[#allocation3 + $0x150] sm:$0xff] %v8017_v1  ;;  %v4996_v29 = vadd.f32 %v4954_v46, %v4807_v16  ;;  %v8019_v5 = vadd.f32 %v7977_v3, %v7829_v6  ;;  %v4809_v8 = vpop.f32.mrb[3].mxu0  ;;  %v7831_v7 = vpop.f32.mrb[3].mxu1 }
 0x66e   : > { %5037 = vst [vmem:[#allocation3 + $0x8] sm:$0xff] %v4995_v51  ;;  %8060 = vst [vmem:[#allocation3 + $0x158] sm:$0xff] %v8018_v44  ;;  %v4997_v23 = vadd.f32 %v4955_v22, %v4809_v8  ;;  %v8020_v20 = vadd.f32 %v7978_v10, %v7831_v7  ;;  %v4964_v22 = vld [vmem:[#allocation3 + $0x60] sm:$0xff]  ;;  %v7987_v10 = vld [vmem:[#allocation3 + $0x1b0] sm:$0xff] }
 0x66f   : > { %5038 = vst [vmem:[#allocation3 + $0x10] sm:$0xff] %v4996_v29  ;;  %8061 = vst [vmem:[#allocation3 + $0x160] sm:$0xff] %v8019_v5  ;;  %v4965_v51 = vld [vmem:[#allocation3 + $0x68] sm:$0xff]  ;;  %v7988_v44 = vld [vmem:[#allocation3 + $0x1b8] sm:$0xff] }
 0x670   : > { %5039 = vst [vmem:[#allocation3 + $0x18] sm:$0xff] %v4997_v23  ;;  %8062 = vst [vmem:[#allocation3 + $0x168] sm:$0xff] %v8020_v20  ;;  %v4966_v29 = vld [vmem:[#allocation3 + $0x70] sm:$0xff]  ;;  %v7989_v5 = vld [vmem:[#allocation3 + $0x1c0] sm:$0xff] }
 0x672   : > { %v4813_v62 = vpop.f32.mrb[4].mxu0  ;;  %v7835_v18 = vpop.f32.mrb[4].mxu1 }
 0x673   : > { %v4998_v39 = vadd.f32 %v4956_v54, %v4813_v62  ;;  %v8021_v58 = vadd.f32 %v7979_v56, %v7835_v18  ;;  %v4815_v28 = vpop.f32.mrb[5].mxu0  ;;  %v7837_v59 = vpop.f32.mrb[5].mxu1  ;;  %v4967_v54 = vld [vmem:[#allocation3 + $0x78] sm:$0xff]  ;;  %v7990_v56 = vld [vmem:[#allocation3 + $0x1c8] sm:$0xff] }
 0x674   : > { %v4999_v53 = vadd.f32 %v4957_v13, %v4815_v28  ;;  %v8022_v12 = vadd.f32 %v7980_v63, %v7837_v59  ;;  %v4817_v36 = vpop.f32.mrb[6].mxu0  ;;  %v7839_v48 = vpop.f32.mrb[6].mxu1 }
 0x675   : > { %5040 = vst [vmem:[#allocation3 + $0x20] sm:$0xff] %v4998_v39  ;;  %8063 = vst [vmem:[#allocation3 + $0x170] sm:$0xff] %v8021_v58  ;;  %v5000_v52 = vadd.f32 %v4958_v2, %v4817_v36  ;;  %v8023_v41 = vadd.f32 %v7981_v40, %v7839_v48  ;;  %v4819_v38 = vpop.f32.mrb[7].mxu0  ;;  %v7841_v57 = vpop.f32.mrb[7].mxu1 }
 0x676   : > { %5041 = vst [vmem:[#allocation3 + $0x28] sm:$0xff] %v4999_v53  ;;  %8064 = vst [vmem:[#allocation3 + $0x178] sm:$0xff] %v8022_v12  ;;  %v5001_v14 = vadd.f32 %v4959_v31, %v4819_v38  ;;  %v8024_v42 = vadd.f32 %v7982_v30, %v7841_v57  ;;  %v4968_v31 = vld [vmem:[#allocation3 + $0x80] sm:$0xff]  ;;  %v7991_v30 = vld [vmem:[#allocation3 + $0x1d0] sm:$0xff] }
 0x677   : > { %5042 = vst [vmem:[#allocation3 + $0x30] sm:$0xff] %v5000_v52  ;;  %8065 = vst [vmem:[#allocation3 + $0x180] sm:$0xff] %v8023_v41  ;;  %v4969_v53 = vld [vmem:[#allocation3 + $0x88] sm:$0xff]  ;;  %v7992_v12 = vld [vmem:[#allocation3 + $0x1d8] sm:$0xff] }
 0x678   : > { %5043 = vst [vmem:[#allocation3 + $0x38] sm:$0xff] %v5001_v14  ;;  %8066 = vst [vmem:[#allocation3 + $0x188] sm:$0xff] %v8024_v42  ;;  %v4970_v52 = vld [vmem:[#allocation3 + $0x90] sm:$0xff]  ;;  %v7993_v41 = vld [vmem:[#allocation3 + $0x1e0] sm:$0xff] }
 0x67a   : > { %v4823_v34 = vpop.f32.mrb[8].mxu0  ;;  %v7845_v19 = vpop.f32.mrb[8].mxu1 }
 0x67b   : > { %v5002_v55 = vadd.f32 %v4960_v33, %v4823_v34  ;;  %v8025_v15 = vadd.f32 %v7983_v4, %v7845_v19  ;;  %v4825_v21 = vpop.f32.mrb[9].mxu0  ;;  %v7847_v35 = vpop.f32.mrb[9].mxu1  ;;  %v4971_v33 = vld [vmem:[#allocation3 + $0x98] sm:$0xff]  ;;  %v7994_v4 = vld [vmem:[#allocation3 + $0x1e8] sm:$0xff] }
 0x67c   : > { %v5003_v24 = vadd.f32 %v4961_v11, %v4825_v21  ;;  %v8026_v32 = vadd.f32 %v7984_v45, %v7847_v35  ;;  %v4827_v9 = vpop.f32.mrb[10].mxu0  ;;  %v7849_v50 = vpop.f32.mrb[10].mxu1 }
 0x67d   : > { %5044 = vst [vmem:[#allocation3 + $0x40] sm:$0xff] %v5002_v55  ;;  %8067 = vst [vmem:[#allocation3 + $0x190] sm:$0xff] %v8025_v15  ;;  %v5004_v46 = vadd.f32 %v4962_v0, %v4827_v9  ;;  %v8027_v3 = vadd.f32 %v7985_v49, %v7849_v50  ;;  %v4829_v25 = vpop.f32.mrb[11].mxu0  ;;  %v7851_v1 = vpop.f32.mrb[11].mxu1 }
 0x67e   : > { %5045 = vst [vmem:[#allocation3 + $0x48] sm:$0xff] %v5003_v24  ;;  %8068 = vst [vmem:[#allocation3 + $0x198] sm:$0xff] %v8026_v32  ;;  %v5005_v47 = vadd.f32 %v4963_v37, %v4829_v25  ;;  %v8028_v26 = vadd.f32 %v7986_v61, %v7851_v1  ;;  %v4972_v37 = vld [vmem:[#allocation3 + $0xa0] sm:$0xff]  ;;  %v7995_v61 = vld [vmem:[#allocation3 + $0x1f0] sm:$0xff] }
 0x67f   : > { %5046 = vst [vmem:[#allocation3 + $0x50] sm:$0xff] %v5004_v46  ;;  %8069 = vst [vmem:[#allocation3 + $0x1a0] sm:$0xff] %v8027_v3  ;;  %v4973_v24 = vld [vmem:[#allocation3 + $0xa8] sm:$0xff]  ;;  %v7996_v32 = vld [vmem:[#allocation3 + $0x1f8] sm:$0xff] }
 0x680   : > { %5047 = vst [vmem:[#allocation3 + $0x58] sm:$0xff] %v5005_v47  ;;  %8070 = vst [vmem:[#allocation3 + $0x1a8] sm:$0xff] %v8028_v26  ;;  %v4974_v46 = vld [vmem:[#allocation3 + $0xb0] sm:$0xff]  ;;  %v7997_v3 = vld [vmem:[#allocation3 + $0x200] sm:$0xff] }
 0x682   : > { %v4833_v16 = vpop.f32.mrb[12].mxu0  ;;  %v7855_v6 = vpop.f32.mrb[12].mxu1 }
 0x683   : > { %v5006_v8 = vadd.f32 %v4964_v22, %v4833_v16  ;;  %v8029_v7 = vadd.f32 %v7987_v10, %v7855_v6  ;;  %v4835_v23 = vpop.f32.mrb[13].mxu0  ;;  %v7857_v20 = vpop.f32.mrb[13].mxu1  ;;  %v4975_v22 = vld [vmem:[#allocation3 + $0xb8] sm:$0xff]  ;;  %v7998_v10 = vld [vmem:[#allocation3 + $0x208] sm:$0xff] }
 0x684   : > { %v5007_v13 = vadd.f32 %v4965_v51, %v4835_v23  ;;  %v8030_v63 = vadd.f32 %v7988_v44, %v7857_v20  ;;  %v4837_v62 = vpop.f32.mrb[14].mxu0  ;;  %v7859_v18 = vpop.f32.mrb[14].mxu1 }
 0x685   : > { %5048 = vst [vmem:[#allocation3 + $0x60] sm:$0xff] %v5006_v8  ;;  %8071 = vst [vmem:[#allocation3 + $0x1b0] sm:$0xff] %v8029_v7  ;;  %v5008_v2 = vadd.f32 %v4966_v29, %v4837_v62  ;;  %v8031_v40 = vadd.f32 %v7989_v5, %v7859_v18  ;;  %v4839_v39 = vpop.f32.mrb[15].mxu0  ;;  %v7861_v58 = vpop.f32.mrb[15].mxu1 }
 0x686   : > { %5049 = vst [vmem:[#allocation3 + $0x68] sm:$0xff] %v5007_v13  ;;  %8072 = vst [vmem:[#allocation3 + $0x1b8] sm:$0xff] %v8030_v63  ;;  %v5009_v28 = vadd.f32 %v4967_v54, %v4839_v39  ;;  %v8032_v59 = vadd.f32 %v7990_v56, %v7861_v58  ;;  %v4976_v54 = vld [vmem:[#allocation3 + $0xc0] sm:$0xff]  ;;  %v7999_v56 = vld [vmem:[#allocation3 + $0x210] sm:$0xff] }
 0x687   : > { %5050 = vst [vmem:[#allocation3 + $0x70] sm:$0xff] %v5008_v2  ;;  %8073 = vst [vmem:[#allocation3 + $0x1c0] sm:$0xff] %v8031_v40  ;;  %v4977_v13 = vld [vmem:[#allocation3 + $0xc8] sm:$0xff]  ;;  %v8000_v63 = vld [vmem:[#allocation3 + $0x218] sm:$0xff] }
 0x688   : > { %5051 = vst [vmem:[#allocation3 + $0x78] sm:$0xff] %v5009_v28  ;;  %8074 = vst [vmem:[#allocation3 + $0x1c8] sm:$0xff] %v8032_v59  ;;  %v4978_v2 = vld [vmem:[#allocation3 + $0xd0] sm:$0xff]  ;;  %v8001_v40 = vld [vmem:[#allocation3 + $0x220] sm:$0xff] }
 0x68a   : > { %v4843_v36 = vpop.f32.mrb[16].mxu0  ;;  %v7865_v48 = vpop.f32.mrb[16].mxu1 }
 0x68b   : > { %v5010_v38 = vadd.f32 %v4968_v31, %v4843_v36  ;;  %v8033_v57 = vadd.f32 %v7991_v30, %v7865_v48  ;;  %v4845_v14 = vpop.f32.mrb[17].mxu0  ;;  %v7867_v42 = vpop.f32.mrb[17].mxu1  ;;  %v4979_v31 = vld [vmem:[#allocation3 + $0xd8] sm:$0xff]  ;;  %v8002_v30 = vld [vmem:[#allocation3 + $0x228] sm:$0xff] }
 0x68c   : > { %v5011_v11 = vadd.f32 %v4969_v53, %v4845_v14  ;;  %v8034_v45 = vadd.f32 %v7992_v12, %v7867_v42  ;;  %v4847_v34 = vpop.f32.mrb[18].mxu0  ;;  %v7869_v19 = vpop.f32.mrb[18].mxu1 }
 0x68d   : > { %5052 = vst [vmem:[#allocation3 + $0x80] sm:$0xff] %v5010_v38  ;;  %8075 = vst [vmem:[#allocation3 + $0x1d0] sm:$0xff] %v8033_v57  ;;  %v5012_v0 = vadd.f32 %v4970_v52, %v4847_v34  ;;  %v8035_v49 = vadd.f32 %v7993_v41, %v7869_v19  ;;  %v4849_v55 = vpop.f32.mrb[19].mxu0  ;;  %v7871_v15 = vpop.f32.mrb[19].mxu1 }
 0x68e   : > { %5053 = vst [vmem:[#allocation3 + $0x88] sm:$0xff] %v5011_v11  ;;  %8076 = vst [vmem:[#allocation3 + $0x1d8] sm:$0xff] %v8034_v45  ;;  %v5013_v21 = vadd.f32 %v4971_v33, %v4849_v55  ;;  %v8036_v35 = vadd.f32 %v7994_v4, %v7871_v15  ;;  %v4980_v33 = vld [vmem:[#allocation3 + $0xe0] sm:$0xff]  ;;  %v8003_v4 = vld [vmem:[#allocation3 + $0x230] sm:$0xff] }
 0x68f   : > { %5054 = vst [vmem:[#allocation3 + $0x90] sm:$0xff] %v5012_v0  ;;  %8077 = vst [vmem:[#allocation3 + $0x1e0] sm:$0xff] %v8035_v49  ;;  %v4981_v11 = vld [vmem:[#allocation3 + $0xe8] sm:$0xff]  ;;  %v8004_v45 = vld [vmem:[#allocation3 + $0x238] sm:$0xff] }
 0x690   : > { %5055 = vst [vmem:[#allocation3 + $0x98] sm:$0xff] %v5013_v21  ;;  %8078 = vst [vmem:[#allocation3 + $0x1e8] sm:$0xff] %v8036_v35  ;;  %v4982_v0 = vld [vmem:[#allocation3 + $0xf0] sm:$0xff]  ;;  %v8005_v49 = vld [vmem:[#allocation3 + $0x240] sm:$0xff] }
 0x692   : > { %v4853_v9 = vpop.f32.mrb[20].mxu0  ;;  %v7875_v50 = vpop.f32.mrb[20].mxu1 }
 0x693   : > { %v5014_v25 = vadd.f32 %v4972_v37, %v4853_v9  ;;  %v8037_v1 = vadd.f32 %v7995_v61, %v7875_v50  ;;  %v4855_v47 = vpop.f32.mrb[21].mxu0  ;;  %v7877_v26 = vpop.f32.mrb[21].mxu1  ;;  %v4983_v37 = vld [vmem:[#allocation3 + $0xf8] sm:$0xff]  ;;  %v8006_v61 = vld [vmem:[#allocation3 + $0x248] sm:$0xff] }
 0x694   : > { %v5015_v51 = vadd.f32 %v4973_v24, %v4855_v47  ;;  %v8038_v44 = vadd.f32 %v7996_v32, %v7877_v26  ;;  %v4857_v16 = vpop.f32.mrb[22].mxu0  ;;  %v7879_v6 = vpop.f32.mrb[22].mxu1 }
 0x695   : > { %5056 = vst [vmem:[#allocation3 + $0xa0] sm:$0xff] %v5014_v25  ;;  %8079 = vst [vmem:[#allocation3 + $0x1f0] sm:$0xff] %v8037_v1  ;;  %v5016_v29 = vadd.f32 %v4974_v46, %v4857_v16  ;;  %v8039_v5 = vadd.f32 %v7997_v3, %v7879_v6  ;;  %v4859_v8 = vpop.f32.mrb[23].mxu0  ;;  %v7881_v7 = vpop.f32.mrb[23].mxu1 }
 0x696   : > { %5057 = vst [vmem:[#allocation3 + $0xa8] sm:$0xff] %v5015_v51  ;;  %8080 = vst [vmem:[#allocation3 + $0x1f8] sm:$0xff] %v8038_v44  ;;  %v5017_v23 = vadd.f32 %v4975_v22, %v4859_v8  ;;  %v8040_v20 = vadd.f32 %v7998_v10, %v7881_v7  ;;  %v4984_v22 = vld [vmem:[#allocation3 + $0x100] sm:$0xff]  ;;  %v8007_v10 = vld [vmem:[#allocation3 + $0x250] sm:$0xff] }
 0x697   : > { %5058 = vst [vmem:[#allocation3 + $0xb0] sm:$0xff] %v5016_v29  ;;  %8081 = vst [vmem:[#allocation3 + $0x200] sm:$0xff] %v8039_v5  ;;  %v4985_v51 = vld [vmem:[#allocation3 + $0x108] sm:$0xff]  ;;  %v8008_v44 = vld [vmem:[#allocation3 + $0x258] sm:$0xff] }
 0x698   : > { %5059 = vst [vmem:[#allocation3 + $0xb8] sm:$0xff] %v5017_v23  ;;  %8082 = vst [vmem:[#allocation3 + $0x208] sm:$0xff] %v8040_v20  ;;  %v4986_v29 = vld [vmem:[#allocation3 + $0x110] sm:$0xff]  ;;  %v8009_v5 = vld [vmem:[#allocation3 + $0x260] sm:$0xff] }
 0x69a   : > { %v4863_v62 = vpop.f32.mrb[24].mxu0  ;;  %v7885_v18 = vpop.f32.mrb[24].mxu1 }
 0x69b   : > { %v5018_v39 = vadd.f32 %v4976_v54, %v4863_v62  ;;  %v8041_v58 = vadd.f32 %v7999_v56, %v7885_v18  ;;  %v4865_v28 = vpop.f32.mrb[25].mxu0  ;;  %v7887_v59 = vpop.f32.mrb[25].mxu1  ;;  %v4987_v54 = vld [vmem:[#allocation3 + $0x118] sm:$0xff]  ;;  %v8010_v56 = vld [vmem:[#allocation3 + $0x268] sm:$0xff] }
 0x69c   : > { %v5019_v53 = vadd.f32 %v4977_v13, %v4865_v28  ;;  %v8042_v12 = vadd.f32 %v8000_v63, %v7887_v59  ;;  %v4867_v36 = vpop.f32.mrb[26].mxu0  ;;  %v7889_v48 = vpop.f32.mrb[26].mxu1 }
 0x69d   : > { %5060 = vst [vmem:[#allocation3 + $0xc0] sm:$0xff] %v5018_v39  ;;  %8083 = vst [vmem:[#allocation3 + $0x210] sm:$0xff] %v8041_v58  ;;  %v5020_v52 = vadd.f32 %v4978_v2, %v4867_v36  ;;  %v8043_v41 = vadd.f32 %v8001_v40, %v7889_v48  ;;  %v4869_v38 = vpop.f32.mrb[27].mxu0  ;;  %v7891_v57 = vpop.f32.mrb[27].mxu1 }
 0x69e   : > { %5061 = vst [vmem:[#allocation3 + $0xc8] sm:$0xff] %v5019_v53  ;;  %8084 = vst [vmem:[#allocation3 + $0x218] sm:$0xff] %v8042_v12  ;;  %v5021_v14 = vadd.f32 %v4979_v31, %v4869_v38  ;;  %v8044_v42 = vadd.f32 %v8002_v30, %v7891_v57  ;;  %v4988_v31 = vld [vmem:[#allocation3 + $0x120] sm:$0xff]  ;;  %v8011_v30 = vld [vmem:[#allocation3 + $0x270] sm:$0xff] }
 0x69f   : > { %5062 = vst [vmem:[#allocation3 + $0xd0] sm:$0xff] %v5020_v52  ;;  %8085 = vst [vmem:[#allocation3 + $0x220] sm:$0xff] %v8043_v41  ;;  %v4989_v53 = vld [vmem:[#allocation3 + $0x128] sm:$0xff]  ;;  %v8012_v12 = vld [vmem:[#allocation3 + $0x278] sm:$0xff] }
 0x6a0   : > { %5063 = vst [vmem:[#allocation3 + $0xd8] sm:$0xff] %v5021_v14  ;;  %8086 = vst [vmem:[#allocation3 + $0x228] sm:$0xff] %v8044_v42  ;;  %v4990_v52 = vld [vmem:[#allocation3 + $0x130] sm:$0xff]  ;;  %v8013_v41 = vld [vmem:[#allocation3 + $0x280] sm:$0xff] }
 0x6a2   : > { %v4873_v34 = vpop.f32.mrb[28].mxu0  ;;  %v7895_v19 = vpop.f32.mrb[28].mxu1 }
 0x6a3   : > { %v5022_v55 = vadd.f32 %v4980_v33, %v4873_v34  ;;  %v8045_v15 = vadd.f32 %v8003_v4, %v7895_v19  ;;  %v4875_v21 = vpop.f32.mrb[29].mxu0  ;;  %v7897_v35 = vpop.f32.mrb[29].mxu1  ;;  %v4991_v33 = vld [vmem:[#allocation3 + $0x138] sm:$0xff]  ;;  %v8014_v4 = vld [vmem:[#allocation3 + $0x288] sm:$0xff] }
 0x6a4   : > { %v5023_v24 = vadd.f32 %v4981_v11, %v4875_v21  ;;  %v8046_v32 = vadd.f32 %v8004_v45, %v7897_v35  ;;  %v4877_v9 = vpop.f32.mrb[30].mxu0  ;;  %v7899_v50 = vpop.f32.mrb[30].mxu1 }
 0x6a5   : > { %5064 = vst [vmem:[#allocation3 + $0xe0] sm:$0xff] %v5022_v55  ;;  %8087 = vst [vmem:[#allocation3 + $0x230] sm:$0xff] %v8045_v15  ;;  %v5024_v46 = vadd.f32 %v4982_v0, %v4877_v9  ;;  %v8047_v3 = vadd.f32 %v8005_v49, %v7899_v50  ;;  %v4879_v25 = vpop.f32.mrb[31].mxu0  ;;  %v7901_v1 = vpop.f32.mrb[31].mxu1 }
 0x6a6   : > { %5065 = vst [vmem:[#allocation3 + $0xe8] sm:$0xff] %v5023_v24  ;;  %8088 = vst [vmem:[#allocation3 + $0x238] sm:$0xff] %v8046_v32  ;;  %v5025_v47 = vadd.f32 %v4983_v37, %v4879_v25  ;;  %v8048_v26 = vadd.f32 %v8006_v61, %v7901_v1  ;;  %v4992_v61 = vld [vmem:[#allocation3 + $0x140] sm:$0x3]  ;;  %v8015_v32 = vld [vmem:[#allocation3 + $0x290] sm:$0x3] }
 0x6a7   : > { %5066 = vst [vmem:[#allocation3 + $0xf0] sm:$0xff] %v5024_v46  ;;  %8089 = vst [vmem:[#allocation3 + $0x240] sm:$0xff] %v8047_v3  ;;  %v4993_v3 = vld [vmem:[#allocation3 + $0x148] sm:$0x3]  ;;  %v8016_v1 = vld [vmem:[#allocation3 + $0x298] sm:$0x3] }
 0x6a8   : > { %5067 = vst [vmem:[#allocation3 + $0xf8] sm:$0xff] %v5025_v47  ;;  %8090 = vst [vmem:[#allocation3 + $0x248] sm:$0xff] %v8048_v26 }
 0x6aa   : > { %v4883_v16 = vpop.f32.mrb[32].mxu0  ;;  %v7905_v6 = vpop.f32.mrb[32].mxu1 }
 0x6ab   : > { %v5026_v8 = vadd.f32 %v4984_v22, %v4883_v16  ;;  %v8049_v7 = vadd.f32 %v8007_v10, %v7905_v6  ;;  %v4885_v23 = vpop.f32.mrb[33].mxu0  ;;  %v7907_v20 = vpop.f32.mrb[33].mxu1 }
 0x6ac   : > { %v5027_v13 = vadd.f32 %v4985_v51, %v4885_v23  ;;  %v8050_v63 = vadd.f32 %v8008_v44, %v7907_v20  ;;  %v4887_v62 = vpop.f32.mrb[34].mxu0  ;;  %v7909_v18 = vpop.f32.mrb[34].mxu1 }
 0x6ad   : > { %5068 = vst [vmem:[#allocation3 + $0x100] sm:$0xff] %v5026_v8  ;;  %8091 = vst [vmem:[#allocation3 + $0x250] sm:$0xff] %v8049_v7  ;;  %v5028_v2 = vadd.f32 %v4986_v29, %v4887_v62  ;;  %v8051_v40 = vadd.f32 %v8009_v5, %v7909_v18  ;;  %v4889_v39 = vpop.f32.mrb[35].mxu0  ;;  %v7911_v58 = vpop.f32.mrb[35].mxu1 }
 0x6ae   : > { %5069 = vst [vmem:[#allocation3 + $0x108] sm:$0xff] %v5027_v13  ;;  %8092 = vst [vmem:[#allocation3 + $0x258] sm:$0xff] %v8050_v63  ;;  %v5029_v28 = vadd.f32 %v4987_v54, %v4889_v39  ;;  %v8052_v59 = vadd.f32 %v8010_v56, %v7911_v58 }
 0x6af   : > { %5070 = vst [vmem:[#allocation3 + $0x110] sm:$0xff] %v5028_v2  ;;  %8093 = vst [vmem:[#allocation3 + $0x260] sm:$0xff] %v8051_v40 }
 0x6b0   : > { %5071 = vst [vmem:[#allocation3 + $0x118] sm:$0xff] %v5029_v28  ;;  %8094 = vst [vmem:[#allocation3 + $0x268] sm:$0xff] %v8052_v59 }
 0x6b2   : > { %v4893_v36 = vpop.f32.mrb[36].mxu0  ;;  %v7915_v48 = vpop.f32.mrb[36].mxu1 }
 0x6b3   : > { %v5030_v38 = vadd.f32 %v4988_v31, %v4893_v36  ;;  %v8053_v57 = vadd.f32 %v8011_v30, %v7915_v48  ;;  %v4895_v14 = vpop.f32.mrb[37].mxu0  ;;  %v7917_v42 = vpop.f32.mrb[37].mxu1 }
 0x6b4   : > { %v5031_v11 = vadd.f32 %v4989_v53, %v4895_v14  ;;  %v8054_v45 = vadd.f32 %v8012_v12, %v7917_v42  ;;  %v4897_v34 = vpop.f32.mrb[38].mxu0  ;;  %v7919_v19 = vpop.f32.mrb[38].mxu1 }
 0x6b5   : > { %5072 = vst [vmem:[#allocation3 + $0x120] sm:$0xff] %v5030_v38  ;;  %8095 = vst [vmem:[#allocation3 + $0x270] sm:$0xff] %v8053_v57  ;;  %v5032_v0 = vadd.f32 %v4990_v52, %v4897_v34  ;;  %v8055_v49 = vadd.f32 %v8013_v41, %v7919_v19  ;;  %v4899_v55 = vpop.f32.mrb[39].mxu0  ;;  %v7921_v15 = vpop.f32.mrb[39].mxu1 }
 0x6b6   : > { %5073 = vst [vmem:[#allocation3 + $0x128] sm:$0xff] %v5031_v11  ;;  %8096 = vst [vmem:[#allocation3 + $0x278] sm:$0xff] %v8054_v45  ;;  %v5033_v21 = vadd.f32 %v4991_v33, %v4899_v55  ;;  %v8056_v35 = vadd.f32 %v8014_v4, %v7921_v15 }
 0x6b7   : > { %5074 = vst [vmem:[#allocation3 + $0x130] sm:$0xff] %v5032_v0  ;;  %8097 = vst [vmem:[#allocation3 + $0x280] sm:$0xff] %v8055_v49 }
 0x6b8   : > { %5075 = vst [vmem:[#allocation3 + $0x138] sm:$0xff] %v5033_v21  ;;  %8098 = vst [vmem:[#allocation3 + $0x288] sm:$0xff] %v8056_v35 }
 0x6ba   : > { %v4903_v37 = vpop.f32.mrb[76].mxu0  ;;  %v7925_v24 = vpop.f32.mrb[76].mxu1  ;;  %8104 = sbr.rel (%p10321_p5) target bundleno = 2105 (0x839), region = 68 }
 0x6bb   : > { %v4950_v9 = vadd.f32 %v4903_v37, %v14363_v17  ;;  %v7972_v50 = vadd.f32 %v7925_v24, %v14365_v60  ;;  %v4905_v46 = vpop.f32.mrb[77].mxu0  ;;  %v7927_v25 = vpop.f32.mrb[77].mxu1 }
 0x6bc   : > { %v4951_v47 = vadd.f32 %v4905_v46, %v14367_v43  ;;  %v7973_v26 = vadd.f32 %v7927_v25, %v14369_v27  ;;  %v4907_v22 = vpop.f32.mrb[78].mxu0  ;;  %v7929_v10 = vpop.f32.mrb[78].mxu1 }
 0x6bd   : > { %v5034_v51 = vadd.f32 %v4992_v61, %v4950_v9  ;;  %v8057_v44 = vadd.f32 %v8015_v32, %v7972_v50  ;;  %v4908_v16 = vpop.f32.mrb[79].mxu0  ;;  %v7930_v6 = vpop.f32.mrb[79].mxu1 }
 0x6be   : > { %v5035_v29 = vadd.f32 %v4993_v3, %v4951_v47  ;;  %v8058_v5 = vadd.f32 %v8016_v1, %v7973_v26 }
 0x6bf   : > { %5076 = vst [vmem:[#allocation3 + $0x140] sm:$0x3] %v5034_v51  ;;  %8099 = vst [vmem:[#allocation3 + $0x290] sm:$0x3] %v8057_v44 }
 0x6c0   : > { %5077 = vst [vmem:[#allocation3 + $0x148] sm:$0x3] %v5035_v29  ;;  %8100 = vst [vmem:[#allocation3 + $0x298] sm:$0x3] %v8058_v5 }
 0x6c1   : > { %v8371_v17 = vld [vmem:[%s15860_s9 + $0x10] sm:$0xff]  ;;  %v8369_v60 = vld [vmem:[%s15860_s9] sm:$0xff]  ;;  %v11494_v43 = vmov 0   ;;  %v8372_v27 = vld [vmem:[%s15860_s9 + $0x18] sm:$0xff]  ;;  %v8191_v53 = vlaneseq  ;;  %vm8598_vm6 = vcmask 1041408  }
 0x6c2   : > { %11477 = vset.pattern.permute.xlu1 %v11494_v43  ;;  %11476 = vset.pattern.permute.xlu0 %v11494_v43  ;;  %v8370_v8 = vld [vmem:[%s15860_s9 + $0x8] sm:$0xff]  ;;  %v8373_v23 = vld [vmem:[%s15860_s9 + $0x20] sm:$0xff]  ;;  %v8376_v20 = vld [vmem:[%s15860_s9 + $0x38] sm:$0xff] }
 0x6c3   : > { %8402 = vperm.xlu1 %11477, %v8371_v17   ;;  %8392 = vperm.xlu0 %11476, %v8369_v60   ;;  %v8374_v7 = vld [vmem:[%s15860_s9 + $0x28] sm:$0xff]  ;;  %v8375_v54 = vld [vmem:[%s15860_s9 + $0x30] sm:$0xff]  ;;  %v8377_v13 = vld [vmem:[%s15860_s9 + $0x40] sm:$0xff]  ;;  %v14439_v12 = vshrl.u32 %v8191_v53, 7 }
 0x6c4   : > { %v8378_v56 = vld [vmem:[%s15860_s9 + $0x48] sm:$0xff]  ;;  %v8380_v63 = vld [vmem:[%s15860_s9 + $0x58] sm:$0xff]  ;;  %v8379_v62 = vld [vmem:[%s15860_s9 + $0x50] sm:$0xff] }
 0x6c5   : > { %v8382_v18 = vld [vmem:[%s15860_s9 + $0x68] sm:$0xff]  ;;  %v8381_v2 = vld [vmem:[%s15860_s9 + $0x60] sm:$0xff]  ;;  %v8384_v40 = vld [vmem:[%s15860_s9 + $0x78] sm:$0xff]  ;;  %16173 = vst [vmem:[#allocation46_spill] sm:$0xff] %v14439_v12  ;;  %v14442_v36 = vsub.s32 0, %v14439_v12  ;;  %v14448_v52 = vsub.s32 1, %v14439_v12 }
 0x6c6   : > { %v8383_v39 = vld [vmem:[%s15860_s9 + $0x70] sm:$0xff]  ;;  %v8386_v58 = vld [vmem:[%s15860_s9 + $0x88] sm:$0xff]  ;;  %v8385_v28 = vld [vmem:[%s15860_s9 + $0x80] sm:$0xff] }
 0x6c7   : > { %8407 = vperm.xlu1 %11477, %v8372_v27   ;;  %8397 = vperm.xlu0 %11476, %v8370_v8   ;;  %v8388_v59 = vld [vmem:[%s15860_s9 + $0x98] sm:$0xff]  ;;  %v8387_v31 = vld [vmem:[%s15860_s9 + $0x90] sm:$0xff]  ;;  %v8389_v30 = vld [vmem:[%s15860_s9 + $0xa0] sm:$0x3]  ;;  %16174 = vst [vmem:[#allocation47_spill] sm:$0xff] %v14442_v36 }
 0x6c8   : > { %v8189_v48 = vld [vmem:[%s15857_s6] sm:$0x3]  ;;  %16175 = vst [vmem:[#allocation48_spill] sm:$0xff] %v14448_v52  ;;  %v8109_v41 = vld [vmem:[#allocation3 + $0x20] sm:$0xff]  ;;  %v8151_v57 = vld [vmem:[#allocation3 + $0x170] sm:$0xff] }
 0x6c9   : > { %v8110_v38 = vld [vmem:[#allocation3 + $0x28] sm:$0xff]  ;;  %v8152_v14 = vld [vmem:[#allocation3 + $0x178] sm:$0xff]  ;;  %v14451_v42 = vrot.slane %v8189_v48, %v14442_v36  ;;  %v14454_v33 = vrot.slane %v8189_v48, %v14448_v52  ;;  %v8105_v4 = vld [vmem:[#allocation3] sm:$0xff] }
 0x6ca   : > { %v8106_v45 = vld [vmem:[#allocation3 + $0x8] sm:$0xff]  ;;  %v8147_v49 = vld [vmem:[#allocation3 + $0x150] sm:$0xff]  ;;  %v8148_v55 = vld [vmem:[#allocation3 + $0x158] sm:$0xff] }
 0x6cb   : > { %8417 = vperm.xlu1 %11477, %v8374_v7   ;;  %8412 = vperm.xlu0 %11476, %v8373_v23   ;;  %v14457_v11 = vadd.f32 %v14451_v42, %v8109_v41  ;;  %v14460_v34 = vadd.f32 %v14454_v33, %v8110_v38  ;;  %v14463_v19 = vadd.f32 %v14451_v42, %v8151_v57  ;;  %v8111_v21 = vld [vmem:[#allocation3 + $0x30] sm:$0xff]  ;;  %v8112_v37 = vld [vmem:[#allocation3 + $0x38] sm:$0xff]  ;;  %v8153_v61 = vld [vmem:[#allocation3 + $0x180] sm:$0xff] }
 0x6cc   : > { %v14466_v0 = vadd.f32 %v14454_v33, %v8152_v14  ;;  %v14469_v15 = vadd.f32 %v14451_v42, %v8105_v4  ;;  %v14472_v35 = vadd.f32 %v14454_v33, %v8106_v45  ;;  %v8154_v24 = vld [vmem:[#allocation3 + $0x188] sm:$0xff]  ;;  %v14476_v9 = vadd.f32 %v14451_v42, %v8147_v49  ;;  %v8107_v46 = vld [vmem:[#allocation3 + $0x10] sm:$0xff]  ;;  %v8108_v3 = vld [vmem:[#allocation3 + $0x18] sm:$0xff] }
 0x6cd   : > { %16176 = vst [vmem:[#allocation49_spill] sm:$0xff] %v14457_v11  ;;  %16177 = vst [vmem:[#allocation50_spill] sm:$0xff] %v14460_v34  ;;  %v14479_v50 = vadd.f32 %v14454_v33, %v8148_v55  ;;  %v8149_v25 = vld [vmem:[#allocation3 + $0x160] sm:$0xff]  ;;  %v14485_v22 = vadd.f32 %v14451_v42, %v8111_v21  ;;  %v8150_v10 = vld [vmem:[#allocation3 + $0x168] sm:$0xff]  ;;  %v14489_v16 = vadd.f32 %v14454_v33, %v8112_v37 }
 0x6ce   : > { %16178 = vst [vmem:[#allocation51_spill] sm:$0xff] %v14463_v19  ;;  %16179 = vst [vmem:[#allocation52_spill] sm:$0xff] %v14466_v0  ;;  %v8115_v51 = vld [vmem:[#allocation3 + $0x50] sm:$0xff]  ;;  %v14492_v6 = vadd.f32 %v14451_v42, %v8153_v61  ;;  %v14495_v29 = vadd.f32 %v14454_v33, %v8154_v24  ;;  %v8116_v5 = vld [vmem:[#allocation3 + $0x58] sm:$0xff]  ;;  %v14499_v27 = vadd.f32 %v14451_v42, %v8107_v46 }
 0x6cf   : > { %8427 = vperm.xlu1 %11477, %v8376_v20   ;;  %8422 = vperm.xlu0 %11476, %v8375_v54   ;;  %16180 = vst [vmem:[#allocation53_spill] sm:$0xff] %v14469_v15  ;;  %16181 = vst [vmem:[#allocation54_spill] sm:$0xff] %v14472_v35  ;;  %v8157_v17 = vld [vmem:[#allocation3 + $0x1a0] sm:$0xff]  ;;  %v8158_v60 = vld [vmem:[#allocation3 + $0x1a8] sm:$0xff]  ;;  %v14502_v8 = vadd.f32 %v14454_v33, %v8108_v3  ;;  %v14505_v7 = vadd.f32 %v14451_v42, %v8149_v25 }
 0x6d0   : > { %16182 = vst [vmem:[#allocation55_spill] sm:$0xff] %v14476_v9  ;;  %16183 = vst [vmem:[#allocation56_spill] sm:$0xff] %v14479_v50  ;;  %v8113_v23 = vld [vmem:[#allocation3 + $0x40] sm:$0xff]  ;;  %v8119_v53 = vld [vmem:[#allocation3 + $0x70] sm:$0xff] }
 0x6d1   : > { %16184 = vst [vmem:[#allocation57_spill] sm:$0xff] %v14485_v22  ;;  %16185 = vst [vmem:[#allocation58_spill] sm:$0xff] %v14489_v16  ;;  %v8120_v14 = vld [vmem:[#allocation3 + $0x78] sm:$0xff]  ;;  %v8161_v4 = vld [vmem:[#allocation3 + $0x1c0] sm:$0xff] }
 0x6d2   : > { %16186 = vst [vmem:[#allocation59_spill] sm:$0xff] %v14492_v6  ;;  %16187 = vst [vmem:[#allocation60_spill] sm:$0xff] %v14495_v29  ;;  %v8162_v45 = vld [vmem:[#allocation3 + $0x1c8] sm:$0xff]  ;;  %v8117_v61 = vld [vmem:[#allocation3 + $0x60] sm:$0xff] }
 0x6d3   : > { %8437 = vperm.xlu1 %11477, %v8378_v56   ;;  %8432 = vperm.xlu0 %11476, %v8377_v13   ;;  %16188 = vst [vmem:[#allocation61_spill] sm:$0xff] %v14499_v27  ;;  %16189 = vst [vmem:[#allocation62_spill] sm:$0xff] %v14502_v8  ;;  %v14510_v56 = vadd.f32 %v14454_v33, %v8150_v10  ;;  %v14513_v13 = vadd.f32 %v14451_v42, %v8115_v51  ;;  %v8118_v24 = vld [vmem:[#allocation3 + $0x68] sm:$0xff]  ;;  %v8159_v46 = vld [vmem:[#allocation3 + $0x1b0] sm:$0xff] }
 0x6d4   : > { %16190 = vst [vmem:[#allocation63_spill] sm:$0xff] %v14505_v7  ;;  %v14549_v51 = vadd.f32 %v14451_v42, %v8119_v53  ;;  %v8165_v25 = vld [vmem:[#allocation3 + $0x1e0] sm:$0xff]  ;;  %v8166_v3 = vld [vmem:[#allocation3 + $0x1e8] sm:$0xff]  ;;  %v14563_v53 = vadd.f32 %v14451_v42, %v8117_v61  ;;  %v14566_v55 = vadd.f32 %v14454_v33, %v8118_v24  ;;  %v8127_v61 = vld [vmem:[#allocation3 + $0xb0] sm:$0xff] }
 0x6d5   : > { %16191 = vst [vmem:[#allocation64_spill] sm:$0xff] %v14510_v56  ;;  %v8122_v10 = vld [vmem:[#allocation3 + $0x88] sm:$0xff]  ;;  %v14587_v41 = vadd.f32 %v14454_v33, %v8166_v3  ;;  %v8167_v20 = vld [vmem:[#allocation3 + $0x1f0] sm:$0xff]  ;;  %v14613_v44 = vadd.f32 %v14451_v42, %v8127_v61  ;;  %v8168_v48 = vld [vmem:[#allocation3 + $0x1f8] sm:$0xff] }
 0x6d6   : > { %v14599_v3 = vadd.f32 %v14454_v33, %v8122_v10  ;;  %v8132_v26 = vld [vmem:[#allocation3 + $0xd8] sm:$0xff]  ;;  %v8173_v10 = vld [vmem:[#allocation3 + $0x220] sm:$0xff]  ;;  %v8174_v1 = vld [vmem:[#allocation3 + $0x228] sm:$0xff]  ;;  %v14637_v52 = vadd.f32 %v14454_v33, %v8168_v48 }
 0x6d7   : > { %8447 = vperm.xlu1 %11477, %v8380_v63   ;;  %8442 = vperm.xlu0 %11476, %v8379_v62   ;;  %v8114_v63 = vld [vmem:[#allocation3 + $0x48] sm:$0xff]  ;;  %16202 = vst [vmem:[#allocation75_spill] sm:$0xff] %v14587_v41  ;;  %v8169_v62 = vld [vmem:[#allocation3 + $0x200] sm:$0xff]  ;;  %16207 = vst [vmem:[#allocation80_spill] sm:$0xff] %v14613_v44  ;;  %v14643_v43 = vadd.f32 %v14454_v33, %v8132_v26  ;;  %v14651_v12 = vadd.f32 %v14454_v33, %v8174_v1 }
 0x6d8   : > { %v14535_v57 = vadd.f32 %v14454_v33, %v8114_v63  ;;  %v14556_v63 = vadd.f32 %v14451_v42, %v8161_v4  ;;  %v8163_v4 = vld [vmem:[#allocation3 + $0x1d0] sm:$0xff]  ;;  %16204 = vst [vmem:[#allocation77_spill] sm:$0xff] %v14599_v3  ;;  %v14620_v47 = vadd.f32 %v14451_v42, %v8169_v62  ;;  %16214 = vst [vmem:[#allocation87_spill] sm:$0xff] %v14637_v52  ;;  %v8172_v26 = vld [vmem:[#allocation3 + $0x218] sm:$0xff] }
 0x6d9   : > { %16216 = vst [vmem:[#allocation89_spill] sm:$0xff] %v14643_v43  ;;  %16218 = vst [vmem:[#allocation91_spill] sm:$0xff] %v14651_v12  ;;  %v8171_v62 = vld [vmem:[#allocation3 + $0x210] sm:$0xff]  ;;  %v8177_v48 = vld [vmem:[#allocation3 + $0x240] sm:$0xff] }
 0x6da   : > { %16196 = vst [vmem:[#allocation69_spill] sm:$0xff] %v14556_v63  ;;  %16209 = vst [vmem:[#allocation82_spill] sm:$0xff] %v14620_v47  ;;  %v8135_v36 = vld [vmem:[#allocation3 + $0xf0] sm:$0xff]  ;;  %v14684_v43 = vadd.f32 %v14451_v42, %v8177_v48  ;;  %v8180_v52 = vld [vmem:[#allocation3 + $0x258] sm:$0xff] }
 0x6db   : > { %8457 = vperm.xlu1 %11477, %v8382_v18   ;;  %8452 = vperm.xlu0 %11476, %v8381_v2   ;;  %v14517_v18 = vadd.f32 %v14454_v33, %v8116_v5  ;;  %v14520_v2 = vadd.f32 %v14451_v42, %v8157_v17  ;;  %v8160_v5 = vld [vmem:[#allocation3 + $0x1b8] sm:$0xff]  ;;  %v8123_v17 = vld [vmem:[#allocation3 + $0x90] sm:$0xff]  ;;  %v8146_v47 = vld [vmem:[#allocation3 + $0x148] sm:$0x3] }
 0x6dc   : > { %v14574_v49 = vadd.f32 %v14454_v33, %v8160_v5  ;;  %v14577_v38 = vadd.f32 %v14451_v42, %v8123_v17  ;;  %v8170_v5 = vld [vmem:[#allocation3 + $0x208] sm:$0xff]  ;;  %v8131_v17 = vld [vmem:[#allocation3 + $0xd0] sm:$0xff]  ;;  %16225 = vst [vmem:[#allocation98_spill] sm:$0xff] %v14684_v43  ;;  %v8184_v12 = vld [vmem:[#allocation3 + $0x278] sm:$0xff] }
 0x6dd   : > { %16192 = vst [vmem:[#allocation65_spill] sm:$0xff] %v14520_v2  ;;  %v8186_v43 = vld [vmem:[#allocation3 + $0x288] sm:$0xff] }
 0x6de   : > { %16199 = vst [vmem:[#allocation72_spill] sm:$0xff] %v14574_v49 }
 0x6df   : > { %8467 = vperm.xlu1 %11477, %v8384_v40   ;;  %8462 = vperm.xlu0 %11476, %v8383_v39   ;;  %v14523_v40 = vadd.f32 %v14454_v33, %v8158_v60  ;;  %v8155_v39 = vld [vmem:[#allocation3 + $0x190] sm:$0xff]  ;;  %v8121_v60 = vld [vmem:[#allocation3 + $0x80] sm:$0xff] }
 0x6e0   : > { %v14540_v21 = vadd.f32 %v14451_v42, %v8155_v39  ;;  %v14559_v39 = vadd.f32 %v14454_v33, %v8162_v45  ;;  %v8164_v45 = vld [vmem:[#allocation3 + $0x1d8] sm:$0xff] }
 0x6e1   : > { %16193 = vst [vmem:[#allocation66_spill] sm:$0xff] %v14523_v40  ;;  %v14607_v54 = vadd.f32 %v14454_v33, %v8164_v45 }
 0x6e2   : > { %16194 = vst [vmem:[#allocation67_spill] sm:$0xff] %v14540_v21  ;;  %16197 = vst [vmem:[#allocation70_spill] sm:$0xff] %v14559_v39 }
 0x6e3   : > { %8477 = vperm.xlu1 %11477, %v8386_v58   ;;  %8472 = vperm.xlu0 %11476, %v8385_v28   ;;  %v8156_v58 = vld [vmem:[#allocation3 + $0x198] sm:$0xff]  ;;  %16206 = vst [vmem:[#allocation79_spill] sm:$0xff] %v14607_v54 }
 0x6e4   : > { %v14543_v37 = vadd.f32 %v14454_v33, %v8156_v58  ;;  %v8124_v58 = vld [vmem:[#allocation3 + $0x98] sm:$0xff] }
 0x6e5   : > { %v14581_v24 = vadd.f32 %v14454_v33, %v8124_v58  ;;  %v8128_v28 = vld [vmem:[#allocation3 + $0xb8] sm:$0xff]  ;;  %v8125_v58 = vld [vmem:[#allocation3 + $0xa0] sm:$0xff] }
 0x6e6   : > { %16195 = vst [vmem:[#allocation68_spill] sm:$0xff] %v14543_v37  ;;  %v14617_v45 = vadd.f32 %v14454_v33, %v8128_v28  ;;  %v14627_v61 = vadd.f32 %v14451_v42, %v8125_v58  ;;  %v8129_v28 = vld [vmem:[#allocation3 + $0xc0] sm:$0xff]  ;;  %v8130_v58 = vld [vmem:[#allocation3 + $0xc8] sm:$0xff]  ;;  %v8136_v54 = vld [vmem:[#allocation3 + $0xf8] sm:$0xff] }
 0x6e7   : > { %8487 = vperm.xlu1 %11477, %v8388_v59   ;;  %8482 = vperm.xlu0 %11476, %v8387_v31   ;;  %16200 = vst [vmem:[#allocation73_spill] sm:$0xff] %v14581_v24  ;;  %v14593_v31 = vadd.f32 %v14451_v42, %v8121_v60  ;;  %v14604_v60 = vadd.f32 %v14451_v42, %v8163_v4 }
 0x6e8   : > { %16208 = vst [vmem:[#allocation81_spill] sm:$0xff] %v14617_v45  ;;  %v14623_v59 = vadd.f32 %v14454_v33, %v8170_v5  ;;  %16211 = vst [vmem:[#allocation84_spill] sm:$0xff] %v14627_v61  ;;  %v14633_v4 = vadd.f32 %v14451_v42, %v8167_v20  ;;  %v14640_v5 = vadd.f32 %v14451_v42, %v8131_v17  ;;  %v8178_v45 = vld [vmem:[#allocation3 + $0x248] sm:$0xff]  ;;  %v8176_v17 = vld [vmem:[#allocation3 + $0x238] sm:$0xff] }
 0x6e9   : > { %16203 = vst [vmem:[#allocation76_spill] sm:$0xff] %v14593_v31  ;;  %16205 = vst [vmem:[#allocation78_spill] sm:$0xff] %v14604_v60  ;;  %v14648_v20 = vadd.f32 %v14451_v42, %v8173_v10  ;;  %v14657_v3 = vadd.f32 %v14451_v42, %v8129_v28  ;;  %v14663_v1 = vadd.f32 %v14454_v33, %v8130_v58  ;;  %v8134_v61 = vld [vmem:[#allocation3 + $0xe8] sm:$0xff]  ;;  %v8175_v10 = vld [vmem:[#allocation3 + $0x230] sm:$0xff] }
 0x6ea   : > { %16210 = vst [vmem:[#allocation83_spill] sm:$0xff] %v14623_v59  ;;  %16213 = vst [vmem:[#allocation86_spill] sm:$0xff] %v14633_v4  ;;  %v14669_v59 = vadd.f32 %v14451_v42, %v8171_v62  ;;  %v14674_v4 = vadd.f32 %v14454_v33, %v8172_v26  ;;  %v8139_v60 = vld [vmem:[#allocation3 + $0x110] sm:$0xff]  ;;  %v14681_v62 = vadd.f32 %v14454_v33, %v8136_v54  ;;  %v8181_v58 = vld [vmem:[#allocation3 + $0x260] sm:$0xff] }
 0x6eb   : > { %8492 = vperm.xlu0 %11476, %v8389_v30   ;;  %v14529_v30 = vadd.f32 %v14451_v42, %v8113_v23  ;;  %v14553_v23 = vadd.f32 %v14454_v33, %v8120_v14  ;;  %v14569_v14 = vadd.f32 %v14451_v42, %v8159_v46  ;;  %v14584_v46 = vadd.f32 %v14451_v42, %v8165_v25  ;;  %v8126_v25 = vld [vmem:[#allocation3 + $0xa8] sm:$0xff]  ;;  %v8137_v54 = vld [vmem:[#allocation3 + $0x100] sm:$0xff] }
 0x6ec   : > { %v14630_v32 = vadd.f32 %v14454_v33, %v8126_v25  ;;  %16215 = vst [vmem:[#allocation88_spill] sm:$0xff] %v14640_v5  ;;  %16217 = vst [vmem:[#allocation90_spill] sm:$0xff] %v14648_v20  ;;  %v8133_v25 = vld [vmem:[#allocation3 + $0xe0] sm:$0xff]  ;;  %v8140_v5 = vld [vmem:[#allocation3 + $0x118] sm:$0xff]  ;;  %v14687_v44 = vadd.f32 %v14454_v33, %v8178_v45  ;;  %v14694_v20 = vadd.f32 %v14454_v33, %v8134_v61 }
 0x6ed   : > { %16198 = vst [vmem:[#allocation71_spill] sm:$0xff] %v14569_v14  ;;  %16201 = vst [vmem:[#allocation74_spill] sm:$0xff] %v14584_v46  ;;  %v8182_v26 = vld [vmem:[#allocation3 + $0x268] sm:$0xff]  ;;  %v14697_v28 = vadd.f32 %v14451_v42, %v8175_v10  ;;  %v14701_v48 = vadd.f32 %v14454_v33, %v8176_v17  ;;  %v14704_v45 = vadd.f32 %v14451_v42, %v8139_v60  ;;  %v8141_v60 = vld [vmem:[#allocation3 + $0x120] sm:$0xff]  ;;  %v16267_v46 = vmax.f32 %v14513_v13, 0.0 }
 0x6ee   : > { %16212 = vst [vmem:[#allocation85_spill] sm:$0xff] %v14630_v32  ;;  %16219 = vst [vmem:[#allocation92_spill] sm:$0xff] %v14657_v3  ;;  %v14677_v32 = vadd.f32 %v14451_v42, %v8135_v36  ;;  %v14691_v36 = vadd.f32 %v14451_v42, %v8133_v25  ;;  %v14707_v3 = vadd.f32 %v14454_v33, %v8140_v5  ;;  %v8179_v5 = vld [vmem:[#allocation3 + $0x250] sm:$0xff] }
 0x6ef   : > { %16220 = vst [vmem:[#allocation93_spill] sm:$0xff] %v14663_v1  ;;  %16221 = vst [vmem:[#allocation94_spill] sm:$0xff] %v14669_v59  ;;  %v14712_v61 = vadd.f32 %v14451_v42, %v8181_v58  ;;  %v14715_v10 = vadd.f32 %v14454_v33, %v8182_v26  ;;  %v8138_v1 = vld [vmem:[#allocation3 + $0x108] sm:$0xff]  ;;  %v8185_v26 = vld [vmem:[#allocation3 + $0x280] sm:$0xff]  ;;  %v14729_v58 = vadd.f32 %v14451_v42, %v8137_v54 }
 0x6f0   : > { %16222 = vst [vmem:[#allocation95_spill] sm:$0xff] %v14674_v4  ;;  %16223 = vst [vmem:[#allocation96_spill] sm:$0xff] %v14677_v32  ;;  %v8143_v32 = vld [vmem:[#allocation3 + $0x130] sm:$0xff]  ;;  %v8144_v4 = vld [vmem:[#allocation3 + $0x138] sm:$0xff]  ;;  %v14735_v17 = vadd.f32 %v14451_v42, %v8179_v5  ;;  %v14738_v59 = vadd.f32 %v14454_v33, %v8180_v52  ;;  %v14747_v54 = vadd.f32 %v14451_v42, %v8185_v26 }
 0x6f1   : > { %16224 = vst [vmem:[#allocation97_spill] sm:$0xff] %v14681_v62  ;;  %16226 = vst [vmem:[#allocation99_spill] sm:$0xff] %v14687_v44  ;;  %v8142_v44 = vld [vmem:[#allocation3 + $0x128] sm:$0xff]  ;;  %v8188_v62 = vld [vmem:[#allocation3 + $0x298] sm:$0x3]  ;;  %v14741_v25 = vadd.f32 %v14451_v42, %v8143_v32  ;;  %v14753_v5 = vadd.f32 %v14451_v42, %v8141_v60  ;;  %v14762_v32 = vadd.f32 %v14454_v33, %v8184_v12  ;;  %v16255_v12 = vmax.f32 %v14469_v15, 0.0 }
 0x6f2   : > { %16227 = vst [vmem:[#allocation100_spill] sm:$0xff] %v14691_v36  ;;  %16228 = vst [vmem:[#allocation101_spill] sm:$0xff] %v14694_v20  ;;  %v8183_v36 = vld [vmem:[#allocation3 + $0x270] sm:$0xff]  ;;  %v8145_v20 = vld [vmem:[#allocation3 + $0x140] sm:$0x3]  ;;  %v14756_v52 = vadd.f32 %v14454_v33, %v8142_v44  ;;  %v14768_v26 = vadd.f32 %v14454_v33, %v8146_v47  ;;  %v14774_v60 = vadd.f32 %v14454_v33, %v8188_v62  ;;  %v16253_v62 = vmax.f32 %v14463_v19, 0.0 }
 0x6f3   : > { %16229 = vst [vmem:[#allocation102_spill] sm:$0xff] %v14697_v28  ;;  %16230 = vst [vmem:[#allocation103_spill] sm:$0xff] %v14701_v48  ;;  %v14732_v28 = vadd.f32 %v14454_v33, %v8138_v1  ;;  %v14750_v1 = vadd.f32 %v14454_v33, %v8186_v43  ;;  %v16257_v47 = vmax.f32 %v14476_v9, 0.0 }
 0x6f4   : > { %16231 = vst [vmem:[#allocation104_spill] sm:$0xff] %v14704_v45  ;;  %16232 = vst [vmem:[#allocation105_spill] sm:$0xff] %v14707_v3  ;;  %v8187_v3 = vld [vmem:[#allocation3 + $0x290] sm:$0x3] }
 0x6f5   : > { %16233 = vst [vmem:[#allocation106_spill] sm:$0xff] %v14712_v61  ;;  %16234 = vst [vmem:[#allocation107_spill] sm:$0xff] %v14715_v10  ;;  %v14744_v10 = vadd.f32 %v14454_v33, %v8144_v4  ;;  %v14759_v61 = vadd.f32 %v14451_v42, %v8183_v36  ;;  %v14765_v4 = vadd.f32 %v14451_v42, %v8145_v20  ;;  %v16254_v36 = vmax.f32 %v14466_v0, 0.0 }
 0x6f6   : > { %16235 = vst [vmem:[#allocation108_spill] sm:$0xff] %v14729_v58  ;;  %16236 = vst [vmem:[#allocation109_spill] sm:$0xff] %v14732_v28  ;;  %v14771_v43 = vadd.f32 %v14451_v42, %v8187_v3  ;;  %v16251_v42 = vmax.f32 %v14457_v11, 0.0  ;;  %v16252_v3 = vmax.f32 %v14460_v34, 0.0  ;;  %v16256_v20 = vmax.f32 %v14472_v35, 0.0 }
 0x6f7   : > { %16237 = vst [vmem:[#allocation110_spill] sm:$0xff] %v14735_v17  ;;  %16238 = vst [vmem:[#allocation111_spill] sm:$0xff] %v14738_v59 }
 0x6f8   : > { %16239 = vst [vmem:[#allocation112_spill] sm:$0xff] %v14741_v25  ;;  %16240 = vst [vmem:[#allocation113_spill] sm:$0xff] %v14744_v10  ;;  %v16265_v25 = vmax.f32 %v14505_v7, 0.0 }
 0x6f9   : > { %16241 = vst [vmem:[#allocation114_spill] sm:$0xff] %v14747_v54  ;;  %16242 = vst [vmem:[#allocation115_spill] sm:$0xff] %v14750_v1  ;;  %v16264_v54 = vmax.f32 %v14502_v8, 0.0 }
 0x6fa   : > { %16243 = vst [vmem:[#allocation116_spill] sm:$0xff] %v14753_v5  ;;  %16244 = vst [vmem:[#allocation117_spill] sm:$0xff] %v14756_v52  ;;  %v16263_v52 = vmax.f32 %v14499_v27, 0.0 }
 0x6fb   : > { %16245 = vst [vmem:[#allocation118_spill] sm:$0xff] %v14759_v61  ;;  %16246 = vst [vmem:[#allocation119_spill] sm:$0xff] %v14762_v32 }
 0x6fc   : > { %16247 = vst [vmem:[#allocation120_spill] sm:$0xff] %v14765_v4  ;;  %16248 = vst [vmem:[#allocation121_spill] sm:$0xff] %v14768_v26 }
 0x6fd   : > { %16249 = vst [vmem:[#allocation122_spill] sm:$0xff] %v14771_v43  ;;  %16250 = vst [vmem:[#allocation123_spill] sm:$0xff] %v14774_v60 }
 0x742   : > { %v8403_v44 = vpop.permute.xlu1 %8402  ;;  %v8393_v45 = vpop.permute.xlu0 %8392 }
 0x743   : > { %v8499_v1 = vmul.f32 %v8403_v44, %v16251_v42  ;;  %v8500_v33 = vmul.f32 %v8403_v44, %v16252_v3  ;;  %v8541_v61 = vmul.f32 %v8403_v44, %v16253_v62  ;;  %v8542_v32 = vmul.f32 %v8403_v44, %v16254_v36 }
 0x744   : > { %v8495_v4 = vmul.f32 %v8393_v45, %v16255_v12  ;;  %v8496_v48 = vmul.f32 %v8393_v45, %v16256_v20  ;;  %v8537_v60 = vmul.f32 %v8393_v45, %v16257_v47  ;;  %v16258_v42 = vmax.f32 %v14479_v50, 0.0 }
 0x745   : > { %v8694_v34 = vmul.f32 %v8499_v1, %v8499_v1  ;;  %v8695_v3 = vmul.f32 %v8500_v33, %v8500_v33  ;;  %v8736_v43 = vmul.f32 %v8541_v61, %v8541_v61  ;;  %v8737_v19 = vmul.f32 %v8542_v32, %v8542_v32 }
 0x746   : > { %v8538_v11 = vmul.f32 %v8393_v45, %v16258_v42  ;;  %v8690_v62 = vmul.f32 %v8495_v4, %v8495_v4  ;;  %v8691_v26 = vmul.f32 %v8496_v48, %v8496_v48  ;;  %v8732_v0 = vmul.f32 %v8537_v60, %v8537_v60  ;;  %v8408_v36 = vpop.permute.xlu1 %8407  ;;  %v8398_v15 = vpop.permute.xlu0 %8397 }
 0x747   : > { %v16259_v12 = vmax.f32 %v14485_v22, 0.0  ;;  %v16260_v20 = vmax.f32 %v14489_v16, 0.0  ;;  %v16261_v47 = vmax.f32 %v14492_v6, 0.0  ;;  %v16262_v45 = vmax.f32 %v14495_v29, 0.0 }
 0x748   : > { %v8733_v44 = vmul.f32 %v8538_v11, %v8538_v11  ;;  %v8497_v5 = vmul.f32 %v8398_v15, %v16263_v52  ;;  %v8498_v10 = vmul.f32 %v8398_v15, %v16264_v54  ;;  %v8539_v59 = vmul.f32 %v8398_v15, %v16265_v25 }
 0x749   : > { %v8501_v35 = vmul.f32 %v8408_v36, %v16259_v12  ;;  %v8502_v9 = vmul.f32 %v8408_v36, %v16260_v20  ;;  %v8543_v50 = vmul.f32 %v8408_v36, %v16261_v47  ;;  %v8544_v42 = vmul.f32 %v8408_v36, %v16262_v45 }
 0x74a   : > { %v16266_v12 = vmax.f32 %v14510_v56, 0.0  ;;  %v8579_v47 = vadd.f32 %v8497_v5, %v8495_v4  ;;  %v8607_v28 = vadd.f32 %v8498_v10, %v8496_v48  ;;  %v8634_v29 = vadd.f32 %v8539_v59, %v8537_v60  ;;  %v8418_v8 = vpop.permute.xlu1 %8417 }
 0x74b   : > { %v8696_v16 = vmul.f32 %v8501_v35, %v8501_v35  ;;  %v8697_v20 = vmul.f32 %v8502_v9, %v8502_v9  ;;  %v8738_v17 = vmul.f32 %v8543_v50, %v8543_v50  ;;  %v8739_v6 = vmul.f32 %v8544_v42, %v8544_v42 }
 0x74c   : > { %v8540_v22 = vmul.f32 %v8398_v15, %v16266_v12  ;;  %v8692_v45 = vmul.f32 %v8497_v5, %v8497_v5  ;;  %v8693_v27 = vmul.f32 %v8498_v10, %v8498_v10  ;;  %v8734_v52 = vmul.f32 %v8539_v59, %v8539_v59 }
 0x74d   : > { %v8580_v54 = vadd.f32 %v8579_v47, %v8499_v1  ;;  %v8608_v31 = vadd.f32 %v8607_v28, %v8500_v33  ;;  %v8635_v7 = vadd.f32 %v8634_v29, %v8541_v61  ;;  %v8505_v24 = vmul.f32 %v8418_v8, %v16267_v46  ;;  %v8413_v1 = vpop.permute.xlu0 %8412 }
 0x74e   : > { %v8661_v36 = vadd.f32 %v8540_v22, %v8538_v11  ;;  %v8735_v58 = vmul.f32 %v8540_v22, %v8540_v22  ;;  %v8774_v41 = vadd.f32 %v8692_v45, %v8690_v62  ;;  %v8801_v56 = vadd.f32 %v8693_v27, %v8691_v26 }
 0x74f   : > { %v8828_v15 = vadd.f32 %v8734_v52, %v8732_v0  ;;  %v16268_v48 = vmax.f32 %v14517_v18, 0.0  ;;  %v16269_v11 = vmax.f32 %v14520_v2, 0.0  ;;  %v16270_v22 = vmax.f32 %v14523_v40, 0.0  ;;  %v8428_v52 = vpop.permute.xlu1 %8427 }
 0x750   : > { %v8662_v25 = vadd.f32 %v8661_v36, %v8542_v32  ;;  %v8855_v12 = vadd.f32 %v8735_v58, %v8733_v44  ;;  %v8775_v28 = vadd.f32 %v8774_v41, %v8694_v34  ;;  %v8802_v29 = vadd.f32 %v8801_v56, %v8695_v3 }
 0x751   : > { %v8506_v4 = vmul.f32 %v8418_v8, %v16268_v48  ;;  %v8547_v10 = vmul.f32 %v8418_v8, %v16269_v11  ;;  %v8548_v59 = vmul.f32 %v8418_v8, %v16270_v22  ;;  %v8829_v61 = vadd.f32 %v8828_v15, %v8736_v43 }
 0x752   : > { %v8856_v5 = vadd.f32 %v8855_v12, %v8737_v19  ;;  %v8700_v27 = vmul.f32 %v8505_v24, %v8505_v24  ;;  %v16271_v46 = vmax.f32 %v14529_v30, 0.0  ;;  %v16272_v60 = vmax.f32 %v14535_v57, 0.0 }
 0x753   : > { %v8701_v0 = vmul.f32 %v8506_v4, %v8506_v4  ;;  %v8742_v58 = vmul.f32 %v8547_v10, %v8547_v10  ;;  %v8743_v32 = vmul.f32 %v8548_v59, %v8548_v59  ;;  %v16273_v62 = vmax.f32 %v14540_v21, 0.0 }
 0x754   : > { %v8503_v26 = vmul.f32 %v8413_v1, %v16271_v46  ;;  %v8504_v33 = vmul.f32 %v8413_v1, %v16272_v60  ;;  %v16274_v8 = vmax.f32 %v14543_v37, 0.0  ;;  %v8581_v34 = vadd.f32 %v8580_v54, %v8501_v35  ;;  %v8423_v54 = vpop.permute.xlu0 %8422 }
 0x755   : > { %v8545_v44 = vmul.f32 %v8413_v1, %v16273_v62  ;;  %v8609_v56 = vadd.f32 %v8608_v31, %v8502_v9  ;;  %v8636_v41 = vadd.f32 %v8635_v7, %v8543_v50  ;;  %v8663_v19 = vadd.f32 %v8662_v25, %v8544_v42 }
 0x756   : > { %v8546_v47 = vmul.f32 %v8413_v1, %v16274_v8  ;;  %v8698_v43 = vmul.f32 %v8503_v26, %v8503_v26  ;;  %v8699_v3 = vmul.f32 %v8504_v33, %v8504_v33  ;;  %v8582_v15 = vadd.f32 %v8581_v34, %v8503_v26 }
 0x757   : > { %v8740_v36 = vmul.f32 %v8545_v44, %v8545_v44  ;;  %v8610_v12 = vadd.f32 %v8609_v56, %v8504_v33  ;;  %v8637_v48 = vadd.f32 %v8636_v41, %v8545_v44  ;;  %v8776_v22 = vadd.f32 %v8775_v28, %v8696_v16 }
 0x758   : > { %v8741_v45 = vmul.f32 %v8546_v47, %v8546_v47  ;;  %v8664_v11 = vadd.f32 %v8663_v19, %v8546_v47  ;;  %v8803_v46 = vadd.f32 %v8802_v29, %v8697_v20  ;;  %v8830_v60 = vadd.f32 %v8829_v61, %v8738_v17 }
 0x759   : > { %v8857_v62 = vadd.f32 %v8856_v5, %v8739_v6  ;;  %v16275_v40 = vmax.f32 %v14549_v51, 0.0  ;;  %v16276_v35 = vmax.f32 %v14553_v23, 0.0  ;;  %v16277_v50 = vmax.f32 %v14556_v63, 0.0 }
 0x75a   : > { %v16278_v31 = vmax.f32 %v14559_v39, 0.0  ;;  %v8777_v25 = vadd.f32 %v8776_v22, %v8698_v43  ;;  %v8804_v26 = vadd.f32 %v8803_v46, %v8699_v3  ;;  %v8831_v33 = vadd.f32 %v8830_v60, %v8740_v36  ;;  %v8438_v22 = vpop.permute.xlu1 %8437 }
 0x75b   : > { %v8509_v1 = vmul.f32 %v8428_v52, %v16275_v40  ;;  %v8510_v9 = vmul.f32 %v8428_v52, %v16276_v35  ;;  %v8551_v7 = vmul.f32 %v8428_v52, %v16277_v50  ;;  %v8858_v16 = vadd.f32 %v8857_v62, %v8741_v45 }
 0x75c   : > { %v8552_v42 = vmul.f32 %v8428_v52, %v16278_v31  ;;  %v16279_v40 = vmax.f32 %v14563_v53, 0.0  ;;  %v16280_v61 = vmax.f32 %v14566_v55, 0.0  ;;  %v16281_v44 = vmax.f32 %v14569_v14, 0.0  ;;  %v16298_v14 = vld [vmem:[#allocation80_spill] sm:$0xff] }
 0x75d   : > { %v8704_v20 = vmul.f32 %v8509_v1, %v8509_v1  ;;  %v8705_v17 = vmul.f32 %v8510_v9, %v8510_v9  ;;  %v8746_v6 = vmul.f32 %v8551_v7, %v8551_v7  ;;  %v16282_v47 = vmax.f32 %v14574_v49, 0.0 }
 0x75e   : > { %v8747_v28 = vmul.f32 %v8552_v42, %v8552_v42  ;;  %v8507_v29 = vmul.f32 %v8423_v54, %v16279_v40  ;;  %v8508_v5 = vmul.f32 %v8423_v54, %v16280_v61  ;;  %v8549_v8 = vmul.f32 %v8423_v54, %v16281_v44 }
 0x75f   : > { %v8550_v34 = vmul.f32 %v8423_v54, %v16282_v47  ;;  %v8583_v56 = vadd.f32 %v8582_v15, %v8505_v24  ;;  %v8611_v41 = vadd.f32 %v8610_v12, %v8506_v4  ;;  %v8638_v19 = vadd.f32 %v8637_v48, %v8547_v10  ;;  %v16284_v24 = vld [vmem:[#allocation73_spill] sm:$0xff]  ;;  %v16288_v48 = vld [vmem:[#allocation75_spill] sm:$0xff] }
 0x760   : > { %v8665_v43 = vadd.f32 %v8664_v11, %v8548_v59  ;;  %v8702_v3 = vmul.f32 %v8507_v29, %v8507_v29  ;;  %v8703_v36 = vmul.f32 %v8508_v5, %v8508_v5  ;;  %v8744_v45 = vmul.f32 %v8549_v8, %v8549_v8  ;;  %v16286_v59 = vld [vmem:[#allocation74_spill] sm:$0xff] }
 0x761   : > { %v8745_v52 = vmul.f32 %v8550_v34, %v8550_v34  ;;  %v8584_v46 = vadd.f32 %v8583_v56, %v8507_v29  ;;  %v8612_v60 = vadd.f32 %v8611_v41, %v8508_v5  ;;  %v8639_v62 = vadd.f32 %v8638_v19, %v8549_v8  ;;  %v8433_v29 = vpop.permute.xlu0 %8432  ;;  %v16292_v56 = vld [vmem:[#allocation77_spill] sm:$0xff] }
 0x762   : > { %v8666_v35 = vadd.f32 %v8665_v43, %v8550_v34  ;;  %v8778_v50 = vadd.f32 %v8777_v25, %v8700_v27  ;;  %v8805_v31 = vadd.f32 %v8804_v26, %v8701_v0  ;;  %v8832_v40 = vadd.f32 %v8831_v33, %v8742_v58  ;;  %v16290_v26 = vld [vmem:[#allocation76_spill] sm:$0xff]  ;;  %v16294_v43 = vld [vmem:[#allocation78_spill] sm:$0xff] }
 0x763   : > { %v8859_v61 = vadd.f32 %v8858_v16, %v8743_v32  ;;  %v16283_v44 = vmax.f32 %v14577_v38, 0.0  ;;  %v16285_v4 = vmax.f32 %v16284_v24, 0.0  ;;  %v16287_v15 = vmax.f32 %v16286_v59, 0.0 }
 0x764   : > { %v16289_v11 = vmax.f32 %v16288_v48, 0.0  ;;  %v8779_v5 = vadd.f32 %v8778_v50, %v8702_v3  ;;  %v8806_v8 = vadd.f32 %v8805_v31, %v8703_v36  ;;  %v8833_v34 = vadd.f32 %v8832_v40, %v8744_v45  ;;  %v8448_v48 = vpop.permute.xlu1 %8447 }
 0x765   : > { %v8513_v54 = vmul.f32 %v8438_v22, %v16283_v44  ;;  %v8514_v10 = vmul.f32 %v8438_v22, %v16285_v4  ;;  %v8555_v12 = vmul.f32 %v8438_v22, %v16287_v15  ;;  %v8860_v27 = vadd.f32 %v8859_v61, %v8745_v52  ;;  %v16296_v15 = vld [vmem:[#allocation79_spill] sm:$0xff] }
 0x766   : > { %v8556_v47 = vmul.f32 %v8438_v22, %v16289_v11  ;;  %v16291_v33 = vmax.f32 %v16290_v26, 0.0  ;;  %v16293_v41 = vmax.f32 %v16292_v56, 0.0  ;;  %v16295_v44 = vmax.f32 %v16294_v43, 0.0 }
 0x767   : > { %v8708_v0 = vmul.f32 %v8513_v54, %v8513_v54  ;;  %v8709_v58 = vmul.f32 %v8514_v10, %v8514_v10  ;;  %v8750_v32 = vmul.f32 %v8555_v12, %v8555_v12  ;;  %v16297_v22 = vmax.f32 %v16296_v15, 0.0 }
 0x768   : > { %v8751_v25 = vmul.f32 %v8556_v47, %v8556_v47  ;;  %v8511_v16 = vmul.f32 %v8433_v29, %v16291_v33  ;;  %v8512_v19 = vmul.f32 %v8433_v29, %v16293_v41  ;;  %v8553_v4 = vmul.f32 %v8433_v29, %v16295_v44 }
 0x769   : > { %v8554_v11 = vmul.f32 %v8433_v29, %v16297_v22  ;;  %v8585_v3 = vadd.f32 %v8584_v46, %v8509_v1  ;;  %v8613_v36 = vadd.f32 %v8612_v60, %v8510_v9  ;;  %v8640_v45 = vadd.f32 %v8639_v62, %v8551_v7  ;;  %v16300_v1 = vld [vmem:[#allocation81_spill] sm:$0xff]  ;;  %v16304_v62 = vld [vmem:[#allocation83_spill] sm:$0xff] }
 0x76a   : > { %v8667_v52 = vadd.f32 %v8666_v35, %v8552_v42  ;;  %v8706_v50 = vmul.f32 %v8511_v16, %v8511_v16  ;;  %v8707_v31 = vmul.f32 %v8512_v19, %v8512_v19  ;;  %v8748_v40 = vmul.f32 %v8553_v4, %v8553_v4  ;;  %v16302_v42 = vld [vmem:[#allocation82_spill] sm:$0xff] }
 0x76b   : > { %v8749_v61 = vmul.f32 %v8554_v11, %v8554_v11  ;;  %v8586_v59 = vadd.f32 %v8585_v3, %v8511_v16  ;;  %v8614_v33 = vadd.f32 %v8613_v36, %v8512_v19  ;;  %v8641_v39 = vadd.f32 %v8640_v45, %v8553_v4  ;;  %v8443_v16 = vpop.permute.xlu0 %8442  ;;  %v16310_v45 = vld [vmem:[#allocation86_spill] sm:$0xff] }
 0x76c   : > { %v8668_v63 = vadd.f32 %v8667_v52, %v8554_v11  ;;  %v8780_v41 = vadd.f32 %v8779_v5, %v8704_v20  ;;  %v8807_v49 = vadd.f32 %v8806_v8, %v8705_v17  ;;  %v8834_v43 = vadd.f32 %v8833_v34, %v8746_v6  ;;  %v16306_v8 = vld [vmem:[#allocation84_spill] sm:$0xff] }
 0x76d   : > { %v8861_v44 = vadd.f32 %v8860_v27, %v8747_v28  ;;  %v16299_v15 = vmax.f32 %v16298_v14, 0.0  ;;  %v16301_v9 = vmax.f32 %v16300_v1, 0.0  ;;  %v16303_v46 = vmax.f32 %v16302_v42, 0.0  ;;  %v16314_v1 = vld [vmem:[#allocation88_spill] sm:$0xff] }
 0x76e   : > { %v16305_v35 = vmax.f32 %v16304_v62, 0.0  ;;  %v8781_v19 = vadd.f32 %v8780_v41, %v8706_v50  ;;  %v8808_v4 = vadd.f32 %v8807_v49, %v8707_v31  ;;  %v8835_v11 = vadd.f32 %v8834_v43, %v8748_v40  ;;  %v8458_v62 = vpop.permute.xlu1 %8457 }
 0x76f   : > { %v8517_v29 = vmul.f32 %v8448_v48, %v16299_v15  ;;  %v8518_v7 = vmul.f32 %v8448_v48, %v16301_v9  ;;  %v8559_v60 = vmul.f32 %v8448_v48, %v16303_v46  ;;  %v8862_v20 = vadd.f32 %v8861_v44, %v8749_v61  ;;  %v16308_v15 = vld [vmem:[#allocation85_spill] sm:$0xff]  ;;  %v16312_v46 = vld [vmem:[#allocation87_spill] sm:$0xff] }
 0x770   : > { %v8560_v22 = vmul.f32 %v8448_v48, %v16305_v35  ;;  %v16307_v34 = vmax.f32 %v16306_v8, 0.0  ;;  %v16309_v3 = vmax.f32 %v16308_v15, 0.0  ;;  %v16311_v52 = vmax.f32 %v16310_v45, 0.0 }
 0x771   : > { %v8712_v17 = vmul.f32 %v8517_v29, %v8517_v29  ;;  %v8713_v6 = vmul.f32 %v8518_v7, %v8518_v7  ;;  %v8754_v28 = vmul.f32 %v8559_v60, %v8559_v60  ;;  %v16313_v48 = vmax.f32 %v16312_v46, 0.0 }
 0x772   : > { %v8755_v5 = vmul.f32 %v8560_v22, %v8560_v22  ;;  %v8515_v27 = vmul.f32 %v8443_v16, %v16307_v34  ;;  %v8516_v36 = vmul.f32 %v8443_v16, %v16309_v3  ;;  %v8557_v9 = vmul.f32 %v8443_v16, %v16311_v52 }
 0x773   : > { %v8558_v35 = vmul.f32 %v8443_v16, %v16313_v48  ;;  %v8587_v50 = vadd.f32 %v8586_v59, %v8513_v54  ;;  %v8615_v49 = vadd.f32 %v8614_v33, %v8514_v10  ;;  %v8642_v43 = vadd.f32 %v8641_v39, %v8555_v12  ;;  %v16316_v54 = vld [vmem:[#allocation89_spill] sm:$0xff] }
 0x774   : > { %v8669_v31 = vadd.f32 %v8668_v63, %v8556_v47  ;;  %v8710_v40 = vmul.f32 %v8515_v27, %v8515_v27  ;;  %v8711_v61 = vmul.f32 %v8516_v36, %v8516_v36  ;;  %v8752_v41 = vmul.f32 %v8557_v9, %v8557_v9  ;;  %v16318_v63 = vld [vmem:[#allocation90_spill] sm:$0xff]  ;;  %v16320_v47 = vld [vmem:[#allocation91_spill] sm:$0xff] }
 0x775   : > { %v8753_v44 = vmul.f32 %v8558_v35, %v8558_v35  ;;  %v8588_v42 = vadd.f32 %v8587_v50, %v8515_v27  ;;  %v8616_v34 = vadd.f32 %v8615_v49, %v8516_v36  ;;  %v8643_v2 = vadd.f32 %v8642_v43, %v8557_v9  ;;  %v8453_v27 = vpop.permute.xlu0 %8452  ;;  %v16326_v43 = vld [vmem:[#allocation94_spill] sm:$0xff] }
 0x776   : > { %v8670_v37 = vadd.f32 %v8669_v31, %v8558_v35  ;;  %v8782_v3 = vadd.f32 %v8781_v19, %v8708_v0  ;;  %v8809_v21 = vadd.f32 %v8808_v4, %v8709_v58  ;;  %v8836_v45 = vadd.f32 %v8835_v11, %v8750_v32  ;;  %v16322_v4 = vld [vmem:[#allocation92_spill] sm:$0xff] }
 0x777   : > { %v8863_v52 = vadd.f32 %v8862_v20, %v8751_v25  ;;  %v16315_v46 = vmax.f32 %v16314_v1, 0.0  ;;  %v16317_v10 = vmax.f32 %v16316_v54, 0.0  ;;  %v16319_v59 = vmax.f32 %v16318_v63, 0.0 }
 0x778   : > { %v16321_v33 = vmax.f32 %v16320_v47, 0.0  ;;  %v8783_v36 = vadd.f32 %v8782_v3, %v8710_v40  ;;  %v8810_v9 = vadd.f32 %v8809_v21, %v8711_v61  ;;  %v8837_v35 = vadd.f32 %v8836_v45, %v8752_v41  ;;  %v8468_v47 = vpop.permute.xlu1 %8467 }
 0x779   : > { %v8521_v16 = vmul.f32 %v8458_v62, %v16315_v46  ;;  %v8522_v39 = vmul.f32 %v8458_v62, %v16317_v10  ;;  %v8563_v12 = vmul.f32 %v8458_v62, %v16319_v59  ;;  %v8864_v0 = vadd.f32 %v8863_v52, %v8753_v44  ;;  %v16324_v46 = vld [vmem:[#allocation93_spill] sm:$0xff]  ;;  %v16328_v59 = vld [vmem:[#allocation95_spill] sm:$0xff] }
 0x77a   : > { %v8564_v48 = vmul.f32 %v8458_v62, %v16321_v33  ;;  %v16323_v11 = vmax.f32 %v16322_v4, 0.0  ;;  %v16325_v50 = vmax.f32 %v16324_v46, 0.0  ;;  %v16327_v31 = vmax.f32 %v16326_v43, 0.0  ;;  %v16330_v4 = vld [vmem:[#allocation96_spill] sm:$0xff] }
 0x77b   : > { %v8716_v58 = vmul.f32 %v8521_v16, %v8521_v16  ;;  %v8717_v32 = vmul.f32 %v8522_v39, %v8522_v39  ;;  %v8758_v25 = vmul.f32 %v8563_v12, %v8563_v12  ;;  %v16329_v62 = vmax.f32 %v16328_v59, 0.0 }
 0x77c   : > { %v8759_v19 = vmul.f32 %v8564_v48, %v8564_v48  ;;  %v8519_v20 = vmul.f32 %v8453_v27, %v16323_v11  ;;  %v8520_v49 = vmul.f32 %v8453_v27, %v16325_v50  ;;  %v8561_v10 = vmul.f32 %v8453_v27, %v16327_v31 }
 0x77d   : > { %v8562_v33 = vmul.f32 %v8453_v27, %v16329_v62  ;;  %v8589_v40 = vadd.f32 %v8588_v42, %v8517_v29  ;;  %v8617_v21 = vadd.f32 %v8616_v34, %v8518_v7  ;;  %v8644_v45 = vadd.f32 %v8643_v2, %v8559_v60  ;;  %v16332_v29 = vld [vmem:[#allocation97_spill] sm:$0xff] }
 0x77e   : > { %v8671_v61 = vadd.f32 %v8670_v37, %v8560_v22  ;;  %v8714_v41 = vmul.f32 %v8519_v20, %v8519_v20  ;;  %v8715_v44 = vmul.f32 %v8520_v49, %v8520_v49  ;;  %v8756_v3 = vmul.f32 %v8561_v10, %v8561_v10  ;;  %v16334_v37 = vld [vmem:[#allocation98_spill] sm:$0xff]  ;;  %v16336_v22 = vld [vmem:[#allocation99_spill] sm:$0xff] }
 0x77f   : > { %v8757_v52 = vmul.f32 %v8562_v33, %v8562_v33  ;;  %v8590_v63 = vadd.f32 %v8589_v40, %v8519_v20  ;;  %v8618_v11 = vadd.f32 %v8617_v21, %v8520_v49  ;;  %v8645_v54 = vadd.f32 %v8644_v45, %v8561_v10  ;;  %v8463_v20 = vpop.permute.xlu0 %8462  ;;  %v16342_v45 = vld [vmem:[#allocation102_spill] sm:$0xff] }
 0x780   : > { %v8672_v1 = vadd.f32 %v8671_v61, %v8562_v33  ;;  %v8784_v50 = vadd.f32 %v8783_v36, %v8712_v17  ;;  %v8811_v46 = vadd.f32 %v8810_v9, %v8713_v6  ;;  %v8838_v43 = vadd.f32 %v8837_v35, %v8754_v28  ;;  %v16338_v9 = vld [vmem:[#allocation100_spill] sm:$0xff] }
 0x781   : > { %v8865_v31 = vadd.f32 %v8864_v0, %v8755_v5  ;;  %v16331_v59 = vmax.f32 %v16330_v4, 0.0  ;;  %v16333_v7 = vmax.f32 %v16332_v29, 0.0  ;;  %v16335_v42 = vmax.f32 %v16334_v37, 0.0 }
 0x782   : > { %v16337_v34 = vmax.f32 %v16336_v22, 0.0  ;;  %v8785_v49 = vadd.f32 %v8784_v50, %v8714_v41  ;;  %v8812_v10 = vadd.f32 %v8811_v46, %v8715_v44  ;;  %v8839_v33 = vadd.f32 %v8838_v43, %v8756_v3  ;;  %v8478_v22 = vpop.permute.xlu1 %8477 }
 0x783   : > { %v8525_v27 = vmul.f32 %v8468_v47, %v16331_v59  ;;  %v8526_v2 = vmul.f32 %v8468_v47, %v16333_v7  ;;  %v8567_v60 = vmul.f32 %v8468_v47, %v16335_v42  ;;  %v8866_v17 = vadd.f32 %v8865_v31, %v8757_v52  ;;  %v16340_v59 = vld [vmem:[#allocation101_spill] sm:$0xff]  ;;  %v16344_v42 = vld [vmem:[#allocation103_spill] sm:$0xff] }
 0x784   : > { %v8568_v62 = vmul.f32 %v8468_v47, %v16337_v34  ;;  %v16339_v35 = vmax.f32 %v16338_v9, 0.0  ;;  %v16341_v40 = vmax.f32 %v16340_v59, 0.0  ;;  %v16343_v61 = vmax.f32 %v16342_v45, 0.0  ;;  %v16346_v9 = vld [vmem:[#allocation104_spill] sm:$0xff] }
 0x785   : > { %v8720_v6 = vmul.f32 %v8525_v27, %v8525_v27  ;;  %v8721_v28 = vmul.f32 %v8526_v2, %v8526_v2  ;;  %v8762_v5 = vmul.f32 %v8567_v60, %v8567_v60  ;;  %v16345_v47 = vmax.f32 %v16344_v42, 0.0 }
 0x786   : > { %v8763_v36 = vmul.f32 %v8568_v62, %v8568_v62  ;;  %v8523_v0 = vmul.f32 %v8463_v20, %v16339_v35  ;;  %v8524_v21 = vmul.f32 %v8463_v20, %v16341_v40  ;;  %v8565_v7 = vmul.f32 %v8463_v20, %v16343_v61 }
 0x787   : > { %v8566_v34 = vmul.f32 %v8463_v20, %v16345_v47  ;;  %v8591_v41 = vadd.f32 %v8590_v63, %v8521_v16  ;;  %v8619_v46 = vadd.f32 %v8618_v11, %v8522_v39  ;;  %v8646_v43 = vadd.f32 %v8645_v54, %v8563_v12  ;;  %v16348_v16 = vld [vmem:[#allocation105_spill] sm:$0xff] }
 0x788   : > { %v8673_v44 = vadd.f32 %v8672_v1, %v8564_v48  ;;  %v8718_v3 = vmul.f32 %v8523_v0, %v8523_v0  ;;  %v8719_v52 = vmul.f32 %v8524_v21, %v8524_v21  ;;  %v8760_v50 = vmul.f32 %v8565_v7, %v8565_v7  ;;  %v16350_v1 = vld [vmem:[#allocation106_spill] sm:$0xff]  ;;  %v16352_v48 = vld [vmem:[#allocation107_spill] sm:$0xff] }
 0x789   : > { %v8761_v31 = vmul.f32 %v8566_v34, %v8566_v34  ;;  %v8592_v37 = vadd.f32 %v8591_v41, %v8523_v0  ;;  %v8620_v35 = vadd.f32 %v8619_v46, %v8524_v21  ;;  %v8647_v29 = vadd.f32 %v8646_v43, %v8565_v7  ;;  %v8473_v0 = vpop.permute.xlu0 %8472  ;;  %v16358_v43 = vld [vmem:[#allocation110_spill] sm:$0xff] }
 0x78a   : > { %v8674_v4 = vadd.f32 %v8673_v44, %v8566_v34  ;;  %v8786_v40 = vadd.f32 %v8785_v49, %v8716_v58  ;;  %v8813_v59 = vadd.f32 %v8812_v10, %v8717_v32  ;;  %v8840_v45 = vadd.f32 %v8839_v33, %v8758_v25  ;;  %v16354_v10 = vld [vmem:[#allocation108_spill] sm:$0xff] }
 0x78b   : > { %v8867_v61 = vadd.f32 %v8866_v17, %v8759_v19  ;;  %v16347_v42 = vmax.f32 %v16346_v9, 0.0  ;;  %v16349_v39 = vmax.f32 %v16348_v16, 0.0  ;;  %v16351_v63 = vmax.f32 %v16350_v1, 0.0 }
 0x78c   : > { %v16353_v11 = vmax.f32 %v16352_v48, 0.0  ;;  %v8787_v21 = vadd.f32 %v8786_v40, %v8718_v3  ;;  %v8814_v7 = vadd.f32 %v8813_v59, %v8719_v52  ;;  %v8841_v34 = vadd.f32 %v8840_v45, %v8760_v50  ;;  %v8488_v48 = vpop.permute.xlu1 %8487 }
 0x78d   : > { %v8529_v20 = vmul.f32 %v8478_v22, %v16347_v42  ;;  %v8530_v54 = vmul.f32 %v8478_v22, %v16349_v39  ;;  %v8571_v12 = vmul.f32 %v8478_v22, %v16351_v63  ;;  %v8868_v58 = vadd.f32 %v8867_v61, %v8761_v31  ;;  %v16356_v42 = vld [vmem:[#allocation109_spill] sm:$0xff]  ;;  %v16360_v63 = vld [vmem:[#allocation111_spill] sm:$0xff] }
 0x78e   : > { %v8572_v47 = vmul.f32 %v8478_v22, %v16353_v11  ;;  %v16355_v33 = vmax.f32 %v16354_v10, 0.0  ;;  %v16357_v41 = vmax.f32 %v16356_v42, 0.0  ;;  %v16359_v44 = vmax.f32 %v16358_v43, 0.0  ;;  %v8483_v10 = vpop.permute.xlu0 %8482 }
 0x78f   : > { %v8724_v32 = vmul.f32 %v8529_v20, %v8529_v20  ;;  %v8725_v25 = vmul.f32 %v8530_v54, %v8530_v54  ;;  %v8766_v19 = vmul.f32 %v8571_v12, %v8571_v12  ;;  %v16361_v22 = vmax.f32 %v16360_v63, 0.0 }
 0x790   : > { %v8767_v49 = vmul.f32 %v8572_v47, %v8572_v47  ;;  %v8527_v17 = vmul.f32 %v8473_v0, %v16355_v33  ;;  %v8528_v46 = vmul.f32 %v8473_v0, %v16357_v41  ;;  %v8569_v39 = vmul.f32 %v8473_v0, %v16359_v44 }
 0x791   : > { %v8570_v11 = vmul.f32 %v8473_v0, %v16361_v22  ;;  %v8593_v3 = vadd.f32 %v8592_v37, %v8525_v27  ;;  %v8621_v59 = vadd.f32 %v8620_v35, %v8526_v2  ;;  %v8648_v45 = vadd.f32 %v8647_v29, %v8567_v60  ;;  %v16362_v0 = vld [vmem:[#allocation112_spill] sm:$0xff]  ;;  %v16364_v29 = vld [vmem:[#allocation113_spill] sm:$0xff]  ;;  %v16366_v60 = vld [vmem:[#allocation114_spill] sm:$0xff] }
 0x792   : > { %v8675_v52 = vadd.f32 %v8674_v4, %v8568_v62  ;;  %v8722_v50 = vmul.f32 %v8527_v17, %v8527_v17  ;;  %v8723_v31 = vmul.f32 %v8528_v46, %v8528_v46  ;;  %v8764_v40 = vmul.f32 %v8569_v39, %v8569_v39  ;;  %v16368_v22 = vld [vmem:[#allocation115_spill] sm:$0xff] }
 0x793   : > { %v8765_v61 = vmul.f32 %v8570_v11, %v8570_v11  ;;  %v8594_v1 = vadd.f32 %v8593_v3, %v8527_v17  ;;  %v8622_v33 = vadd.f32 %v8621_v59, %v8528_v46  ;;  %v8649_v16 = vadd.f32 %v8648_v45, %v8569_v39  ;;  %v16372_v59 = vld [vmem:[#allocation117_spill] sm:$0xff] }
 0x794   : > { %v8676_v9 = vadd.f32 %v8675_v52, %v8570_v11  ;;  %v8788_v41 = vadd.f32 %v8787_v21, %v8720_v6  ;;  %v8815_v42 = vadd.f32 %v8814_v7, %v8721_v28  ;;  %v8842_v43 = vadd.f32 %v8841_v34, %v8762_v5  ;;  %v16370_v34 = vld [vmem:[#allocation116_spill] sm:$0xff] }
 0x795   : > { %v8869_v44 = vadd.f32 %v8868_v58, %v8763_v36  ;;  %v16363_v27 = vmax.f32 %v16362_v0, 0.0  ;;  %v16365_v4 = vmax.f32 %v16364_v29, 0.0  ;;  %v16367_v62 = vmax.f32 %v16366_v60, 0.0  ;;  %v8493_v60 = vpop.permute.xlu0 %8492 }
 0x796   : > { %v16369_v17 = vmax.f32 %v16368_v22, 0.0  ;;  %v8789_v39 = vadd.f32 %v8788_v41, %v8722_v50  ;;  %v8816_v11 = vadd.f32 %v8815_v42, %v8723_v31  ;;  %v8843_v6 = vadd.f32 %v8842_v43, %v8764_v40  ;;  %v16376_v22 = vld [vmem:[#allocation119_spill] sm:$0xff] }
 0x797   : > { %v8533_v2 = vmul.f32 %v8488_v48, %v16363_v27  ;;  %v8534_v37 = vmul.f32 %v8488_v48, %v16365_v4  ;;  %v8575_v35 = vmul.f32 %v8488_v48, %v16367_v62  ;;  %v8870_v28 = vadd.f32 %v8869_v44, %v8765_v61  ;;  %v16374_v27 = vld [vmem:[#allocation118_spill] sm:$0xff] }
 0x798   : > { %v8576_v46 = vmul.f32 %v8488_v48, %v16369_v17  ;;  %v16371_v58 = vmax.f32 %v16370_v34, 0.0  ;;  %v16373_v45 = vmax.f32 %v16372_v59, 0.0  ;;  %v16375_v4 = vmax.f32 %v16374_v27, 0.0  ;;  %v16378_v34 = vld [vmem:[#allocation120_spill] sm:$0xff] }
 0x799   : > { %v8728_v5 = vmul.f32 %v8533_v2, %v8533_v2  ;;  %v8729_v36 = vmul.f32 %v8534_v37, %v8534_v37  ;;  %v8770_v21 = vmul.f32 %v8575_v35, %v8575_v35  ;;  %v16377_v48 = vmax.f32 %v16376_v22, 0.0 }
 0x79a   : > { %v14944_v7 = vmul.f32 %v8576_v46, %v8576_v46  ;;  %v8531_v3 = vmul.f32 %v8483_v10, %v16371_v58  ;;  %v8532_v52 = vmul.f32 %v8483_v10, %v16373_v45  ;;  %v8573_v62 = vmul.f32 %v8483_v10, %v16375_v4 }
 0x79b   : > { %v8574_v50 = vmul.f32 %v8483_v10, %v16377_v48  ;;  %v8595_v42 = vadd.f32 %v8594_v1, %v8529_v20  ;;  %v8623_v43 = vadd.f32 %v8622_v33, %v8530_v54  ;;  %v8650_v31 = vadd.f32 %v8649_v16, %v8571_v12  ;;  %v16380_v20 = vld [vmem:[#allocation121_spill] sm:$0xff] }
 0x79c   : > { %v8677_v40 = vadd.f32 %v8676_v9, %v8572_v47  ;;  %v8726_v61 = vmul.f32 %v8531_v3, %v8531_v3  ;;  %v8727_v41 = vmul.f32 %v8532_v52, %v8532_v52  ;;  %v8768_v44 = vmul.f32 %v8573_v62, %v8573_v62  ;;  %v16382_v9 = vld [vmem:[#allocation122_spill] sm:$0xff]  ;;  %v16384_v47 = vld [vmem:[#allocation123_spill] sm:$0xff] }
 0x79d   : > { %v8769_v17 = vmul.f32 %v8574_v50, %v8574_v50  ;;  %v8596_v63 = vadd.f32 %v8595_v42, %v8531_v3  ;;  %v8624_v58 = vadd.f32 %v8623_v43, %v8532_v52  ;;  %v8651_v29 = vadd.f32 %v8650_v31, %v8573_v62 }
 0x79e   : > { %v8678_v0 = vadd.f32 %v8677_v40, %v8574_v50  ;;  %v8790_v45 = vadd.f32 %v8789_v39, %v8724_v32  ;;  %v8817_v59 = vadd.f32 %v8816_v11, %v8725_v25  ;;  %v8844_v27 = vadd.f32 %v8843_v6, %v8766_v19 }
 0x79f   : > { %v8871_v4 = vadd.f32 %v8870_v28, %v8767_v49  ;;  %v16379_v22 = vmax.f32 %v16378_v34, 0.0  ;;  %v16381_v54 = vmax.f32 %v16380_v20, 0.0  ;;  %v16383_v1 = vmax.f32 %v16382_v9, 0.0 }
 0x7a0   : > { %v16385_v33 = vmax.f32 %v16384_v47, 0.0  ;;  %v8791_v3 = vadd.f32 %v8790_v45, %v8726_v61  ;;  %v8818_v52 = vadd.f32 %v8817_v59, %v8727_v41  ;;  %v8845_v62 = vadd.f32 %v8844_v27, %v8768_v44 }
 0x7a1   : > { %v8535_v10 = vmul.f32 %v8493_v60, %v16379_v22  ;;  %v8536_v16 = vmul.f32 %v8493_v60, %v16381_v54  ;;  %v8577_v12 = vmul.f32 %v8493_v60, %v16383_v1  ;;  %v8872_v50 = vadd.f32 %v8871_v4, %v8769_v17 }
 0x7a2   : > { %v8578_v48 = vmul.f32 %v8493_v60, %v16385_v33  ;;  %v8597_v32 = vadd.f32 %v8596_v63, %v8533_v2  ;;  %v8625_v19 = vadd.f32 %v8624_v58, %v8534_v37  ;;  %v8652_v22 = vadd.f32 %v8651_v29, %v8575_v35 }
 0x7a3   : > { %v8599_v25 = vsel %vm8598_vm6, %v8535_v10, 0.0  ;;  %v8626_v49 = vsel %vm8598_vm6, %v8536_v16, 0.0  ;;  %v8653_v39 = vsel %vm8598_vm6, %v8577_v12, 0.0  ;;  %v8679_v11 = vadd.f32 %v8678_v0, %v8576_v46 }
 0x7a4   : > { %v8680_v6 = vsel %vm8598_vm6, %v8578_v48, 0.0  ;;  %v8600_v28 = vadd.f32 %v8599_v25, %v8597_v32  ;;  %v8627_v42 = vadd.f32 %v8626_v49, %v8625_v19  ;;  %v8730_v43 = vmul.f32 %v8535_v10, %v8535_v10 }
 0x7a5   : > { %v8731_v60 = vmul.f32 %v8536_v16, %v8536_v16  ;;  %v8654_v31 = vadd.f32 %v8653_v39, %v8652_v22  ;;  %v8681_v59 = vadd.f32 %v8680_v6, %v8679_v11  ;;  %v8772_v27 = vmul.f32 %v8577_v12, %v8577_v12 }
 0x7a6   : > { %v8773_v40 = vmul.f32 %v8578_v48, %v8578_v48  ;;  %v8601_v63 = vrot.slane %v8600_v28, 4  ;;  %v8628_v2 = vrot.slane %v8627_v42, 4  ;;  %v8792_v61 = vadd.f32 %v8791_v3, %v8728_v5 }
 0x7a7   : > { %v8793_v37 = vsel %vm8598_vm6, %v8730_v43, 0.0  ;;  %v8655_v41 = vrot.slane %v8654_v31, 4  ;;  %v8682_v29 = vrot.slane %v8681_v59, 4  ;;  %v8819_v35 = vadd.f32 %v8818_v52, %v8729_v36 }
 0x7a8   : > { %v8820_v0 = vsel %vm8598_vm6, %v8731_v60, 0.0  ;;  %v8602_v46 = vadd.f32 %v8601_v63, %v8600_v28  ;;  %v8629_v44 = vadd.f32 %v8628_v2, %v8627_v42  ;;  %v8794_v17 = vadd.f32 %v8793_v37, %v8792_v61 }
 0x7a9   : > { %v8846_v58 = vadd.f32 %v8845_v62, %v8770_v21  ;;  %v8656_v45 = vadd.f32 %v8655_v41, %v8654_v31  ;;  %v8683_v4 = vadd.f32 %v8682_v29, %v8681_v59  ;;  %v8821_v10 = vadd.f32 %v8820_v0, %v8819_v35 }
 0x7aa   : > { %v8847_v54 = vsel %vm8598_vm6, %v8772_v27, 0.0  ;;  %v8603_v16 = vrot.slane %v8602_v46, 2  ;;  %v8630_v1 = vrot.slane %v8629_v44, 2  ;;  %v8795_v12 = vrot.slane %v8794_v17, 4 }
 0x7ab   : > { %v8848_v5 = vadd.f32 %v8847_v54, %v8846_v58  ;;  %v8657_v33 = vrot.slane %v8656_v45, 2  ;;  %v8684_v48 = vrot.slane %v8683_v4, 2  ;;  %v8822_v3 = vrot.slane %v8821_v10, 4 }
 0x7ac   : > { %v8873_v36 = vadd.f32 %v8872_v50, %v14944_v7  ;;  %v8604_v52 = vadd.f32 %v8603_v16, %v8602_v46  ;;  %v8631_v32 = vadd.f32 %v8630_v1, %v8629_v44  ;;  %v8796_v25 = vadd.f32 %v8795_v12, %v8794_v17 }
 0x7ad   : > { %v8849_v19 = vrot.slane %v8848_v5, 4  ;;  %v8658_v49 = vadd.f32 %v8657_v33, %v8656_v45  ;;  %v8685_v21 = vadd.f32 %v8684_v48, %v8683_v4  ;;  %v8823_v62 = vadd.f32 %v8822_v3, %v8821_v10 }
 0x7ae   : > { %v8874_v22 = vsel %vm8598_vm6, %v8773_v40, 0.0  ;;  %v8605_v39 = vrot.slane %v8604_v52, 1  ;;  %v8632_v11 = vrot.slane %v8631_v32, 1  ;;  %v8797_v6 = vrot.slane %v8796_v25, 2 }
 0x7af   : > { %v8850_v28 = vadd.f32 %v8849_v19, %v8848_v5  ;;  %v8659_v42 = vrot.slane %v8658_v49, 1  ;;  %v8686_v43 = vrot.slane %v8685_v21, 1  ;;  %v8824_v60 = vrot.slane %v8823_v62, 2 }
 0x7b0   : > { %v8875_v31 = vadd.f32 %v8874_v22, %v8873_v36  ;;  %v8606_v59 = vadd.f32 %v8605_v39, %v8604_v52  ;;  %v8633_v27 = vadd.f32 %v8632_v11, %v8631_v32  ;;  %v8798_v7 = vadd.f32 %v8797_v6, %v8796_v25 }
 0x7b1   : > { %v8851_v50 = vrot.slane %v8850_v28, 2  ;;  %v8660_v63 = vadd.f32 %v8659_v42, %v8658_v49  ;;  %v8687_v2 = vadd.f32 %v8686_v43, %v8685_v21  ;;  %v8825_v61 = vadd.f32 %v8824_v60, %v8823_v62  ;;  %v16386_v43 = vld [vmem:[#allocation46_spill] sm:$0xff] }
 0x7b2   : > { %v8876_v37 = vrot.slane %v8875_v31, 4  ;;  %v8799_v41 = vrot.slane %v8798_v7, 1  ;;  %v11495_v22 = vmov 1966171168  }
 0x7b3   : > { %v8852_v29 = vadd.f32 %v8851_v50, %v8850_v28  ;;  %v8688_v35 = vadd.f32 %v8660_v63, %v8606_v59  ;;  %v8689_v44 = vadd.f32 %v8687_v2, %v8633_v27  ;;  %v8826_v17 = vrot.slane %v8825_v61, 1  ;;  %v8894_v27 = vld [vmem:[%s15858_s7] sm:$0x3]  ;;  %v16388_v2 = vld [vmem:[#allocation48_spill] sm:$0xff] }
 0x7b4   : > { %v8877_v40 = vadd.f32 %v8876_v37, %v8875_v31  ;;  %v8800_v0 = vadd.f32 %v8799_v41, %v8798_v7  ;;  %v8903_v39 = vunpack.c.l.s4 %v11495_v22  ;;  %v16387_v50 = vld [vmem:[#allocation47_spill] sm:$0xff]  ;;  %v16389_v37 = vld [vmem:[#allocation53_spill] sm:$0xff] }
 0x7b5   : > { %v8853_v46 = vrot.slane %v8852_v29, 1  ;;  %v14971_v45 = vmul.f32 0.0061728396, %v8688_v35  ;;  %v8827_v1 = vadd.f32 %v8826_v17, %v8825_v61  ;;  %v14975_v5 = vmul.f32 0.0061728396, %v8689_v44  ;;  %v16391_v35 = vld [vmem:[#allocation54_spill] sm:$0xff] }
 0x7b6   : > { %v8878_v58 = vrot.slane %v8877_v40, 2  ;;  %v8904_v11 = vunpack.c.0.s8 %v8903_v39  ;;  %v16390_v41 = vmax.f32 %v16389_v37, 0.0  ;;  %v16407_v39 = vmax.f32 %v14513_v13, 0.0 }
 0x7b7   : > { %v8854_v4 = vadd.f32 %v8853_v46, %v8852_v29  ;;  %v8888_v16 = vmul.f32 %v14971_v45, %v14971_v45  ;;  %v8889_v52 = vmul.f32 %v14975_v5, %v14975_v5  ;;  %v16393_v46 = vld [vmem:[#allocation61_spill] sm:$0xff]  ;;  %v16411_v13 = vmax.f32 %v14549_v51, 0.0 }
 0x7b8   : > { %v8879_v10 = vadd.f32 %v8878_v58, %v8877_v40  ;;  %v14980_v60 = vsub.s32 %v8904_v11, %v16386_v43  ;;  %v16392_v40 = vmax.f32 %v16391_v35, 0.0  ;;  %v16394_v44 = vmax.f32 %v16393_v46, 0.0  ;;  %v16395_v58 = vld [vmem:[#allocation62_spill] sm:$0xff] }
 0x7b9   : > { %v8882_v54 = vadd.f32 %v8854_v4, %v8800_v0  ;;  %v16396_v4 = vmax.f32 %v16395_v58, 0.0  ;;  %v16415_v51 = vmax.f32 %v14577_v38, 0.0  ;;  %v16419_v38 = vmax.f32 %v16298_v14, 0.0 }
 0x7ba   : > { %v8880_v12 = vrot.slane %v8879_v10, 1 }
 0x7bb   : > { %v8886_v33 = vmul.f32 0.0061728396, %v8882_v54  ;;  %v16397_v54 = vld [vmem:[#allocation49_spill] sm:$0xff] }
 0x7bc   : > { %v8881_v48 = vadd.f32 %v8880_v12, %v8879_v10  ;;  %v16399_v12 = vld [vmem:[#allocation50_spill] sm:$0xff] }
 0x7bd   : > { %v8890_v3 = vsub.f32 %v8886_v33, %v8888_v16  ;;  %v16398_v16 = vmax.f32 %v16397_v54, 0.0  ;;  %v16400_v33 = vmax.f32 %v16399_v12, 0.0 }
 0x7be   : > { %v8883_v36 = vadd.f32 %v8881_v48, %v8827_v1 }
 0x7bf   : > { %v8892_v32 = vmax.f32 %v8890_v3, 0.0  ;;  %v16401_v3 = vld [vmem:[#allocation57_spill] sm:$0xff] }
 0x7c0   : > { %v8887_v25 = vmul.f32 0.0061728396, %v8883_v36  ;;  %v16402_v36 = vmax.f32 %v16401_v3, 0.0 }
 0x7c1   : > { %v8895_v49 = vadd.f32 1e-05, %v8892_v32  ;;  %v16403_v32 = vld [vmem:[#allocation58_spill] sm:$0xff] }
 0x7c2   : > { %v8891_v19 = vsub.f32 %v8887_v25, %v8889_v52  ;;  %v16404_v25 = vmax.f32 %v16403_v32, 0.0 }
 0x7c3   : > { %11478 = vrsqrt.f32 %v8895_v49  ;;  %v16405_v49 = vmax.f32 %v14529_v30, 0.0  ;;  %v16409_v30 = vmax.f32 %v14563_v53, 0.0  ;;  %v16413_v53 = vmax.f32 %v16290_v26, 0.0 }
 0x7c4   : > { %v8893_v21 = vmax.f32 %v8891_v19, 0.0  ;;  %v16417_v26 = vmax.f32 %v16306_v8, 0.0 }
 0x7c6   : > { %v8896_v62 = vadd.f32 1e-05, %v8893_v21 }
 0x7c8   : > { %11480 = vrsqrt.f32 %v8896_v62  ;;  %v16406_v62 = vmax.f32 %v14535_v57, 0.0  ;;  %v16410_v57 = vmax.f32 %v14566_v55, 0.0  ;;  %v16414_v55 = vmax.f32 %v16292_v56, 0.0 }
 0x7c9   : > { %v16418_v56 = vmax.f32 %v16308_v15, 0.0 }
 0x7cd   : > { %v11479_v6 = vpop.eup %11478 }
 0x7d2   : > { %v11481_v28 = vpop.eup %11480 }
 0x7d3   : > { %v8901_v42 = vcombine.low %v11479_v6, %v11481_v28  ;;  %v16408_v6 = vmax.f32 %v14517_v18, 0.0  ;;  %v16412_v18 = vmax.f32 %v14553_v23, 0.0  ;;  %v16416_v23 = vmax.f32 %v16284_v24, 0.0 }
 0x7d5   : > { %v8908_v31 = vrot.slane %v8901_v42, %v14980_v60 }
 0x7d7   : > { %v8915_v59 = vrot.slane %v8908_v31, %v14980_v60 }
 0x7d9   : > { %v8917_v7 = vmul.f32 %v8915_v59, %v8894_v27 }
 0x7db   : > { %v14988_v63 = vrot.slane %v8917_v7, %v16387_v50  ;;  %v14991_v61 = vrot.slane %v8917_v7, %v16388_v2 }
 0x7dd   : > { %v14996_v29 = vmul.f32 %v14988_v63, %v16390_v41  ;;  %v15001_v0 = vmul.f32 %v14991_v61, %v16392_v40  ;;  %v15006_v17 = vmul.f32 %v14988_v63, %v16394_v44  ;;  %v15011_v10 = vmul.f32 %v14991_v61, %v16396_v4  ;;  %v16420_v44 = vld [vmem:[#allocation81_spill] sm:$0xff]  ;;  %v16422_v4 = vld [vmem:[#allocation92_spill] sm:$0xff] }
 0x7de   : > { %v15016_v1 = vmul.f32 %v14988_v63, %v16398_v16  ;;  %v15021_v48 = vmul.f32 %v14991_v61, %v16400_v33  ;;  %v15026_v52 = vmul.f32 %v14988_v63, %v16402_v36  ;;  %v15031_v19 = vmul.f32 %v14991_v61, %v16404_v25  ;;  %v16424_v16 = vld [vmem:[#allocation93_spill] sm:$0xff]  ;;  %v16426_v33 = vld [vmem:[#allocation88_spill] sm:$0xff] }
 0x7df   : > { %v15036_v21 = vmul.f32 %v14988_v63, %v16405_v49  ;;  %v15041_v22 = vmul.f32 %v14991_v61, %v16406_v62  ;;  %v15046_v11 = vmul.f32 %v14988_v63, %v16407_v39  ;;  %v15051_v28 = vmul.f32 %v14991_v61, %v16408_v6  ;;  %v16428_v36 = vld [vmem:[#allocation89_spill] sm:$0xff]  ;;  %v16430_v49 = vld [vmem:[#allocation100_spill] sm:$0xff] }
 0x7e0   : > { %v15056_v42 = vmul.f32 %v14988_v63, %v16409_v30  ;;  %v15061_v43 = vmul.f32 %v14991_v61, %v16410_v57  ;;  %v15066_v31 = vmul.f32 %v14988_v63, %v16411_v13  ;;  %v15071_v59 = vmul.f32 %v14991_v61, %v16412_v18  ;;  %v16432_v6 = vld [vmem:[#allocation101_spill] sm:$0xff]  ;;  %v16434_v13 = vld [vmem:[#allocation96_spill] sm:$0xff] }
 0x7e1   : > { %v15076_v27 = vmul.f32 %v14988_v63, %v16413_v53  ;;  %v15081_v7 = vmul.f32 %v14991_v61, %v16414_v55  ;;  %v15086_v37 = vmul.f32 %v14988_v63, %v16415_v51  ;;  %v15091_v41 = vmul.f32 %v14991_v61, %v16416_v23  ;;  %v16436_v55 = vld [vmem:[#allocation97_spill] sm:$0xff] }
 0x7e2   : > { %v15096_v35 = vmul.f32 %v14988_v63, %v16417_v26  ;;  %v15101_v40 = vmul.f32 %v14991_v61, %v16418_v56  ;;  %v15106_v46 = vmul.f32 %v14988_v63, %v16419_v38  ;;  %v16421_v24 = vmax.f32 %v16420_v44, 0.0  ;;  %v16438_v26 = vld [vmem:[#allocation108_spill] sm:$0xff]  ;;  %v16440_v44 = vld [vmem:[#allocation109_spill] sm:$0xff] }
 0x7e3   : > { %v16423_v8 = vmax.f32 %v16422_v4, 0.0  ;;  %v16425_v15 = vmax.f32 %v16424_v16, 0.0  ;;  %v16427_v14 = vmax.f32 %v16426_v33, 0.0  ;;  %v16429_v32 = vmax.f32 %v16428_v36, 0.0  ;;  %v16444_v33 = vld [vmem:[#allocation105_spill] sm:$0xff] }
 0x7e4   : > { %v15111_v58 = vmul.f32 %v14991_v61, %v16421_v24  ;;  %v16431_v62 = vmax.f32 %v16430_v49, 0.0  ;;  %v16433_v30 = vmax.f32 %v16432_v6, 0.0  ;;  %v16435_v18 = vmax.f32 %v16434_v13, 0.0  ;;  %v16448_v6 = vld [vmem:[#allocation117_spill] sm:$0xff] }
 0x7e5   : > { %v15116_v54 = vmul.f32 %v14988_v63, %v16423_v8  ;;  %v15121_v12 = vmul.f32 %v14991_v61, %v16425_v15  ;;  %v15126_v3 = vmul.f32 %v14988_v63, %v16427_v14  ;;  %v15131_v25 = vmul.f32 %v14991_v61, %v16429_v32  ;;  %v16442_v8 = vld [vmem:[#allocation104_spill] sm:$0xff] }
 0x7e6   : > { %v15136_v39 = vmul.f32 %v14988_v63, %v16431_v62  ;;  %v15141_v57 = vmul.f32 %v14991_v61, %v16433_v30  ;;  %v15146_v53 = vmul.f32 %v14988_v63, %v16435_v18  ;;  %v16437_v51 = vmax.f32 %v16436_v55, 0.0  ;;  %v16446_v32 = vld [vmem:[#allocation116_spill] sm:$0xff] }
 0x7e7   : > { %v16439_v56 = vmax.f32 %v16438_v26, 0.0  ;;  %v16441_v24 = vmax.f32 %v16440_v44, 0.0  ;;  %v16443_v16 = vmax.f32 %v16442_v8, 0.0  ;;  %v16445_v14 = vmax.f32 %v16444_v33, 0.0  ;;  %v16450_v18 = vld [vmem:[#allocation112_spill] sm:$0xff]  ;;  %v16452_v26 = vld [vmem:[#allocation113_spill] sm:$0xff] }
 0x7e8   : > { %v15151_v23 = vmul.f32 %v14991_v61, %v16437_v51  ;;  %v16447_v49 = vmax.f32 %v16446_v32, 0.0  ;;  %v16449_v30 = vmax.f32 %v16448_v6, 0.0  ;;  %v16451_v55 = vmax.f32 %v16450_v18, 0.0  ;;  %v16460_v6 = vld [vmem:[#allocation56_spill] sm:$0xff] }
 0x7e9   : > { %v15156_v38 = vmul.f32 %v14988_v63, %v16439_v56  ;;  %v15161_v4 = vmul.f32 %v14991_v61, %v16441_v24  ;;  %v15166_v15 = vmul.f32 %v14988_v63, %v16443_v16  ;;  %v15171_v36 = vmul.f32 %v14991_v61, %v16445_v14  ;;  %v16457_v14 = vld [vmem:[#allocation55_spill] sm:$0xff] }
 0x7ea   : > { %v15176_v62 = vmul.f32 %v14988_v63, %v16447_v49  ;;  %v15181_v13 = vmul.f32 %v14991_v61, %v16449_v30  ;;  %v15186_v51 = vmul.f32 %v14988_v63, %v16451_v55  ;;  %v16453_v56 = vmax.f32 %v16452_v26, 0.0  ;;  %v16463_v55 = vld [vmem:[#allocation63_spill] sm:$0xff] }
 0x7eb   : > { %v16454_v24 = vmax.f32 %v16378_v34, 0.0  ;;  %v16455_v16 = vmax.f32 %v16380_v20, 0.0  ;;  %v16458_v32 = vmax.f32 %v16457_v14, 0.0  ;;  %v16461_v30 = vmax.f32 %v16460_v6, 0.0 }
 0x7ec   : > { %v15191_v44 = vmul.f32 %v14991_v61, %v16453_v56  ;;  %v16464_v34 = vmax.f32 %v16463_v55, 0.0  ;;  %v16466_v56 = vld [vmem:[#allocation64_spill] sm:$0xff]  ;;  %v9015_v14 = vmul.f32 %v14991_v61, %v14975_v5  ;;  %v16481_v5 = vld [vmem:[#allocation67_spill] sm:$0xff] }
 0x7ed   : > { %v15196_v8 = vmul.f32 %v14988_v63, %v16454_v24  ;;  %v15201_v33 = vmul.f32 %v14991_v61, %v16455_v16  ;;  %v15206_v49 = vmul.f32 %v14988_v63, %v16458_v32  ;;  %v15211_v18 = vmul.f32 %v14991_v61, %v16461_v30  ;;  %v16469_v32 = vld [vmem:[#allocation51_spill] sm:$0xff]  ;;  %v16472_v55 = vld [vmem:[#allocation52_spill] sm:$0xff] }
 0x7ee   : > { %v15216_v26 = vmul.f32 %v14988_v63, %v16464_v34  ;;  %v16467_v20 = vmax.f32 %v16466_v56, 0.0  ;;  %v9014_v16 = vmul.f32 %v14988_v63, %v14971_v45  ;;  %v16470_v6 = vmax.f32 %v16469_v32, 0.0  ;;  %v16475_v56 = vld [vmem:[#allocation59_spill] sm:$0xff] }
 0x7ef   : > { %16456 = vst [vmem:[#allocation73_spill] sm:$0xff] %v15201_v33  ;;  %16459 = vst [vmem:[#allocation76_spill] sm:$0xff] %v15206_v49  ;;  %v16482_v32 = vmax.f32 %v16481_v5, 0.0  ;;  %v16492_v5 = vld [vmem:[#allocation71_spill] sm:$0xff] }
 0x7f0   : > { %16462 = vst [vmem:[#allocation77_spill] sm:$0xff] %v15211_v18  ;;  %16465 = vst [vmem:[#allocation80_spill] sm:$0xff] %v15216_v26  ;;  %v15221_v24 = vmul.f32 %v14991_v61, %v16467_v20  ;;  %v15230_v30 = vmul.f32 %v14988_v63, %v16470_v6  ;;  %v16473_v18 = vmax.f32 %v16472_v55, 0.0  ;;  %v16476_v26 = vmax.f32 %v16475_v56, 0.0 }
 0x7f1   : > { %v15250_v6 = vmul.f32 %v14988_v63, %v16482_v32 }
 0x7f2   : > { %16468 = vst [vmem:[#allocation84_spill] sm:$0xff] %v15221_v24  ;;  %16471 = vst [vmem:[#allocation85_spill] sm:$0xff] %v15230_v30  ;;  %v15235_v34 = vmul.f32 %v14991_v61, %v16473_v18  ;;  %v15240_v20 = vmul.f32 %v14988_v63, %v16476_v26  ;;  %v16478_v24 = vld [vmem:[#allocation60_spill] sm:$0xff] }
 0x7f3   : > { %v16479_v45 = vmax.f32 %v16478_v24, 0.0  ;;  %16483 = vst [vmem:[#allocation123_spill] sm:$0xff] %v15250_v6  ;;  %v16484_v30 = vld [vmem:[#allocation68_spill] sm:$0xff]  ;;  %v16489_v24 = vld [vmem:[#allocation66_spill] sm:$0xff] }
 0x7f4   : > { %16474 = vst [vmem:[#allocation120_spill] sm:$0xff] %v15235_v34  ;;  %16477 = vst [vmem:[#allocation121_spill] sm:$0xff] %v15240_v20  ;;  %v16485_v55 = vmax.f32 %v16484_v30, 0.0  ;;  %v16487_v34 = vld [vmem:[#allocation65_spill] sm:$0xff]  ;;  %v9018_v20 = vcombine.low %v9014_v16, %v9015_v14  ;;  %v16490_v33 = vmax.f32 %v16489_v24, 0.0  ;;  %v16495_v30 = vld [vmem:[#allocation72_spill] sm:$0xff] }
 0x7f5   : > { %v15245_v49 = vmul.f32 %v14991_v61, %v16479_v45  ;;  %v16488_v56 = vmax.f32 %v16487_v34, 0.0  ;;  %v16496_v6 = vmax.f32 %v16495_v30, 0.0  ;;  %v16498_v34 = vld [vmem:[#allocation69_spill] sm:$0xff]  ;;  %v16501_v16 = vld [vmem:[#allocation70_spill] sm:$0xff] }
 0x7f6   : > { %v15255_v18 = vmul.f32 %v14991_v61, %v16485_v55  ;;  %v15265_v45 = vmul.f32 %v14991_v61, %v16490_v33  ;;  %v16502_v14 = vmax.f32 %v16501_v16, 0.0  ;;  %v16504_v24 = vld [vmem:[#allocation78_spill] sm:$0xff] }
 0x7f7   : > { %16480 = vst [vmem:[#allocation122_spill] sm:$0xff] %v15245_v49  ;;  %v15260_v26 = vmul.f32 %v14988_v63, %v16488_v56  ;;  %v16493_v49 = vmax.f32 %v16492_v5, 0.0  ;;  %v15275_v55 = vmul.f32 %v14991_v61, %v16496_v6  ;;  %v16505_v5 = vmax.f32 %v16504_v24, 0.0  ;;  %v16510_v16 = vld [vmem:[#allocation74_spill] sm:$0xff]  ;;  %v16513_v24 = vld [vmem:[#allocation75_spill] sm:$0xff] }
 0x7f8   : > { %16486 = vst [vmem:[#allocation46_spill] sm:$0xff] %v15255_v18  ;;  %16491 = vst [vmem:[#allocation47_spill] sm:$0xff] %v15265_v45  ;;  %v16499_v18 = vmax.f32 %v16498_v34, 0.0  ;;  %v15285_v33 = vmul.f32 %v14991_v61, %v16502_v14  ;;  %v9025_v34 = vrot.slane %v9018_v20, %v14980_v60  ;;  %v16519_v20 = vld [vmem:[#allocation87_spill] sm:$0xff]  ;;  %v16522_v45 = vld [vmem:[#allocation82_spill] sm:$0xff] }
 0x7f9   : > { %v15270_v32 = vmul.f32 %v14988_v63, %v16493_v49  ;;  %16497 = vst [vmem:[#allocation53_spill] sm:$0xff] %v15275_v55  ;;  %v15290_v49 = vmul.f32 %v14988_v63, %v16505_v5 }
 0x7fa   : > { %v15280_v56 = vmul.f32 %v14988_v63, %v16499_v18  ;;  %16503 = vst [vmem:[#allocation61_spill] sm:$0xff] %v15285_v33  ;;  %v9013_v18 = vld [vmem:[%s15859_s8] sm:$0x3]  ;;  %v16514_v33 = vmax.f32 %v16513_v24, 0.0 }
 0x7fb   : > { %16494 = vst [vmem:[#allocation48_spill] sm:$0xff] %v15270_v32  ;;  %16506 = vst [vmem:[#allocation62_spill] sm:$0xff] %v15290_v49  ;;  %v16507_v32 = vld [vmem:[#allocation79_spill] sm:$0xff] }
 0x7fc   : > { %16500 = vst [vmem:[#allocation54_spill] sm:$0xff] %v15280_v56  ;;  %v16508_v30 = vmax.f32 %v16507_v32, 0.0  ;;  %v16511_v56 = vmax.f32 %v16510_v16, 0.0  ;;  %v15309_v5 = vmul.f32 %v14991_v61, %v16514_v33  ;;  %v16516_v32 = vld [vmem:[#allocation86_spill] sm:$0xff]  ;;  %v16523_v16 = vmax.f32 %v16522_v45, 0.0 }
 0x7fd   : > { %v16517_v49 = vmax.f32 %v16516_v32, 0.0  ;;  %v16534_v45 = vld [vmem:[#allocation90_spill] sm:$0xff] }
 0x7fe   : > { %v15295_v6 = vmul.f32 %v14991_v61, %v16508_v30  ;;  %v15304_v14 = vmul.f32 %v14988_v63, %v16511_v56  ;;  %16515 = vst [vmem:[#allocation57_spill] sm:$0xff] %v15309_v5  ;;  %v15324_v56 = vmul.f32 %v14988_v63, %v16523_v16  ;;  %v16528_v5 = vld [vmem:[#allocation94_spill] sm:$0xff]  ;;  %v16535_v16 = vmax.f32 %v16534_v45, 0.0 }
 0x7ff   : > { %v15314_v30 = vmul.f32 %v14988_v63, %v16517_v49  ;;  %v16529_v32 = vmax.f32 %v16528_v5, 0.0  ;;  %v16540_v5 = vld [vmem:[#allocation102_spill] sm:$0xff] }
 0x800   : > { %16509 = vst [vmem:[#allocation49_spill] sm:$0xff] %v15295_v6  ;;  %16512 = vst [vmem:[#allocation50_spill] sm:$0xff] %v15304_v14  ;;  %v16520_v6 = vmax.f32 %v16519_v20, 0.0  ;;  %v16525_v14 = vld [vmem:[#allocation83_spill] sm:$0xff]  ;;  %v9032_v20 = vrot.slane %v9025_v34, %v14980_v60 }
 0x801   : > { %16518 = vst [vmem:[#allocation58_spill] sm:$0xff] %v15314_v30  ;;  %16524 = vst [vmem:[#allocation92_spill] sm:$0xff] %v15324_v56  ;;  %v16526_v24 = vmax.f32 %v16525_v14, 0.0  ;;  %v15334_v49 = vmul.f32 %v14988_v63, %v16529_v32  ;;  %v16531_v30 = vld [vmem:[#allocation95_spill] sm:$0xff]  ;;  %v15345_v56 = vmul.f32 %v14988_v63, %v16535_v16  ;;  %v16541_v32 = vmax.f32 %v16540_v5, 0.0  ;;  %v16551_v5 = vld [vmem:[#allocation110_spill] sm:$0xff] }
 0x802   : > { %v15319_v55 = vmul.f32 %v14991_v61, %v16520_v6  ;;  %v16532_v6 = vmax.f32 %v16531_v30, 0.0  ;;  %v16537_v14 = vld [vmem:[#allocation91_spill] sm:$0xff] }
 0x803   : > { %v15329_v33 = vmul.f32 %v14991_v61, %v16526_v24  ;;  %16530 = vst [vmem:[#allocation88_spill] sm:$0xff] %v15334_v49  ;;  %16536 = vst [vmem:[#allocation100_spill] sm:$0xff] %v15345_v56  ;;  %v16538_v24 = vmax.f32 %v16537_v14, 0.0  ;;  %v15355_v49 = vmul.f32 %v14988_v63, %v16541_v32  ;;  %v16543_v60 = vld [vmem:[#allocation103_spill] sm:$0xff] }
 0x804   : > { %16521 = vst [vmem:[#allocation81_spill] sm:$0xff] %v15319_v55  ;;  %v15340_v55 = vmul.f32 %v14991_v61, %v16532_v6  ;;  %v16544_v34 = vmax.f32 %v16543_v60, 0.0  ;;  %v16546_v6 = vld [vmem:[#allocation98_spill] sm:$0xff]  ;;  %v16549_v56 = vld [vmem:[#allocation99_spill] sm:$0xff] }
 0x805   : > { %16527 = vst [vmem:[#allocation93_spill] sm:$0xff] %v15329_v33  ;;  %v15350_v33 = vmul.f32 %v14991_v61, %v16538_v24  ;;  %16542 = vst [vmem:[#allocation96_spill] sm:$0xff] %v15355_v49  ;;  %v16547_v45 = vmax.f32 %v16546_v6, 0.0  ;;  %v16550_v14 = vmax.f32 %v16549_v56, 0.0  ;;  %v16553_v60 = vld [vmem:[#allocation111_spill] sm:$0xff]  ;;  %v16555_v6 = vld [vmem:[#allocation106_spill] sm:$0xff] }
 0x806   : > { %16533 = vst [vmem:[#allocation89_spill] sm:$0xff] %v15340_v55  ;;  %v15360_v30 = vmul.f32 %v14991_v61, %v16544_v34  ;;  %v16552_v55 = vmax.f32 %v16551_v5, 0.0  ;;  %v16554_v49 = vmax.f32 %v16553_v60, 0.0  ;;  %v16558_v56 = vld [vmem:[#allocation107_spill] sm:$0xff] }
 0x807   : > { %16539 = vst [vmem:[#allocation101_spill] sm:$0xff] %v15350_v33  ;;  %v15365_v16 = vmul.f32 %v14988_v63, %v16547_v45  ;;  %v15370_v24 = vmul.f32 %v14991_v61, %v16550_v14  ;;  %v9034_v33 = vsub.f32 %v9013_v18, %v9032_v20  ;;  %v16561_v18 = vld [vmem:[#allocation118_spill] sm:$0xff]  ;;  %v16563_v5 = vld [vmem:[#allocation119_spill] sm:$0xff] }
 0x808   : > { %16545 = vst [vmem:[#allocation97_spill] sm:$0xff] %v15360_v30  ;;  %v15375_v32 = vmul.f32 %v14988_v63, %v16552_v55  ;;  %v15380_v34 = vmul.f32 %v14991_v61, %v16554_v49  ;;  %v16556_v30 = vmax.f32 %v16555_v6, 0.0  ;;  %v16562_v20 = vmax.f32 %v16561_v18, 0.0  ;;  %v16567_v18 = vld [vmem:[#allocation115_spill] sm:$0xff] }
 0x809   : > { %16548 = vst [vmem:[#allocation108_spill] sm:$0xff] %v15365_v16  ;;  %v16559_v16 = vmax.f32 %v16558_v56, 0.0  ;;  %v16564_v60 = vmax.f32 %v16563_v5, 0.0  ;;  %v15403_v6 = vrot.slane %v9034_v33, %v16387_v50  ;;  %v16565_v56 = vld [vmem:[#allocation114_spill] sm:$0xff]  ;;  %v16569_v5 = vmax.f32 %v16382_v9, 0.0 }
 0x80a   : > { %v15385_v45 = vmul.f32 %v14988_v63, %v16556_v30  ;;  %v15395_v55 = vmul.f32 %v14988_v63, %v16562_v20  ;;  %v15406_v30 = vrot.slane %v9034_v33, %v16388_v2  ;;  %v16570_v50 = vmax.f32 %v16384_v47, 0.0 }
 0x80b   : > { %v15390_v14 = vmul.f32 %v14991_v61, %v16559_v16  ;;  %v15400_v49 = vmul.f32 %v14991_v61, %v16564_v60  ;;  %v15421_v60 = vmul.f32 %v14988_v63, %v16569_v5  ;;  %v9046_v33 = vadd.f32 %v15403_v6, %v14996_v29 }
 0x80c   : > { %16557 = vst [vmem:[#allocation109_spill] sm:$0xff] %v15385_v45  ;;  %v16566_v45 = vmax.f32 %v16565_v56, 0.0  ;;  %v15426_v2 = vmul.f32 %v14991_v61, %v16570_v50  ;;  %v9049_v9 = vadd.f32 %v15406_v30, %v15011_v10  ;;  %v9051_v47 = vadd.f32 %v15406_v30, %v15021_v48  ;;  %v16576_v50 = vld [vmem:[#allocation85_spill] sm:$0xff] }
 0x80d   : > { %16560 = vst [vmem:[#allocation104_spill] sm:$0xff] %v15390_v14  ;;  %v16568_v14 = vmax.f32 %v16567_v18, 0.0  ;;  %v9053_v29 = vadd.f32 %v15406_v30, %v15031_v19  ;;  %v9056_v10 = vadd.f32 %v15403_v6, %v15046_v11  ;;  %9130 = vst [vmem:[%s15861_s10] sm:$0xff] %v9046_v33  ;;  %v9058_v48 = vadd.f32 %v15403_v6, %v15056_v42  ;;  %v16575_v18 = vld [vmem:[#allocation84_spill] sm:$0xff] }
 0x80e   : > { %v15411_v16 = vmul.f32 %v14988_v63, %v16566_v45  ;;  %v9047_v45 = vadd.f32 %v15406_v30, %v15001_v0  ;;  %v9050_v63 = vadd.f32 %v15403_v6, %v15016_v1  ;;  %v9054_v0 = vadd.f32 %v15403_v6, %v15036_v21  ;;  %9133 = vst [vmem:[%s15861_s10 + $0x18] sm:$0xff] %v9049_v9  ;;  %v16578_v9 = vld [vmem:[#allocation121_spill] sm:$0xff] }
 0x80f   : > { %v15416_v20 = vmul.f32 %v14991_v61, %v16568_v14  ;;  %v9048_v14 = vadd.f32 %v15403_v6, %v15006_v17  ;;  %v9052_v61 = vadd.f32 %v15403_v6, %v15026_v52  ;;  %v9055_v17 = vadd.f32 %v15406_v30, %v15041_v22  ;;  %9135 = vst [vmem:[%s15861_s10 + $0x28] sm:$0xff] %v9051_v47  ;;  %v16579_v47 = vld [vmem:[#allocation122_spill] sm:$0xff] }
 0x810   : > { %v9057_v1 = vadd.f32 %v15406_v30, %v15051_v28  ;;  %9131 = vst [vmem:[%s15861_s10 + $0x8] sm:$0xff] %v9047_v45  ;;  %v9059_v52 = vadd.f32 %v15406_v30, %v15061_v43  ;;  %v9060_v19 = vadd.f32 %v15403_v6, %v15066_v31  ;;  %v9061_v21 = vadd.f32 %v15406_v30, %v15071_v59  ;;  %v16577_v45 = vld [vmem:[#allocation120_spill] sm:$0xff] }
 0x811   : > { %9132 = vst [vmem:[%s15861_s10 + $0x10] sm:$0xff] %v9048_v14  ;;  %9134 = vst [vmem:[%s15861_s10 + $0x20] sm:$0xff] %v9050_v63  ;;  %v9062_v22 = vadd.f32 %v15403_v6, %v15076_v27  ;;  %v9063_v11 = vadd.f32 %v15406_v30, %v15081_v7  ;;  %v9064_v28 = vadd.f32 %v15403_v6, %v15086_v37 }
 0x812   : > { %9136 = vst [vmem:[%s15861_s10 + $0x30] sm:$0xff] %v9052_v61  ;;  %9137 = vst [vmem:[%s15861_s10 + $0x38] sm:$0xff] %v9053_v29  ;;  %v9065_v42 = vadd.f32 %v15406_v30, %v15091_v41  ;;  %v9066_v43 = vadd.f32 %v15403_v6, %v15096_v35  ;;  %v9067_v31 = vadd.f32 %v15406_v30, %v15101_v40  ;;  %v16580_v29 = vld [vmem:[#allocation123_spill] sm:$0xff] }
 0x813   : > { %9138 = vst [vmem:[%s15861_s10 + $0x40] sm:$0xff] %v9054_v0  ;;  %9139 = vst [vmem:[%s15861_s10 + $0x48] sm:$0xff] %v9055_v17  ;;  %v9068_v59 = vadd.f32 %v15403_v6, %v15106_v46  ;;  %v9069_v27 = vadd.f32 %v15406_v30, %v15111_v58  ;;  %v9070_v7 = vadd.f32 %v15403_v6, %v15116_v54  ;;  %v16581_v17 = vld [vmem:[#allocation46_spill] sm:$0xff] }
 0x814   : > { %9140 = vst [vmem:[%s15861_s10 + $0x50] sm:$0xff] %v9056_v10  ;;  %9141 = vst [vmem:[%s15861_s10 + $0x58] sm:$0xff] %v9057_v1  ;;  %v9071_v37 = vadd.f32 %v15406_v30, %v15121_v12  ;;  %v9072_v41 = vadd.f32 %v15403_v6, %v15126_v3  ;;  %v9073_v35 = vadd.f32 %v15406_v30, %v15131_v25 }
 0x815   : > { %9142 = vst [vmem:[%s15861_s10 + $0x60] sm:$0xff] %v9058_v48  ;;  %9143 = vst [vmem:[%s15861_s10 + $0x68] sm:$0xff] %v9059_v52  ;;  %v9074_v40 = vadd.f32 %v15403_v6, %v15136_v39  ;;  %v9075_v46 = vadd.f32 %v15406_v30, %v15141_v57  ;;  %v9076_v58 = vadd.f32 %v15403_v6, %v15146_v53  ;;  %v16582_v48 = vld [vmem:[#allocation47_spill] sm:$0xff] }
 0x816   : > { %9144 = vst [vmem:[%s15861_s10 + $0x70] sm:$0xff] %v9060_v19  ;;  %9145 = vst [vmem:[%s15861_s10 + $0x78] sm:$0xff] %v9061_v21  ;;  %v9077_v54 = vadd.f32 %v15406_v30, %v15151_v23  ;;  %v9078_v12 = vadd.f32 %v15403_v6, %v15156_v38  ;;  %v9079_v3 = vadd.f32 %v15406_v30, %v15161_v4  ;;  %v16583_v19 = vld [vmem:[#allocation48_spill] sm:$0xff] }
 0x817   : > { %9146 = vst [vmem:[%s15861_s10 + $0x80] sm:$0xff] %v9062_v22  ;;  %9147 = vst [vmem:[%s15861_s10 + $0x88] sm:$0xff] %v9063_v11  ;;  %v9080_v25 = vadd.f32 %v15403_v6, %v15166_v15  ;;  %v9081_v39 = vadd.f32 %v15406_v30, %v15171_v36  ;;  %v9082_v57 = vadd.f32 %v15403_v6, %v15176_v62  ;;  %v16571_v15 = vld [vmem:[#allocation73_spill] sm:$0xff]  ;;  %v16572_v62 = vld [vmem:[#allocation76_spill] sm:$0xff] }
 0x818   : > { %9148 = vst [vmem:[%s15861_s10 + $0x90] sm:$0xff] %v9064_v28  ;;  %9149 = vst [vmem:[%s15861_s10 + $0x98] sm:$0xff] %v9065_v42  ;;  %v9083_v53 = vadd.f32 %v15406_v30, %v15181_v13  ;;  %v9084_v23 = vadd.f32 %v15403_v6, %v15186_v51  ;;  %v9085_v38 = vadd.f32 %v15406_v30, %v15191_v44  ;;  %v16573_v51 = vld [vmem:[#allocation77_spill] sm:$0xff] }
 0x819   : > { %9150 = vst [vmem:[%s15861_s10 + $0xa0] sm:$0xff] %v9066_v43  ;;  %9151 = vst [vmem:[%s15861_s10 + $0xa8] sm:$0xff] %v9067_v31  ;;  %v9086_v4 = vadd.f32 %v15403_v6, %v15196_v8  ;;  %v9087_v36 = vadd.f32 %v15406_v30, %v16571_v15  ;;  %v9088_v13 = vadd.f32 %v15403_v6, %v16572_v62  ;;  %v16574_v8 = vld [vmem:[#allocation80_spill] sm:$0xff]  ;;  %v16584_v22 = vld [vmem:[#allocation53_spill] sm:$0xff] }
 0x81a   : > { %9152 = vst [vmem:[%s15861_s10 + $0xb0] sm:$0xff] %v9068_v59  ;;  %9153 = vst [vmem:[%s15861_s10 + $0xb8] sm:$0xff] %v9069_v27  ;;  %v9089_v44 = vadd.f32 %v15406_v30, %v16573_v51  ;;  %v9090_v56 = vadd.f32 %v15403_v6, %v16574_v8  ;;  %v9091_v5 = vadd.f32 %v15406_v30, %v16575_v18  ;;  %v16586_v42 = vld [vmem:[#allocation61_spill] sm:$0xff]  ;;  %v16587_v31 = vld [vmem:[#allocation62_spill] sm:$0xff] }
 0x81b   : > { %9154 = vst [vmem:[%s15861_s10 + $0xc0] sm:$0xff] %v9070_v7  ;;  %9155 = vst [vmem:[%s15861_s10 + $0xc8] sm:$0xff] %v9071_v37  ;;  %v9092_v33 = vadd.f32 %v15403_v6, %v16576_v50  ;;  %v9093_v14 = vadd.f32 %v15406_v30, %v16577_v45  ;;  %v9094_v63 = vadd.f32 %v15403_v6, %v16578_v9  ;;  %v16588_v27 = vld [vmem:[#allocation49_spill] sm:$0xff]  ;;  %v16589_v37 = vld [vmem:[#allocation50_spill] sm:$0xff] }
 0x81c   : > { %9156 = vst [vmem:[%s15861_s10 + $0xd0] sm:$0xff] %v9072_v41  ;;  %9157 = vst [vmem:[%s15861_s10 + $0xd8] sm:$0xff] %v9073_v35  ;;  %v9095_v61 = vadd.f32 %v15406_v30, %v16579_v47  ;;  %v9096_v0 = vadd.f32 %v15403_v6, %v16580_v29  ;;  %v9097_v10 = vadd.f32 %v15406_v30, %v16581_v17  ;;  %v16590_v35 = vld [vmem:[#allocation57_spill] sm:$0xff]  ;;  %v16597_v15 = vld [vmem:[#allocation100_spill] sm:$0xff] }
 0x81d   : > { %9158 = vst [vmem:[%s15861_s10 + $0xe0] sm:$0xff] %v9074_v40  ;;  %9159 = vst [vmem:[%s15861_s10 + $0xe8] sm:$0xff] %v9075_v46  ;;  %v9098_v1 = vadd.f32 %v15403_v6, %v15260_v26  ;;  %v9099_v52 = vadd.f32 %v15406_v30, %v16582_v48  ;;  %v9100_v21 = vadd.f32 %v15403_v6, %v16583_v19  ;;  %v16585_v26 = vld [vmem:[#allocation54_spill] sm:$0xff]  ;;  %v16598_v62 = vld [vmem:[#allocation101_spill] sm:$0xff] }
 0x81e   : > { %9160 = vst [vmem:[%s15861_s10 + $0xf0] sm:$0xff] %v9076_v58  ;;  %9161 = vst [vmem:[%s15861_s10 + $0xf8] sm:$0xff] %v9077_v54  ;;  %v9101_v11 = vadd.f32 %v15406_v30, %v16584_v22  ;;  %v9102_v28 = vadd.f32 %v15403_v6, %v16585_v26  ;;  %v9103_v43 = vadd.f32 %v15406_v30, %v16586_v42  ;;  %v16591_v46 = vld [vmem:[#allocation58_spill] sm:$0xff]  ;;  %v16592_v54 = vld [vmem:[#allocation81_spill] sm:$0xff] }
 0x81f   : > { %9162 = vst [vmem:[%s15861_s10 + $0x100] sm:$0xff] %v9078_v12  ;;  %9163 = vst [vmem:[%s15861_s10 + $0x108] sm:$0xff] %v9079_v3  ;;  %v9104_v59 = vadd.f32 %v15403_v6, %v16587_v31  ;;  %v9105_v7 = vadd.f32 %v15406_v30, %v16588_v27  ;;  %v9106_v41 = vadd.f32 %v15403_v6, %v16589_v37  ;;  %v16593_v3 = vld [vmem:[#allocation92_spill] sm:$0xff]  ;;  %v16600_v8 = vld [vmem:[#allocation97_spill] sm:$0xff] }
 0x820   : > { %9164 = vst [vmem:[%s15861_s10 + $0x110] sm:$0xff] %v9080_v25  ;;  %9165 = vst [vmem:[%s15861_s10 + $0x118] sm:$0xff] %v9081_v39  ;;  %v9107_v40 = vadd.f32 %v15406_v30, %v16590_v35  ;;  %v9108_v58 = vadd.f32 %v15403_v6, %v16591_v46  ;;  %v9109_v12 = vadd.f32 %v15406_v30, %v16592_v54  ;;  %v16594_v39 = vld [vmem:[#allocation93_spill] sm:$0xff]  ;;  %v16599_v51 = vld [vmem:[#allocation96_spill] sm:$0xff] }
 0x821   : > { %9166 = vst [vmem:[%s15861_s10 + $0x120] sm:$0xff] %v9082_v57  ;;  %9167 = vst [vmem:[%s15861_s10 + $0x128] sm:$0xff] %v9083_v53  ;;  %v9110_v25 = vadd.f32 %v15403_v6, %v16593_v3  ;;  %v9111_v57 = vadd.f32 %v15406_v30, %v16594_v39  ;;  %v16595_v53 = vld [vmem:[#allocation88_spill] sm:$0xff]  ;;  %v9119_v50 = vadd.f32 %v15406_v30, %v15370_v24  ;;  %v16602_v24 = vld [vmem:[#allocation109_spill] sm:$0xff] }
 0x822   : > { %9168 = vst [vmem:[%s15861_s10 + $0x130] sm:$0xff] %v9084_v23  ;;  %9169 = vst [vmem:[%s15861_s10 + $0x138] sm:$0xff] %v9085_v38  ;;  %v9112_v23 = vadd.f32 %v15403_v6, %v16595_v53  ;;  %v16596_v38 = vld [vmem:[#allocation89_spill] sm:$0xff]  ;;  %v16601_v18 = vld [vmem:[#allocation108_spill] sm:$0xff]  ;;  %v9121_v45 = vadd.f32 %v15406_v30, %v15380_v34  ;;  %v9124_v9 = vadd.f32 %v15403_v6, %v15395_v55 }
 0x823   : > { %9170 = vst [vmem:[%s15861_s10 + $0x140] sm:$0x3] %v9086_v4  ;;  %9171 = vst [vmem:[%s15861_s10 + $0x148] sm:$0x3] %v9087_v36  ;;  %v9113_v4 = vadd.f32 %v15406_v30, %v16596_v38  ;;  %v9114_v36 = vadd.f32 %v15403_v6, %v16597_v15  ;;  %v16603_v34 = vld [vmem:[#allocation104_spill] sm:$0xff]  ;;  %v9126_v55 = vadd.f32 %v15403_v6, %v15411_v16 }
 0x824   : > { %9172 = vst [vmem:[%s15861_s10 + $0x150] sm:$0xff] %v9088_v13  ;;  %9173 = vst [vmem:[%s15861_s10 + $0x158] sm:$0xff] %v9089_v44  ;;  %v9115_v13 = vadd.f32 %v15406_v30, %v16598_v62  ;;  %v9116_v44 = vadd.f32 %v15403_v6, %v16599_v51  ;;  %v9128_v47 = vadd.f32 %v15403_v6, %v15421_v60 }
 0x825   : > { %9174 = vst [vmem:[%s15861_s10 + $0x160] sm:$0xff] %v9090_v56  ;;  %9175 = vst [vmem:[%s15861_s10 + $0x168] sm:$0xff] %v9091_v5  ;;  %v9117_v56 = vadd.f32 %v15406_v30, %v16600_v8  ;;  %v9118_v5 = vadd.f32 %v15403_v6, %v16601_v18 }
 0x826   : > { %9176 = vst [vmem:[%s15861_s10 + $0x170] sm:$0xff] %v9092_v33  ;;  %9177 = vst [vmem:[%s15861_s10 + $0x178] sm:$0xff] %v9093_v14  ;;  %v9120_v33 = vadd.f32 %v15403_v6, %v15375_v32  ;;  %v9122_v32 = vadd.f32 %v15403_v6, %v16602_v24  ;;  %v9123_v14 = vadd.f32 %v15406_v30, %v16603_v34 }
 0x827   : > { %9178 = vst [vmem:[%s15861_s10 + $0x180] sm:$0xff] %v9094_v63  ;;  %9179 = vst [vmem:[%s15861_s10 + $0x188] sm:$0xff] %v9095_v61  ;;  %v9125_v63 = vadd.f32 %v15406_v30, %v15400_v49  ;;  %v9127_v49 = vadd.f32 %v15406_v30, %v15416_v20  ;;  %v9129_v61 = vadd.f32 %v15406_v30, %v15426_v2 }
 0x828   : > { %9180 = vst [vmem:[%s15861_s10 + $0x190] sm:$0xff] %v9096_v0  ;;  %9181 = vst [vmem:[%s15861_s10 + $0x198] sm:$0xff] %v9097_v10 }
 0x829   : > { %9182 = vst [vmem:[%s15861_s10 + $0x1a0] sm:$0xff] %v9098_v1  ;;  %9183 = vst [vmem:[%s15861_s10 + $0x1a8] sm:$0xff] %v9099_v52 }
 0x82a   : > { %9184 = vst [vmem:[%s15861_s10 + $0x1b0] sm:$0xff] %v9100_v21  ;;  %9185 = vst [vmem:[%s15861_s10 + $0x1b8] sm:$0xff] %v9101_v11 }
 0x82b   : > { %9186 = vst [vmem:[%s15861_s10 + $0x1c0] sm:$0xff] %v9102_v28  ;;  %9187 = vst [vmem:[%s15861_s10 + $0x1c8] sm:$0xff] %v9103_v43 }
 0x82c   : > { %9188 = vst [vmem:[%s15861_s10 + $0x1d0] sm:$0xff] %v9104_v59  ;;  %9189 = vst [vmem:[%s15861_s10 + $0x1d8] sm:$0xff] %v9105_v7 }
 0x82d   : > { %9190 = vst [vmem:[%s15861_s10 + $0x1e0] sm:$0xff] %v9106_v41  ;;  %9191 = vst [vmem:[%s15861_s10 + $0x1e8] sm:$0xff] %v9107_v40 }
 0x82e   : > { %9192 = vst [vmem:[%s15861_s10 + $0x1f0] sm:$0xff] %v9108_v58  ;;  %9193 = vst [vmem:[%s15861_s10 + $0x1f8] sm:$0xff] %v9109_v12 }
 0x82f   : > { %9194 = vst [vmem:[%s15861_s10 + $0x200] sm:$0xff] %v9110_v25  ;;  %9195 = vst [vmem:[%s15861_s10 + $0x208] sm:$0xff] %v9111_v57 }
 0x830   : > { %9196 = vst [vmem:[%s15861_s10 + $0x210] sm:$0xff] %v9112_v23  ;;  %9197 = vst [vmem:[%s15861_s10 + $0x218] sm:$0xff] %v9113_v4 }
 0x831   : > { %9198 = vst [vmem:[%s15861_s10 + $0x220] sm:$0xff] %v9114_v36  ;;  %9199 = vst [vmem:[%s15861_s10 + $0x228] sm:$0xff] %v9115_v13 }
 0x832   : > { %9200 = vst [vmem:[%s15861_s10 + $0x230] sm:$0xff] %v9116_v44  ;;  %9201 = vst [vmem:[%s15861_s10 + $0x238] sm:$0xff] %v9117_v56 }
 0x833   : > { %9202 = vst [vmem:[%s15861_s10 + $0x240] sm:$0xff] %v9118_v5  ;;  %9203 = vst [vmem:[%s15861_s10 + $0x248] sm:$0xff] %v9119_v50 }
 0x834   : > { %9204 = vst [vmem:[%s15861_s10 + $0x250] sm:$0xff] %v9120_v33  ;;  %9205 = vst [vmem:[%s15861_s10 + $0x258] sm:$0xff] %v9121_v45 }
 0x835   : > { %9206 = vst [vmem:[%s15861_s10 + $0x260] sm:$0xff] %v9122_v32  ;;  %9207 = vst [vmem:[%s15861_s10 + $0x268] sm:$0xff] %v9123_v14 }
 0x836   : > { %9208 = vst [vmem:[%s15861_s10 + $0x270] sm:$0xff] %v9124_v9  ;;  %9209 = vst [vmem:[%s15861_s10 + $0x278] sm:$0xff] %v9125_v63 }
 0x837   : > { %9210 = vst [vmem:[%s15861_s10 + $0x280] sm:$0xff] %v9126_v55  ;;  %9211 = vst [vmem:[%s15861_s10 + $0x288] sm:$0xff] %v9127_v49 }
 0x838   : > { %9212 = vst [vmem:[%s15861_s10 + $0x290] sm:$0x3] %v9128_v47  ;;  %9213 = vst [vmem:[%s15861_s10 + $0x298] sm:$0x3] %v9129_v61 }
 0x839 PF: > { %s20_s13 = sadd.s32 1, %s11488_s13  }
 0x83a   : > { %p17_p6 = scmp.ge.s32.totalorder %s20_s13, 12  }
 0x83c   :  { %19 = sbr.rel (!%p17_p6) target bundleno = 1 (0x1), region = 124 }

</bundles_post_ra>
